<compile_context>
chip_gen: v6e
topology: v6e:2x2x1
jax: 0.10.0
libtpu: 0.0.40
codegen_flags: <defaults>
</compile_context>

<pallas_src>
import functools

import jax
import jax.numpy as jnp
from jax.experimental import pallas as pl
from jax.experimental.pallas import tpu as pltpu

IN_FEATURES = 128 * 8 * 8   # 8192
H1 = 1024
H2 = 512
TN = 512                    # fc1 output tile; H1 // TN = 2 -> megacore 'parallel' axis
HEAD_PAD = 128              # lane-dense fused cls|bbox output width


# --------------------------------------------------------------------------
# Kernel 1: h1 = relu(x @ w1 + b1).  Full-K tile, N-tiled grid (2 steps).
# --------------------------------------------------------------------------
def _fc1_kernel(x_ref, w1_ref, b1_ref, h1_ref):
    acc = jnp.dot(x_ref[...], w1_ref[...], preferred_element_type=jnp.float32)
    h1_ref[...] = jnp.maximum(acc + b1_ref[...], 0.0).astype(h1_ref.dtype)


# --------------------------------------------------------------------------
# Kernel 2: h2 = relu(h1 @ w2 + b2);  out = h2 @ [wc|wb|0] + [bc|bb|0]
# --------------------------------------------------------------------------
def _epilogue_kernel(h1_ref, w2_ref, b2_ref, wh_ref, bh_ref, out_ref):
    h2 = jnp.maximum(
        jnp.dot(h1_ref[...], w2_ref[...], preferred_element_type=jnp.float32)
        + b2_ref[...], 0.0)
    out_ref[...] = (
        jnp.dot(h2.astype(jnp.bfloat16), wh_ref[...],
                preferred_element_type=jnp.float32)
        + bh_ref[...]).astype(out_ref.dtype)


@functools.partial(jax.jit, static_argnames=("num_classes",))
def detection_head1(x_nchw, kparams, *, num_classes):
    """x_nchw: (B, 128, 8, 8) f32.  Returns (cls_logits (B, C), bbox_pred (B, 4))."""
    B = x_nchw.shape[0]
    # == torch x.view(B, -1); cast to bf16 once here (not per grid step).
    x = x_nchw.reshape(B, -1).astype(jnp.bfloat16)

    w1, b1 = kparams["w1"], kparams["b1"]
    w2, b2 = kparams["w2"], kparams["b2"]
    wh, bh = kparams["wh"], kparams["bh"]

    # ---------------- fc1 (memory-bound w1 stream) ----------------
    h1 = pl.pallas_call(
        _fc1_kernel,
        out_shape=jax.ShapeDtypeStruct((B, H1), jnp.bfloat16),
        grid_spec=pltpu.PrefetchScalarGridSpec(
            num_scalar_prefetch=0,
            grid=(H1 // TN,),                                  # 2 steps over H1
            in_specs=[
                pl.BlockSpec((B, IN_FEATURES), lambda j: (0, 0)),   # x (bf16)
                pl.BlockSpec((IN_FEATURES, TN), lambda j: (0, j)),  # w1 (bf16), 8 MiB
                pl.BlockSpec((1, TN), lambda j: (0, j)),            # b1 (f32)
            ],
            out_specs=pl.BlockSpec((B, TN), lambda j: (0, j)),
        ),
        compiler_params=pltpu.CompilerParams(
            dimension_semantics=("parallel",),
            vmem_limit_bytes=32 << 20),
        cost_estimate=pl.CostEstimate(
            flops=2 * B * IN_FEATURES * H1,
            transcendentals=0,
            bytes_accessed=(B * IN_FEATURES * 2 * (H1 // TN)
                            + IN_FEATURES * H1 * 2
                            + H1 * 4 + B * H1 * 2)),
    )(x, w1, b1)

    # ---------------- tiny fused epilogue ----------------
    out = pl.pallas_call(
        _epilogue_kernel,
        out_shape=jax.ShapeDtypeStruct((B, HEAD_PAD), jnp.float32),
        grid_spec=pltpu.PrefetchScalarGridSpec(
            num_scalar_prefetch=0,
            grid=(1,),
            in_specs=[
                pl.BlockSpec((B, H1), lambda i: (0, 0)),            # h1 (bf16)
                pl.BlockSpec((H1, H2), lambda i: (0, 0)),           # w2 (bf16)
                pl.BlockSpec((1, H2), lambda i: (0, 0)),            # b2 (f32)
                pl.BlockSpec((H2, HEAD_PAD), lambda i: (0, 0)),     # wh (bf16)
                pl.BlockSpec((1, HEAD_PAD), lambda i: (0, 0)),      # bh (f32)
            ],
            out_specs=pl.BlockSpec((B, HEAD_PAD), lambda i: (0, 0)),
        ),
        compiler_params=pltpu.CompilerParams(
            dimension_semantics=("arbitrary",),
            vmem_limit_bytes=16 << 20),
        cost_estimate=pl.CostEstimate(
            flops=2 * B * (H1 * H2 + H2 * HEAD_PAD),
            transcendentals=0,
            bytes_accessed=(B * H1 * 2 + H1 * H2 * 2 + H2 * HEAD_PAD * 2
                            + H2 * 4 + HEAD_PAD * 4 + B * HEAD_PAD * 4)),
    )(h1, w2, b2, wh, bh)

    cls_logits = out[:, :num_classes]
    bbox_pred = out[:, num_classes:num_classes + 4]
    return cls_logits, bbox_pred


# --------------------------------------------------------------------------
# Parameters
# --------------------------------------------------------------------------
def init_params(key, num_classes):
    """Deterministic synthetic f32 parameters, already transposed to (in, out)."""
    ks = jax.random.split(key, 8)

    def u(k, shape, fan_in):
        bound = 1.0 / jnp.sqrt(fan_in)
        return jax.random.uniform(k, shape, jnp.float32, -bound, bound)

    return {
        "w1": u(ks[0], (IN_FEATURES, H1), IN_FEATURES),
        "b1": u(ks[1], (1, H1), IN_FEATURES),
        "w2": u(ks[2], (H1, H2), H1),
        "b2": u(ks[3], (1, H2), H1),
        "wc": u(ks[4], (H2, num_classes), H2),
        "bc": u(ks[5], (1, num_classes), H2),
        "wb": u(ks[6], (H2, 4), H2),
        "bb": u(ks[7], (1, 4), H2),
    }


def pack_params(params, num_classes):
    """One-time packing: weights in bf16; cls/bbox heads fused & lane-padded."""
    assert num_classes + 4 <= HEAD_PAD
    pad = HEAD_PAD - (num_classes + 4)
    wh = jnp.pad(jnp.concatenate([params["wc"], params["wb"]], axis=1),
                 ((0, 0), (0, pad)))
    bh = jnp.pad(jnp.concatenate([params["bc"], params["bb"]], axis=1),
                 ((0, 0), (0, pad)))
    return {
        "w1": params["w1"].astype(jnp.bfloat16),
        "b1": params["b1"],
        "w2": params["w2"].astype(jnp.bfloat16),
        "b2": params["b2"],
        "wh": wh.astype(jnp.bfloat16),
        "bh": bh,
    }


def reference_matched(x_nchw, kparams, num_classes):
    """Pure-JAX reference using the SAME bf16 casts as the kernels (f32 accumulate)."""
    B = x_nchw.shape[0]
    x = x_nchw.reshape(B, -1).astype(jnp.bfloat16)
    h1 = jnp.maximum(
        jnp.dot(x, kparams["w1"], preferred_element_type=jnp.float32)
        + kparams["b1"], 0.0).astype(jnp.bfloat16)
    h2 = jnp.maximum(
        jnp.dot(h1, kparams["w2"], preferred_element_type=jnp.float32)
        + kparams["b2"], 0.0)
    out = (jnp.dot(h2.astype(jnp.bfloat16), kparams["wh"],
                   preferred_element_type=jnp.float32) + kparams["bh"])
    return out[:, :num_classes], out[:, num_classes:num_classes + 4]


if __name__ == "__main__":
    num_classes = 10
    B = 2
    key = jax.random.PRNGKey(0)
    kx, kp = jax.random.split(key)

    # Forward implies a fixed feature size: (B, 128, 8, 8) NCHW input.
    x = jax.random.normal(kx, (B, 128, 8, 8), jnp.float32)
    params = init_params(kp, num_classes)
    kparams = pack_params(params, num_classes)

    cls_logits, bbox_pred = detection_head1(x, kparams, num_classes=num_classes)
    jax.block_until_ready((cls_logits, bbox_pred))

    cls_ref, bbox_ref = reference_matched(x, kparams, num_classes)
    assert cls_logits.shape == (B, num_classes) and bbox_pred.shape == (B, 4)
    assert jnp.allclose(cls_logits, cls_ref, rtol=1e-2, atol=1e-2)
    assert jnp.allclose(bbox_pred, bbox_ref, rtol=1e-2, atol=1e-2)

    print("KERNEL_OK")
</pallas_src>

<mosaic_0001>
module attributes {stable_mosaic.version = 11 : i64} {
  func.func @_fc1_kernel(%arg0: i32, %arg1: memref<2x8192xbf16, #tpu.memory_space<vmem>>, %arg2: memref<8192x512xbf16, #tpu.memory_space<vmem>>, %arg3: memref<1x512xf32, #tpu.memory_space<vmem>>, %arg4: memref<2x512xbf16, #tpu.memory_space<vmem>>) attributes {dimension_semantics = [#tpu.dimension_semantics<parallel>], iteration_bounds = array<i64: 2>, scalar_prefetch = 0 : i64, scratch_operands = 0 : i64, tpu.core_type = #tpu.core_type<tc>, window_params = [{pipeline_mode = #tpu.pipeline_mode<synchronous>, transform_indices = @transform_0, window_bounds = array<i64: 2, 8192>}, {transform_indices = @transform_1, window_bounds = array<i64: 8192, 512>}, {transform_indices = @transform_2, window_bounds = array<i64: 1, 512>}, {transform_indices = @transform_3, window_bounds = array<i64: 2, 512>}]} {
    %c0 = arith.constant 0 : index
    %c0_0 = arith.constant 0 : index
    %0 = vector.load %arg1[%c0, %c0_0] : memref<2x8192xbf16, #tpu.memory_space<vmem>>, vector<2x8192xbf16>
    %c0_1 = arith.constant 0 : index
    %c0_2 = arith.constant 0 : index
    %1 = vector.load %arg2[%c0_1, %c0_2] : memref<8192x512xbf16, #tpu.memory_space<vmem>>, vector<8192x512xbf16>
    %cst = arith.constant dense<0.000000e+00> : vector<2x512xf32>
    %2 = tpu.matmul %0, %1, %cst {dimension_numbers = #tpu.dot_dimension_numbers<[1], [0], [0], [1], [0, 0, 1, 1], [], []>} : vector<2x8192xbf16>, vector<8192x512xbf16>, vector<2x512xf32> -> vector<2x512xf32>
    %c0_3 = arith.constant 0 : index
    %c0_4 = arith.constant 0 : index
    %3 = vector.load %arg3[%c0_3, %c0_4] : memref<1x512xf32, #tpu.memory_space<vmem>>, vector<1x512xf32>
    %4 = vector.broadcast %3 : vector<1x512xf32> to vector<2x512xf32>
    %5 = arith.addf %2, %4 : vector<2x512xf32>
    %cst_5 = arith.constant 0.000000e+00 : f32
    %6 = vector.broadcast %cst_5 : f32 to vector<2x512xf32>
    %7 = arith.maximumf %5, %6 : vector<2x512xf32>
    %8 = arith.truncf %7 : vector<2x512xf32> to vector<2x512xbf16>
    %c0_6 = arith.constant 0 : index
    %c0_7 = arith.constant 0 : index
    %9 = vector.load %arg4[%c0_6, %c0_7] : memref<2x512xbf16, #tpu.memory_space<vmem>>, vector<2x512xbf16>
    tpu.vector_store %arg4[%c0_6, %c0_7], %8 {strides = array<i32>} : memref<2x512xbf16, #tpu.memory_space<vmem>>, vector<2x512xbf16>,
    return
  }
  func.func @transform_0(%arg0: i32) -> (i32, i32) {
    %c0_i32 = arith.constant 0 : i32
    %c0_i32_0 = arith.constant 0 : i32
    %c0_i32_1 = arith.constant 0 : i32
    return %c0_i32, %c0_i32_0 : i32, i32
  }
  func.func @transform_1(%arg0: i32) -> (i32, i32) {
    %c0_i32 = arith.constant 0 : i32
    %c0_i32_0 = arith.constant 0 : i32
    return %c0_i32, %arg0 : i32, i32
  }
  func.func @transform_2(%arg0: i32) -> (i32, i32) {
    %c0_i32 = arith.constant 0 : i32
    %c0_i32_0 = arith.constant 0 : i32
    return %c0_i32, %arg0 : i32, i32
  }
  func.func @transform_3(%arg0: i32) -> (i32, i32) {
    %c0_i32 = arith.constant 0 : i32
    %c0_i32_0 = arith.constant 0 : i32
    return %c0_i32, %arg0 : i32, i32
  }
}

module attributes {stable_mosaic.version = 11 : i64} {
  func.func @_epilogue_kernel(%arg0: i32, %arg1: memref<2x1024xbf16, #tpu.memory_space<vmem>>, %arg2: memref<1024x512xbf16, #tpu.memory_space<vmem>>, %arg3: memref<1x512xf32, #tpu.memory_space<vmem>>, %arg4: memref<512x128xbf16, #tpu.memory_space<vmem>>, %arg5: memref<1x128xf32, #tpu.memory_space<vmem>>, %arg6: memref<2x128xf32, #tpu.memory_space<vmem>>) attributes {dimension_semantics = [#tpu.dimension_semantics<arbitrary>], iteration_bounds = array<i64: 1>, scalar_prefetch = 0 : i64, scratch_operands = 0 : i64, tpu.core_type = #tpu.core_type<tc>, window_params = [{pipeline_mode = #tpu.pipeline_mode<synchronous>, transform_indices = @transform_0, window_bounds = array<i64: 2, 1024>}, {pipeline_mode = #tpu.pipeline_mode<synchronous>, transform_indices = @transform_1, window_bounds = array<i64: 1024, 512>}, {pipeline_mode = #tpu.pipeline_mode<synchronous>, transform_indices = @transform_2, window_bounds = array<i64: 1, 512>}, {pipeline_mode = #tpu.pipeline_mode<synchronous>, transform_indices = @transform_3, window_bounds = array<i64: 512, 128>}, {pipeline_mode = #tpu.pipeline_mode<synchronous>, transform_indices = @transform_4, window_bounds = array<i64: 1, 128>}, {pipeline_mode = #tpu.pipeline_mode<synchronous>, transform_indices = @transform_5, window_bounds = array<i64: 2, 128>}]} {
    %c0 = arith.constant 0 : index
    %c0_0 = arith.constant 0 : index
    %0 = vector.load %arg1[%c0, %c0_0] : memref<2x1024xbf16, #tpu.memory_space<vmem>>, vector<2x1024xbf16>
    %c0_1 = arith.constant 0 : index
    %c0_2 = arith.constant 0 : index
    %1 = vector.load %arg2[%c0_1, %c0_2] : memref<1024x512xbf16, #tpu.memory_space<vmem>>, vector<1024x512xbf16>
    %cst = arith.constant dense<0.000000e+00> : vector<2x512xf32>
    %2 = tpu.matmul %0, %1, %cst {dimension_numbers = #tpu.dot_dimension_numbers<[1], [0], [0], [1], [0, 0, 1, 1], [], []>} : vector<2x1024xbf16>, vector<1024x512xbf16>, vector<2x512xf32> -> vector<2x512xf32>
    %c0_3 = arith.constant 0 : index
    %c0_4 = arith.constant 0 : index
    %3 = vector.load %arg3[%c0_3, %c0_4] : memref<1x512xf32, #tpu.memory_space<vmem>>, vector<1x512xf32>
    %4 = vector.broadcast %3 : vector<1x512xf32> to vector<2x512xf32>
    %5 = arith.addf %2, %4 : vector<2x512xf32>
    %cst_5 = arith.constant 0.000000e+00 : f32
    %6 = vector.broadcast %cst_5 : f32 to vector<2x512xf32>
    %7 = arith.maximumf %5, %6 : vector<2x512xf32>
    %8 = arith.truncf %7 : vector<2x512xf32> to vector<2x512xbf16>
    %c0_6 = arith.constant 0 : index
    %c0_7 = arith.constant 0 : index
    %9 = vector.load %arg4[%c0_6, %c0_7] : memref<512x128xbf16, #tpu.memory_space<vmem>>, vector<512x128xbf16>
    %cst_8 = arith.constant dense<0.000000e+00> : vector<2x128xf32>
    %10 = tpu.matmul %8, %9, %cst_8 {dimension_numbers = #tpu.dot_dimension_numbers<[1], [0], [0], [1], [0, 0, 1, 1], [], []>} : vector<2x512xbf16>, vector<512x128xbf16>, vector<2x128xf32> -> vector<2x128xf32>
    %c0_9 = arith.constant 0 : index
    %c0_10 = arith.constant 0 : index
    %11 = vector.load %arg5[%c0_9, %c0_10] : memref<1x128xf32, #tpu.memory_space<vmem>>, vector<1x128xf32>
    %12 = vector.broadcast %11 : vector<1x128xf32> to vector<2x128xf32>
    %13 = arith.addf %10, %12 : vector<2x128xf32>
    %c0_11 = arith.constant 0 : index
    %c0_12 = arith.constant 0 : index
    %14 = vector.load %arg6[%c0_11, %c0_12] : memref<2x128xf32, #tpu.memory_space<vmem>>, vector<2x128xf32>
    tpu.vector_store %arg6[%c0_11, %c0_12], %13 {strides = array<i32>} : memref<2x128xf32, #tpu.memory_space<vmem>>, vector<2x128xf32>,
    return
  }
  func.func @transform_0(%arg0: i32) -> (i32, i32) {
    %c0_i32 = arith.constant 0 : i32
    %c0_i32_0 = arith.constant 0 : i32
    %c0_i32_1 = arith.constant 0 : i32
    return %c0_i32, %c0_i32_0 : i32, i32
  }
  func.func @transform_1(%arg0: i32) -> (i32, i32) {
    %c0_i32 = arith.constant 0 : i32
    %c0_i32_0 = arith.constant 0 : i32
    %c0_i32_1 = arith.constant 0 : i32
    return %c0_i32, %c0_i32_0 : i32, i32
  }
  func.func @transform_2(%arg0: i32) -> (i32, i32) {
    %c0_i32 = arith.constant 0 : i32
    %c0_i32_0 = arith.constant 0 : i32
    %c0_i32_1 = arith.constant 0 : i32
    return %c0_i32, %c0_i32_0 : i32, i32
  }
  func.func @transform_3(%arg0: i32) -> (i32, i32) {
    %c0_i32 = arith.constant 0 : i32
    %c0_i32_0 = arith.constant 0 : i32
    %c0_i32_1 = arith.constant 0 : i32
    return %c0_i32, %c0_i32_0 : i32, i32
  }
  func.func @transform_4(%arg0: i32) -> (i32, i32) {
    %c0_i32 = arith.constant 0 : i32
    %c0_i32_0 = arith.constant 0 : i32
    %c0_i32_1 = arith.constant 0 : i32
    return %c0_i32, %c0_i32_0 : i32, i32
  }
  func.func @transform_5(%arg0: i32) -> (i32, i32) {
    %c0_i32 = arith.constant 0 : i32
    %c0_i32_0 = arith.constant 0 : i32
    %c0_i32_1 = arith.constant 0 : i32
    return %c0_i32, %c0_i32_0 : i32, i32
  }
}

</mosaic_0001>

<bundles_post_ra>
// kernel: detection_head1.3
= control target key start
LH: loop header
LB: loop body
LE: loop exit
PB: predicated region body
PF: predicated region fallthrough
CT: control target
= control target key end

     0   :  { %v280_v36 = vlaneseq  ;;  %v3073_v37 = vmov 1966171168   ;;  %s4036_s1 = inlined_call_operand.vmem [shape: bf16[1024,512], index: 1, kind: input, shape index: {}]   ;;  %s4037_s0 = inlined_call_operand.vmem [shape: bf16[2,1024], index: 0, kind: input, shape index: {}]   ;;  %s4038_s3 = inlined_call_operand.vmem [shape: bf16[512,128], index: 3, kind: input, shape index: {}]   ;;  %s4039_s2 = inlined_call_operand.vmem [shape: f32[1,512], index: 2, kind: input, shape index: {}]   ;;  %s4040_s4 = inlined_call_operand.vmem [shape: f32[1,128], index: 4, kind: input, shape index: {}]   ;;  %s4041_s5 = inlined_call_operand.vmem [shape: f32[2,128], index: 5, kind: output, shape index: {}]  }
   0x1   :  { %v2656_v0 = vld [vmem:[%s4036_s1 + $0xe4] ss:$16 sps:$4 sm:$0xff]   ;;  %v2660_v2 = vld [vmem:[%s4036_s1 + $0xe0] ss:$16 sps:$4 sm:$0xff]   ;;  %v303_v38 = vunpack.c.l.s4 %v3073_v37 }
   0x2   :  { %v2658_v1 = vld [vmem:[%s4036_s1 + $0x2e4] ss:$16 sps:$4 sm:$0xff]   ;;  %1638 = vmatprep.subr.bf16.mxu0 %v2656_v0  ;;  %v2661_v3 = vld [vmem:[%s4036_s1 + $0x2e0] ss:$16 sps:$4 sm:$0xff]   ;;  %v3221_v42 = vshrl.u32 %v280_v36, 7 }
   0x3   :  { %1679 = vmatprep.subr.bf16.mxu1 %v2658_v1  ;;  %v2662_v4 = vld [vmem:[%s4036_s1 + $0xc4] ss:$16 sps:$4 sm:$0xff]   ;;  %1639 = vmatpush1.bf16.msra.mxu0 %v2660_v2  ;;  %v2666_v6 = vld [vmem:[%s4036_s1 + $0xc0] ss:$16 sps:$4 sm:$0xff]   ;;  %v304_v43 = vunpack.c.0.s8 %v303_v38 }
   0x4   :  { %1680 = vmatpush1.bf16.msra.mxu1 %v2661_v3  ;;  %v2664_v5 = vld [vmem:[%s4036_s1 + $0x2c4] ss:$16 sps:$4 sm:$0xff]   ;;  %1640 = vmatprep.subr.bf16.mxu0 %v2662_v4  ;;  %v2667_v7 = vld [vmem:[%s4036_s1 + $0x2c0] ss:$16 sps:$4 sm:$0xff]  }
   0x5   :  { %1681 = vmatprep.subr.bf16.mxu1 %v2664_v5  ;;  %v2668_v8 = vld [vmem:[%s4036_s1 + $0xa4] ss:$16 sps:$4 sm:$0xff]   ;;  %v2672_v10 = vld [vmem:[%s4036_s1 + $0xa0] ss:$16 sps:$4 sm:$0xff]   ;;  %v307_v49 = vsub.s32 %v304_v43, %v3221_v42 }
   0x6   :  { %v2670_v9 = vld [vmem:[%s4036_s1 + $0x2a4] ss:$16 sps:$4 sm:$0xff]   ;;  %v2673_v11 = vld [vmem:[%s4036_s1 + $0x2a0] ss:$16 sps:$4 sm:$0xff]  }
   0x7   :  { %1641 = vmatpush1.bf16.msra.mxu0 %v2666_v6  ;;  %v2674_v12 = vld [vmem:[%s4036_s1 + $0x84] ss:$16 sps:$4 sm:$0xff]   ;;  %v2678_v14 = vld [vmem:[%s4036_s1 + $0x80] ss:$16 sps:$4 sm:$0xff]  }
   0x8   :  { %1682 = vmatpush1.bf16.msra.mxu1 %v2667_v7  ;;  %1642 = vmatprep.subr.bf16.mxu0 %v2668_v8  ;;  %v2676_v13 = vld [vmem:[%s4036_s1 + $0x284] ss:$16 sps:$4 sm:$0xff]   ;;  %v2679_v15 = vld [vmem:[%s4036_s1 + $0x280] ss:$16 sps:$4 sm:$0xff]  }
   0x9   :  { %1683 = vmatprep.subr.bf16.mxu1 %v2670_v9  ;;  %v2680_v16 = vld [vmem:[%s4036_s1 + $0x64] ss:$16 sps:$4 sm:$0xff]   ;;  %v2684_v18 = vld [vmem:[%s4036_s1 + $0x60] ss:$16 sps:$4 sm:$0xff]  }
   0xa   :  { %v2682_v17 = vld [vmem:[%s4036_s1 + $0x264] ss:$16 sps:$4 sm:$0xff]   ;;  %v2685_v19 = vld [vmem:[%s4036_s1 + $0x260] ss:$16 sps:$4 sm:$0xff]  }
   0xb   :  { %1643 = vmatpush1.bf16.msra.mxu0 %v2672_v10  ;;  %v2686_v20 = vld [vmem:[%s4036_s1 + $0x44] ss:$16 sps:$4 sm:$0xff]   ;;  %v2690_v22 = vld [vmem:[%s4036_s1 + $0x40] ss:$16 sps:$4 sm:$0xff]  }
   0xc   :  { %1684 = vmatpush1.bf16.msra.mxu1 %v2673_v11  ;;  %1644 = vmatprep.subr.bf16.mxu0 %v2674_v12  ;;  %v2688_v21 = vld [vmem:[%s4036_s1 + $0x244] ss:$16 sps:$4 sm:$0xff]   ;;  %v2691_v23 = vld [vmem:[%s4036_s1 + $0x240] ss:$16 sps:$4 sm:$0xff]  }
   0xd   :  { %1685 = vmatprep.subr.bf16.mxu1 %v2676_v13  ;;  %v2692_v24 = vld [vmem:[%s4036_s1 + $0x24] ss:$16 sps:$4 sm:$0xff]   ;;  %v2696_v26 = vld [vmem:[%s4036_s1 + $0x20] ss:$16 sps:$4 sm:$0xff]  }
   0xe   :  { %v2694_v25 = vld [vmem:[%s4036_s1 + $0x224] ss:$16 sps:$4 sm:$0xff]   ;;  %v2697_v27 = vld [vmem:[%s4036_s1 + $0x220] ss:$16 sps:$4 sm:$0xff]  }
   0xf   :  { %1645 = vmatpush1.bf16.msra.mxu0 %v2678_v14  ;;  %v2698_v28 = vld [vmem:[%s4036_s1 + $0x4] ss:$16 sps:$4 sm:$0xff]   ;;  %v2702_v30 = vld [vmem:[%s4036_s1] ss:$16 sps:$4 sm:$0xff]  }
  0x10   :  { %1686 = vmatpush1.bf16.msra.mxu1 %v2679_v15  ;;  %1646 = vmatprep.subr.bf16.mxu0 %v2680_v16  ;;  %v2700_v29 = vld [vmem:[%s4036_s1 + $0x204] ss:$16 sps:$4 sm:$0xff]   ;;  %v2703_v31 = vld [vmem:[%s4036_s1 + $0x200] ss:$16 sps:$4 sm:$0xff]  }
  0x11   :  { %1687 = vmatprep.subr.bf16.mxu1 %v2682_v17  ;;  %v2704_v32 = vld [vmem:[%s4036_s1 + $0x1e4] ss:$16 sps:$4 sm:$0xff]   ;;  %v2708_v34 = vld [vmem:[%s4036_s1 + $0x1e0] ss:$16 sps:$4 sm:$0xff]  }
  0x12   :  { %v2706_v33 = vld [vmem:[%s4036_s1 + $0x3e4] ss:$16 sps:$4 sm:$0xff]   ;;  %v2709_v35 = vld [vmem:[%s4036_s1 + $0x3e0] ss:$16 sps:$4 sm:$0xff]  }
  0x13   :  { %1647 = vmatpush1.bf16.msra.mxu0 %v2684_v18  ;;  %v2710_v39 = vld [vmem:[%s4036_s1 + $0x1c4] ss:$16 sps:$4 sm:$0xff]   ;;  %v2714_v41 = vld [vmem:[%s4036_s1 + $0x1c0] ss:$16 sps:$4 sm:$0xff]  }
  0x14   :  { %1688 = vmatpush1.bf16.msra.mxu1 %v2685_v19  ;;  %1648 = vmatprep.subr.bf16.mxu0 %v2686_v20  ;;  %v2712_v40 = vld [vmem:[%s4036_s1 + $0x3c4] ss:$16 sps:$4 sm:$0xff]   ;;  %v2715_v44 = vld [vmem:[%s4036_s1 + $0x3c0] ss:$16 sps:$4 sm:$0xff]  }
  0x15   :  { %1689 = vmatprep.subr.bf16.mxu1 %v2688_v21  ;;  %v2716_v45 = vld [vmem:[%s4036_s1 + $0x1a4] ss:$16 sps:$4 sm:$0xff]   ;;  %v2720_v47 = vld [vmem:[%s4036_s1 + $0x1a0] ss:$16 sps:$4 sm:$0xff]  }
  0x16   :  { %v2718_v46 = vld [vmem:[%s4036_s1 + $0x3a4] ss:$16 sps:$4 sm:$0xff]   ;;  %v2721_v48 = vld [vmem:[%s4036_s1 + $0x3a0] ss:$16 sps:$4 sm:$0xff]  }
  0x17   :  { %1649 = vmatpush1.bf16.msra.mxu0 %v2690_v22  ;;  %v2722_v50 = vld [vmem:[%s4036_s1 + $0x184] ss:$16 sps:$4 sm:$0xff]   ;;  %v2726_v53 = vld [vmem:[%s4036_s1 + $0x180] ss:$16 sps:$4 sm:$0xff]  }
  0x18   :  { %1690 = vmatpush1.bf16.msra.mxu1 %v2691_v23  ;;  %1650 = vmatprep.subr.bf16.mxu0 %v2692_v24  ;;  %v2724_v51 = vld [vmem:[%s4036_s1 + $0x384] ss:$16 sps:$4 sm:$0xff]   ;;  %v2727_v56 = vld [vmem:[%s4036_s1 + $0x380] ss:$16 sps:$4 sm:$0xff]  }
  0x19   :  { %1691 = vmatprep.subr.bf16.mxu1 %v2694_v25  ;;  %v21_v52 = vld [vmem:[%s4037_s0] sm:$0xff] }
  0x1a   :  { %v308_v54 = vrot.slane %v21_v52, %v307_v49  ;;  %v301_v55 = vcombine.high %v21_v52, %v21_v52  ;;  %v2728_v57 = vld [vmem:[%s4036_s1 + $0x164] ss:$16 sps:$4 sm:$0xff]   ;;  %v2732_v61 = vld [vmem:[%s4036_s1 + $0x160] ss:$16 sps:$4 sm:$0xff]  }
  0x1b   :  { %1651 = vmatpush1.bf16.msra.mxu0 %v2696_v26  ;;  %v2730_v58 = vld [vmem:[%s4036_s1 + $0x364] ss:$16 sps:$4 sm:$0xff]   ;;  %v2733_v0 = vld [vmem:[%s4036_s1 + $0x360] ss:$16 sps:$4 sm:$0xff]  }
  0x1c   :  { %1692 = vmatpush1.bf16.msra.mxu1 %v2697_v27  ;;  %1652 = vmatprep.subr.bf16.mxu0 %v2698_v28  ;;  %v316_v59 = vcombine.high %v308_v54, %v308_v54  ;;  %v315_v60 = vrot.slane %v301_v55, %v307_v49  ;;  %v2734_v1 = vld [vmem:[%s4036_s1 + $0x144] ss:$16 sps:$4 sm:$0xff]   ;;  %v2738_v4 = vld [vmem:[%s4036_s1 + $0x140] ss:$16 sps:$4 sm:$0xff]   ;;  %v3309_v14 = vrot.slane %v308_v54, %v307_v49 }
  0x1d   :  { %1693 = vmatprep.subr.bf16.mxu1 %v2700_v29  ;;  %v2736_v2 = vld [vmem:[%s4036_s1 + $0x344] ss:$16 sps:$4 sm:$0xff]   ;;  %v2739_v5 = vld [vmem:[%s4036_s1 + $0x340] ss:$16 sps:$4 sm:$0xff]  }
  0x1e   :  { %v3263_v62 = vrot.slane %v316_v59, %v307_v49  ;;  %v3265_v63 = vrot.slane %v315_v60, %v307_v49  ;;  %v2740_v6 = vld [vmem:[%s4036_s1 + $0x124] ss:$16 sps:$4 sm:$0xff]   ;;  %v2744_v8 = vld [vmem:[%s4036_s1 + $0x120] ss:$16 sps:$4 sm:$0xff]   ;;  %v317_v12 = vcombine.high %v315_v60, %v315_v60  ;;  %v3324_v19 = vcombine.high %v3309_v14, %v3309_v14 }
  0x1f   :  { %1653 = vmatpush1.bf16.msra.mxu0 %v2702_v30  ;;  %v2742_v7 = vld [vmem:[%s4036_s1 + $0x324] ss:$16 sps:$4 sm:$0xff]   ;;  %v2745_v9 = vld [vmem:[%s4036_s1 + $0x320] ss:$16 sps:$4 sm:$0xff]  }
  0x20   :  { %1694 = vmatpush1.bf16.msra.mxu1 %v2703_v31  ;;  %1654 = vmatprep.subr.bf16.mxu0 %v2704_v32  ;;  %v3278_v3 = vcombine.high %v3263_v62, %v3263_v62  ;;  %v2746_v10 = vld [vmem:[%s4036_s1 + $0x104] ss:$16 sps:$4 sm:$0xff]   ;;  %v2750_v13 = vld [vmem:[%s4036_s1 + $0x100] ss:$16 sps:$4 sm:$0xff]   ;;  %v3320_v18 = vrot.slane %v317_v12, %v307_v49 }
  0x21   :  { %1695 = vmatprep.subr.bf16.mxu1 %v2706_v33  ;;  %1670 = vmatprep.mubr.bf16.mxu0 %v3263_v62  ;;  %v2748_v11 = vld [vmem:[%s4036_s1 + $0x304] ss:$16 sps:$4 sm:$0xff]   ;;  %v2751_v15 = vld [vmem:[%s4036_s1 + $0x300] ss:$16 sps:$4 sm:$0xff]  }
  0x22   :  { %1711 = vmatprep.mubr.bf16.mxu1 %v3278_v3  ;;  %v2754_v16 = vld [vmem:[%s4036_s1 + $0x4e4] ss:$16 sps:$4 sm:$0xff]   ;;  %v2752_v20 = vld [vmem:[%s4036_s1 + $0x4e0] ss:$16 sps:$4 sm:$0xff]   ;;  %v3340_v24 = vcombine.high %v3320_v18, %v3320_v18 }
  0x23   :  { %1655 = vmatpush2.bf16.msra.mxu0 %v2708_v34  ;;  %v2757_v17 = vld [vmem:[%s4036_s1 + $0x6e4] ss:$16 sps:$4 sm:$0xff]   ;;  %v2755_v21 = vld [vmem:[%s4036_s1 + $0x6e0] ss:$16 sps:$4 sm:$0xff]  }
  0x24   :  { %1696 = vmatpush2.bf16.msra.mxu1 %v2709_v35  ;;  %1656 = vmatprep.subr.bf16.mxu0 %v2710_v39  ;;  %v2760_v22 = vld [vmem:[%s4036_s1 + $0x4c4] ss:$16 sps:$4 sm:$0xff]   ;;  %v2758_v25 = vld [vmem:[%s4036_s1 + $0x4c0] ss:$16 sps:$4 sm:$0xff]  }
  0x25   :  { %1697 = vmatprep.subr.bf16.mxu1 %v2712_v40  ;;  %v2763_v23 = vld [vmem:[%s4036_s1 + $0x6c4] ss:$16 sps:$4 sm:$0xff]   ;;  %v2761_v26 = vld [vmem:[%s4036_s1 + $0x6c0] ss:$16 sps:$4 sm:$0xff]  }
  0x26   :  { %v2766_v27 = vld [vmem:[%s4036_s1 + $0x4a4] ss:$16 sps:$4 sm:$0xff]   ;;  %v2764_v29 = vld [vmem:[%s4036_s1 + $0x4a0] ss:$16 sps:$4 sm:$0xff]  }
  0x27   :  { %1657 = vmatpush2.bf16.msra.mxu0 %v2714_v41  ;;  %v2769_v28 = vld [vmem:[%s4036_s1 + $0x6a4] ss:$16 sps:$4 sm:$0xff]   ;;  %v2767_v30 = vld [vmem:[%s4036_s1 + $0x6a0] ss:$16 sps:$4 sm:$0xff]  }
  0x28   :  { %1698 = vmatpush2.bf16.msra.mxu1 %v2715_v44  ;;  %1658 = vmatprep.subr.bf16.mxu0 %v2716_v45  ;;  %v2772_v31 = vld [vmem:[%s4036_s1 + $0x484] ss:$16 sps:$4 sm:$0xff]   ;;  %v2770_v33 = vld [vmem:[%s4036_s1 + $0x480] ss:$16 sps:$4 sm:$0xff]  }
  0x29   :  { %1699 = vmatprep.subr.bf16.mxu1 %v2718_v46  ;;  %v2775_v32 = vld [vmem:[%s4036_s1 + $0x684] ss:$16 sps:$4 sm:$0xff]   ;;  %v2773_v34 = vld [vmem:[%s4036_s1 + $0x680] ss:$16 sps:$4 sm:$0xff]  }
  0x2a   :  { %v2778_v35 = vld [vmem:[%s4036_s1 + $0x464] ss:$16 sps:$4 sm:$0xff]   ;;  %v2776_v37 = vld [vmem:[%s4036_s1 + $0x460] ss:$16 sps:$4 sm:$0xff]  }
  0x2b   :  { %1659 = vmatpush2.bf16.msra.mxu0 %v2720_v47  ;;  %v2781_v36 = vld [vmem:[%s4036_s1 + $0x664] ss:$16 sps:$4 sm:$0xff]   ;;  %v2779_v38 = vld [vmem:[%s4036_s1 + $0x660] ss:$16 sps:$4 sm:$0xff]  }
  0x2c   :  { %1700 = vmatpush2.bf16.msra.mxu1 %v2721_v48  ;;  %1660 = vmatprep.subr.bf16.mxu0 %v2722_v50  ;;  %v2784_v39 = vld [vmem:[%s4036_s1 + $0x444] ss:$16 sps:$4 sm:$0xff]   ;;  %v2782_v41 = vld [vmem:[%s4036_s1 + $0x440] ss:$16 sps:$4 sm:$0xff]  }
  0x2d   :  { %1701 = vmatprep.subr.bf16.mxu1 %v2724_v51  ;;  %v2787_v40 = vld [vmem:[%s4036_s1 + $0x644] ss:$16 sps:$4 sm:$0xff]   ;;  %v2785_v43 = vld [vmem:[%s4036_s1 + $0x640] ss:$16 sps:$4 sm:$0xff]  }
  0x2e   :  { %v2790_v44 = vld [vmem:[%s4036_s1 + $0x424] ss:$16 sps:$4 sm:$0xff]   ;;  %v2788_v46 = vld [vmem:[%s4036_s1 + $0x420] ss:$16 sps:$4 sm:$0xff]  }
  0x2f   :  { %1661 = vmatpush2.bf16.msra.mxu0 %v2726_v53  ;;  %v2793_v45 = vld [vmem:[%s4036_s1 + $0x624] ss:$16 sps:$4 sm:$0xff]   ;;  %v2791_v47 = vld [vmem:[%s4036_s1 + $0x620] ss:$16 sps:$4 sm:$0xff]  }
  0x30   :  { %1702 = vmatpush2.bf16.msra.mxu1 %v2727_v56  ;;  %1662 = vmatprep.subr.bf16.mxu0 %v2728_v57  ;;  %v2796_v48 = vld [vmem:[%s4036_s1 + $0x404] ss:$16 sps:$4 sm:$0xff]   ;;  %v2794_v50 = vld [vmem:[%s4036_s1 + $0x400] ss:$16 sps:$4 sm:$0xff]  }
  0x31   :  { %1703 = vmatprep.subr.bf16.mxu1 %v2730_v58  ;;  %v2799_v49 = vld [vmem:[%s4036_s1 + $0x604] ss:$16 sps:$4 sm:$0xff]   ;;  %v2797_v51 = vld [vmem:[%s4036_s1 + $0x600] ss:$16 sps:$4 sm:$0xff]  }
  0x32   :  { %v2802_v52 = vld [vmem:[%s4036_s1 + $0x5e4] ss:$16 sps:$4 sm:$0xff]   ;;  %v2800_v54 = vld [vmem:[%s4036_s1 + $0x5e0] ss:$16 sps:$4 sm:$0xff]  }
  0x33   :  { %1663 = vmatpush2.bf16.msra.mxu0 %v2732_v61  ;;  %v2805_v53 = vld [vmem:[%s4036_s1 + $0x7e4] ss:$16 sps:$4 sm:$0xff]   ;;  %v2803_v55 = vld [vmem:[%s4036_s1 + $0x7e0] ss:$16 sps:$4 sm:$0xff]  }
  0x34   :  { %1704 = vmatpush2.bf16.msra.mxu1 %v2733_v0  ;;  %1664 = vmatprep.subr.bf16.mxu0 %v2734_v1  ;;  %v2808_v56 = vld [vmem:[%s4036_s1 + $0x5c4] ss:$16 sps:$4 sm:$0xff]   ;;  %v2806_v58 = vld [vmem:[%s4036_s1 + $0x5c0] ss:$16 sps:$4 sm:$0xff]  }
  0x35   :  { %1705 = vmatprep.subr.bf16.mxu1 %v2736_v2  ;;  %v2811_v57 = vld [vmem:[%s4036_s1 + $0x7c4] ss:$16 sps:$4 sm:$0xff]   ;;  %v2809_v59 = vld [vmem:[%s4036_s1 + $0x7c0] ss:$16 sps:$4 sm:$0xff]  }
  0x36   :  { %v2814_v60 = vld [vmem:[%s4036_s1 + $0x5a4] ss:$16 sps:$4 sm:$0xff]   ;;  %v2812_v0 = vld [vmem:[%s4036_s1 + $0x5a0] ss:$16 sps:$4 sm:$0xff]  }
  0x37   :  { %1665 = vmatpush2.bf16.msra.mxu0 %v2738_v4  ;;  %v2817_v61 = vld [vmem:[%s4036_s1 + $0x7a4] ss:$16 sps:$4 sm:$0xff]   ;;  %v2815_v1 = vld [vmem:[%s4036_s1 + $0x7a0] ss:$16 sps:$4 sm:$0xff]  }
  0x38   :  { %1706 = vmatpush2.bf16.msra.mxu1 %v2739_v5  ;;  %1666 = vmatprep.subr.bf16.mxu0 %v2740_v6  ;;  %v2820_v2 = vld [vmem:[%s4036_s1 + $0x584] ss:$16 sps:$4 sm:$0xff]   ;;  %v2818_v5 = vld [vmem:[%s4036_s1 + $0x580] ss:$16 sps:$4 sm:$0xff]  }
  0x39   :  { %1707 = vmatprep.subr.bf16.mxu1 %v2742_v7  ;;  %v2823_v4 = vld [vmem:[%s4036_s1 + $0x784] ss:$16 sps:$4 sm:$0xff]   ;;  %v2821_v6 = vld [vmem:[%s4036_s1 + $0x780] ss:$16 sps:$4 sm:$0xff]  }
  0x3a   :  { %v2826_v7 = vld [vmem:[%s4036_s1 + $0x564] ss:$16 sps:$4 sm:$0xff]  }
  0x3b   :  { %1667 = vmatpush2.bf16.msra.mxu0 %v2744_v8  ;;  %v2829_v8 = vld [vmem:[%s4036_s1 + $0x764] ss:$16 sps:$4 sm:$0xff]  }
  0x3c   :  { %1708 = vmatpush2.bf16.msra.mxu1 %v2745_v9  ;;  %1668 = vmatprep.subr.bf16.mxu0 %v2746_v10  ;;  %v2824_v9 = vld [vmem:[%s4036_s1 + $0x560] ss:$16 sps:$4 sm:$0xff]   ;;  %v2835_v12 = vld [vmem:[%s4036_s1 + $0x744] ss:$16 sps:$4 sm:$0xff]  }
  0x3d   :  { %1709 = vmatprep.subr.bf16.mxu1 %v2748_v11  ;;  %v2827_v10 = vld [vmem:[%s4036_s1 + $0x760] ss:$16 sps:$4 sm:$0xff]   ;;  %v2832_v11 = vld [vmem:[%s4036_s1 + $0x544] ss:$16 sps:$4 sm:$0xff]  }
  0x3f   :  { %1669 = vmatpush2.bf16.msra.mxu0 %v2750_v13  ;;  %v2830_v13 = vld [vmem:[%s4036_s1 + $0x540] ss:$16 sps:$4 sm:$0xff]  }
  0x40   :  { %1710 = vmatpush2.bf16.msra.mxu1 %v2751_v15  ;;  %1720 = vmatprep.subr.bf16.mxu0 %v2754_v16  ;;  %v2833_v15 = vld [vmem:[%s4036_s1 + $0x740] ss:$16 sps:$4 sm:$0xff]   ;;  %v2838_v16 = vld [vmem:[%s4036_s1 + $0x524] ss:$16 sps:$4 sm:$0xff]  }
  0x41   :  { %1761 = vmatprep.subr.bf16.mxu1 %v2757_v17  ;;  %v2841_v17 = vld [vmem:[%s4036_s1 + $0x724] ss:$16 sps:$4 sm:$0xff]  }
  0x42   :  { %1671 = vmatmul.mubr.bf16.vlgmr.msra.gmra.mxu0 %v3309_v14 }
  0x43   :  { %1712 = vmatmul.mubr.bf16.vlgmr.msra.gmra.mxu1 %v3324_v19  ;;  %1721 = vmatpush1.bf16.msra.mxu0 %v2752_v20  ;;  %v2836_v20 = vld [vmem:[%s4036_s1 + $0x520] ss:$16 sps:$4 sm:$0xff]  }
  0x44   :  { %1762 = vmatpush1.bf16.msra.mxu1 %v2755_v21  ;;  %1722 = vmatprep.subr.bf16.mxu0 %v2760_v22  ;;  %v2839_v21 = vld [vmem:[%s4036_s1 + $0x720] ss:$16 sps:$4 sm:$0xff]   ;;  %v2844_v22 = vld [vmem:[%s4036_s1 + $0x504] ss:$16 sps:$4 sm:$0xff]  }
  0x45   :  { %1763 = vmatprep.subr.bf16.mxu1 %v2763_v23  ;;  %1752 = vmatprep.mubr.bf16.mxu0 %v3320_v18  ;;  %v2847_v23 = vld [vmem:[%s4036_s1 + $0x704] ss:$16 sps:$4 sm:$0xff]  }
  0x46   :  { %1793 = vmatprep.mubr.bf16.mxu1 %v3340_v24 }
  0x47   :  { %1723 = vmatpush1.bf16.msra.mxu0 %v2758_v25  ;;  %v2842_v25 = vld [vmem:[%s4036_s1 + $0x500] ss:$16 sps:$4 sm:$0xff]  }
  0x48   :  { %1764 = vmatpush1.bf16.msra.mxu1 %v2761_v26  ;;  %1724 = vmatprep.subr.bf16.mxu0 %v2766_v27  ;;  %v2845_v26 = vld [vmem:[%s4036_s1 + $0x700] ss:$16 sps:$4 sm:$0xff]   ;;  %v2851_v27 = vld [vmem:[%s4036_s1 + $0xec] ss:$16 sps:$4 sm:$0xff]  }
  0x49   :  { %1765 = vmatprep.subr.bf16.mxu1 %v2769_v28  ;;  %v2854_v28 = vld [vmem:[%s4036_s1 + $0x2ec] ss:$16 sps:$4 sm:$0xff]  }
  0x4b   :  { %1725 = vmatpush1.bf16.msra.mxu0 %v2764_v29  ;;  %v3528_v29 = vcombine.high %v3265_v63, %v3265_v63 }
  0x4c   :  { %1766 = vmatpush1.bf16.msra.mxu1 %v2767_v30  ;;  %1726 = vmatprep.subr.bf16.mxu0 %v2772_v31  ;;  %v2849_v30 = vld [vmem:[%s4036_s1 + $0xe8] ss:$16 sps:$4 sm:$0xff]  }
  0x4d   :  { %1767 = vmatprep.subr.bf16.mxu1 %v2775_v32  ;;  %v2852_v31 = vld [vmem:[%s4036_s1 + $0x2e8] ss:$16 sps:$4 sm:$0xff]   ;;  %v2857_v32 = vld [vmem:[%s4036_s1 + $0xcc] ss:$16 sps:$4 sm:$0xff]  }
  0x4f   :  { %1727 = vmatpush1.bf16.msra.mxu0 %v2770_v33  ;;  %v2860_v33 = vld [vmem:[%s4036_s1 + $0x2cc] ss:$16 sps:$4 sm:$0xff]  }
  0x50   :  { %1768 = vmatpush1.bf16.msra.mxu1 %v2773_v34  ;;  %1728 = vmatprep.subr.bf16.mxu0 %v2778_v35  ;;  %v2855_v34 = vld [vmem:[%s4036_s1 + $0xc8] ss:$16 sps:$4 sm:$0xff]  }
  0x51   :  { %1769 = vmatprep.subr.bf16.mxu1 %v2781_v36  ;;  %v2858_v35 = vld [vmem:[%s4036_s1 + $0x2c8] ss:$16 sps:$4 sm:$0xff]   ;;  %v2863_v36 = vld [vmem:[%s4036_s1 + $0xac] ss:$16 sps:$4 sm:$0xff]  }
  0x53   :  { %1729 = vmatpush1.bf16.msra.mxu0 %v2776_v37  ;;  %v2866_v37 = vld [vmem:[%s4036_s1 + $0x2ac] ss:$16 sps:$4 sm:$0xff]  }
  0x54   :  { %1770 = vmatpush1.bf16.msra.mxu1 %v2779_v38  ;;  %1730 = vmatprep.subr.bf16.mxu0 %v2784_v39  ;;  %v2861_v38 = vld [vmem:[%s4036_s1 + $0xa8] ss:$16 sps:$4 sm:$0xff]  }
  0x55   :  { %1771 = vmatprep.subr.bf16.mxu1 %v2787_v40  ;;  %v2864_v39 = vld [vmem:[%s4036_s1 + $0x2a8] ss:$16 sps:$4 sm:$0xff]   ;;  %v2869_v40 = vld [vmem:[%s4036_s1 + $0x8c] ss:$16 sps:$4 sm:$0xff]  }
  0x57   :  { %1731 = vmatpush1.bf16.msra.mxu0 %v2782_v41  ;;  %v2870_v41 = vld [vmem:[%s4036_s1 + $0x288] ss:$16 sps:$4 sm:$0xff]  }
  0x58   :  { %1772 = vmatpush1.bf16.msra.mxu1 %v2785_v43  ;;  %1732 = vmatprep.subr.bf16.mxu0 %v2790_v44  ;;  %v2875_v43 = vld [vmem:[%s4036_s1 + $0x6c] ss:$16 sps:$4 sm:$0xff]  }
  0x59   :  { %1773 = vmatprep.subr.bf16.mxu1 %v2793_v45  ;;  %v2878_v44 = vld [vmem:[%s4036_s1 + $0x26c] ss:$16 sps:$4 sm:$0xff]   ;;  %v2873_v45 = vld [vmem:[%s4036_s1 + $0x68] ss:$16 sps:$4 sm:$0xff]  }
  0x5b   :  { %1733 = vmatpush1.bf16.msra.mxu0 %v2788_v46  ;;  %v2876_v46 = vld [vmem:[%s4036_s1 + $0x268] ss:$16 sps:$4 sm:$0xff]  }
  0x5c   :  { %1774 = vmatpush1.bf16.msra.mxu1 %v2791_v47  ;;  %1734 = vmatprep.subr.bf16.mxu0 %v2796_v48  ;;  %v2881_v47 = vld [vmem:[%s4036_s1 + $0x4c] ss:$16 sps:$4 sm:$0xff]  }
  0x5d   :  { %1775 = vmatprep.subr.bf16.mxu1 %v2799_v49  ;;  %v2884_v48 = vld [vmem:[%s4036_s1 + $0x24c] ss:$16 sps:$4 sm:$0xff]   ;;  %v2879_v49 = vld [vmem:[%s4036_s1 + $0x48] ss:$16 sps:$4 sm:$0xff]  }
  0x5f   :  { %1735 = vmatpush1.bf16.msra.mxu0 %v2794_v50  ;;  %v2882_v50 = vld [vmem:[%s4036_s1 + $0x248] ss:$16 sps:$4 sm:$0xff]  }
  0x60   :  { %1776 = vmatpush1.bf16.msra.mxu1 %v2797_v51  ;;  %1736 = vmatprep.subr.bf16.mxu0 %v2802_v52  ;;  %v2887_v51 = vld [vmem:[%s4036_s1 + $0x2c] ss:$16 sps:$4 sm:$0xff]  }
  0x61   :  { %1777 = vmatprep.subr.bf16.mxu1 %v2805_v53  ;;  %v2890_v52 = vld [vmem:[%s4036_s1 + $0x22c] ss:$16 sps:$4 sm:$0xff]   ;;  %v2885_v53 = vld [vmem:[%s4036_s1 + $0x28] ss:$16 sps:$4 sm:$0xff]  }
  0x63   :  { %1737 = vmatpush2.bf16.msra.mxu0 %v2800_v54  ;;  %v2888_v54 = vld [vmem:[%s4036_s1 + $0x228] ss:$16 sps:$4 sm:$0xff]  }
  0x64   :  { %1778 = vmatpush2.bf16.msra.mxu1 %v2803_v55  ;;  %1738 = vmatprep.subr.bf16.mxu0 %v2808_v56  ;;  %v2893_v55 = vld [vmem:[%s4036_s1 + $0xc] ss:$16 sps:$4 sm:$0xff]  }
  0x65   :  { %1779 = vmatprep.subr.bf16.mxu1 %v2811_v57  ;;  %v2896_v56 = vld [vmem:[%s4036_s1 + $0x20c] ss:$16 sps:$4 sm:$0xff]   ;;  %v2891_v57 = vld [vmem:[%s4036_s1 + $0x8] ss:$16 sps:$4 sm:$0xff]  }
  0x67   :  { %1739 = vmatpush2.bf16.msra.mxu0 %v2806_v58  ;;  %v2894_v58 = vld [vmem:[%s4036_s1 + $0x208] ss:$16 sps:$4 sm:$0xff]  }
  0x68   :  { %1780 = vmatpush2.bf16.msra.mxu1 %v2809_v59  ;;  %1740 = vmatprep.subr.bf16.mxu0 %v2814_v60  ;;  %v2899_v59 = vld [vmem:[%s4036_s1 + $0x1ec] ss:$16 sps:$4 sm:$0xff]  }
  0x69   :  { %1781 = vmatprep.subr.bf16.mxu1 %v2817_v61  ;;  %v2902_v60 = vld [vmem:[%s4036_s1 + $0x3ec] ss:$16 sps:$4 sm:$0xff]   ;;  %v2897_v61 = vld [vmem:[%s4036_s1 + $0x1e8] ss:$16 sps:$4 sm:$0xff]  }
  0x6b   :  { %1741 = vmatpush2.bf16.msra.mxu0 %v2812_v0  ;;  %v2900_v0 = vld [vmem:[%s4036_s1 + $0x3e8] ss:$16 sps:$4 sm:$0xff]  }
  0x6c   :  { %1782 = vmatpush2.bf16.msra.mxu1 %v2815_v1  ;;  %1742 = vmatprep.subr.bf16.mxu0 %v2820_v2  ;;  %v2905_v1 = vld [vmem:[%s4036_s1 + $0x1cc] ss:$16 sps:$4 sm:$0xff]  }
  0x6d   :  { %1783 = vmatprep.subr.bf16.mxu1 %v2823_v4  ;;  %v2908_v2 = vld [vmem:[%s4036_s1 + $0x3cc] ss:$16 sps:$4 sm:$0xff]   ;;  %v2903_v4 = vld [vmem:[%s4036_s1 + $0x1c8] ss:$16 sps:$4 sm:$0xff]  }
  0x6f   :  { %1743 = vmatpush2.bf16.msra.mxu0 %v2818_v5  ;;  %v2906_v5 = vld [vmem:[%s4036_s1 + $0x3c8] ss:$16 sps:$4 sm:$0xff]  }
  0x70   :  { %1784 = vmatpush2.bf16.msra.mxu1 %v2821_v6  ;;  %1744 = vmatprep.subr.bf16.mxu0 %v2826_v7  ;;  %v2911_v6 = vld [vmem:[%s4036_s1 + $0x1ac] ss:$16 sps:$4 sm:$0xff]  }
  0x71   :  { %1785 = vmatprep.subr.bf16.mxu1 %v2829_v8  ;;  %v2914_v7 = vld [vmem:[%s4036_s1 + $0x3ac] ss:$16 sps:$4 sm:$0xff]   ;;  %v2909_v8 = vld [vmem:[%s4036_s1 + $0x1a8] ss:$16 sps:$4 sm:$0xff]  }
  0x73   :  { %1745 = vmatpush2.bf16.msra.mxu0 %v2824_v9  ;;  %v2912_v9 = vld [vmem:[%s4036_s1 + $0x3a8] ss:$16 sps:$4 sm:$0xff]  }
  0x74   :  { %1786 = vmatpush2.bf16.msra.mxu1 %v2827_v10  ;;  %1746 = vmatprep.subr.bf16.mxu0 %v2832_v11  ;;  %v2917_v10 = vld [vmem:[%s4036_s1 + $0x18c] ss:$16 sps:$4 sm:$0xff]  }
  0x75   :  { %1787 = vmatprep.subr.bf16.mxu1 %v2835_v12  ;;  %v2920_v11 = vld [vmem:[%s4036_s1 + $0x38c] ss:$16 sps:$4 sm:$0xff]   ;;  %v2915_v12 = vld [vmem:[%s4036_s1 + $0x188] ss:$16 sps:$4 sm:$0xff]  }
  0x77   :  { %1747 = vmatpush2.bf16.msra.mxu0 %v2830_v13  ;;  %v2918_v13 = vld [vmem:[%s4036_s1 + $0x388] ss:$16 sps:$4 sm:$0xff]  }
  0x78   :  { %1788 = vmatpush2.bf16.msra.mxu1 %v2833_v15  ;;  %1748 = vmatprep.subr.bf16.mxu0 %v2838_v16  ;;  %v2923_v15 = vld [vmem:[%s4036_s1 + $0x16c] ss:$16 sps:$4 sm:$0xff]  }
  0x79   :  { %1789 = vmatprep.subr.bf16.mxu1 %v2841_v17  ;;  %v2926_v16 = vld [vmem:[%s4036_s1 + $0x36c] ss:$16 sps:$4 sm:$0xff]   ;;  %v2921_v17 = vld [vmem:[%s4036_s1 + $0x168] ss:$16 sps:$4 sm:$0xff]  }
  0x7b   :  { %1749 = vmatpush2.bf16.msra.mxu0 %v2836_v20  ;;  %v2924_v20 = vld [vmem:[%s4036_s1 + $0x368] ss:$16 sps:$4 sm:$0xff]  }
  0x7c   :  { %1790 = vmatpush2.bf16.msra.mxu1 %v2839_v21  ;;  %1750 = vmatprep.subr.bf16.mxu0 %v2844_v22  ;;  %v2929_v21 = vld [vmem:[%s4036_s1 + $0x14c] ss:$16 sps:$4 sm:$0xff]  }
  0x7d   :  { %1791 = vmatprep.subr.bf16.mxu1 %v2847_v23  ;;  %v2932_v22 = vld [vmem:[%s4036_s1 + $0x34c] ss:$16 sps:$4 sm:$0xff]   ;;  %v2927_v23 = vld [vmem:[%s4036_s1 + $0x148] ss:$16 sps:$4 sm:$0xff]  }
  0x7f   :  { %1751 = vmatpush2.bf16.msra.mxu0 %v2842_v25  ;;  %v2930_v25 = vld [vmem:[%s4036_s1 + $0x348] ss:$16 sps:$4 sm:$0xff]  }
  0x80   :  { %1792 = vmatpush2.bf16.msra.mxu1 %v2845_v26  ;;  %1802 = vmatprep.subr.bf16.mxu0 %v2851_v27  ;;  %v2935_v26 = vld [vmem:[%s4036_s1 + $0x12c] ss:$16 sps:$4 sm:$0xff]  }
  0x81   :  { %1843 = vmatprep.subr.bf16.mxu1 %v2854_v28  ;;  %v2938_v27 = vld [vmem:[%s4036_s1 + $0x32c] ss:$16 sps:$4 sm:$0xff]   ;;  %v2933_v28 = vld [vmem:[%s4036_s1 + $0x128] ss:$16 sps:$4 sm:$0xff]  }
  0x82   :  { %1753 = vmatmul.mubr.bf16.vlgmr.msra.gmra.mxu0 %v3265_v63 }
  0x83   :  { %1794 = vmatmul.mubr.bf16.vlgmr.msra.gmra.mxu1 %v3528_v29  ;;  %1803 = vmatpush1.bf16.msra.mxu0 %v2849_v30  ;;  %v2936_v30 = vld [vmem:[%s4036_s1 + $0x328] ss:$16 sps:$4 sm:$0xff]  }
  0x84   :  { %1844 = vmatpush1.bf16.msra.mxu1 %v2852_v31  ;;  %1804 = vmatprep.subr.bf16.mxu0 %v2857_v32  ;;  %v2941_v31 = vld [vmem:[%s4036_s1 + $0x10c] ss:$16 sps:$4 sm:$0xff]  }
  0x85   :  { %1845 = vmatprep.subr.bf16.mxu1 %v2860_v33  ;;  %1834 = vmatprep.mubr.bf16.mxu0 %v3263_v62  ;;  %v2872_v62 = vld [vmem:[%s4036_s1 + $0x28c] ss:$16 sps:$4 sm:$0xff]   ;;  %v2939_v33 = vld [vmem:[%s4036_s1 + $0x108] ss:$16 sps:$4 sm:$0xff]  }
  0x86   :  { %1875 = vmatprep.mubr.bf16.mxu1 %v3278_v3  ;;  %v2867_v3 = vld [vmem:[%s4036_s1 + $0x88] ss:$16 sps:$4 sm:$0xff]   ;;  %v2944_v32 = vld [vmem:[%s4036_s1 + $0x30c] ss:$16 sps:$4 sm:$0xff]  }
  0x87   :  { %1805 = vmatpush1.bf16.msra.mxu0 %v2855_v34  ;;  %v2942_v34 = vld [vmem:[%s4036_s1 + $0x308] ss:$16 sps:$4 sm:$0xff]  }
  0x88   :  { %1846 = vmatpush1.bf16.msra.mxu1 %v2858_v35  ;;  %1806 = vmatprep.subr.bf16.mxu0 %v2863_v36  ;;  %v2947_v35 = vld [vmem:[%s4036_s1 + $0x4ec] ss:$16 sps:$4 sm:$0xff]  }
  0x89   :  { %1847 = vmatprep.subr.bf16.mxu1 %v2866_v37  ;;  %v2950_v36 = vld [vmem:[%s4036_s1 + $0x6ec] ss:$16 sps:$4 sm:$0xff]   ;;  %v2945_v37 = vld [vmem:[%s4036_s1 + $0x4e8] ss:$16 sps:$4 sm:$0xff]  }
  0x8b   :  { %1807 = vmatpush1.bf16.msra.mxu0 %v2861_v38  ;;  %v2948_v38 = vld [vmem:[%s4036_s1 + $0x6e8] ss:$16 sps:$4 sm:$0xff]  }
  0x8c   :  { %1848 = vmatpush1.bf16.msra.mxu1 %v2864_v39  ;;  %1808 = vmatprep.subr.bf16.mxu0 %v2869_v40  ;;  %v2953_v39 = vld [vmem:[%s4036_s1 + $0x4cc] ss:$16 sps:$4 sm:$0xff]  }
  0x8d   :  { %1849 = vmatprep.subr.bf16.mxu1 %v2872_v62  ;;  %v2956_v40 = vld [vmem:[%s4036_s1 + $0x6cc] ss:$16 sps:$4 sm:$0xff]   ;;  %v2951_v62 = vld [vmem:[%s4036_s1 + $0x4c8] ss:$16 sps:$4 sm:$0xff]  }
  0x8f   :  { %1809 = vmatpush1.bf16.msra.mxu0 %v2867_v3  ;;  %v2954_v3 = vld [vmem:[%s4036_s1 + $0x6c8] ss:$16 sps:$4 sm:$0xff]  }
  0x90   :  { %1850 = vmatpush1.bf16.msra.mxu1 %v2870_v41  ;;  %1810 = vmatprep.subr.bf16.mxu0 %v2875_v43  ;;  %v2959_v41 = vld [vmem:[%s4036_s1 + $0x4ac] ss:$16 sps:$4 sm:$0xff]  }
  0x91   :  { %1851 = vmatprep.subr.bf16.mxu1 %v2878_v44  ;;  %v2962_v43 = vld [vmem:[%s4036_s1 + $0x6ac] ss:$16 sps:$4 sm:$0xff]  }
  0x92   :  { %v2965_v44 = vld [vmem:[%s4036_s1 + $0x48c] ss:$16 sps:$4 sm:$0xff]  }
  0x93   :  { %1811 = vmatpush1.bf16.msra.mxu0 %v2873_v45  ;;  %v2966_v45 = vld [vmem:[%s4036_s1 + $0x688] ss:$16 sps:$4 sm:$0xff]  }
  0x94   :  { %1852 = vmatpush1.bf16.msra.mxu1 %v2876_v46  ;;  %1812 = vmatprep.subr.bf16.mxu0 %v2881_v47  ;;  %v2971_v46 = vld [vmem:[%s4036_s1 + $0x46c] ss:$16 sps:$4 sm:$0xff]  }
  0x95   :  { %1853 = vmatprep.subr.bf16.mxu1 %v2884_v48  ;;  %v2974_v47 = vld [vmem:[%s4036_s1 + $0x66c] ss:$16 sps:$4 sm:$0xff]   ;;  %v2969_v48 = vld [vmem:[%s4036_s1 + $0x468] ss:$16 sps:$4 sm:$0xff]  }
  0x97   :  { %1813 = vmatpush1.bf16.msra.mxu0 %v2879_v49  ;;  %v2972_v49 = vld [vmem:[%s4036_s1 + $0x668] ss:$16 sps:$4 sm:$0xff]  }
  0x98   :  { %1854 = vmatpush1.bf16.msra.mxu1 %v2882_v50  ;;  %1814 = vmatprep.subr.bf16.mxu0 %v2887_v51  ;;  %v2977_v50 = vld [vmem:[%s4036_s1 + $0x44c] ss:$16 sps:$4 sm:$0xff]  }
  0x99   :  { %1855 = vmatprep.subr.bf16.mxu1 %v2890_v52  ;;  %v2980_v51 = vld [vmem:[%s4036_s1 + $0x64c] ss:$16 sps:$4 sm:$0xff]   ;;  %v2975_v52 = vld [vmem:[%s4036_s1 + $0x448] ss:$16 sps:$4 sm:$0xff]  }
  0x9b   :  { %1815 = vmatpush1.bf16.msra.mxu0 %v2885_v53  ;;  %v2978_v53 = vld [vmem:[%s4036_s1 + $0x648] ss:$16 sps:$4 sm:$0xff]  }
  0x9c   :  { %1856 = vmatpush1.bf16.msra.mxu1 %v2888_v54  ;;  %1816 = vmatprep.subr.bf16.mxu0 %v2893_v55  ;;  %v2983_v54 = vld [vmem:[%s4036_s1 + $0x42c] ss:$16 sps:$4 sm:$0xff]  }
  0x9d   :  { %1857 = vmatprep.subr.bf16.mxu1 %v2896_v56  ;;  %v2986_v55 = vld [vmem:[%s4036_s1 + $0x62c] ss:$16 sps:$4 sm:$0xff]   ;;  %v2981_v56 = vld [vmem:[%s4036_s1 + $0x428] ss:$16 sps:$4 sm:$0xff]  }
  0x9f   :  { %1817 = vmatpush1.bf16.msra.mxu0 %v2891_v57  ;;  %v2984_v57 = vld [vmem:[%s4036_s1 + $0x628] ss:$16 sps:$4 sm:$0xff]  }
  0xa0   :  { %1858 = vmatpush1.bf16.msra.mxu1 %v2894_v58  ;;  %1818 = vmatprep.subr.bf16.mxu0 %v2899_v59  ;;  %v2989_v58 = vld [vmem:[%s4036_s1 + $0x40c] ss:$16 sps:$4 sm:$0xff]  }
  0xa1   :  { %1859 = vmatprep.subr.bf16.mxu1 %v2902_v60  ;;  %v2992_v59 = vld [vmem:[%s4036_s1 + $0x60c] ss:$16 sps:$4 sm:$0xff]   ;;  %v2987_v60 = vld [vmem:[%s4036_s1 + $0x408] ss:$16 sps:$4 sm:$0xff]  }
  0xa3   :  { %1819 = vmatpush2.bf16.msra.mxu0 %v2897_v61  ;;  %v2990_v61 = vld [vmem:[%s4036_s1 + $0x608] ss:$16 sps:$4 sm:$0xff]  }
  0xa4   :  { %1860 = vmatpush2.bf16.msra.mxu1 %v2900_v0  ;;  %1820 = vmatprep.subr.bf16.mxu0 %v2905_v1  ;;  %v2995_v0 = vld [vmem:[%s4036_s1 + $0x5ec] ss:$16 sps:$4 sm:$0xff]  }
  0xa5   :  { %1861 = vmatprep.subr.bf16.mxu1 %v2908_v2  ;;  %v2998_v1 = vld [vmem:[%s4036_s1 + $0x7ec] ss:$16 sps:$4 sm:$0xff]   ;;  %v2993_v2 = vld [vmem:[%s4036_s1 + $0x5e8] ss:$16 sps:$4 sm:$0xff]  }
  0xa7   :  { %1821 = vmatpush2.bf16.msra.mxu0 %v2903_v4  ;;  %v2996_v4 = vld [vmem:[%s4036_s1 + $0x7e8] ss:$16 sps:$4 sm:$0xff]  }
  0xa8   :  { %1862 = vmatpush2.bf16.msra.mxu1 %v2906_v5  ;;  %1822 = vmatprep.subr.bf16.mxu0 %v2911_v6  ;;  %v3001_v5 = vld [vmem:[%s4036_s1 + $0x5cc] ss:$16 sps:$4 sm:$0xff]  }
  0xa9   :  { %1863 = vmatprep.subr.bf16.mxu1 %v2914_v7  ;;  %v3004_v6 = vld [vmem:[%s4036_s1 + $0x7cc] ss:$16 sps:$4 sm:$0xff]   ;;  %v2999_v7 = vld [vmem:[%s4036_s1 + $0x5c8] ss:$16 sps:$4 sm:$0xff]  }
  0xab   :  { %1823 = vmatpush2.bf16.msra.mxu0 %v2909_v8  ;;  %v3002_v8 = vld [vmem:[%s4036_s1 + $0x7c8] ss:$16 sps:$4 sm:$0xff]  }
  0xac   :  { %1864 = vmatpush2.bf16.msra.mxu1 %v2912_v9  ;;  %1824 = vmatprep.subr.bf16.mxu0 %v2917_v10  ;;  %v3007_v9 = vld [vmem:[%s4036_s1 + $0x5ac] ss:$16 sps:$4 sm:$0xff]  }
  0xad   :  { %1865 = vmatprep.subr.bf16.mxu1 %v2920_v11  ;;  %v3010_v10 = vld [vmem:[%s4036_s1 + $0x7ac] ss:$16 sps:$4 sm:$0xff]   ;;  %v3005_v11 = vld [vmem:[%s4036_s1 + $0x5a8] ss:$16 sps:$4 sm:$0xff]  }
  0xaf   :  { %1825 = vmatpush2.bf16.msra.mxu0 %v2915_v12  ;;  %v3008_v12 = vld [vmem:[%s4036_s1 + $0x7a8] ss:$16 sps:$4 sm:$0xff]  }
  0xb0   :  { %1866 = vmatpush2.bf16.msra.mxu1 %v2918_v13  ;;  %1826 = vmatprep.subr.bf16.mxu0 %v2923_v15  ;;  %v3013_v13 = vld [vmem:[%s4036_s1 + $0x58c] ss:$16 sps:$4 sm:$0xff]  }
  0xb1   :  { %1867 = vmatprep.subr.bf16.mxu1 %v2926_v16  ;;  %v3016_v15 = vld [vmem:[%s4036_s1 + $0x78c] ss:$16 sps:$4 sm:$0xff]   ;;  %v3011_v16 = vld [vmem:[%s4036_s1 + $0x588] ss:$16 sps:$4 sm:$0xff]  }
  0xb3   :  { %1827 = vmatpush2.bf16.msra.mxu0 %v2921_v17  ;;  %v3014_v17 = vld [vmem:[%s4036_s1 + $0x788] ss:$16 sps:$4 sm:$0xff]  }
  0xb4   :  { %1868 = vmatpush2.bf16.msra.mxu1 %v2924_v20  ;;  %1828 = vmatprep.subr.bf16.mxu0 %v2929_v21  ;;  %v3019_v20 = vld [vmem:[%s4036_s1 + $0x56c] ss:$16 sps:$4 sm:$0xff]  }
  0xb5   :  { %1869 = vmatprep.subr.bf16.mxu1 %v2932_v22  ;;  %v3022_v21 = vld [vmem:[%s4036_s1 + $0x76c] ss:$16 sps:$4 sm:$0xff]   ;;  %v3017_v22 = vld [vmem:[%s4036_s1 + $0x568] ss:$16 sps:$4 sm:$0xff]  }
  0xb7   :  { %1829 = vmatpush2.bf16.msra.mxu0 %v2927_v23  ;;  %v3020_v23 = vld [vmem:[%s4036_s1 + $0x768] ss:$16 sps:$4 sm:$0xff]  }
  0xb8   :  { %1870 = vmatpush2.bf16.msra.mxu1 %v2930_v25  ;;  %1830 = vmatprep.subr.bf16.mxu0 %v2935_v26  ;;  %v3025_v25 = vld [vmem:[%s4036_s1 + $0x54c] ss:$16 sps:$4 sm:$0xff]  }
  0xb9   :  { %1871 = vmatprep.subr.bf16.mxu1 %v2938_v27  ;;  %v3028_v26 = vld [vmem:[%s4036_s1 + $0x74c] ss:$16 sps:$4 sm:$0xff]   ;;  %v3023_v27 = vld [vmem:[%s4036_s1 + $0x548] ss:$16 sps:$4 sm:$0xff]  }
  0xbb   :  { %1831 = vmatpush2.bf16.msra.mxu0 %v2933_v28  ;;  %v3026_v28 = vld [vmem:[%s4036_s1 + $0x748] ss:$16 sps:$4 sm:$0xff]  }
  0xbc   :  { %1872 = vmatpush2.bf16.msra.mxu1 %v2936_v30  ;;  %1832 = vmatprep.subr.bf16.mxu0 %v2941_v31  ;;  %v3031_v30 = vld [vmem:[%s4036_s1 + $0x52c] ss:$16 sps:$4 sm:$0xff]  }
  0xbd   :  { %1873 = vmatprep.subr.bf16.mxu1 %v2944_v32  ;;  %v3034_v31 = vld [vmem:[%s4036_s1 + $0x72c] ss:$16 sps:$4 sm:$0xff]   ;;  %v3029_v32 = vld [vmem:[%s4036_s1 + $0x528] ss:$16 sps:$4 sm:$0xff]  }
  0xbf   :  { %1833 = vmatpush2.bf16.msra.mxu0 %v2939_v33  ;;  %v3032_v33 = vld [vmem:[%s4036_s1 + $0x728] ss:$16 sps:$4 sm:$0xff]  }
  0xc0   :  { %1874 = vmatpush2.bf16.msra.mxu1 %v2942_v34  ;;  %1884 = vmatprep.subr.bf16.mxu0 %v2947_v35  ;;  %v3037_v34 = vld [vmem:[%s4036_s1 + $0x50c] ss:$16 sps:$4 sm:$0xff]  }
  0xc1   :  { %1925 = vmatprep.subr.bf16.mxu1 %v2950_v36  ;;  %v3040_v35 = vld [vmem:[%s4036_s1 + $0x70c] ss:$16 sps:$4 sm:$0xff]   ;;  %v3035_v36 = vld [vmem:[%s4036_s1 + $0x508] ss:$16 sps:$4 sm:$0xff]  }
  0xc2   :  { %1835 = vmatmul.mubr.bf16.vlgmr.msra.gmra.mxu0 %v3309_v14  ;;  %v2957_v14 = vld [vmem:[%s4036_s1 + $0x4a8] ss:$16 sps:$4 sm:$0xff]  }
  0xc3   :  { %1876 = vmatmul.mubr.bf16.vlgmr.msra.gmra.mxu1 %v3324_v19  ;;  %1885 = vmatpush1.bf16.msra.mxu0 %v2945_v37  ;;  %v2960_v19 = vld [vmem:[%s4036_s1 + $0x6a8] ss:$16 sps:$4 sm:$0xff]  }
  0xc4   :  { %1926 = vmatpush1.bf16.msra.mxu1 %v2948_v38  ;;  %1886 = vmatprep.subr.bf16.mxu0 %v2953_v39  ;;  %v3038_v37 = vld [vmem:[%s4036_s1 + $0x708] ss:$16 sps:$4 sm:$0xff]  }
  0xc5   :  { %1927 = vmatprep.subr.bf16.mxu1 %v2956_v40  ;;  %1916 = vmatprep.mubr.bf16.mxu0 %v3320_v18  ;;  %v2968_v18 = vld [vmem:[%s4036_s1 + $0x68c] ss:$16 sps:$4 sm:$0xff]   ;;  %v3043_v40 = vld [vmem:[%s4038_s3 + $0x70] sm:$0xff]  }
  0xc6   :  { %1957 = vmatprep.mubr.bf16.mxu1 %v3340_v24  ;;  %v2963_v24 = vld [vmem:[%s4036_s1 + $0x488] ss:$16 sps:$4 sm:$0xff]  }
  0xc7   :  { %1887 = vmatpush1.bf16.msra.mxu0 %v2951_v62  ;;  %v3041_v38 = vld [vmem:[%s4038_s3 + $0x78] sm:$0xff]  }
  0xc8   :  { %1928 = vmatpush1.bf16.msra.mxu1 %v2954_v3  ;;  %1888 = vmatprep.subr.bf16.mxu0 %v2959_v41  ;;  %v3042_v39 = vld [vmem:[%s4038_s3 + $0x38] sm:$0xff]   ;;  %v3044_v41 = vld [vmem:[%s4038_s3 + $0x30] sm:$0xff]  }
  0xc9   :  { %1929 = vmatprep.subr.bf16.mxu1 %v2962_v43 }
  0xcb   :  { %1889 = vmatpush1.bf16.msra.mxu0 %v2957_v14 }
  0xcc   :  { %1930 = vmatpush1.bf16.msra.mxu1 %v2960_v19  ;;  %1890 = vmatprep.subr.bf16.mxu0 %v2965_v44  ;;  %v3045_v19 = vld [vmem:[%s4038_s3 + $0x68] sm:$0xff]  }
  0xcd   :  { %1931 = vmatprep.subr.bf16.mxu1 %v2968_v18 }
  0xcf   :  { %1891 = vmatpush1.bf16.msra.mxu0 %v2963_v24 }
  0xd0   :  { %1932 = vmatpush1.bf16.msra.mxu1 %v2966_v45  ;;  %1892 = vmatprep.subr.bf16.mxu0 %v2971_v46  ;;  %v3057_v46 = vld [vmem:[%s4038_s3 + $0xf8] sm:$0xff]  }
  0xd1   :  { %1933 = vmatprep.subr.bf16.mxu1 %v2974_v47  ;;  %v3058_v47 = vld [vmem:[%s4038_s3 + $0xb8] sm:$0xff]  }
  0xd3   :  { %1893 = vmatpush1.bf16.msra.mxu0 %v2969_v48  ;;  %v3059_v48 = vld [vmem:[%s4038_s3 + $0xf0] sm:$0xff]  }
  0xd4   :  { %1934 = vmatpush1.bf16.msra.mxu1 %v2972_v49  ;;  %1894 = vmatprep.subr.bf16.mxu0 %v2977_v50  ;;  %v3048_v49 = vld [vmem:[%s4038_s3 + $0x20] sm:$0xff]   ;;  %v3060_v50 = vld [vmem:[%s4038_s3 + $0xb0] sm:$0xff]  }
  0xd5   :  { %1935 = vmatprep.subr.bf16.mxu1 %v2980_v51  ;;  %v3049_v51 = vld [vmem:[%s4038_s3 + $0x58] sm:$0xff]  }
  0xd7   :  { %1895 = vmatpush1.bf16.msra.mxu0 %v2975_v52  ;;  %v3061_v52 = vld [vmem:[%s4038_s3 + $0xe8] sm:$0xff]  }
  0xd8   :  { %1936 = vmatpush1.bf16.msra.mxu1 %v2978_v53  ;;  %1896 = vmatprep.subr.bf16.mxu0 %v2983_v54  ;;  %v3050_v53 = vld [vmem:[%s4038_s3 + $0x18] sm:$0xff]   ;;  %v3062_v54 = vld [vmem:[%s4038_s3 + $0xa8] sm:$0xff]  }
  0xd9   :  { %1937 = vmatprep.subr.bf16.mxu1 %v2986_v55  ;;  %v3051_v55 = vld [vmem:[%s4038_s3 + $0x50] sm:$0xff]  }
  0xdb   :  { %1897 = vmatpush1.bf16.msra.mxu0 %v2981_v56  ;;  %v3063_v56 = vld [vmem:[%s4038_s3 + $0xe0] sm:$0xff]  }
  0xdc   :  { %1938 = vmatpush1.bf16.msra.mxu1 %v2984_v57  ;;  %1898 = vmatprep.subr.bf16.mxu0 %v2989_v58  ;;  %v3052_v57 = vld [vmem:[%s4038_s3 + $0x10] sm:$0xff]   ;;  %v3064_v58 = vld [vmem:[%s4038_s3 + $0xa0] sm:$0xff]  }
  0xdd   :  { %1939 = vmatprep.subr.bf16.mxu1 %v2992_v59  ;;  %v3053_v59 = vld [vmem:[%s4038_s3 + $0x48] sm:$0xff]  }
  0xdf   :  { %1899 = vmatpush1.bf16.msra.mxu0 %v2987_v60  ;;  %v3065_v60 = vld [vmem:[%s4038_s3 + $0xd8] sm:$0xff]  }
  0xe0   :  { %1940 = vmatpush1.bf16.msra.mxu1 %v2990_v61  ;;  %1900 = vmatprep.subr.bf16.mxu0 %v2995_v0  ;;  %v3054_v61 = vld [vmem:[%s4038_s3 + $0x8] sm:$0xff]   ;;  %v3066_v0 = vld [vmem:[%s4038_s3 + $0x98] sm:$0xff]  }
  0xe1   :  { %1941 = vmatprep.subr.bf16.mxu1 %v2998_v1  ;;  %v3055_v1 = vld [vmem:[%s4038_s3 + $0x40] sm:$0xff]  }
  0xe3   :  { %1901 = vmatpush2.bf16.msra.mxu0 %v2993_v2  ;;  %v3056_v2 = vld [vmem:[%s4038_s3] sm:$0xff]  }
  0xe4   :  { %1942 = vmatpush2.bf16.msra.mxu1 %v2996_v4  ;;  %1902 = vmatprep.subr.bf16.mxu0 %v3001_v5  ;;  %v282_v4 = vsub.s32 0, %v3221_v42  ;;  %v278_v5 = vld [vmem:[%s4039_s2] sm:$0xf] }
  0xe5   :  { %1943 = vmatprep.subr.bf16.mxu1 %v3004_v6  ;;  %v286_v6 = vsub.s32 1, %v3221_v42 }
  0xe7   :  { %1903 = vmatpush2.bf16.msra.mxu0 %v2999_v7  ;;  %v283_v7 = vrot.slane %v278_v5, %v282_v4 }
  0xe8   :  { %1944 = vmatpush2.bf16.msra.mxu1 %v3002_v8  ;;  %1904 = vmatprep.subr.bf16.mxu0 %v3007_v9  ;;  %v287_v8 = vrot.slane %v278_v5, %v286_v6 }
  0xe9   :  { %1945 = vmatprep.subr.bf16.mxu1 %v3010_v10 }
  0xeb   :  { %1905 = vmatpush2.bf16.msra.mxu0 %v3005_v11  ;;  %v3067_v11 = vld [vmem:[%s4038_s3 + $0xd0] sm:$0xff]  }
  0xec   :  { %1946 = vmatpush2.bf16.msra.mxu1 %v3008_v12  ;;  %1906 = vmatprep.subr.bf16.mxu0 %v3013_v13  ;;  %v3068_v13 = vld [vmem:[%s4038_s3 + $0x90] sm:$0xff]  }
  0xed   :  { %1947 = vmatprep.subr.bf16.mxu1 %v3016_v15 }
  0xef   :  { %1907 = vmatpush2.bf16.msra.mxu0 %v3011_v16 }
  0xf0   :  { %1948 = vmatpush2.bf16.msra.mxu1 %v3014_v17  ;;  %1908 = vmatprep.subr.bf16.mxu0 %v3019_v20 }
  0xf1   :  { %1949 = vmatprep.subr.bf16.mxu1 %v3022_v21 }
  0xf3   :  { %1909 = vmatpush2.bf16.msra.mxu0 %v3017_v22 }
  0xf4   :  { %1950 = vmatpush2.bf16.msra.mxu1 %v3020_v23  ;;  %1910 = vmatprep.subr.bf16.mxu0 %v3025_v25  ;;  %v3069_v23 = vld [vmem:[%s4038_s3 + $0xc8] sm:$0xff]  }
  0xf5   :  { %1951 = vmatprep.subr.bf16.mxu1 %v3028_v26 }
  0xf7   :  { %1911 = vmatpush2.bf16.msra.mxu0 %v3023_v27  ;;  %v3070_v27 = vld [vmem:[%s4038_s3 + $0x88] sm:$0xff]  }
  0xf8   :  { %1952 = vmatpush2.bf16.msra.mxu1 %v3026_v28  ;;  %1912 = vmatprep.subr.bf16.mxu0 %v3031_v30 }
  0xf9   :  { %1953 = vmatprep.subr.bf16.mxu1 %v3034_v31 }
  0xfb   :  { %1913 = vmatpush2.bf16.msra.mxu0 %v3029_v32 }
  0xfc   :  { %1954 = vmatpush2.bf16.msra.mxu1 %v3032_v33  ;;  %1914 = vmatprep.subr.bf16.mxu0 %v3037_v34 }
  0xfd   :  { %1955 = vmatprep.subr.bf16.mxu1 %v3040_v35  ;;  %v3071_v35 = vld [vmem:[%s4038_s3 + $0xc0] sm:$0xff]  }
  0xff   :  { %1915 = vmatpush2.bf16.msra.mxu0 %v3035_v36 }
 0x100   :  { %1956 = vmatpush2.bf16.msra.mxu1 %v3038_v37  ;;  %2611 = vmatprep.subr.bf16.mxu0 %v3041_v38  ;;  %v3072_v37 = vld [vmem:[%s4038_s3 + $0x80] sm:$0xff]  }
 0x101   :  { %2633 = vmatprep.subr.bf16.mxu1 %v3057_v46 }
 0x102   :  { %v3925_v62 = vpop.f32.mrf.mxu0  ;;  %1917 = vmatmul.mubr.bf16.vlgmr.msra.gmra.mxu0 %v3265_v63  ;;  %v3046_v63 = vld [vmem:[%s4038_s3 + $0x28] sm:$0xff]  }
 0x103   :  { %v3927_v3 = vpop.f32.mrf.mxu1  ;;  %1958 = vmatmul.mubr.bf16.vlgmr.msra.gmra.mxu1 %v3528_v29  ;;  %2612 = vmatpush3.bf16.msra.mxu0 %v3042_v39  ;;  %v3047_v29 = vld [vmem:[%s4038_s3 + $0x60] sm:$0xff]   ;;  %v1673_v9 = vadd.f32 %v3925_v62, %v283_v7 }
 0x104   :  { %v1674_v43 = vpop.f32.mrf.mxu0  ;;  %2613 = vmatprep.subr.bf16.mxu0 %v3043_v40  ;;  %2634 = vmatpush3.bf16.msra.mxu1 %v3058_v47 }
 0x105   :  { %v3934_v14 = vpop.f32.mrf.mxu1  ;;  %2635 = vmatprep.subr.bf16.mxu1 %v3059_v48  ;;  %v1675_v10 = vadd.f32 %v1674_v43, %v287_v8  ;;  %v1714_v12 = vadd.f32 %v3927_v3, %v1673_v9  ;;  %v2578_v8 = vld [vmem:[%s4040_s4] ss:$0 sm:$0xff] }
 0x106   :  { %v1676_v44 = vpop.f32.mrf.mxu0 }
 0x107   :  { %v1717_v18 = vpop.f32.mrf.mxu1  ;;  %2614 = vmatpush3.bf16.msra.mxu0 %v3044_v41  ;;  %v1716_v17 = vadd.f32 %v3934_v14, %v1675_v10 }
 0x108   :  { %v1677_v24 = vpop.f32.mrf.mxu0  ;;  %2615 = vmatprep.subr.bf16.mxu0 %v3045_v19  ;;  %2636 = vmatpush3.bf16.msra.mxu1 %v3060_v50  ;;  %v290_v18 = vsub.s32 2, %v3221_v42 }
 0x109   :  { %v1718_v45 = vpop.f32.mrf.mxu1  ;;  %2637 = vmatprep.subr.bf16.mxu1 %v3061_v52 }
 0x10b   :  { %2616 = vmatpush3.bf16.msra.mxu0 %v3046_v63  ;;  %v294_v63 = vsub.s32 3, %v3221_v42 }
 0x10c   :  { %2617 = vmatprep.subr.bf16.mxu0 %v3047_v29  ;;  %2638 = vmatpush3.bf16.msra.mxu1 %v3062_v54  ;;  %v291_v29 = vrot.slane %v278_v5, %v290_v18 }
 0x10d   :  { %2639 = vmatprep.subr.bf16.mxu1 %v3063_v56  ;;  %v295_v24 = vrot.slane %v278_v5, %v294_v63 }
 0x10f   :  { %2618 = vmatpush3.bf16.msra.mxu0 %v3048_v49 }
 0x110   :  { %2619 = vmatprep.subr.bf16.mxu0 %v3049_v51  ;;  %2640 = vmatpush3.bf16.msra.mxu1 %v3064_v58 }
 0x111   :  { %2641 = vmatprep.subr.bf16.mxu1 %v3065_v60 }
 0x113   :  { %2620 = vmatpush3.bf16.msra.mxu0 %v3050_v53 }
 0x114   :  { %2621 = vmatprep.subr.bf16.mxu0 %v3051_v55  ;;  %2642 = vmatpush3.bf16.msra.mxu1 %v3066_v0 }
 0x115   :  { %2643 = vmatprep.subr.bf16.mxu1 %v3067_v11 }
 0x117   :  { %2622 = vmatpush3.bf16.msra.mxu0 %v3052_v57 }
 0x118   :  { %2623 = vmatprep.subr.bf16.mxu0 %v3053_v59  ;;  %2644 = vmatpush3.bf16.msra.mxu1 %v3068_v13 }
 0x119   :  { %2645 = vmatprep.subr.bf16.mxu1 %v3069_v23 }
 0x11b   :  { %2624 = vmatpush3.bf16.msra.mxu0 %v3054_v61 }
 0x11c   :  { %2625 = vmatprep.subr.bf16.mxu0 %v3055_v1  ;;  %2646 = vmatpush3.bf16.msra.mxu1 %v3070_v27 }
 0x11d   :  { %2647 = vmatprep.subr.bf16.mxu1 %v3071_v35 }
 0x11f   :  { %2626 = vmatpush3.bf16.msra.mxu0 %v3056_v2 }
 0x120   :  { %2648 = vmatpush3.bf16.msra.mxu1 %v3072_v37 }
 0x142   :  { %v1754_v15 = vpop.f32.mrf.mxu0 }
 0x143   :  { %v1795_v16 = vpop.f32.mrf.mxu1  ;;  %v1755_v20 = vadd.f32 %v1754_v15, %v1714_v12 }
 0x144   :  { %v1756_v21 = vpop.f32.mrf.mxu0 }
 0x145   :  { %v1797_v22 = vpop.f32.mrf.mxu1  ;;  %v1796_v25 = vadd.f32 %v1795_v16, %v1755_v20  ;;  %v1757_v26 = vadd.f32 %v1756_v21, %v1716_v17 }
 0x146   :  { %v1758_v28 = vpop.f32.mrf.mxu0 }
 0x147   :  { %v1799_v30 = vpop.f32.mrf.mxu1  ;;  %v1798_v31 = vadd.f32 %v1797_v22, %v1757_v26  ;;  %v1966_v32 = vmax.f32 %v1796_v25, 0.0 }
 0x148   :  { %v1759_v33 = vpop.f32.mrf.mxu0 }
 0x149   :  { %v1800_v34 = vpop.f32.mrf.mxu1  ;;  %v1967_v36 = vmax.f32 %v1798_v31, 0.0  ;;  %v1970_v39 = vpack.c.bf16 %v1966_v32, %v1966_v32 }
 0x14b   :  { %v1971_v38 = vpack.c.bf16 %v1967_v36, %v1967_v36 }
 0x14d   :  { %2269 = vmatprep.mubr.bf16.mxu0 %v1971_v38 }
 0x14e   :  { %2270 = vmatmul.mubr.bf16.vlgmr.msra.gmra.mxu0 %v1970_v39 }
 0x182   :  { %v1836_v40 = vpop.f32.mrf.mxu0 }
 0x183   :  { %v1877_v62 = vpop.f32.mrf.mxu1  ;;  %v1837_v45 = vadd.f32 %v1836_v40, %v291_v29 }
 0x184   :  { %v1838_v3 = vpop.f32.mrf.mxu0 }
 0x185   :  { %v1879_v41 = vpop.f32.mrf.mxu1  ;;  %v1839_v46 = vadd.f32 %v1838_v3, %v295_v24  ;;  %v1878_v47 = vadd.f32 %v1877_v62, %v1837_v45 }
 0x186   :  { %v1840_v43 = vpop.f32.mrf.mxu0 }
 0x187   :  { %v1881_v14 = vpop.f32.mrf.mxu1  ;;  %v1880_v50 = vadd.f32 %v1879_v41, %v1839_v46 }
 0x188   :  { %v1841_v19 = vpop.f32.mrf.mxu0 }
 0x189   :  { %v1882_v44 = vpop.f32.mrf.mxu1 }
 0x1c2   :  { %v1918_v48 = vpop.f32.mrf.mxu0 }
 0x1c3   :  { %v1959_v49 = vpop.f32.mrf.mxu1  ;;  %v1919_v51 = vadd.f32 %v1918_v48, %v1878_v47 }
 0x1c4   :  { %v1920_v52 = vpop.f32.mrf.mxu0 }
 0x1c5   :  { %v1961_v53 = vpop.f32.mrf.mxu1  ;;  %v1960_v54 = vadd.f32 %v1959_v49, %v1919_v51  ;;  %v1921_v55 = vadd.f32 %v1920_v52, %v1880_v50 }
 0x1c6   :  { %v1922_v56 = vpop.f32.mrf.mxu0 }
 0x1c7   :  { %v1963_v57 = vpop.f32.mrf.mxu1  ;;  %v1962_v58 = vadd.f32 %v1961_v53, %v1921_v55  ;;  %v1968_v59 = vmax.f32 %v1960_v54, 0.0 }
 0x1c8   :  { %v1923_v60 = vpop.f32.mrf.mxu0 }
 0x1c9   :  { %v1964_v61 = vpop.f32.mrf.mxu1  ;;  %v1969_v42 = vmax.f32 %v1962_v58, 0.0  ;;  %v1972_v1 = vpack.c.bf16 %v1968_v59, %v1968_v59 }
 0x1cb   :  { %v1973_v0 = vpack.c.bf16 %v1969_v42, %v1969_v42 }
 0x1cd   :  { %2309 = vmatprep.mubr.bf16.mxu1 %v1973_v0 }
 0x1ce   :  { %2310 = vmatmul.mubr.bf16.vlgmr.msra.gmra.mxu1 %v1972_v1 }
 0x20e   :  { %v2627_v2 = vpop.f32.mrf.mxu0 }
 0x210   :  { %v2628_v4 = vpop.f32.mrf.mxu0 }
 0x211   :  { %v2629_v5 = vadd.f32 %v2628_v4, %v2627_v2 }
 0x212   :  { %v2630_v6 = vpop.f32.mrf.mxu0 }
 0x213   :  { %v2272_v11 = vadd.f32 %v2629_v5, %v2578_v8 }
 0x214   :  { %v2631_v7 = vpop.f32.mrf.mxu0 }
 0x28e   :  { %v2649_v9 = vpop.f32.mrf.mxu1 }
 0x290   :  { %v2650_v10 = vpop.f32.mrf.mxu1 }
 0x291   :  { %v2651_v12 = vadd.f32 %v2650_v10, %v2649_v9 }
 0x292   :  { %v2652_v13 = vpop.f32.mrf.mxu1 }
 0x293   :  { %v2312_v15 = vadd.f32 %v2651_v12, %v2272_v11 }
 0x294   :  { %v2653_v16 = vpop.f32.mrf.mxu1 }
 0x295   :  { %2317 = vst [vmem:[%s4041_s5] sm:$0x3] %v2312_v15 }

// kernel: detection_head1.2
= control target key start
LH: loop header
LB: loop body
LE: loop exit
PB: predicated region body
PF: predicated region fallthrough
CT: control target
= control target key end

     0   :  { %8 = vsyncpa [#allocation3], 0  ;;  %s23947_s0 = inlined_call_operand.vmem [shape: bf16[2,8192], index: 0, kind: input, shape index: {}]   ;;  %s23948_s1 = inlined_call_operand.hbm [shape: bf16[8192,1024], index: 1, kind: input, shape index: {}]   ;;  %s23949_s2 = inlined_call_operand.hbm [shape: f32[1,1024], index: 2, kind: input, shape index: {}]   ;;  %s23950_s3 = inlined_call_operand.vmem [shape: bf16[2,1024], index: 3, kind: output, shape index: {}]  }
   0x1   :  { %10 = vsyncpa [#allocation3 + $0x1], 0 }
   0x2   :  { %11 = vsyncpa [#allocation5], 0 }
   0x3   :  { %13 = vsyncpa [#allocation5 + $0x1], 0  ;;  %s21078_s12 = smov 0   ;;  %s21080_s13 = smov 0  }
   0x4   :  { %s21082_s14 = smov 0   ;;  %s21084_s15 = smov 0  }
   0x5 LB: > { %s15758_s16 = sadd.s32 4294967295, %s21050_s15   ;;  %s21098_s17 = sadd.s32 1, %s21050_s15   ;;  %s21050_s15 = sphi %s21084_s15, %s24024_s15   ;;  %s21046_s14 = sphi %s21082_s14, %s24023_s14   ;;  %s21042_s13 = sphi %s21080_s13, %s24022_s13   ;;  %s21038_s12 = sphi %s21078_s12, %s24021_s12  }
   0x6   : > { %s44_s18 = ssub.s32 %s21050_s15, %s21098_s17  ;;  %s47_s19 = sadd.s32 1, %s21046_s14 }
   0x7   : > { %p45_p0 = scmp.eq.s32.totalorder %s44_s18, 0  ;;  %p54_p1 = scmp.ne.s32.totalorder %s21046_s14, %s21042_s13 }
   0x8   : > { %p55_p2 = scmp.eq.s32.totalorder %s21050_s15, 0  ;;  %p60_p3 = scmp.ne.s32.totalorder %s21042_s13, %s21038_s12 }
   0x9   : > { %s21108_s20 = scalar_select %p45_p0, %s21046_s14, %s47_s19  }
   0xa   : > { %p56_p4 = por %p55_p2, %p54_p1  ;;  %p61_p5 = scmp.eq.s32.totalorder %s15758_s16, 0 }
   0xb   : > { %p17838_p6 = scmp.lt.s32.totalorder %s21050_s15, 2  ;;  %s21118_s22 = sand.u32 1, %s21046_s14  }
   0xc   : > { %p21113_p7 = por %p61_p5, %p60_p3  ;;  %s15762_s23 = sshll.u32 %s21118_s22, 14 }
   0xd   : > { %s17825_s24 = sshll.u32 %s21050_s15, 8  ;;  %s143_s28 = scalar_lea.vmem [#allocation2], %s15762_s23 }
   0xe   : > { %s23974_s21 = scalar_select %p21113_p7, 1, 0 }
   0xf   : > { %s21125_s27 = scalar_lea.hbm %s23948_s1, %s17825_s24  ;;  %s150_s29 = sshll.u32 %s143_s28, 4  ;;  %s21127_s29 = int_to_ptr.vmem [resolvable:$true] %s150_s29 }
  0x10   : > { %p21129_p8 = pnand %p17838_p6, %p56_p4  ;;  %s140_s4 = scalar_lea.sflag [#allocation3], %s21118_s22 }
  0x11   : > { %s20956_s5 = scalar_lea.hbm %s21125_s27, 262144  ;;  %s20961_s8 = scalar_lea.hbm %s23948_s1, 524288 }
  0x12   : > { %p20957_p9 = scmp.ne.s32.totalorder %s21125_s27, %s20956_s5  ;;  %p20958_p10 = pneg %p21129_p8 }
  0x13   : > { %p20962_p13 = scmp.lt.s32.totalorder %s21125_s27, %s23948_s1  ;;  %p20963_p0 = scmp.lt.s32.totalorder %s20961_s8, %s20956_s5 }
  0x14   : > { %p20959_p11 = pnand %p20958_p10, %p20957_p9 }
  0x15   : > { %p20964_p1 = por %p20963_p0, %p20962_p13 }
  0x16   : > { %p20960_p12 = pneg %p20959_p11 }
  0x18   : > { %p20965_p2 = pnand %p20964_p1, %p20960_p12 }
  0x1a   : > { %20968 = shalt.err (!%p20965_p2)
}
  0x1b   : > { %s20969_s11 = scalar_lea.vmem %s21127_s29, 262144  ;;  %s21052_s12 = smov [#allocation2]  }
  0x1c   : > { %p20970_p3 = scmp.ne.s32.totalorder %s21127_s29, %s20969_s11  ;;  %s20974_s18 = sshll.u32 %s21052_s12, 4  ;;  %s20975_s18 = int_to_ptr.vmem [resolvable:$false] %s20974_s18 }
  0x1d   : > { %s20976_s19 = scalar_lea.vmem %s20975_s18, 524288  ;;  %p20977_p6 = scmp.lt.s32.totalorder %s21127_s29, %s20975_s18 }
  0x1e   : > { %p20972_p4 = pnand %p20970_p3, %p20958_p10  ;;  %p20978_p9 = scmp.lt.s32.totalorder %s20976_s19, %s20969_s11 }
  0x20   : > { %p20973_p5 = pneg %p20972_p4  ;;  %p20979_p11 = por %p20978_p9, %p20977_p6 }
  0x22   : > { %p20980_p13 = pnand %p20979_p11, %p20973_p5 }
  0x24   : > { %20983 = shalt.err (!%p20980_p13)
}
  0x25   : > { %s21053_s23 = smov 512   ;;  %s21054_s24 = smov 256  }
  0x26   : > { %s21055_s25 = smov 16   ;;  %p15768_p12 = scmp.ge.s32.totalorder %s21050_s15, 1 }
  0x27   : > { %17834 = dma.hbm_to_vmem [thread:$0]  (!%p21129_p8), %s21125_s27, 262144, %s21127_s29, %s140_s4, %s21053_s23, %s21054_s24, %s21055_s25  }
  0x28   : > { %p177_p0 = scmp.lt.s32.totalorder %s21050_s15, 3  ;;  %s15765_s26 = sshll.u32 %s21118_s22, 2 }
  0x29   : > { %s17826_s5 = sshll.u32 %s21050_s15, 6  ;;  %s164_s6 = scalar_lea.vmem [#allocation4], %s15765_s26 }
  0x2a   : > { %p21163_p1 = pnand %p15768_p12, %p177_p0  ;;  %s172_s7 = sshll.u32 %s164_s6, 4  ;;  %s173_s7 = int_to_ptr.vmem [resolvable:$true] %s172_s7 }
  0x2b   : > { %s170_s10 = scalar_lea.hbm %s23949_s2, %s17826_s5  ;;  %s161_s11 = scalar_lea.sflag [#allocation5], %s21118_s22 }
  0x2c   : > { %s23976_s28 = scalar_select %p21163_p1, 1, 0 }
  0x2d   : > { %s20984_s12 = scalar_lea.hbm %s170_s10, 64  ;;  %s20989_s4 = scalar_lea.hbm %s23949_s2, 128 }
  0x2e   : > { %p20985_p2 = scmp.ne.s32.totalorder %s170_s10, %s20984_s12  ;;  %p20990_p5 = scmp.lt.s32.totalorder %s170_s10, %s23949_s2 }
  0x2f   : > { %p20991_p6 = scmp.lt.s32.totalorder %s20989_s4, %s20984_s12 }
  0x30   : > { %p20987_p3 = pnand %p20985_p2, %p20958_p10 }
  0x31   : > { %p20992_p9 = por %p20991_p6, %p20990_p5 }
  0x32   : > { %p20988_p4 = pneg %p20987_p3 }
  0x34   : > { %p20993_p11 = pnand %p20992_p9, %p20988_p4 }
  0x36   : > { %20996 = shalt.err (!%p20993_p11)
}
  0x37   : > { %s20997_s23 = scalar_lea.vmem %s173_s7, 64  ;;  %s21056_s22 = smov [#allocation4]  }
  0x38   : > { %p20998_p13 = scmp.ne.s32.totalorder %s173_s7, %s20997_s23  ;;  %s21002_s24 = sshll.u32 %s21056_s22, 4  ;;  %s21003_s24 = int_to_ptr.vmem [resolvable:$false] %s21002_s24 }
  0x39   : > { %s21004_s25 = scalar_lea.vmem %s21003_s24, 128  ;;  %p21005_p2 = scmp.lt.s32.totalorder %s173_s7, %s21003_s24 }
  0x3a   : > { %p21000_p12 = pnand %p20998_p13, %p20958_p10  ;;  %p21006_p3 = scmp.lt.s32.totalorder %s21004_s25, %s20997_s23 }
  0x3c   : > { %p21001_p0 = pneg %p21000_p12  ;;  %p21007_p7 = por %p21006_p3, %p21005_p2 }
  0x3e   : > { %p21008_p1 = pnand %p21007_p7, %p21001_p0 }
  0x40   : > { %21011 = shalt.err (!%p21008_p1)
}
  0x41   : > { %17837 = dma.hbm_to_vmem [thread:$0]  (!%p21129_p8), %s170_s10, 64, %s173_s7, %s161_s11  }
  0x42   : > { %p23977_p4 = scmp.ne.s32.totalorder %s23976_s28, 0 }
  0x44   : > { %181 = sbr.rel (%p23977_p4) target bundleno = 2337 (0x921), region = 32 }
  0x49   : > { %s183_s26 = sand.u32 1, %s21042_s13   ;;  %p23978_p10 = scmp.ne.s32.totalorder %s23974_s21, 0 }
  0x4a   : > { %s15769_s5 = sshll.u32 %s183_s26, 14  ;;  %s184_s6 = scalar_lea.sflag [#allocation3], %s183_s26 }
  0x4b   : > { %s21189_s8 = scalar_lea.vmem [#allocation2], %s15769_s5 }
  0x4c   : > { %21029 = dma.done.wait (%p23978_p10), %s184_s6, 262144  }
  0x4d   : > { %21031 = vsyncadd (%p23978_p10), %s184_s6, 4294705152  ;;  %s15770_s9 = sshll.u32 %s183_s26, 2  ;;  %s193_s12 = scalar_lea.sflag [#allocation5], %s183_s26 }
  0x4e   : > { %s21195_s30 = scalar_lea.vmem [#allocation4], %s15770_s9 }
  0x4f   : > { %21033 = dma.done.wait (%p23978_p10), %s193_s12, 64  }
  0x50   : > { %21035 = vsyncadd (%p23978_p10), %s193_s12, 4294967232  ;;  %v17875_v0 = vld [vmem:[%s21189_s8 + $0xe4] ss:$16 sps:$4 sm:$0xff]   ;;  %v17879_v2 = vld [vmem:[%s21189_s8 + $0xe0] ss:$16 sps:$4 sm:$0xff]   ;;  %v2288_v36 = vlaneseq  ;;  %s15771_s6 = sshll.u32 %s15758_s16, 2 }
  0x51   : > { %v17877_v1 = vld [vmem:[%s21189_s8 + $0x2e4] ss:$16 sps:$4 sm:$0xff]   ;;  %13012 = vmatprep.subr.bf16.mxu0 %v17875_v0  ;;  %v17880_v3 = vld [vmem:[%s21189_s8 + $0x2e0] ss:$16 sps:$4 sm:$0xff]   ;;  %v21057_v37 = vmov 1966171168  }
  0x52   : > { %13053 = vmatprep.subr.bf16.mxu1 %v17877_v1  ;;  %v17881_v4 = vld [vmem:[%s21189_s8 + $0xc4] ss:$16 sps:$4 sm:$0xff]   ;;  %13013 = vmatpush1.bf16.msra.mxu0 %v17879_v2  ;;  %v17885_v6 = vld [vmem:[%s21189_s8 + $0xc0] ss:$16 sps:$4 sm:$0xff]   ;;  %v2318_v38 = vunpack.c.l.s4 %v21057_v37  ;;  %v21240_v42 = vshrl.u32 %v2288_v36, 7  ;;  %p226_p7 = scmp.lt.s32.totalorder %s15771_s6, 7 }
  0x53   : > { %13054 = vmatpush1.bf16.msra.mxu1 %v17880_v3  ;;  %v17883_v5 = vld [vmem:[%s21189_s8 + $0x2c4] ss:$16 sps:$4 sm:$0xff]   ;;  %13014 = vmatprep.subr.bf16.mxu0 %v17881_v4  ;;  %v17886_v7 = vld [vmem:[%s21189_s8 + $0x2c0] ss:$16 sps:$4 sm:$0xff]  }
  0x54   : > { %13055 = vmatprep.subr.bf16.mxu1 %v17883_v5  ;;  %v17887_v8 = vld [vmem:[%s21189_s8 + $0xa4] ss:$16 sps:$4 sm:$0xff]   ;;  %v17891_v10 = vld [vmem:[%s21189_s8 + $0xa0] ss:$16 sps:$4 sm:$0xff]   ;;  %v2319_v43 = vunpack.c.0.s8 %v2318_v38  ;;  %s24026_s6 = smov (!%p226_p7, %s15771_s6), 7 }
  0x55   : > { %v17889_v9 = vld [vmem:[%s21189_s8 + $0x2a4] ss:$16 sps:$4 sm:$0xff]   ;;  %v17892_v11 = vld [vmem:[%s21189_s8 + $0x2a0] ss:$16 sps:$4 sm:$0xff]  }
  0x56   : > { %13015 = vmatpush1.bf16.msra.mxu0 %v17885_v6  ;;  %v17893_v12 = vld [vmem:[%s21189_s8 + $0x84] ss:$16 sps:$4 sm:$0xff]   ;;  %v17897_v14 = vld [vmem:[%s21189_s8 + $0x80] ss:$16 sps:$4 sm:$0xff]   ;;  %v21248_v49 = vsub.s32 %v2319_v43, %v21240_v42 }
  0x57   : > { %13056 = vmatpush1.bf16.msra.mxu1 %v17886_v7  ;;  %13016 = vmatprep.subr.bf16.mxu0 %v17887_v8  ;;  %v17895_v13 = vld [vmem:[%s21189_s8 + $0x284] ss:$16 sps:$4 sm:$0xff]   ;;  %v17898_v15 = vld [vmem:[%s21189_s8 + $0x280] ss:$16 sps:$4 sm:$0xff]  }
  0x58   : > { %13057 = vmatprep.subr.bf16.mxu1 %v17889_v9  ;;  %v17899_v16 = vld [vmem:[%s21189_s8 + $0x64] ss:$16 sps:$4 sm:$0xff]   ;;  %v17903_v18 = vld [vmem:[%s21189_s8 + $0x60] ss:$16 sps:$4 sm:$0xff]   ;;  %23979 = vst [vmem:[#allocation8_spill] sm:$0xff] %v21248_v49 }
  0x59   : > { %v17901_v17 = vld [vmem:[%s21189_s8 + $0x264] ss:$16 sps:$4 sm:$0xff]   ;;  %v17904_v19 = vld [vmem:[%s21189_s8 + $0x260] ss:$16 sps:$4 sm:$0xff]  }
  0x5a   : > { %13017 = vmatpush1.bf16.msra.mxu0 %v17891_v10  ;;  %v17905_v20 = vld [vmem:[%s21189_s8 + $0x44] ss:$16 sps:$4 sm:$0xff]   ;;  %v17909_v22 = vld [vmem:[%s21189_s8 + $0x40] ss:$16 sps:$4 sm:$0xff]  }
  0x5b   : > { %13058 = vmatpush1.bf16.msra.mxu1 %v17892_v11  ;;  %13018 = vmatprep.subr.bf16.mxu0 %v17893_v12  ;;  %v17907_v21 = vld [vmem:[%s21189_s8 + $0x244] ss:$16 sps:$4 sm:$0xff]   ;;  %v17910_v23 = vld [vmem:[%s21189_s8 + $0x240] ss:$16 sps:$4 sm:$0xff]  }
  0x5c   : > { %13059 = vmatprep.subr.bf16.mxu1 %v17895_v13  ;;  %v17911_v24 = vld [vmem:[%s21189_s8 + $0x24] ss:$16 sps:$4 sm:$0xff]   ;;  %v17915_v26 = vld [vmem:[%s21189_s8 + $0x20] ss:$16 sps:$4 sm:$0xff]  }
  0x5d   : > { %v17913_v25 = vld [vmem:[%s21189_s8 + $0x224] ss:$16 sps:$4 sm:$0xff]   ;;  %v17916_v27 = vld [vmem:[%s21189_s8 + $0x220] ss:$16 sps:$4 sm:$0xff]  }
  0x5e   : > { %13019 = vmatpush1.bf16.msra.mxu0 %v17897_v14  ;;  %v17917_v28 = vld [vmem:[%s21189_s8 + $0x4] ss:$16 sps:$4 sm:$0xff]   ;;  %v17921_v30 = vld [vmem:[%s21189_s8] ss:$16 sps:$4 sm:$0xff]  }
  0x5f   : > { %13060 = vmatpush1.bf16.msra.mxu1 %v17898_v15  ;;  %13020 = vmatprep.subr.bf16.mxu0 %v17899_v16  ;;  %v17919_v29 = vld [vmem:[%s21189_s8 + $0x204] ss:$16 sps:$4 sm:$0xff]   ;;  %v17922_v31 = vld [vmem:[%s21189_s8 + $0x200] ss:$16 sps:$4 sm:$0xff]  }
  0x60   : > { %13061 = vmatprep.subr.bf16.mxu1 %v17901_v17  ;;  %v17923_v32 = vld [vmem:[%s21189_s8 + $0x1e4] ss:$16 sps:$4 sm:$0xff]   ;;  %v17927_v34 = vld [vmem:[%s21189_s8 + $0x1e0] ss:$16 sps:$4 sm:$0xff]  }
  0x61   : > { %v17925_v33 = vld [vmem:[%s21189_s8 + $0x3e4] ss:$16 sps:$4 sm:$0xff]   ;;  %v17928_v35 = vld [vmem:[%s21189_s8 + $0x3e0] ss:$16 sps:$4 sm:$0xff]  }
  0x62   : > { %13021 = vmatpush1.bf16.msra.mxu0 %v17903_v18  ;;  %v17929_v39 = vld [vmem:[%s21189_s8 + $0x1c4] ss:$16 sps:$4 sm:$0xff]   ;;  %v17933_v41 = vld [vmem:[%s21189_s8 + $0x1c0] ss:$16 sps:$4 sm:$0xff]  }
  0x63   : > { %13062 = vmatpush1.bf16.msra.mxu1 %v17904_v19  ;;  %13022 = vmatprep.subr.bf16.mxu0 %v17905_v20  ;;  %v17931_v40 = vld [vmem:[%s21189_s8 + $0x3c4] ss:$16 sps:$4 sm:$0xff]   ;;  %v17934_v44 = vld [vmem:[%s21189_s8 + $0x3c0] ss:$16 sps:$4 sm:$0xff]  }
  0x64   : > { %13063 = vmatprep.subr.bf16.mxu1 %v17907_v21  ;;  %v17935_v45 = vld [vmem:[%s21189_s8 + $0x1a4] ss:$16 sps:$4 sm:$0xff]   ;;  %v17939_v47 = vld [vmem:[%s21189_s8 + $0x1a0] ss:$16 sps:$4 sm:$0xff]  }
  0x65   : > { %v17937_v46 = vld [vmem:[%s21189_s8 + $0x3a4] ss:$16 sps:$4 sm:$0xff]   ;;  %v17940_v48 = vld [vmem:[%s21189_s8 + $0x3a0] ss:$16 sps:$4 sm:$0xff]  }
  0x66   : > { %13023 = vmatpush1.bf16.msra.mxu0 %v17909_v22  ;;  %v17941_v50 = vld [vmem:[%s21189_s8 + $0x184] ss:$16 sps:$4 sm:$0xff]   ;;  %v17945_v53 = vld [vmem:[%s21189_s8 + $0x180] ss:$16 sps:$4 sm:$0xff]  }
  0x67   : > { %13064 = vmatpush1.bf16.msra.mxu1 %v17910_v23  ;;  %13024 = vmatprep.subr.bf16.mxu0 %v17911_v24  ;;  %v17943_v51 = vld [vmem:[%s21189_s8 + $0x384] ss:$16 sps:$4 sm:$0xff]   ;;  %v17946_v55 = vld [vmem:[%s21189_s8 + $0x380] ss:$16 sps:$4 sm:$0xff]  }
  0x68   : > { %13065 = vmatprep.subr.bf16.mxu1 %v17913_v25  ;;  %v230_v52 = vld [vmem:[%s23947_s0] sm:$0xff] }
  0x69   : > { %v2323_v54 = vrot.slane %v230_v52, %v21248_v49  ;;  %v17947_v56 = vld [vmem:[%s21189_s8 + $0x164] ss:$16 sps:$4 sm:$0xff]   ;;  %v17951_v59 = vld [vmem:[%s21189_s8 + $0x160] ss:$16 sps:$4 sm:$0xff]   ;;  %v2316_v1 = vcombine.high %v230_v52, %v230_v52 }
  0x6a   : > { %13025 = vmatpush1.bf16.msra.mxu0 %v17915_v26  ;;  %v17949_v57 = vld [vmem:[%s21189_s8 + $0x364] ss:$16 sps:$4 sm:$0xff]   ;;  %v17952_v61 = vld [vmem:[%s21189_s8 + $0x360] ss:$16 sps:$4 sm:$0xff]  }
  0x6b   : > { %13066 = vmatpush1.bf16.msra.mxu1 %v17916_v27  ;;  %13026 = vmatprep.subr.bf16.mxu0 %v17917_v28  ;;  %v2331_v58 = vcombine.high %v2323_v54, %v2323_v54  ;;  %v17953_v62 = vld [vmem:[%s21189_s8 + $0x144] ss:$16 sps:$4 sm:$0xff]   ;;  %v17957_v2 = vld [vmem:[%s21189_s8 + $0x140] ss:$16 sps:$4 sm:$0xff]   ;;  %v21278_v6 = vrot.slane %v2316_v1, %v21248_v49  ;;  %v21288_v13 = vrot.slane %v2323_v54, %v21248_v49 }
  0x6c   : > { %13067 = vmatprep.subr.bf16.mxu1 %v17919_v29  ;;  %v17955_v63 = vld [vmem:[%s21189_s8 + $0x344] ss:$16 sps:$4 sm:$0xff]   ;;  %v17958_v3 = vld [vmem:[%s21189_s8 + $0x340] ss:$16 sps:$4 sm:$0xff]  }
  0x6d   : > { %v21262_v60 = vrot.slane %v2331_v58, %v21248_v49  ;;  %v17959_v4 = vld [vmem:[%s21189_s8 + $0x124] ss:$16 sps:$4 sm:$0xff]   ;;  %v17963_v7 = vld [vmem:[%s21189_s8 + $0x120] ss:$16 sps:$4 sm:$0xff]   ;;  %v2332_v11 = vcombine.high %v21278_v6, %v21278_v6  ;;  %v21298_v18 = vcombine.high %v21288_v13, %v21288_v13 }
  0x6e   : > { %13027 = vmatpush1.bf16.msra.mxu0 %v17921_v30  ;;  %v17961_v5 = vld [vmem:[%s21189_s8 + $0x324] ss:$16 sps:$4 sm:$0xff]   ;;  %v17964_v8 = vld [vmem:[%s21189_s8 + $0x320] ss:$16 sps:$4 sm:$0xff]  }
  0x6f   : > { %13068 = vmatpush1.bf16.msra.mxu1 %v17922_v31  ;;  %13028 = vmatprep.subr.bf16.mxu0 %v17923_v32  ;;  %v21269_v0 = vcombine.high %v21262_v60, %v21262_v60  ;;  %v17965_v9 = vld [vmem:[%s21189_s8 + $0x104] ss:$16 sps:$4 sm:$0xff]   ;;  %v17969_v12 = vld [vmem:[%s21189_s8 + $0x100] ss:$16 sps:$4 sm:$0xff]   ;;  %v21294_v17 = vrot.slane %v2332_v11, %v21248_v49 }
  0x70   : > { %13069 = vmatprep.subr.bf16.mxu1 %v17925_v33  ;;  %13044 = vmatprep.mubr.bf16.mxu0 %v21262_v60  ;;  %v17967_v10 = vld [vmem:[%s21189_s8 + $0x304] ss:$16 sps:$4 sm:$0xff]   ;;  %v17970_v14 = vld [vmem:[%s21189_s8 + $0x300] ss:$16 sps:$4 sm:$0xff]  }
  0x71   : > { %13085 = vmatprep.mubr.bf16.mxu1 %v21269_v0  ;;  %v17973_v15 = vld [vmem:[%s21189_s8 + $0x4e4] ss:$16 sps:$4 sm:$0xff]   ;;  %v17971_v19 = vld [vmem:[%s21189_s8 + $0x4e0] ss:$16 sps:$4 sm:$0xff]   ;;  %v21306_v23 = vcombine.high %v21294_v17, %v21294_v17 }
  0x72   : > { %13029 = vmatpush2.bf16.msra.mxu0 %v17927_v34  ;;  %v17976_v16 = vld [vmem:[%s21189_s8 + $0x6e4] ss:$16 sps:$4 sm:$0xff]   ;;  %v17974_v20 = vld [vmem:[%s21189_s8 + $0x6e0] ss:$16 sps:$4 sm:$0xff]  }
  0x73   : > { %13070 = vmatpush2.bf16.msra.mxu1 %v17928_v35  ;;  %13030 = vmatprep.subr.bf16.mxu0 %v17929_v39  ;;  %v17979_v21 = vld [vmem:[%s21189_s8 + $0x4c4] ss:$16 sps:$4 sm:$0xff]   ;;  %v17977_v24 = vld [vmem:[%s21189_s8 + $0x4c0] ss:$16 sps:$4 sm:$0xff]  }
  0x74   : > { %13071 = vmatprep.subr.bf16.mxu1 %v17931_v40  ;;  %v17982_v22 = vld [vmem:[%s21189_s8 + $0x6c4] ss:$16 sps:$4 sm:$0xff]   ;;  %v17980_v25 = vld [vmem:[%s21189_s8 + $0x6c0] ss:$16 sps:$4 sm:$0xff]  }
  0x75   : > { %v17985_v26 = vld [vmem:[%s21189_s8 + $0x4a4] ss:$16 sps:$4 sm:$0xff]   ;;  %v17983_v28 = vld [vmem:[%s21189_s8 + $0x4a0] ss:$16 sps:$4 sm:$0xff]  }
  0x76   : > { %13031 = vmatpush2.bf16.msra.mxu0 %v17933_v41  ;;  %v17988_v27 = vld [vmem:[%s21189_s8 + $0x6a4] ss:$16 sps:$4 sm:$0xff]   ;;  %v17986_v29 = vld [vmem:[%s21189_s8 + $0x6a0] ss:$16 sps:$4 sm:$0xff]  }
  0x77   : > { %13072 = vmatpush2.bf16.msra.mxu1 %v17934_v44  ;;  %13032 = vmatprep.subr.bf16.mxu0 %v17935_v45  ;;  %v17991_v30 = vld [vmem:[%s21189_s8 + $0x484] ss:$16 sps:$4 sm:$0xff]   ;;  %v17989_v32 = vld [vmem:[%s21189_s8 + $0x480] ss:$16 sps:$4 sm:$0xff]  }
  0x78   : > { %13073 = vmatprep.subr.bf16.mxu1 %v17937_v46  ;;  %v17994_v31 = vld [vmem:[%s21189_s8 + $0x684] ss:$16 sps:$4 sm:$0xff]   ;;  %v17992_v33 = vld [vmem:[%s21189_s8 + $0x680] ss:$16 sps:$4 sm:$0xff]  }
  0x79   : > { %v17997_v34 = vld [vmem:[%s21189_s8 + $0x464] ss:$16 sps:$4 sm:$0xff]   ;;  %v17995_v36 = vld [vmem:[%s21189_s8 + $0x460] ss:$16 sps:$4 sm:$0xff]  }
  0x7a   : > { %13033 = vmatpush2.bf16.msra.mxu0 %v17939_v47  ;;  %v18000_v35 = vld [vmem:[%s21189_s8 + $0x664] ss:$16 sps:$4 sm:$0xff]   ;;  %v17998_v37 = vld [vmem:[%s21189_s8 + $0x660] ss:$16 sps:$4 sm:$0xff]  }
  0x7b   : > { %13074 = vmatpush2.bf16.msra.mxu1 %v17940_v48  ;;  %13034 = vmatprep.subr.bf16.mxu0 %v17941_v50  ;;  %v18003_v38 = vld [vmem:[%s21189_s8 + $0x444] ss:$16 sps:$4 sm:$0xff]   ;;  %v18001_v40 = vld [vmem:[%s21189_s8 + $0x440] ss:$16 sps:$4 sm:$0xff]  }
  0x7c   : > { %13075 = vmatprep.subr.bf16.mxu1 %v17943_v51  ;;  %v18006_v39 = vld [vmem:[%s21189_s8 + $0x644] ss:$16 sps:$4 sm:$0xff]   ;;  %v18004_v41 = vld [vmem:[%s21189_s8 + $0x640] ss:$16 sps:$4 sm:$0xff]  }
  0x7d   : > { %v18009_v43 = vld [vmem:[%s21189_s8 + $0x424] ss:$16 sps:$4 sm:$0xff]   ;;  %v18007_v45 = vld [vmem:[%s21189_s8 + $0x420] ss:$16 sps:$4 sm:$0xff]  }
  0x7e   : > { %13035 = vmatpush2.bf16.msra.mxu0 %v17945_v53  ;;  %v18012_v44 = vld [vmem:[%s21189_s8 + $0x624] ss:$16 sps:$4 sm:$0xff]   ;;  %v18010_v46 = vld [vmem:[%s21189_s8 + $0x620] ss:$16 sps:$4 sm:$0xff]  }
  0x7f   : > { %13076 = vmatpush2.bf16.msra.mxu1 %v17946_v55  ;;  %13036 = vmatprep.subr.bf16.mxu0 %v17947_v56  ;;  %v18015_v47 = vld [vmem:[%s21189_s8 + $0x404] ss:$16 sps:$4 sm:$0xff]   ;;  %v18013_v50 = vld [vmem:[%s21189_s8 + $0x400] ss:$16 sps:$4 sm:$0xff]  }
  0x80   : > { %13077 = vmatprep.subr.bf16.mxu1 %v17949_v57  ;;  %v18018_v48 = vld [vmem:[%s21189_s8 + $0x604] ss:$16 sps:$4 sm:$0xff]   ;;  %v18016_v51 = vld [vmem:[%s21189_s8 + $0x600] ss:$16 sps:$4 sm:$0xff]  }
  0x81   : > { %v18021_v52 = vld [vmem:[%s21189_s8 + $0x5e4] ss:$16 sps:$4 sm:$0xff]   ;;  %v18019_v54 = vld [vmem:[%s21189_s8 + $0x5e0] ss:$16 sps:$4 sm:$0xff]  }
  0x82   : > { %13037 = vmatpush2.bf16.msra.mxu0 %v17951_v59  ;;  %v18024_v53 = vld [vmem:[%s21189_s8 + $0x7e4] ss:$16 sps:$4 sm:$0xff]   ;;  %v18022_v55 = vld [vmem:[%s21189_s8 + $0x7e0] ss:$16 sps:$4 sm:$0xff]  }
  0x83   : > { %13078 = vmatpush2.bf16.msra.mxu1 %v17952_v61  ;;  %13038 = vmatprep.subr.bf16.mxu0 %v17953_v62  ;;  %v18027_v56 = vld [vmem:[%s21189_s8 + $0x5c4] ss:$16 sps:$4 sm:$0xff]   ;;  %v18025_v58 = vld [vmem:[%s21189_s8 + $0x5c0] ss:$16 sps:$4 sm:$0xff]  }
  0x84   : > { %13079 = vmatprep.subr.bf16.mxu1 %v17955_v63  ;;  %v18030_v57 = vld [vmem:[%s21189_s8 + $0x7c4] ss:$16 sps:$4 sm:$0xff]   ;;  %v18028_v59 = vld [vmem:[%s21189_s8 + $0x7c0] ss:$16 sps:$4 sm:$0xff]  }
  0x85   : > { %v18033_v61 = vld [vmem:[%s21189_s8 + $0x5a4] ss:$16 sps:$4 sm:$0xff]   ;;  %v18031_v63 = vld [vmem:[%s21189_s8 + $0x5a0] ss:$16 sps:$4 sm:$0xff]  }
  0x86   : > { %13039 = vmatpush2.bf16.msra.mxu0 %v17957_v2  ;;  %v18036_v62 = vld [vmem:[%s21189_s8 + $0x7a4] ss:$16 sps:$4 sm:$0xff]   ;;  %v18034_v1 = vld [vmem:[%s21189_s8 + $0x7a0] ss:$16 sps:$4 sm:$0xff]  }
  0x87   : > { %13080 = vmatpush2.bf16.msra.mxu1 %v17958_v3  ;;  %13040 = vmatprep.subr.bf16.mxu0 %v17959_v4  ;;  %v18039_v2 = vld [vmem:[%s21189_s8 + $0x584] ss:$16 sps:$4 sm:$0xff]   ;;  %v18037_v4 = vld [vmem:[%s21189_s8 + $0x580] ss:$16 sps:$4 sm:$0xff]  }
  0x88   : > { %13081 = vmatprep.subr.bf16.mxu1 %v17961_v5  ;;  %v18042_v3 = vld [vmem:[%s21189_s8 + $0x784] ss:$16 sps:$4 sm:$0xff]   ;;  %v18040_v5 = vld [vmem:[%s21189_s8 + $0x780] ss:$16 sps:$4 sm:$0xff]  }
  0x89   : > { %v18051_v11 = vld [vmem:[%s21189_s8 + $0x544] ss:$16 sps:$4 sm:$0xff]  }
  0x8a   : > { %13041 = vmatpush2.bf16.msra.mxu0 %v17963_v7  ;;  %v18045_v7 = vld [vmem:[%s21189_s8 + $0x564] ss:$16 sps:$4 sm:$0xff]  }
  0x8b   : > { %13082 = vmatpush2.bf16.msra.mxu1 %v17964_v8  ;;  %13042 = vmatprep.subr.bf16.mxu0 %v17965_v9  ;;  %v18048_v8 = vld [vmem:[%s21189_s8 + $0x764] ss:$16 sps:$4 sm:$0xff]   ;;  %v18043_v9 = vld [vmem:[%s21189_s8 + $0x560] ss:$16 sps:$4 sm:$0xff]  }
  0x8c   : > { %13083 = vmatprep.subr.bf16.mxu1 %v17967_v10  ;;  %v18046_v10 = vld [vmem:[%s21189_s8 + $0x760] ss:$16 sps:$4 sm:$0xff]  }
  0x8e   : > { %13043 = vmatpush2.bf16.msra.mxu0 %v17969_v12  ;;  %v18054_v12 = vld [vmem:[%s21189_s8 + $0x744] ss:$16 sps:$4 sm:$0xff]  }
  0x8f   : > { %13084 = vmatpush2.bf16.msra.mxu1 %v17970_v14  ;;  %13094 = vmatprep.subr.bf16.mxu0 %v17973_v15  ;;  %v18049_v14 = vld [vmem:[%s21189_s8 + $0x540] ss:$16 sps:$4 sm:$0xff]  }
  0x90   : > { %13135 = vmatprep.subr.bf16.mxu1 %v17976_v16  ;;  %v18052_v15 = vld [vmem:[%s21189_s8 + $0x740] ss:$16 sps:$4 sm:$0xff]   ;;  %v18057_v16 = vld [vmem:[%s21189_s8 + $0x524] ss:$16 sps:$4 sm:$0xff]  }
  0x91   : > { %13045 = vmatmul.mubr.bf16.vlgmr.msra.gmra.mxu0 %v21288_v13 }
  0x92   : > { %13086 = vmatmul.mubr.bf16.vlgmr.msra.gmra.mxu1 %v21298_v18  ;;  %13095 = vmatpush1.bf16.msra.mxu0 %v17971_v19  ;;  %v18060_v19 = vld [vmem:[%s21189_s8 + $0x724] ss:$16 sps:$4 sm:$0xff]  }
  0x93   : > { %13136 = vmatpush1.bf16.msra.mxu1 %v17974_v20  ;;  %13096 = vmatprep.subr.bf16.mxu0 %v17979_v21  ;;  %v18055_v20 = vld [vmem:[%s21189_s8 + $0x520] ss:$16 sps:$4 sm:$0xff]  }
  0x94   : > { %13137 = vmatprep.subr.bf16.mxu1 %v17982_v22  ;;  %13126 = vmatprep.mubr.bf16.mxu0 %v21294_v17  ;;  %v18058_v21 = vld [vmem:[%s21189_s8 + $0x720] ss:$16 sps:$4 sm:$0xff]   ;;  %v18063_v22 = vld [vmem:[%s21189_s8 + $0x504] ss:$16 sps:$4 sm:$0xff]  }
  0x95   : > { %13167 = vmatprep.mubr.bf16.mxu1 %v21306_v23 }
  0x96   : > { %13097 = vmatpush1.bf16.msra.mxu0 %v17977_v24  ;;  %v18066_v24 = vld [vmem:[%s21189_s8 + $0x704] ss:$16 sps:$4 sm:$0xff]  }
  0x97   : > { %13138 = vmatpush1.bf16.msra.mxu1 %v17980_v25  ;;  %13098 = vmatprep.subr.bf16.mxu0 %v17985_v26  ;;  %v18061_v25 = vld [vmem:[%s21189_s8 + $0x500] ss:$16 sps:$4 sm:$0xff]   ;;  %v21371_v26 = vrot.slane %v21278_v6, %v21248_v49 }
  0x98   : > { %13139 = vmatprep.subr.bf16.mxu1 %v17988_v27  ;;  %v18064_v27 = vld [vmem:[%s21189_s8 + $0x700] ss:$16 sps:$4 sm:$0xff]  }
  0x99   : > { %v18071_v6 = vld [vmem:[%s21189_s8 + $0xae0] ss:$16 sps:$4 sm:$0xff]  }
  0x9a   : > { %13099 = vmatpush1.bf16.msra.mxu0 %v17983_v28  ;;  %v18070_v28 = vld [vmem:[%s21189_s8 + $0x8e4] ss:$16 sps:$4 sm:$0xff]  }
  0x9b   : > { %13140 = vmatpush1.bf16.msra.mxu1 %v17986_v29  ;;  %13100 = vmatprep.subr.bf16.mxu0 %v17991_v30  ;;  %v18073_v29 = vld [vmem:[%s21189_s8 + $0xae4] ss:$16 sps:$4 sm:$0xff]   ;;  %v21378_v30 = vcombine.high %v21371_v26, %v21371_v26 }
  0x9c   : > { %13141 = vmatprep.subr.bf16.mxu1 %v17994_v31  ;;  %v18068_v31 = vld [vmem:[%s21189_s8 + $0x8e0] ss:$16 sps:$4 sm:$0xff]  }
  0x9e   : > { %13101 = vmatpush1.bf16.msra.mxu0 %v17989_v32  ;;  %v21385_v32 = vld [vmem:[%s23947_s0 + $0x8] sm:$0xff] }
  0x9f   : > { %13142 = vmatpush1.bf16.msra.mxu1 %v17992_v33  ;;  %13102 = vmatprep.subr.bf16.mxu0 %v17997_v34  ;;  %v18076_v33 = vld [vmem:[%s21189_s8 + $0x8c4] ss:$16 sps:$4 sm:$0xff]  }
  0xa0   : > { %13143 = vmatprep.subr.bf16.mxu1 %v18000_v35  ;;  %v18079_v34 = vld [vmem:[%s21189_s8 + $0xac4] ss:$16 sps:$4 sm:$0xff]   ;;  %v21391_v35 = vrot.slane %v21385_v32, %v21248_v49 }
  0xa2   : > { %13103 = vmatpush1.bf16.msra.mxu0 %v17995_v36  ;;  %v2380_v36 = vcombine.high %v21391_v35, %v21391_v35 }
  0xa3   : > { %13144 = vmatpush1.bf16.msra.mxu1 %v17998_v37  ;;  %13104 = vmatprep.subr.bf16.mxu0 %v18003_v38  ;;  %v18074_v37 = vld [vmem:[%s21189_s8 + $0x8c0] ss:$16 sps:$4 sm:$0xff]  }
  0xa4   : > { %13145 = vmatprep.subr.bf16.mxu1 %v18006_v39  ;;  %v18077_v38 = vld [vmem:[%s21189_s8 + $0xac0] ss:$16 sps:$4 sm:$0xff]   ;;  %v18082_v39 = vld [vmem:[%s21189_s8 + $0x8a4] ss:$16 sps:$4 sm:$0xff]  }
  0xa6   : > { %13105 = vmatpush1.bf16.msra.mxu0 %v18001_v40  ;;  %v18085_v40 = vld [vmem:[%s21189_s8 + $0xaa4] ss:$16 sps:$4 sm:$0xff]  }
  0xa7   : > { %13146 = vmatpush1.bf16.msra.mxu1 %v18004_v41  ;;  %13106 = vmatprep.subr.bf16.mxu0 %v18009_v43  ;;  %v21402_v41 = vrot.slane %v2380_v36, %v21248_v49  ;;  %v18146_v36 = vld [vmem:[%s21189_s8 + $0x940] ss:$16 sps:$4 sm:$0xff]  }
  0xa8   : > { %13147 = vmatprep.subr.bf16.mxu1 %v18012_v44  ;;  %v18080_v44 = vld [vmem:[%s21189_s8 + $0x8a0] ss:$16 sps:$4 sm:$0xff]  }
  0xa9   : > { %v21407_v43 = vcombine.high %v21402_v41, %v21402_v41 }
  0xaa   : > { %13107 = vmatpush1.bf16.msra.mxu0 %v18007_v45  ;;  %v18083_v45 = vld [vmem:[%s21189_s8 + $0xaa0] ss:$16 sps:$4 sm:$0xff]  }
  0xab   : > { %13148 = vmatpush1.bf16.msra.mxu1 %v18010_v46  ;;  %13108 = vmatprep.subr.bf16.mxu0 %v18015_v47  ;;  %v18088_v46 = vld [vmem:[%s21189_s8 + $0x884] ss:$16 sps:$4 sm:$0xff]  }
  0xac   : > { %13149 = vmatprep.subr.bf16.mxu1 %v18018_v48  ;;  %v18091_v47 = vld [vmem:[%s21189_s8 + $0xa84] ss:$16 sps:$4 sm:$0xff]   ;;  %v18086_v48 = vld [vmem:[%s21189_s8 + $0x880] ss:$16 sps:$4 sm:$0xff]  }
  0xae   : > { %13109 = vmatpush1.bf16.msra.mxu0 %v18013_v50  ;;  %v18089_v50 = vld [vmem:[%s21189_s8 + $0xa80] ss:$16 sps:$4 sm:$0xff]  }
  0xaf   : > { %13150 = vmatpush1.bf16.msra.mxu1 %v18016_v51  ;;  %13110 = vmatprep.subr.bf16.mxu0 %v18021_v52  ;;  %v18094_v51 = vld [vmem:[%s21189_s8 + $0x864] ss:$16 sps:$4 sm:$0xff]  }
  0xb0   : > { %13151 = vmatprep.subr.bf16.mxu1 %v18024_v53  ;;  %v18097_v52 = vld [vmem:[%s21189_s8 + $0xa64] ss:$16 sps:$4 sm:$0xff]   ;;  %v18092_v53 = vld [vmem:[%s21189_s8 + $0x860] ss:$16 sps:$4 sm:$0xff]  }
  0xb2   : > { %13111 = vmatpush2.bf16.msra.mxu0 %v18019_v54  ;;  %v18095_v54 = vld [vmem:[%s21189_s8 + $0xa60] ss:$16 sps:$4 sm:$0xff]  }
  0xb3   : > { %13152 = vmatpush2.bf16.msra.mxu1 %v18022_v55  ;;  %13112 = vmatprep.subr.bf16.mxu0 %v18027_v56  ;;  %v18100_v55 = vld [vmem:[%s21189_s8 + $0x844] ss:$16 sps:$4 sm:$0xff]  }
  0xb4   : > { %13153 = vmatprep.subr.bf16.mxu1 %v18030_v57  ;;  %v18103_v56 = vld [vmem:[%s21189_s8 + $0xa44] ss:$16 sps:$4 sm:$0xff]   ;;  %v18098_v57 = vld [vmem:[%s21189_s8 + $0x840] ss:$16 sps:$4 sm:$0xff]  }
  0xb6   : > { %13113 = vmatpush2.bf16.msra.mxu0 %v18025_v58  ;;  %v18101_v58 = vld [vmem:[%s21189_s8 + $0xa40] ss:$16 sps:$4 sm:$0xff]  }
  0xb7   : > { %13154 = vmatpush2.bf16.msra.mxu1 %v18028_v59  ;;  %13114 = vmatprep.subr.bf16.mxu0 %v18033_v61  ;;  %v18106_v59 = vld [vmem:[%s21189_s8 + $0x824] ss:$16 sps:$4 sm:$0xff]  }
  0xb8   : > { %13155 = vmatprep.subr.bf16.mxu1 %v18036_v62  ;;  %v18109_v61 = vld [vmem:[%s21189_s8 + $0xa24] ss:$16 sps:$4 sm:$0xff]   ;;  %v18104_v62 = vld [vmem:[%s21189_s8 + $0x820] ss:$16 sps:$4 sm:$0xff]  }
  0xba   : > { %13115 = vmatpush2.bf16.msra.mxu0 %v18031_v63  ;;  %v18107_v63 = vld [vmem:[%s21189_s8 + $0xa20] ss:$16 sps:$4 sm:$0xff]  }
  0xbb   : > { %13156 = vmatpush2.bf16.msra.mxu1 %v18034_v1  ;;  %13116 = vmatprep.subr.bf16.mxu0 %v18039_v2  ;;  %v18112_v1 = vld [vmem:[%s21189_s8 + $0x804] ss:$16 sps:$4 sm:$0xff]  }
  0xbc   : > { %13157 = vmatprep.subr.bf16.mxu1 %v18042_v3  ;;  %v18115_v2 = vld [vmem:[%s21189_s8 + $0xa04] ss:$16 sps:$4 sm:$0xff]   ;;  %v18110_v3 = vld [vmem:[%s21189_s8 + $0x800] ss:$16 sps:$4 sm:$0xff]  }
  0xbe   : > { %13117 = vmatpush2.bf16.msra.mxu0 %v18037_v4  ;;  %v18113_v4 = vld [vmem:[%s21189_s8 + $0xa00] ss:$16 sps:$4 sm:$0xff]  }
  0xbf   : > { %13158 = vmatpush2.bf16.msra.mxu1 %v18040_v5  ;;  %13118 = vmatprep.subr.bf16.mxu0 %v18045_v7  ;;  %v18118_v5 = vld [vmem:[%s21189_s8 + $0x9e4] ss:$16 sps:$4 sm:$0xff]  }
  0xc0   : > { %13159 = vmatprep.subr.bf16.mxu1 %v18048_v8  ;;  %v18121_v7 = vld [vmem:[%s21189_s8 + $0xbe4] ss:$16 sps:$4 sm:$0xff]   ;;  %v18116_v8 = vld [vmem:[%s21189_s8 + $0x9e0] ss:$16 sps:$4 sm:$0xff]  }
  0xc2   : > { %13119 = vmatpush2.bf16.msra.mxu0 %v18043_v9  ;;  %v18119_v9 = vld [vmem:[%s21189_s8 + $0xbe0] ss:$16 sps:$4 sm:$0xff]  }
  0xc3   : > { %13160 = vmatpush2.bf16.msra.mxu1 %v18046_v10  ;;  %13120 = vmatprep.subr.bf16.mxu0 %v18051_v11  ;;  %v18124_v10 = vld [vmem:[%s21189_s8 + $0x9c4] ss:$16 sps:$4 sm:$0xff]  }
  0xc4   : > { %13161 = vmatprep.subr.bf16.mxu1 %v18054_v12  ;;  %v18127_v11 = vld [vmem:[%s21189_s8 + $0xbc4] ss:$16 sps:$4 sm:$0xff]   ;;  %v18122_v12 = vld [vmem:[%s21189_s8 + $0x9c0] ss:$16 sps:$4 sm:$0xff]  }
  0xc6   : > { %13121 = vmatpush2.bf16.msra.mxu0 %v18049_v14  ;;  %v18125_v14 = vld [vmem:[%s21189_s8 + $0xbc0] ss:$16 sps:$4 sm:$0xff]  }
  0xc7   : > { %13162 = vmatpush2.bf16.msra.mxu1 %v18052_v15  ;;  %13122 = vmatprep.subr.bf16.mxu0 %v18057_v16  ;;  %v18130_v15 = vld [vmem:[%s21189_s8 + $0x9a4] ss:$16 sps:$4 sm:$0xff]  }
  0xc8   : > { %13163 = vmatprep.subr.bf16.mxu1 %v18060_v19  ;;  %v18133_v16 = vld [vmem:[%s21189_s8 + $0xba4] ss:$16 sps:$4 sm:$0xff]   ;;  %v18128_v19 = vld [vmem:[%s21189_s8 + $0x9a0] ss:$16 sps:$4 sm:$0xff]  }
  0xca   : > { %13123 = vmatpush2.bf16.msra.mxu0 %v18055_v20  ;;  %v18131_v20 = vld [vmem:[%s21189_s8 + $0xba0] ss:$16 sps:$4 sm:$0xff]  }
  0xcb   : > { %13164 = vmatpush2.bf16.msra.mxu1 %v18058_v21  ;;  %13124 = vmatprep.subr.bf16.mxu0 %v18063_v22  ;;  %v18136_v21 = vld [vmem:[%s21189_s8 + $0x984] ss:$16 sps:$4 sm:$0xff]  }
  0xcc   : > { %13165 = vmatprep.subr.bf16.mxu1 %v18066_v24  ;;  %v18139_v22 = vld [vmem:[%s21189_s8 + $0xb84] ss:$16 sps:$4 sm:$0xff]   ;;  %v18134_v24 = vld [vmem:[%s21189_s8 + $0x980] ss:$16 sps:$4 sm:$0xff]  }
  0xce   : > { %13125 = vmatpush2.bf16.msra.mxu0 %v18061_v25  ;;  %v18137_v25 = vld [vmem:[%s21189_s8 + $0xb80] ss:$16 sps:$4 sm:$0xff]  }
  0xcf   : > { %13166 = vmatpush2.bf16.msra.mxu1 %v18064_v27  ;;  %13176 = vmatprep.subr.bf16.mxu0 %v18070_v28  ;;  %v18142_v27 = vld [vmem:[%s21189_s8 + $0x964] ss:$16 sps:$4 sm:$0xff]  }
  0xd0   : > { %13217 = vmatprep.subr.bf16.mxu1 %v18073_v29  ;;  %v18145_v28 = vld [vmem:[%s21189_s8 + $0xb64] ss:$16 sps:$4 sm:$0xff]   ;;  %v18140_v29 = vld [vmem:[%s21189_s8 + $0x960] ss:$16 sps:$4 sm:$0xff]  }
  0xd1   : > { %13127 = vmatmul.mubr.bf16.vlgmr.msra.gmra.mxu0 %v21371_v26 }
  0xd2   : > { %13168 = vmatmul.mubr.bf16.vlgmr.msra.gmra.mxu1 %v21378_v30  ;;  %13177 = vmatpush1.bf16.msra.mxu0 %v18068_v31  ;;  %v18143_v31 = vld [vmem:[%s21189_s8 + $0xb60] ss:$16 sps:$4 sm:$0xff]  }
  0xd3   : > { %13218 = vmatpush1.bf16.msra.mxu1 %v18071_v6  ;;  %13178 = vmatprep.subr.bf16.mxu0 %v18076_v33  ;;  %v18148_v6 = vld [vmem:[%s21189_s8 + $0x944] ss:$16 sps:$4 sm:$0xff]  }
  0xd4   : > { %13219 = vmatprep.subr.bf16.mxu1 %v18079_v34  ;;  %13208 = vmatprep.mubr.bf16.mxu0 %v21402_v41  ;;  %v18151_v33 = vld [vmem:[%s21189_s8 + $0xb44] ss:$16 sps:$4 sm:$0xff]   ;;  %v2365_v34 = vcombine.high %v21385_v32, %v21385_v32  ;;  %v18155_v32 = vld [vmem:[%s21189_s8 + $0xb20] ss:$16 sps:$4 sm:$0xff]  }
  0xd5   : > { %13249 = vmatprep.mubr.bf16.mxu1 %v21407_v43 }
  0xd6   : > { %13179 = vmatpush1.bf16.msra.mxu0 %v18074_v37  ;;  %v18149_v37 = vld [vmem:[%s21189_s8 + $0xb40] ss:$16 sps:$4 sm:$0xff]  }
  0xd7   : > { %13220 = vmatpush1.bf16.msra.mxu1 %v18077_v38  ;;  %13180 = vmatprep.subr.bf16.mxu0 %v18082_v39  ;;  %v18154_v38 = vld [vmem:[%s21189_s8 + $0x924] ss:$16 sps:$4 sm:$0xff]  }
  0xd8   : > { %13221 = vmatprep.subr.bf16.mxu1 %v18085_v40  ;;  %v18157_v39 = vld [vmem:[%s21189_s8 + $0xb24] ss:$16 sps:$4 sm:$0xff]   ;;  %v21461_v40 = vrot.slane %v2365_v34, %v21248_v49  ;;  %v18215_v34 = vld [vmem:[%s21189_s8 + $0xfe0] ss:$16 sps:$4 sm:$0xff]  }
  0xda   : > { %13181 = vmatpush1.bf16.msra.mxu0 %v18080_v44  ;;  %v18152_v44 = vld [vmem:[%s21189_s8 + $0x920] ss:$16 sps:$4 sm:$0xff]  }
  0xdb   : > { %13222 = vmatpush1.bf16.msra.mxu1 %v18083_v45  ;;  %13182 = vmatprep.subr.bf16.mxu0 %v18088_v46  ;;  %v18160_v45 = vld [vmem:[%s21189_s8 + $0x904] ss:$16 sps:$4 sm:$0xff]  }
  0xdc   : > { %13223 = vmatprep.subr.bf16.mxu1 %v18091_v47  ;;  %v18163_v46 = vld [vmem:[%s21189_s8 + $0xb04] ss:$16 sps:$4 sm:$0xff]   ;;  %v2381_v47 = vcombine.high %v21461_v40, %v21461_v40 }
  0xde   : > { %13183 = vmatpush1.bf16.msra.mxu0 %v18086_v48  ;;  %v18158_v48 = vld [vmem:[%s21189_s8 + $0x900] ss:$16 sps:$4 sm:$0xff]  }
  0xdf   : > { %13224 = vmatpush1.bf16.msra.mxu1 %v18089_v50  ;;  %13184 = vmatprep.subr.bf16.mxu0 %v18094_v51  ;;  %v21472_v50 = vrot.slane %v21391_v35, %v21248_v49  ;;  %v18161_v51 = vld [vmem:[%s21189_s8 + $0xb00] ss:$16 sps:$4 sm:$0xff]  }
  0xe0   : > { %13225 = vmatprep.subr.bf16.mxu1 %v18097_v52  ;;  %v18166_v52 = vld [vmem:[%s21189_s8 + $0xce4] ss:$16 sps:$4 sm:$0xff]   ;;  %v18164_v35 = vld [vmem:[%s21189_s8 + $0xce0] ss:$16 sps:$4 sm:$0xff]  }
  0xe2   : > { %13185 = vmatpush1.bf16.msra.mxu0 %v18092_v53  ;;  %v18169_v53 = vld [vmem:[%s21189_s8 + $0xee4] ss:$16 sps:$4 sm:$0xff]  }
  0xe3   : > { %13226 = vmatpush1.bf16.msra.mxu1 %v18095_v54  ;;  %13186 = vmatprep.subr.bf16.mxu0 %v18100_v55  ;;  %v21478_v54 = vrot.slane %v2381_v47, %v21248_v49  ;;  %v21482_v55 = vcombine.high %v21472_v50, %v21472_v50  ;;  %v18232_v47 = vld [vmem:[%s21189_s8 + $0xd84] ss:$16 sps:$4 sm:$0xff]  }
  0xe4   : > { %13227 = vmatprep.subr.bf16.mxu1 %v18103_v56  ;;  %v18167_v56 = vld [vmem:[%s21189_s8 + $0xee0] ss:$16 sps:$4 sm:$0xff]  }
  0xe6   : > { %13187 = vmatpush1.bf16.msra.mxu0 %v18098_v57  ;;  %v18172_v57 = vld [vmem:[%s21189_s8 + $0xcc4] ss:$16 sps:$4 sm:$0xff]  }
  0xe7   : > { %13228 = vmatpush1.bf16.msra.mxu1 %v18101_v58  ;;  %13188 = vmatprep.subr.bf16.mxu0 %v18106_v59  ;;  %v18175_v58 = vld [vmem:[%s21189_s8 + $0xec4] ss:$16 sps:$4 sm:$0xff]   ;;  %v21490_v59 = vcombine.high %v21478_v54, %v21478_v54 }
  0xe8   : > { %13229 = vmatprep.subr.bf16.mxu1 %v18109_v61  ;;  %v18170_v61 = vld [vmem:[%s21189_s8 + $0xcc0] ss:$16 sps:$4 sm:$0xff]  }
  0xea   : > { %13189 = vmatpush1.bf16.msra.mxu0 %v18104_v62  ;;  %v18173_v62 = vld [vmem:[%s21189_s8 + $0xec0] ss:$16 sps:$4 sm:$0xff]  }
  0xeb   : > { %13230 = vmatpush1.bf16.msra.mxu1 %v18107_v63  ;;  %13190 = vmatprep.subr.bf16.mxu0 %v18112_v1  ;;  %v18178_v63 = vld [vmem:[%s21189_s8 + $0xca4] ss:$16 sps:$4 sm:$0xff]  }
  0xec   : > { %13231 = vmatprep.subr.bf16.mxu1 %v18115_v2  ;;  %v18181_v1 = vld [vmem:[%s21189_s8 + $0xea4] ss:$16 sps:$4 sm:$0xff]   ;;  %v18176_v2 = vld [vmem:[%s21189_s8 + $0xca0] ss:$16 sps:$4 sm:$0xff]  }
  0xee   : > { %13191 = vmatpush1.bf16.msra.mxu0 %v18110_v3  ;;  %v18179_v3 = vld [vmem:[%s21189_s8 + $0xea0] ss:$16 sps:$4 sm:$0xff]  }
  0xef   : > { %13232 = vmatpush1.bf16.msra.mxu1 %v18113_v4  ;;  %13192 = vmatprep.subr.bf16.mxu0 %v18118_v5  ;;  %v18184_v4 = vld [vmem:[%s21189_s8 + $0xc84] ss:$16 sps:$4 sm:$0xff]  }
  0xf0   : > { %13233 = vmatprep.subr.bf16.mxu1 %v18121_v7  ;;  %v18187_v5 = vld [vmem:[%s21189_s8 + $0xe84] ss:$16 sps:$4 sm:$0xff]   ;;  %v18182_v7 = vld [vmem:[%s21189_s8 + $0xc80] ss:$16 sps:$4 sm:$0xff]  }
  0xf2   : > { %13193 = vmatpush2.bf16.msra.mxu0 %v18116_v8  ;;  %v18185_v8 = vld [vmem:[%s21189_s8 + $0xe80] ss:$16 sps:$4 sm:$0xff]  }
  0xf3   : > { %13234 = vmatpush2.bf16.msra.mxu1 %v18119_v9  ;;  %13194 = vmatprep.subr.bf16.mxu0 %v18124_v10  ;;  %v18190_v9 = vld [vmem:[%s21189_s8 + $0xc64] ss:$16 sps:$4 sm:$0xff]  }
  0xf4   : > { %13235 = vmatprep.subr.bf16.mxu1 %v18127_v11  ;;  %v18193_v10 = vld [vmem:[%s21189_s8 + $0xe64] ss:$16 sps:$4 sm:$0xff]   ;;  %v18188_v11 = vld [vmem:[%s21189_s8 + $0xc60] ss:$16 sps:$4 sm:$0xff]  }
  0xf6   : > { %13195 = vmatpush2.bf16.msra.mxu0 %v18122_v12  ;;  %v18191_v12 = vld [vmem:[%s21189_s8 + $0xe60] ss:$16 sps:$4 sm:$0xff]  }
  0xf7   : > { %13236 = vmatpush2.bf16.msra.mxu1 %v18125_v14  ;;  %13196 = vmatprep.subr.bf16.mxu0 %v18130_v15  ;;  %v18196_v14 = vld [vmem:[%s21189_s8 + $0xc44] ss:$16 sps:$4 sm:$0xff]  }
  0xf8   : > { %13237 = vmatprep.subr.bf16.mxu1 %v18133_v16  ;;  %v18199_v15 = vld [vmem:[%s21189_s8 + $0xe44] ss:$16 sps:$4 sm:$0xff]   ;;  %v18194_v16 = vld [vmem:[%s21189_s8 + $0xc40] ss:$16 sps:$4 sm:$0xff]  }
  0xfa   : > { %13197 = vmatpush2.bf16.msra.mxu0 %v18128_v19  ;;  %v18197_v19 = vld [vmem:[%s21189_s8 + $0xe40] ss:$16 sps:$4 sm:$0xff]  }
  0xfb   : > { %13238 = vmatpush2.bf16.msra.mxu1 %v18131_v20  ;;  %13198 = vmatprep.subr.bf16.mxu0 %v18136_v21  ;;  %v18202_v20 = vld [vmem:[%s21189_s8 + $0xc24] ss:$16 sps:$4 sm:$0xff]  }
  0xfc   : > { %13239 = vmatprep.subr.bf16.mxu1 %v18139_v22  ;;  %v18205_v21 = vld [vmem:[%s21189_s8 + $0xe24] ss:$16 sps:$4 sm:$0xff]   ;;  %v18200_v22 = vld [vmem:[%s21189_s8 + $0xc20] ss:$16 sps:$4 sm:$0xff]  }
  0xfe   : > { %13199 = vmatpush2.bf16.msra.mxu0 %v18134_v24  ;;  %v18203_v24 = vld [vmem:[%s21189_s8 + $0xe20] ss:$16 sps:$4 sm:$0xff]  }
  0xff   : > { %13240 = vmatpush2.bf16.msra.mxu1 %v18137_v25  ;;  %13200 = vmatprep.subr.bf16.mxu0 %v18142_v27  ;;  %v18208_v25 = vld [vmem:[%s21189_s8 + $0xc04] ss:$16 sps:$4 sm:$0xff]  }
 0x100   : > { %13241 = vmatprep.subr.bf16.mxu1 %v18145_v28  ;;  %v18211_v27 = vld [vmem:[%s21189_s8 + $0xe04] ss:$16 sps:$4 sm:$0xff]   ;;  %v18206_v28 = vld [vmem:[%s21189_s8 + $0xc00] ss:$16 sps:$4 sm:$0xff]  }
 0x102   : > { %13201 = vmatpush2.bf16.msra.mxu0 %v18140_v29  ;;  %v18209_v29 = vld [vmem:[%s21189_s8 + $0xe00] ss:$16 sps:$4 sm:$0xff]  }
 0x103   : > { %13242 = vmatpush2.bf16.msra.mxu1 %v18143_v31  ;;  %13202 = vmatprep.subr.bf16.mxu0 %v18148_v6  ;;  %v18214_v31 = vld [vmem:[%s21189_s8 + $0xde4] ss:$16 sps:$4 sm:$0xff]  }
 0x104   : > { %13243 = vmatprep.subr.bf16.mxu1 %v18151_v33  ;;  %v18217_v6 = vld [vmem:[%s21189_s8 + $0xfe4] ss:$16 sps:$4 sm:$0xff]   ;;  %v18212_v33 = vld [vmem:[%s21189_s8 + $0xde0] ss:$16 sps:$4 sm:$0xff]  }
 0x106   : > { %13203 = vmatpush2.bf16.msra.mxu0 %v18146_v36  ;;  %v18220_v36 = vld [vmem:[%s21189_s8 + $0xdc4] ss:$16 sps:$4 sm:$0xff]  }
 0x107   : > { %13244 = vmatpush2.bf16.msra.mxu1 %v18149_v37  ;;  %13204 = vmatprep.subr.bf16.mxu0 %v18154_v38  ;;  %v18223_v37 = vld [vmem:[%s21189_s8 + $0xfc4] ss:$16 sps:$4 sm:$0xff]   ;;  %v18218_v38 = vld [vmem:[%s21189_s8 + $0xdc0] ss:$16 sps:$4 sm:$0xff]  }
 0x108   : > { %13245 = vmatprep.subr.bf16.mxu1 %v18157_v39  ;;  %v18221_v39 = vld [vmem:[%s21189_s8 + $0xfc0] ss:$16 sps:$4 sm:$0xff]  }
 0x10a   : > { %13205 = vmatpush2.bf16.msra.mxu0 %v18152_v44  ;;  %v18226_v44 = vld [vmem:[%s21189_s8 + $0xda4] ss:$16 sps:$4 sm:$0xff]  }
 0x10b   : > { %13246 = vmatpush2.bf16.msra.mxu1 %v18155_v32  ;;  %13206 = vmatprep.subr.bf16.mxu0 %v18160_v45  ;;  %v18229_v32 = vld [vmem:[%s21189_s8 + $0xfa4] ss:$16 sps:$4 sm:$0xff]   ;;  %v18224_v45 = vld [vmem:[%s21189_s8 + $0xda0] ss:$16 sps:$4 sm:$0xff]  }
 0x10c   : > { %13247 = vmatprep.subr.bf16.mxu1 %v18163_v46  ;;  %v18227_v46 = vld [vmem:[%s21189_s8 + $0xfa0] ss:$16 sps:$4 sm:$0xff]  }
 0x10e   : > { %13207 = vmatpush2.bf16.msra.mxu0 %v18158_v48  ;;  %v18235_v48 = vld [vmem:[%s21189_s8 + $0xf84] ss:$16 sps:$4 sm:$0xff]  }
 0x10f   : > { %13248 = vmatpush2.bf16.msra.mxu1 %v18161_v51  ;;  %13258 = vmatprep.subr.bf16.mxu0 %v18166_v52  ;;  %v18230_v51 = vld [vmem:[%s21189_s8 + $0xd80] ss:$16 sps:$4 sm:$0xff]  }
 0x110   : > { %13299 = vmatprep.subr.bf16.mxu1 %v18169_v53  ;;  %v18233_v52 = vld [vmem:[%s21189_s8 + $0xf80] ss:$16 sps:$4 sm:$0xff]   ;;  %v18238_v53 = vld [vmem:[%s21189_s8 + $0xd64] ss:$16 sps:$4 sm:$0xff]  }
 0x111   : > { %13209 = vmatmul.mubr.bf16.vlgmr.msra.gmra.mxu0 %v21472_v50 }
 0x112   : > { %13250 = vmatmul.mubr.bf16.vlgmr.msra.gmra.mxu1 %v21482_v55  ;;  %13259 = vmatpush1.bf16.msra.mxu0 %v18164_v35  ;;  %v18241_v35 = vld [vmem:[%s21189_s8 + $0xf64] ss:$16 sps:$4 sm:$0xff]  }
 0x113   : > { %13300 = vmatpush1.bf16.msra.mxu1 %v18167_v56  ;;  %13260 = vmatprep.subr.bf16.mxu0 %v18172_v57  ;;  %v18236_v56 = vld [vmem:[%s21189_s8 + $0xd60] ss:$16 sps:$4 sm:$0xff]  }
 0x114   : > { %13301 = vmatprep.subr.bf16.mxu1 %v18175_v58  ;;  %13290 = vmatprep.mubr.bf16.mxu0 %v21478_v54  ;;  %v18239_v57 = vld [vmem:[%s21189_s8 + $0xf60] ss:$16 sps:$4 sm:$0xff]   ;;  %v18244_v58 = vld [vmem:[%s21189_s8 + $0xd44] ss:$16 sps:$4 sm:$0xff]  }
 0x115   : > { %13331 = vmatprep.mubr.bf16.mxu1 %v21490_v59 }
 0x116   : > { %13261 = vmatpush1.bf16.msra.mxu0 %v18170_v61  ;;  %v18247_v61 = vld [vmem:[%s21189_s8 + $0xf44] ss:$16 sps:$4 sm:$0xff]  }
 0x117   : > { %13302 = vmatpush1.bf16.msra.mxu1 %v18173_v62  ;;  %13262 = vmatprep.subr.bf16.mxu0 %v18178_v63  ;;  %v18242_v62 = vld [vmem:[%s21189_s8 + $0xd40] ss:$16 sps:$4 sm:$0xff]  }
 0x118   : > { %13303 = vmatprep.subr.bf16.mxu1 %v18181_v1  ;;  %v18245_v63 = vld [vmem:[%s21189_s8 + $0xf40] ss:$16 sps:$4 sm:$0xff]  }
 0x119   : > { %v21549_v1 = vld [vmem:[%s23947_s0 + $0x10] sm:$0xff] }
 0x11a   : > { %13263 = vmatpush1.bf16.msra.mxu0 %v18176_v2  ;;  %v18250_v2 = vld [vmem:[%s21189_s8 + $0xd24] ss:$16 sps:$4 sm:$0xff]  }
 0x11b   : > { %13304 = vmatpush1.bf16.msra.mxu1 %v18179_v3  ;;  %13264 = vmatprep.subr.bf16.mxu0 %v18184_v4  ;;  %v18253_v3 = vld [vmem:[%s21189_s8 + $0xf24] ss:$16 sps:$4 sm:$0xff]   ;;  %v21555_v4 = vrot.slane %v21549_v1, %v21248_v49 }
 0x11c   : > { %13305 = vmatprep.subr.bf16.mxu1 %v18187_v5  ;;  %v18248_v5 = vld [vmem:[%s21189_s8 + $0xd20] ss:$16 sps:$4 sm:$0xff]  }
 0x11e   : > { %13265 = vmatpush1.bf16.msra.mxu0 %v18182_v7  ;;  %v18251_v7 = vld [vmem:[%s21189_s8 + $0xf20] ss:$16 sps:$4 sm:$0xff]  }
 0x11f   : > { %13306 = vmatpush1.bf16.msra.mxu1 %v18185_v8  ;;  %13266 = vmatprep.subr.bf16.mxu0 %v18190_v9  ;;  %v18256_v8 = vld [vmem:[%s21189_s8 + $0xd04] ss:$16 sps:$4 sm:$0xff]  }
 0x120   : > { %13307 = vmatprep.subr.bf16.mxu1 %v18193_v10  ;;  %v18259_v9 = vld [vmem:[%s21189_s8 + $0xf04] ss:$16 sps:$4 sm:$0xff]   ;;  %v18254_v10 = vld [vmem:[%s21189_s8 + $0xd00] ss:$16 sps:$4 sm:$0xff]  }
 0x122   : > { %13267 = vmatpush1.bf16.msra.mxu0 %v18188_v11  ;;  %v2429_v11 = vcombine.high %v21555_v4, %v21555_v4 }
 0x123   : > { %13308 = vmatpush1.bf16.msra.mxu1 %v18191_v12  ;;  %13268 = vmatprep.subr.bf16.mxu0 %v18196_v14  ;;  %v18257_v12 = vld [vmem:[%s21189_s8 + $0xf00] ss:$16 sps:$4 sm:$0xff]  }
 0x124   : > { %13309 = vmatprep.subr.bf16.mxu1 %v18199_v15  ;;  %v2286_v14 = vld [vmem:[%s21195_s30] sm:$0xf]  ;;  %v21568_v15 = vrot.slane %v21461_v40, %v21248_v49 }
 0x125   : > { %v18261_v40 = vld [vmem:[%s21189_s8 + $0x10e0] ss:$16 sps:$4 sm:$0xff]  }
 0x126   : > { %13269 = vmatpush1.bf16.msra.mxu0 %v18194_v16  ;;  %v2290_v16 = vsub.s32 0, %v21240_v42 }
 0x127   : > { %13310 = vmatpush1.bf16.msra.mxu1 %v18197_v19  ;;  %13270 = vmatprep.subr.bf16.mxu0 %v18202_v20  ;;  %v18263_v19 = vld [vmem:[%s21189_s8 + $0x10e4] ss:$16 sps:$4 sm:$0xff]  }
 0x128   : > { %13311 = vmatprep.subr.bf16.mxu1 %v18205_v21  ;;  %v18266_v20 = vld [vmem:[%s21189_s8 + $0x12e4] ss:$16 sps:$4 sm:$0xff]   ;;  %v2294_v21 = vsub.s32 1, %v21240_v42 }
 0x12a   : > { %13271 = vmatpush1.bf16.msra.mxu0 %v18200_v22  ;;  %v21575_v22 = vrot.slane %v2429_v11, %v21248_v49  ;;  %v18294_v11 = vld [vmem:[%s21189_s8 + $0x1240] ss:$16 sps:$4 sm:$0xff]  }
 0x12b   : > { %13312 = vmatpush1.bf16.msra.mxu1 %v18203_v24  ;;  %13272 = vmatprep.subr.bf16.mxu0 %v18208_v25  ;;  %v21579_v24 = vcombine.high %v21568_v15, %v21568_v15  ;;  %v18264_v25 = vld [vmem:[%s21189_s8 + $0x12e0] ss:$16 sps:$4 sm:$0xff]  }
 0x12c   : > { %13313 = vmatprep.subr.bf16.mxu1 %v18211_v27  ;;  %v2291_v27 = vrot.slane %v2286_v14, %v2290_v16  ;;  %v18297_v16 = vld [vmem:[%s21189_s8 + $0x1020] ss:$16 sps:$4 sm:$0xff]  }
 0x12e   : > { %13273 = vmatpush1.bf16.msra.mxu0 %v18206_v28  ;;  %v18269_v28 = vld [vmem:[%s21189_s8 + $0x10c4] ss:$16 sps:$4 sm:$0xff]  }
 0x12f   : > { %13314 = vmatpush1.bf16.msra.mxu1 %v18209_v29  ;;  %13274 = vmatprep.subr.bf16.mxu0 %v18214_v31  ;;  %v18272_v29 = vld [vmem:[%s21189_s8 + $0x12c4] ss:$16 sps:$4 sm:$0xff]   ;;  %v2295_v31 = vrot.slane %v2286_v14, %v2294_v21 }
 0x130   : > { %13315 = vmatprep.subr.bf16.mxu1 %v18217_v6  ;;  %v21587_v6 = vcombine.high %v21575_v22, %v21575_v22  ;;  %v18302_v14 = vld [vmem:[%s21189_s8 + $0x1224] ss:$16 sps:$4 sm:$0xff]  }
 0x131   : > { %v18308_v21 = vld [vmem:[%s21189_s8 + $0x1204] ss:$16 sps:$4 sm:$0xff]  }
 0x132   : > { %13275 = vmatpush2.bf16.msra.mxu0 %v18212_v33 }
 0x133   : > { %13316 = vmatpush2.bf16.msra.mxu1 %v18215_v34  ;;  %13276 = vmatprep.subr.bf16.mxu0 %v18220_v36  ;;  %v18267_v36 = vld [vmem:[%s21189_s8 + $0x10c0] ss:$16 sps:$4 sm:$0xff]  }
 0x134   : > { %13317 = vmatprep.subr.bf16.mxu1 %v18223_v37  ;;  %v18270_v37 = vld [vmem:[%s21189_s8 + $0x12c0] ss:$16 sps:$4 sm:$0xff]  }
 0x136   : > { %13277 = vmatpush2.bf16.msra.mxu0 %v18218_v38 }
 0x137   : > { %13318 = vmatpush2.bf16.msra.mxu1 %v18221_v39  ;;  %13278 = vmatprep.subr.bf16.mxu0 %v18226_v44 }
 0x138   : > { %13319 = vmatprep.subr.bf16.mxu1 %v18229_v32  ;;  %v18275_v32 = vld [vmem:[%s21189_s8 + $0x10a4] ss:$16 sps:$4 sm:$0xff]  }
 0x13a   : > { %13279 = vmatpush2.bf16.msra.mxu0 %v18224_v45  ;;  %v18278_v45 = vld [vmem:[%s21189_s8 + $0x12a4] ss:$16 sps:$4 sm:$0xff]  }
 0x13b   : > { %13320 = vmatpush2.bf16.msra.mxu1 %v18227_v46  ;;  %13280 = vmatprep.subr.bf16.mxu0 %v18232_v47 }
 0x13c   : > { %13321 = vmatprep.subr.bf16.mxu1 %v18235_v48  ;;  %v18273_v48 = vld [vmem:[%s21189_s8 + $0x10a0] ss:$16 sps:$4 sm:$0xff]  }
 0x13e   : > { %13281 = vmatpush2.bf16.msra.mxu0 %v18230_v51  ;;  %v18276_v51 = vld [vmem:[%s21189_s8 + $0x12a0] ss:$16 sps:$4 sm:$0xff]  }
 0x13f   : > { %13322 = vmatpush2.bf16.msra.mxu1 %v18233_v52  ;;  %13282 = vmatprep.subr.bf16.mxu0 %v18238_v53 }
 0x140   : > { %13323 = vmatprep.subr.bf16.mxu1 %v18241_v35 }
 0x142   : > { %13283 = vmatpush2.bf16.msra.mxu0 %v18236_v56 }
 0x143   : > { %13324 = vmatpush2.bf16.msra.mxu1 %v18239_v57  ;;  %13284 = vmatprep.subr.bf16.mxu0 %v18244_v58  ;;  %v18281_v58 = vld [vmem:[%s21189_s8 + $0x1084] ss:$16 sps:$4 sm:$0xff]  }
 0x144   : > { %13325 = vmatprep.subr.bf16.mxu1 %v18247_v61  ;;  %v18284_v61 = vld [vmem:[%s21189_s8 + $0x1284] ss:$16 sps:$4 sm:$0xff]  }
 0x146   : > { %13285 = vmatpush2.bf16.msra.mxu0 %v18242_v62  ;;  %v18279_v62 = vld [vmem:[%s21189_s8 + $0x1080] ss:$16 sps:$4 sm:$0xff]  }
 0x147   : > { %13326 = vmatpush2.bf16.msra.mxu1 %v18245_v63  ;;  %13286 = vmatprep.subr.bf16.mxu0 %v18250_v2  ;;  %v18282_v63 = vld [vmem:[%s21189_s8 + $0x1280] ss:$16 sps:$4 sm:$0xff]   ;;  %v18287_v2 = vld [vmem:[%s21189_s8 + $0x1064] ss:$16 sps:$4 sm:$0xff]  }
 0x148   : > { %13327 = vmatprep.subr.bf16.mxu1 %v18253_v3  ;;  %v18290_v3 = vld [vmem:[%s21189_s8 + $0x1264] ss:$16 sps:$4 sm:$0xff]  }
 0x14a   : > { %13287 = vmatpush2.bf16.msra.mxu0 %v18248_v5  ;;  %v18285_v5 = vld [vmem:[%s21189_s8 + $0x1060] ss:$16 sps:$4 sm:$0xff]  }
 0x14b   : > { %13328 = vmatpush2.bf16.msra.mxu1 %v18251_v7  ;;  %13288 = vmatprep.subr.bf16.mxu0 %v18256_v8  ;;  %v18288_v7 = vld [vmem:[%s21189_s8 + $0x1260] ss:$16 sps:$4 sm:$0xff]   ;;  %v18293_v8 = vld [vmem:[%s21189_s8 + $0x1044] ss:$16 sps:$4 sm:$0xff]  }
 0x14c   : > { %13329 = vmatprep.subr.bf16.mxu1 %v18259_v9  ;;  %v18296_v9 = vld [vmem:[%s21189_s8 + $0x1244] ss:$16 sps:$4 sm:$0xff]  }
 0x14e   : > { %13289 = vmatpush2.bf16.msra.mxu0 %v18254_v10  ;;  %v18291_v10 = vld [vmem:[%s21189_s8 + $0x1040] ss:$16 sps:$4 sm:$0xff]  }
 0x14f   : > { %13330 = vmatpush2.bf16.msra.mxu1 %v18257_v12  ;;  %13340 = vmatprep.subr.bf16.mxu0 %v18263_v19  ;;  %v18299_v12 = vld [vmem:[%s21189_s8 + $0x1024] ss:$16 sps:$4 sm:$0xff]   ;;  %v18300_v19 = vld [vmem:[%s21189_s8 + $0x1220] ss:$16 sps:$4 sm:$0xff]  }
 0x150   : > { %13381 = vmatprep.subr.bf16.mxu1 %v18266_v20  ;;  %v18305_v20 = vld [vmem:[%s21189_s8 + $0x1004] ss:$16 sps:$4 sm:$0xff]  }
 0x151   : > { %v13046_v33 = vpop.f32.mrf.mxu0  ;;  %13291 = vmatmul.mubr.bf16.vlgmr.msra.gmra.mxu0 %v21568_v15 }
 0x152   : > { %v13087_v34 = vpop.f32.mrf.mxu1  ;;  %13332 = vmatmul.mubr.bf16.vlgmr.msra.gmra.mxu1 %v21579_v24  ;;  %v13047_v38 = vadd.f32 %v13046_v33, %v2291_v27  ;;  %13341 = vmatpush1.bf16.msra.mxu0 %v18261_v40  ;;  %v18303_v40 = vld [vmem:[%s21189_s8 + $0x1000] ss:$16 sps:$4 sm:$0xff]   ;;  %v18311_v27 = vld [vmem:[%s21189_s8 + $0x11e4] ss:$16 sps:$4 sm:$0xff]  }
 0x153   : > { %13382 = vmatpush1.bf16.msra.mxu1 %v18264_v25  ;;  %v13048_v39 = vpop.f32.mrf.mxu0  ;;  %13342 = vmatprep.subr.bf16.mxu0 %v18269_v28  ;;  %v18306_v25 = vld [vmem:[%s21189_s8 + $0x1200] ss:$16 sps:$4 sm:$0xff]   ;;  %v18314_v28 = vld [vmem:[%s21189_s8 + $0x13e4] ss:$16 sps:$4 sm:$0xff]  }
 0x154   : > { %v13089_v44 = vpop.f32.mrf.mxu1  ;;  %13383 = vmatprep.subr.bf16.mxu1 %v18272_v29  ;;  %v21595_v46 = vadd.f32 %v13087_v34, %v13047_v38  ;;  %v13049_v47 = vadd.f32 %v13048_v39, %v2295_v31  ;;  %13372 = vmatprep.mubr.bf16.mxu0 %v21575_v22  ;;  %v18309_v29 = vld [vmem:[%s21189_s8 + $0x11e0] ss:$16 sps:$4 sm:$0xff]   ;;  %v18317_v33 = vld [vmem:[%s21189_s8 + $0x11c4] ss:$16 sps:$4 sm:$0xff]  }
 0x155   : > { %13413 = vmatprep.mubr.bf16.mxu1 %v21587_v6  ;;  %v13050_v52 = vpop.f32.mrf.mxu0  ;;  %v18312_v31 = vld [vmem:[%s21189_s8 + $0x13e0] ss:$16 sps:$4 sm:$0xff]   ;;  %v18320_v34 = vld [vmem:[%s21189_s8 + $0x13c4] ss:$16 sps:$4 sm:$0xff]  }
 0x156   : > { %v13091_v53 = vpop.f32.mrf.mxu1  ;;  %v21601_v35 = vadd.f32 %v13089_v44, %v13049_v47  ;;  %13343 = vmatpush1.bf16.msra.mxu0 %v18267_v36  ;;  %v18315_v36 = vld [vmem:[%s21189_s8 + $0x11c0] ss:$16 sps:$4 sm:$0xff]   ;;  %v18323_v38 = vld [vmem:[%s21189_s8 + $0x11a4] ss:$16 sps:$4 sm:$0xff]  }
 0x157   : > { %13384 = vmatpush1.bf16.msra.mxu1 %v18270_v37  ;;  %v13051_v56 = vpop.f32.mrf.mxu0  ;;  %13344 = vmatprep.subr.bf16.mxu0 %v18275_v32  ;;  %v18318_v37 = vld [vmem:[%s21189_s8 + $0x13c0] ss:$16 sps:$4 sm:$0xff]   ;;  %v18326_v39 = vld [vmem:[%s21189_s8 + $0x13a4] ss:$16 sps:$4 sm:$0xff]  }
 0x158   : > { %v13092_v57 = vpop.f32.mrf.mxu1  ;;  %13385 = vmatprep.subr.bf16.mxu1 %v18278_v45  ;;  %v18321_v44 = vld [vmem:[%s21189_s8 + $0x11a0] ss:$16 sps:$4 sm:$0xff]   ;;  %v18329_v45 = vld [vmem:[%s21189_s8 + $0x1184] ss:$16 sps:$4 sm:$0xff]  }
 0x159   : > { %v18324_v32 = vld [vmem:[%s21189_s8 + $0x13a0] ss:$16 sps:$4 sm:$0xff]   ;;  %v18332_v47 = vld [vmem:[%s21189_s8 + $0x1384] ss:$16 sps:$4 sm:$0xff]  }
 0x15a   : > { %13345 = vmatpush1.bf16.msra.mxu0 %v18273_v48  ;;  %v18327_v48 = vld [vmem:[%s21189_s8 + $0x1180] ss:$16 sps:$4 sm:$0xff]   ;;  %v18335_v52 = vld [vmem:[%s21189_s8 + $0x1164] ss:$16 sps:$4 sm:$0xff]  }
 0x15b   : > { %13386 = vmatpush1.bf16.msra.mxu1 %v18276_v51  ;;  %13346 = vmatprep.subr.bf16.mxu0 %v18281_v58  ;;  %v18330_v51 = vld [vmem:[%s21189_s8 + $0x1380] ss:$16 sps:$4 sm:$0xff]   ;;  %v18338_v53 = vld [vmem:[%s21189_s8 + $0x1364] ss:$16 sps:$4 sm:$0xff]  }
 0x15c   : > { %13387 = vmatprep.subr.bf16.mxu1 %v18284_v61  ;;  %v18333_v56 = vld [vmem:[%s21189_s8 + $0x1160] ss:$16 sps:$4 sm:$0xff]   ;;  %v18341_v58 = vld [vmem:[%s21189_s8 + $0x1144] ss:$16 sps:$4 sm:$0xff]  }
 0x15d   : > { %v18336_v57 = vld [vmem:[%s21189_s8 + $0x1360] ss:$16 sps:$4 sm:$0xff]   ;;  %v18344_v61 = vld [vmem:[%s21189_s8 + $0x1344] ss:$16 sps:$4 sm:$0xff]  }
 0x15e   : > { %13347 = vmatpush1.bf16.msra.mxu0 %v18279_v62  ;;  %v2414_v62 = vcombine.high %v21549_v1, %v21549_v1  ;;  %v18345_v1 = vld [vmem:[%s21189_s8 + $0x1120] ss:$16 sps:$4 sm:$0xff]  }
 0x15f   : > { %13388 = vmatpush1.bf16.msra.mxu1 %v18282_v63  ;;  %13348 = vmatprep.subr.bf16.mxu0 %v18287_v2  ;;  %v18339_v63 = vld [vmem:[%s21189_s8 + $0x1140] ss:$16 sps:$4 sm:$0xff]  }
 0x160   : > { %13389 = vmatprep.subr.bf16.mxu1 %v18290_v3  ;;  %v18342_v2 = vld [vmem:[%s21189_s8 + $0x1340] ss:$16 sps:$4 sm:$0xff]   ;;  %v18347_v3 = vld [vmem:[%s21189_s8 + $0x1124] ss:$16 sps:$4 sm:$0xff]  }
 0x162   : > { %13349 = vmatpush1.bf16.msra.mxu0 %v18285_v5  ;;  %v18350_v5 = vld [vmem:[%s21189_s8 + $0x1324] ss:$16 sps:$4 sm:$0xff]  }
 0x163   : > { %13390 = vmatpush1.bf16.msra.mxu1 %v18288_v7  ;;  %13350 = vmatprep.subr.bf16.mxu0 %v18293_v8  ;;  %v21652_v7 = vrot.slane %v2414_v62, %v21248_v49  ;;  %v18348_v8 = vld [vmem:[%s21189_s8 + $0x1320] ss:$16 sps:$4 sm:$0xff]  }
 0x164   : > { %13391 = vmatprep.subr.bf16.mxu1 %v18296_v9  ;;  %v18353_v9 = vld [vmem:[%s21189_s8 + $0x1104] ss:$16 sps:$4 sm:$0xff]   ;;  %v18378_v62 = vld [vmem:[%s21189_s8 + $0x1680] ss:$16 sps:$4 sm:$0xff]  }
 0x166   : > { %13351 = vmatpush1.bf16.msra.mxu0 %v18291_v10  ;;  %v18356_v10 = vld [vmem:[%s21189_s8 + $0x1304] ss:$16 sps:$4 sm:$0xff]  }
 0x167   : > { %13392 = vmatpush1.bf16.msra.mxu1 %v18294_v11  ;;  %13352 = vmatprep.subr.bf16.mxu0 %v18299_v12  ;;  %v2430_v11 = vcombine.high %v21652_v7, %v21652_v7  ;;  %v21662_v12 = vrot.slane %v21555_v4, %v21248_v49 }
 0x168   : > { %13393 = vmatprep.subr.bf16.mxu1 %v18302_v14  ;;  %v18351_v14 = vld [vmem:[%s21189_s8 + $0x1100] ss:$16 sps:$4 sm:$0xff]  }
 0x169   : > { %v21675_v4 = vcombine.high %v21662_v12, %v21662_v12 }
 0x16a   : > { %13353 = vmatpush1.bf16.msra.mxu0 %v18297_v16  ;;  %v18354_v16 = vld [vmem:[%s21189_s8 + $0x1300] ss:$16 sps:$4 sm:$0xff]  }
 0x16b   : > { %13394 = vmatpush1.bf16.msra.mxu1 %v18300_v19  ;;  %13354 = vmatprep.subr.bf16.mxu0 %v18305_v20  ;;  %v18359_v19 = vld [vmem:[%s21189_s8 + $0x14e4] ss:$16 sps:$4 sm:$0xff]  }
 0x16c   : > { %13395 = vmatprep.subr.bf16.mxu1 %v18308_v21  ;;  %v18362_v20 = vld [vmem:[%s21189_s8 + $0x16e4] ss:$16 sps:$4 sm:$0xff]   ;;  %v18357_v21 = vld [vmem:[%s21189_s8 + $0x14e0] ss:$16 sps:$4 sm:$0xff]  }
 0x16e   : > { %13355 = vmatpush1.bf16.msra.mxu0 %v18303_v40  ;;  %v18360_v40 = vld [vmem:[%s21189_s8 + $0x16e0] ss:$16 sps:$4 sm:$0xff]  }
 0x16f   : > { %13396 = vmatpush1.bf16.msra.mxu1 %v18306_v25  ;;  %13356 = vmatprep.subr.bf16.mxu0 %v18311_v27  ;;  %v21671_v25 = vrot.slane %v2430_v11, %v21248_v49  ;;  %v18365_v27 = vld [vmem:[%s21189_s8 + $0x14c4] ss:$16 sps:$4 sm:$0xff]  }
 0x170   : > { %13397 = vmatprep.subr.bf16.mxu1 %v18314_v28  ;;  %v18368_v28 = vld [vmem:[%s21189_s8 + $0x16c4] ss:$16 sps:$4 sm:$0xff]  }
 0x171   : > { %v18395_v11 = vld [vmem:[%s21189_s8 + $0x1424] ss:$16 sps:$4 sm:$0xff]  }
 0x172   : > { %13357 = vmatpush2.bf16.msra.mxu0 %v18309_v29  ;;  %v18363_v29 = vld [vmem:[%s21189_s8 + $0x14c0] ss:$16 sps:$4 sm:$0xff]  }
 0x173   : > { %13398 = vmatpush2.bf16.msra.mxu1 %v18312_v31  ;;  %13358 = vmatprep.subr.bf16.mxu0 %v18317_v33  ;;  %v18366_v31 = vld [vmem:[%s21189_s8 + $0x16c0] ss:$16 sps:$4 sm:$0xff]   ;;  %v21683_v33 = vcombine.high %v21671_v25, %v21671_v25 }
 0x174   : > { %13399 = vmatprep.subr.bf16.mxu1 %v18320_v34 }
 0x176   : > { %13359 = vmatpush2.bf16.msra.mxu0 %v18315_v36 }
 0x177   : > { %13400 = vmatpush2.bf16.msra.mxu1 %v18318_v37  ;;  %13360 = vmatprep.subr.bf16.mxu0 %v18323_v38 }
 0x178   : > { %13401 = vmatprep.subr.bf16.mxu1 %v18326_v39 }
 0x17a   : > { %13361 = vmatpush2.bf16.msra.mxu0 %v18321_v44  ;;  %v18371_v44 = vld [vmem:[%s21189_s8 + $0x14a4] ss:$16 sps:$4 sm:$0xff]  }
 0x17b   : > { %13402 = vmatpush2.bf16.msra.mxu1 %v18324_v32  ;;  %13362 = vmatprep.subr.bf16.mxu0 %v18329_v45  ;;  %v18374_v32 = vld [vmem:[%s21189_s8 + $0x16a4] ss:$16 sps:$4 sm:$0xff]  }
 0x17c   : > { %13403 = vmatprep.subr.bf16.mxu1 %v18332_v47 }
 0x17e   : > { %13363 = vmatpush2.bf16.msra.mxu0 %v18327_v48  ;;  %v18369_v48 = vld [vmem:[%s21189_s8 + $0x14a0] ss:$16 sps:$4 sm:$0xff]  }
 0x17f   : > { %13404 = vmatpush2.bf16.msra.mxu1 %v18330_v51  ;;  %13364 = vmatprep.subr.bf16.mxu0 %v18335_v52  ;;  %v18372_v51 = vld [vmem:[%s21189_s8 + $0x16a0] ss:$16 sps:$4 sm:$0xff]  }
 0x180   : > { %13405 = vmatprep.subr.bf16.mxu1 %v18338_v53 }
 0x182   : > { %13365 = vmatpush2.bf16.msra.mxu0 %v18333_v56 }
 0x183   : > { %13406 = vmatpush2.bf16.msra.mxu1 %v18336_v57  ;;  %13366 = vmatprep.subr.bf16.mxu0 %v18341_v58  ;;  %v18380_v58 = vld [vmem:[%s21189_s8 + $0x1684] ss:$16 sps:$4 sm:$0xff]  }
 0x184   : > { %13407 = vmatprep.subr.bf16.mxu1 %v18344_v61  ;;  %v18375_v61 = vld [vmem:[%s21189_s8 + $0x1480] ss:$16 sps:$4 sm:$0xff]  }
 0x186   : > { %13367 = vmatpush2.bf16.msra.mxu0 %v18339_v63  ;;  %v18383_v63 = vld [vmem:[%s21189_s8 + $0x1464] ss:$16 sps:$4 sm:$0xff]  }
 0x187   : > { %13408 = vmatpush2.bf16.msra.mxu1 %v18342_v2  ;;  %13368 = vmatprep.subr.bf16.mxu0 %v18347_v3  ;;  %v18386_v2 = vld [vmem:[%s21189_s8 + $0x1664] ss:$16 sps:$4 sm:$0xff]   ;;  %v18381_v3 = vld [vmem:[%s21189_s8 + $0x1460] ss:$16 sps:$4 sm:$0xff]  }
 0x188   : > { %13409 = vmatprep.subr.bf16.mxu1 %v18350_v5  ;;  %v18384_v5 = vld [vmem:[%s21189_s8 + $0x1660] ss:$16 sps:$4 sm:$0xff]  }
 0x18a   : > { %13369 = vmatpush2.bf16.msra.mxu0 %v18345_v1  ;;  %v18389_v1 = vld [vmem:[%s21189_s8 + $0x1444] ss:$16 sps:$4 sm:$0xff]  }
 0x18b   : > { %13410 = vmatpush2.bf16.msra.mxu1 %v18348_v8  ;;  %13370 = vmatprep.subr.bf16.mxu0 %v18353_v9  ;;  %v18392_v8 = vld [vmem:[%s21189_s8 + $0x1644] ss:$16 sps:$4 sm:$0xff]   ;;  %v18387_v9 = vld [vmem:[%s21189_s8 + $0x1440] ss:$16 sps:$4 sm:$0xff]  }
 0x18c   : > { %13411 = vmatprep.subr.bf16.mxu1 %v18356_v10  ;;  %v18390_v10 = vld [vmem:[%s21189_s8 + $0x1640] ss:$16 sps:$4 sm:$0xff]  }
 0x18e   : > { %13371 = vmatpush2.bf16.msra.mxu0 %v18351_v14  ;;  %v18398_v14 = vld [vmem:[%s21189_s8 + $0x1624] ss:$16 sps:$4 sm:$0xff]  }
 0x18f   : > { %13412 = vmatpush2.bf16.msra.mxu1 %v18354_v16  ;;  %13422 = vmatprep.subr.bf16.mxu0 %v18359_v19  ;;  %v18393_v16 = vld [vmem:[%s21189_s8 + $0x1420] ss:$16 sps:$4 sm:$0xff]  }
 0x190   : > { %13463 = vmatprep.subr.bf16.mxu1 %v18362_v20  ;;  %v18396_v19 = vld [vmem:[%s21189_s8 + $0x1620] ss:$16 sps:$4 sm:$0xff]   ;;  %v18401_v20 = vld [vmem:[%s21189_s8 + $0x1404] ss:$16 sps:$4 sm:$0xff]  }
 0x191   : > { %v13128_v34 = vpop.f32.mrf.mxu0  ;;  %13373 = vmatmul.mubr.bf16.vlgmr.msra.gmra.mxu0 %v21662_v12 }
 0x192   : > { %v13169_v36 = vpop.f32.mrf.mxu1  ;;  %13414 = vmatmul.mubr.bf16.vlgmr.msra.gmra.mxu1 %v21675_v4  ;;  %v13129_v37 = vadd.f32 %v13128_v34, %v21595_v46  ;;  %13423 = vmatpush1.bf16.msra.mxu0 %v18357_v21  ;;  %v18404_v21 = vld [vmem:[%s21189_s8 + $0x1604] ss:$16 sps:$4 sm:$0xff]   ;;  %v18408_v34 = vld [vmem:[%s21189_s8 + $0x17e0] ss:$16 sps:$4 sm:$0xff]  }
 0x193   : > { %13464 = vmatpush1.bf16.msra.mxu1 %v18360_v40  ;;  %v13130_v38 = vpop.f32.mrf.mxu0  ;;  %13424 = vmatprep.subr.bf16.mxu0 %v18365_v27  ;;  %v18399_v40 = vld [vmem:[%s21189_s8 + $0x1400] ss:$16 sps:$4 sm:$0xff]  }
 0x194   : > { %v13171_v39 = vpop.f32.mrf.mxu1  ;;  %13465 = vmatprep.subr.bf16.mxu1 %v18368_v28  ;;  %v21690_v45 = vadd.f32 %v13169_v36, %v13129_v37  ;;  %v13131_v47 = vadd.f32 %v13130_v38, %v21601_v35  ;;  %13454 = vmatprep.mubr.bf16.mxu0 %v21671_v25  ;;  %v18377_v35 = vld [vmem:[%s21189_s8 + $0x1484] ss:$16 sps:$4 sm:$0xff]   ;;  %v18402_v27 = vld [vmem:[%s21189_s8 + $0x1600] ss:$16 sps:$4 sm:$0xff]  }
 0x195   : > { %13495 = vmatprep.mubr.bf16.mxu1 %v21683_v33  ;;  %v13132_v46 = vpop.f32.mrf.mxu0  ;;  %v18407_v28 = vld [vmem:[%s21189_s8 + $0x15e4] ss:$16 sps:$4 sm:$0xff]   ;;  %v18411_v38 = vld [vmem:[%s21189_s8 + $0x15c0] ss:$16 sps:$4 sm:$0xff]  }
 0x196   : > { %v13173_v52 = vpop.f32.mrf.mxu1  ;;  %v21697_v53 = vadd.f32 %v13171_v39, %v13131_v47  ;;  %13425 = vmatpush1.bf16.msra.mxu0 %v18363_v29  ;;  %v18410_v29 = vld [vmem:[%s21189_s8 + $0x17e4] ss:$16 sps:$4 sm:$0xff]   ;;  %v18414_v39 = vld [vmem:[%s21189_s8 + $0x17c0] ss:$16 sps:$4 sm:$0xff]  }
 0x197   : > { %13466 = vmatpush1.bf16.msra.mxu1 %v18366_v31  ;;  %v13133_v56 = vpop.f32.mrf.mxu0  ;;  %13426 = vmatprep.subr.bf16.mxu0 %v18371_v44  ;;  %v18405_v31 = vld [vmem:[%s21189_s8 + $0x15e0] ss:$16 sps:$4 sm:$0xff]   ;;  %v18413_v36 = vld [vmem:[%s21189_s8 + $0x15c4] ss:$16 sps:$4 sm:$0xff]  }
 0x198   : > { %v13174_v57 = vpop.f32.mrf.mxu1  ;;  %13467 = vmatprep.subr.bf16.mxu1 %v18374_v32  ;;  %v18416_v37 = vld [vmem:[%s21189_s8 + $0x17c4] ss:$16 sps:$4 sm:$0xff]   ;;  %v18417_v47 = vld [vmem:[%s21189_s8 + $0x15a0] ss:$16 sps:$4 sm:$0xff]  }
 0x199   : > { %v18419_v44 = vld [vmem:[%s21189_s8 + $0x15a4] ss:$16 sps:$4 sm:$0xff]   ;;  %v18423_v52 = vld [vmem:[%s21189_s8 + $0x1580] ss:$16 sps:$4 sm:$0xff]  }
 0x19a   : > { %13427 = vmatpush1.bf16.msra.mxu0 %v18369_v48  ;;  %v18422_v32 = vld [vmem:[%s21189_s8 + $0x17a4] ss:$16 sps:$4 sm:$0xff]   ;;  %v18420_v48 = vld [vmem:[%s21189_s8 + $0x17a0] ss:$16 sps:$4 sm:$0xff]  }
 0x19b   : > { %13468 = vmatpush1.bf16.msra.mxu1 %v18372_v51  ;;  %13428 = vmatprep.subr.bf16.mxu0 %v18377_v35  ;;  %v18425_v51 = vld [vmem:[%s21189_s8 + $0x1584] ss:$16 sps:$4 sm:$0xff]   ;;  %v18426_v56 = vld [vmem:[%s21189_s8 + $0x1780] ss:$16 sps:$4 sm:$0xff]  }
 0x19c   : > { %13469 = vmatprep.subr.bf16.mxu1 %v18380_v58  ;;  %v18428_v46 = vld [vmem:[%s21189_s8 + $0x1784] ss:$16 sps:$4 sm:$0xff]   ;;  %v18429_v58 = vld [vmem:[%s21189_s8 + $0x1560] ss:$16 sps:$4 sm:$0xff]  }
 0x19d   : > { %v18431_v57 = vld [vmem:[%s21189_s8 + $0x1564] ss:$16 sps:$4 sm:$0xff]  }
 0x19e   : > { %13429 = vmatpush1.bf16.msra.mxu0 %v18375_v61  ;;  %v18434_v35 = vld [vmem:[%s21189_s8 + $0x1764] ss:$16 sps:$4 sm:$0xff]   ;;  %v18432_v61 = vld [vmem:[%s21189_s8 + $0x1760] ss:$16 sps:$4 sm:$0xff]  }
 0x19f   : > { %13470 = vmatpush1.bf16.msra.mxu1 %v18378_v62  ;;  %13430 = vmatprep.subr.bf16.mxu0 %v18383_v63  ;;  %v18437_v62 = vld [vmem:[%s21189_s8 + $0x1544] ss:$16 sps:$4 sm:$0xff]  }
 0x1a0   : > { %13471 = vmatprep.subr.bf16.mxu1 %v18386_v2  ;;  %v18440_v63 = vld [vmem:[%s21189_s8 + $0x1744] ss:$16 sps:$4 sm:$0xff]   ;;  %v21744_v2 = vld [vmem:[%s23947_s0 + $0x18] sm:$0xff] }
 0x1a2   : > { %13431 = vmatpush1.bf16.msra.mxu0 %v18381_v3  ;;  %v18435_v3 = vld [vmem:[%s21189_s8 + $0x1540] ss:$16 sps:$4 sm:$0xff]  }
 0x1a3   : > { %13472 = vmatpush1.bf16.msra.mxu1 %v18384_v5  ;;  %13432 = vmatprep.subr.bf16.mxu0 %v18389_v1  ;;  %v18438_v5 = vld [vmem:[%s21189_s8 + $0x1740] ss:$16 sps:$4 sm:$0xff]   ;;  %v18443_v1 = vld [vmem:[%s21189_s8 + $0x1524] ss:$16 sps:$4 sm:$0xff]  }
 0x1a4   : > { %13473 = vmatprep.subr.bf16.mxu1 %v18392_v8  ;;  %v18446_v8 = vld [vmem:[%s21189_s8 + $0x1724] ss:$16 sps:$4 sm:$0xff]  }
 0x1a6   : > { %13433 = vmatpush1.bf16.msra.mxu0 %v18387_v9  ;;  %v21752_v9 = vrot.slane %v21744_v2, %v21248_v49 }
 0x1a7   : > { %13474 = vmatpush1.bf16.msra.mxu1 %v18390_v10  ;;  %13434 = vmatprep.subr.bf16.mxu0 %v18395_v11  ;;  %v18441_v10 = vld [vmem:[%s21189_s8 + $0x1520] ss:$16 sps:$4 sm:$0xff]  }
 0x1a8   : > { %13475 = vmatprep.subr.bf16.mxu1 %v18398_v14  ;;  %v18444_v11 = vld [vmem:[%s21189_s8 + $0x1720] ss:$16 sps:$4 sm:$0xff]   ;;  %v18449_v14 = vld [vmem:[%s21189_s8 + $0x1504] ss:$16 sps:$4 sm:$0xff]  }
 0x1aa   : > { %13435 = vmatpush1.bf16.msra.mxu0 %v18393_v16  ;;  %v18452_v16 = vld [vmem:[%s21189_s8 + $0x1704] ss:$16 sps:$4 sm:$0xff]  }
 0x1ab   : > { %13476 = vmatpush1.bf16.msra.mxu1 %v18396_v19  ;;  %13436 = vmatprep.subr.bf16.mxu0 %v18401_v20  ;;  %v2478_v19 = vcombine.high %v21752_v9, %v21752_v9  ;;  %v21762_v20 = vrot.slane %v21652_v7, %v21248_v49 }
 0x1ac   : > { %13477 = vmatprep.subr.bf16.mxu1 %v18404_v21  ;;  %v18447_v21 = vld [vmem:[%s21189_s8 + $0x1500] ss:$16 sps:$4 sm:$0xff]  }
 0x1ad   : > { %v21775_v7 = vcombine.high %v21762_v20, %v21762_v20 }
 0x1ae   : > { %13437 = vmatpush1.bf16.msra.mxu0 %v18399_v40  ;;  %v18450_v40 = vld [vmem:[%s21189_s8 + $0x1700] ss:$16 sps:$4 sm:$0xff]  }
 0x1af   : > { %13478 = vmatpush1.bf16.msra.mxu1 %v18402_v27  ;;  %13438 = vmatprep.subr.bf16.mxu0 %v18407_v28  ;;  %v18456_v27 = vld [vmem:[%s21189_s8 + $0x18e4] ss:$16 sps:$4 sm:$0xff]  }
 0x1b0   : > { %13479 = vmatprep.subr.bf16.mxu1 %v18410_v29  ;;  %v18459_v28 = vld [vmem:[%s21189_s8 + $0x1ae4] ss:$16 sps:$4 sm:$0xff]   ;;  %v18454_v29 = vld [vmem:[%s21189_s8 + $0x18e0] ss:$16 sps:$4 sm:$0xff]  }
 0x1b2   : > { %13439 = vmatpush2.bf16.msra.mxu0 %v18405_v31  ;;  %v18457_v31 = vld [vmem:[%s21189_s8 + $0x1ae0] ss:$16 sps:$4 sm:$0xff]  }
 0x1b3   : > { %13480 = vmatpush2.bf16.msra.mxu1 %v18408_v34  ;;  %13440 = vmatprep.subr.bf16.mxu0 %v18413_v36  ;;  %v21771_v34 = vrot.slane %v2478_v19, %v21248_v49  ;;  %v18462_v36 = vld [vmem:[%s21189_s8 + $0x18c4] ss:$16 sps:$4 sm:$0xff]   ;;  %v18481_v19 = vld [vmem:[%s21189_s8 + $0x1a60] ss:$16 sps:$4 sm:$0xff]  }
 0x1b4   : > { %13481 = vmatprep.subr.bf16.mxu1 %v18416_v37  ;;  %v18465_v37 = vld [vmem:[%s21189_s8 + $0x1ac4] ss:$16 sps:$4 sm:$0xff]  }
 0x1b6   : > { %13441 = vmatpush2.bf16.msra.mxu0 %v18411_v38  ;;  %v18460_v38 = vld [vmem:[%s21189_s8 + $0x18c0] ss:$16 sps:$4 sm:$0xff]  }
 0x1b7   : > { %13482 = vmatpush2.bf16.msra.mxu1 %v18414_v39  ;;  %13442 = vmatprep.subr.bf16.mxu0 %v18419_v44  ;;  %v18463_v39 = vld [vmem:[%s21189_s8 + $0x1ac0] ss:$16 sps:$4 sm:$0xff]   ;;  %v21783_v44 = vcombine.high %v21771_v34, %v21771_v34 }
 0x1b8   : > { %13483 = vmatprep.subr.bf16.mxu1 %v18422_v32 }
 0x1ba   : > { %13443 = vmatpush2.bf16.msra.mxu0 %v18417_v47 }
 0x1bb   : > { %13484 = vmatpush2.bf16.msra.mxu1 %v18420_v48  ;;  %13444 = vmatprep.subr.bf16.mxu0 %v18425_v51 }
 0x1bc   : > { %13485 = vmatprep.subr.bf16.mxu1 %v18428_v46 }
 0x1be   : > { %13445 = vmatpush2.bf16.msra.mxu0 %v18423_v52  ;;  %v18468_v52 = vld [vmem:[%s21189_s8 + $0x18a4] ss:$16 sps:$4 sm:$0xff]  }
 0x1bf   : > { %13486 = vmatpush2.bf16.msra.mxu1 %v18426_v56  ;;  %13446 = vmatprep.subr.bf16.mxu0 %v18431_v57  ;;  %v18471_v56 = vld [vmem:[%s21189_s8 + $0x1aa4] ss:$16 sps:$4 sm:$0xff]  }
 0x1c0   : > { %13487 = vmatprep.subr.bf16.mxu1 %v18434_v35 }
 0x1c2   : > { %13447 = vmatpush2.bf16.msra.mxu0 %v18429_v58  ;;  %v18466_v58 = vld [vmem:[%s21189_s8 + $0x18a0] ss:$16 sps:$4 sm:$0xff]  }
 0x1c3   : > { %13488 = vmatpush2.bf16.msra.mxu1 %v18432_v61  ;;  %13448 = vmatprep.subr.bf16.mxu0 %v18437_v62  ;;  %v18469_v61 = vld [vmem:[%s21189_s8 + $0x1aa0] ss:$16 sps:$4 sm:$0xff]  }
 0x1c4   : > { %13489 = vmatprep.subr.bf16.mxu1 %v18440_v63 }
 0x1c6   : > { %13449 = vmatpush2.bf16.msra.mxu0 %v18435_v3 }
 0x1c7   : > { %13490 = vmatpush2.bf16.msra.mxu1 %v18438_v5  ;;  %13450 = vmatprep.subr.bf16.mxu0 %v18443_v1  ;;  %v18477_v1 = vld [vmem:[%s21189_s8 + $0x1a84] ss:$16 sps:$4 sm:$0xff]  }
 0x1c8   : > { %13491 = vmatprep.subr.bf16.mxu1 %v18446_v8  ;;  %v18472_v8 = vld [vmem:[%s21189_s8 + $0x1880] ss:$16 sps:$4 sm:$0xff]  }
 0x1ca   : > { %13451 = vmatpush2.bf16.msra.mxu0 %v18441_v10  ;;  %v18475_v10 = vld [vmem:[%s21189_s8 + $0x1a80] ss:$16 sps:$4 sm:$0xff]  }
 0x1cb   : > { %13492 = vmatpush2.bf16.msra.mxu1 %v18444_v11  ;;  %13452 = vmatprep.subr.bf16.mxu0 %v18449_v14  ;;  %v18480_v11 = vld [vmem:[%s21189_s8 + $0x1864] ss:$16 sps:$4 sm:$0xff]  }
 0x1cc   : > { %13493 = vmatprep.subr.bf16.mxu1 %v18452_v16  ;;  %v18483_v14 = vld [vmem:[%s21189_s8 + $0x1a64] ss:$16 sps:$4 sm:$0xff]   ;;  %v18478_v16 = vld [vmem:[%s21189_s8 + $0x1860] ss:$16 sps:$4 sm:$0xff]  }
 0x1ce   : > { %13453 = vmatpush2.bf16.msra.mxu0 %v18447_v21  ;;  %v18486_v21 = vld [vmem:[%s21189_s8 + $0x1844] ss:$16 sps:$4 sm:$0xff]  }
 0x1cf   : > { %13494 = vmatpush2.bf16.msra.mxu1 %v18450_v40  ;;  %13504 = vmatprep.subr.bf16.mxu0 %v18456_v27  ;;  %v18489_v40 = vld [vmem:[%s21189_s8 + $0x1a44] ss:$16 sps:$4 sm:$0xff]   ;;  %v18484_v27 = vld [vmem:[%s21189_s8 + $0x1840] ss:$16 sps:$4 sm:$0xff]  }
 0x1d0   : > { %13545 = vmatprep.subr.bf16.mxu1 %v18459_v28  ;;  %v18487_v28 = vld [vmem:[%s21189_s8 + $0x1a40] ss:$16 sps:$4 sm:$0xff]  }
 0x1d1   : > { %v13210_v32 = vpop.f32.mrf.mxu0  ;;  %13455 = vmatmul.mubr.bf16.vlgmr.msra.gmra.mxu0 %v21762_v20 }
 0x1d2   : > { %v13251_v47 = vpop.f32.mrf.mxu1  ;;  %13496 = vmatmul.mubr.bf16.vlgmr.msra.gmra.mxu1 %v21775_v7  ;;  %v13211_v48 = vadd.f32 %v13210_v32, %v21690_v45  ;;  %13505 = vmatpush1.bf16.msra.mxu0 %v18454_v29  ;;  %v18492_v29 = vld [vmem:[%s21189_s8 + $0x1824] ss:$16 sps:$4 sm:$0xff]   ;;  %v18496_v32 = vld [vmem:[%s21189_s8 + $0x1800] ss:$16 sps:$4 sm:$0xff]  }
 0x1d3   : > { %13546 = vmatpush1.bf16.msra.mxu1 %v18457_v31  ;;  %v13212_v51 = vpop.f32.mrf.mxu0  ;;  %13506 = vmatprep.subr.bf16.mxu0 %v18462_v36  ;;  %v18495_v31 = vld [vmem:[%s21189_s8 + $0x1a24] ss:$16 sps:$4 sm:$0xff]   ;;  %v18490_v36 = vld [vmem:[%s21189_s8 + $0x1820] ss:$16 sps:$4 sm:$0xff]  }
 0x1d4   : > { %v13253_v46 = vpop.f32.mrf.mxu1  ;;  %13547 = vmatprep.subr.bf16.mxu1 %v18465_v37  ;;  %v21790_v57 = vadd.f32 %v13251_v47, %v13211_v48  ;;  %v13213_v35 = vadd.f32 %v13212_v51, %v21697_v53  ;;  %13536 = vmatprep.mubr.bf16.mxu0 %v21771_v34  ;;  %v18474_v53 = vld [vmem:[%s21189_s8 + $0x1884] ss:$16 sps:$4 sm:$0xff]   ;;  %v18493_v37 = vld [vmem:[%s21189_s8 + $0x1a20] ss:$16 sps:$4 sm:$0xff]  }
 0x1d5   : > { %13577 = vmatprep.mubr.bf16.mxu1 %v21783_v44  ;;  %v13214_v45 = vpop.f32.mrf.mxu0  ;;  %v18499_v47 = vld [vmem:[%s21189_s8 + $0x1a00] ss:$16 sps:$4 sm:$0xff]   ;;  %v18504_v48 = vld [vmem:[%s21189_s8 + $0x19e4] ss:$16 sps:$4 sm:$0xff]  }
 0x1d6   : > { %v13255_v62 = vpop.f32.mrf.mxu1  ;;  %v21797_v63 = vadd.f32 %v13253_v46, %v13213_v35  ;;  %13507 = vmatpush1.bf16.msra.mxu0 %v18460_v38  ;;  %v18498_v38 = vld [vmem:[%s21189_s8 + $0x1804] ss:$16 sps:$4 sm:$0xff]   ;;  %v18502_v46 = vld [vmem:[%s21189_s8 + $0x19e0] ss:$16 sps:$4 sm:$0xff]  }
 0x1d7   : > { %13548 = vmatpush1.bf16.msra.mxu1 %v18463_v39  ;;  %v13215_v3 = vpop.f32.mrf.mxu0  ;;  %13508 = vmatprep.subr.bf16.mxu0 %v18468_v52  ;;  %v18501_v39 = vld [vmem:[%s21189_s8 + $0x1a04] ss:$16 sps:$4 sm:$0xff]   ;;  %v18505_v52 = vld [vmem:[%s21189_s8 + $0x1be0] ss:$16 sps:$4 sm:$0xff]  }
 0x1d8   : > { %v13256_v5 = vpop.f32.mrf.mxu1  ;;  %13549 = vmatprep.subr.bf16.mxu1 %v18471_v56  ;;  %v18507_v51 = vld [vmem:[%s21189_s8 + $0x1be4] ss:$16 sps:$4 sm:$0xff]   ;;  %v18514_v3 = vld [vmem:[%s21189_s8 + $0x19a0] ss:$16 sps:$4 sm:$0xff]  }
 0x1d9   : > { %v18510_v56 = vld [vmem:[%s21189_s8 + $0x19c4] ss:$16 sps:$4 sm:$0xff]   ;;  %v18517_v5 = vld [vmem:[%s21189_s8 + $0x1ba0] ss:$16 sps:$4 sm:$0xff]  }
 0x1da   : > { %13509 = vmatpush1.bf16.msra.mxu0 %v18466_v58  ;;  %v18513_v35 = vld [vmem:[%s21189_s8 + $0x1bc4] ss:$16 sps:$4 sm:$0xff]   ;;  %v18508_v58 = vld [vmem:[%s21189_s8 + $0x19c0] ss:$16 sps:$4 sm:$0xff]  }
 0x1db   : > { %13550 = vmatpush1.bf16.msra.mxu1 %v18469_v61  ;;  %13510 = vmatprep.subr.bf16.mxu0 %v18474_v53  ;;  %v18511_v61 = vld [vmem:[%s21189_s8 + $0x1bc0] ss:$16 sps:$4 sm:$0xff]   ;;  %v18516_v45 = vld [vmem:[%s21189_s8 + $0x19a4] ss:$16 sps:$4 sm:$0xff]  }
 0x1dc   : > { %13551 = vmatprep.subr.bf16.mxu1 %v18477_v1  ;;  %v18519_v62 = vld [vmem:[%s21189_s8 + $0x1ba4] ss:$16 sps:$4 sm:$0xff]  }
 0x1dd   : > { %v18522_v53 = vld [vmem:[%s21189_s8 + $0x1984] ss:$16 sps:$4 sm:$0xff]  }
 0x1de   : > { %13511 = vmatpush1.bf16.msra.mxu0 %v18472_v8  ;;  %v18525_v1 = vld [vmem:[%s21189_s8 + $0x1b84] ss:$16 sps:$4 sm:$0xff]   ;;  %v18520_v8 = vld [vmem:[%s21189_s8 + $0x1980] ss:$16 sps:$4 sm:$0xff]  }
 0x1df   : > { %13552 = vmatpush1.bf16.msra.mxu1 %v18475_v10  ;;  %13512 = vmatprep.subr.bf16.mxu0 %v18480_v11  ;;  %v18523_v10 = vld [vmem:[%s21189_s8 + $0x1b80] ss:$16 sps:$4 sm:$0xff]   ;;  %v18528_v11 = vld [vmem:[%s21189_s8 + $0x1964] ss:$16 sps:$4 sm:$0xff]  }
 0x1e0   : > { %13553 = vmatprep.subr.bf16.mxu1 %v18483_v14  ;;  %v18531_v14 = vld [vmem:[%s21189_s8 + $0x1b64] ss:$16 sps:$4 sm:$0xff]  }
 0x1e2   : > { %13513 = vmatpush1.bf16.msra.mxu0 %v18478_v16  ;;  %v18526_v16 = vld [vmem:[%s21189_s8 + $0x1960] ss:$16 sps:$4 sm:$0xff]  }
 0x1e3   : > { %13554 = vmatpush1.bf16.msra.mxu1 %v18481_v19  ;;  %13514 = vmatprep.subr.bf16.mxu0 %v18486_v21  ;;  %v18529_v19 = vld [vmem:[%s21189_s8 + $0x1b60] ss:$16 sps:$4 sm:$0xff]   ;;  %v18534_v21 = vld [vmem:[%s21189_s8 + $0x1944] ss:$16 sps:$4 sm:$0xff]  }
 0x1e4   : > { %13555 = vmatprep.subr.bf16.mxu1 %v18489_v40  ;;  %v18537_v40 = vld [vmem:[%s21189_s8 + $0x1b44] ss:$16 sps:$4 sm:$0xff]  }
 0x1e6   : > { %13515 = vmatpush1.bf16.msra.mxu0 %v18484_v27  ;;  %v2463_v27 = vcombine.high %v21744_v2, %v21744_v2  ;;  %v18538_v2 = vld [vmem:[%s21189_s8 + $0x1920] ss:$16 sps:$4 sm:$0xff]  }
 0x1e7   : > { %13556 = vmatpush1.bf16.msra.mxu1 %v18487_v28  ;;  %13516 = vmatprep.subr.bf16.mxu0 %v18492_v29  ;;  %v18532_v28 = vld [vmem:[%s21189_s8 + $0x1940] ss:$16 sps:$4 sm:$0xff]  }
 0x1e8   : > { %13557 = vmatprep.subr.bf16.mxu1 %v18495_v31  ;;  %v18535_v29 = vld [vmem:[%s21189_s8 + $0x1b40] ss:$16 sps:$4 sm:$0xff]   ;;  %v18540_v31 = vld [vmem:[%s21189_s8 + $0x1924] ss:$16 sps:$4 sm:$0xff]  }
 0x1ea   : > { %13517 = vmatpush1.bf16.msra.mxu0 %v18490_v36  ;;  %v18543_v36 = vld [vmem:[%s21189_s8 + $0x1b24] ss:$16 sps:$4 sm:$0xff]  }
 0x1eb   : > { %13558 = vmatpush1.bf16.msra.mxu1 %v18493_v37  ;;  %13518 = vmatprep.subr.bf16.mxu0 %v18498_v38  ;;  %v21848_v37 = vrot.slane %v2463_v27, %v21248_v49  ;;  %v18541_v38 = vld [vmem:[%s21189_s8 + $0x1b20] ss:$16 sps:$4 sm:$0xff]  }
 0x1ec   : > { %13559 = vmatprep.subr.bf16.mxu1 %v18501_v39  ;;  %v18546_v39 = vld [vmem:[%s21189_s8 + $0x1904] ss:$16 sps:$4 sm:$0xff]   ;;  %v18562_v27 = vld [vmem:[%s21189_s8 + $0x1ca0] ss:$16 sps:$4 sm:$0xff]  }
 0x1ee   : > { %13519 = vmatpush1.bf16.msra.mxu0 %v18496_v32  ;;  %v18549_v32 = vld [vmem:[%s21189_s8 + $0x1b04] ss:$16 sps:$4 sm:$0xff]  }
 0x1ef   : > { %13560 = vmatpush1.bf16.msra.mxu1 %v18499_v47  ;;  %13520 = vmatprep.subr.bf16.mxu0 %v18504_v48  ;;  %v2479_v47 = vcombine.high %v21848_v37, %v21848_v37  ;;  %v21858_v48 = vrot.slane %v21752_v9, %v21248_v49 }
 0x1f0   : > { %13561 = vmatprep.subr.bf16.mxu1 %v18507_v51  ;;  %v18544_v51 = vld [vmem:[%s21189_s8 + $0x1900] ss:$16 sps:$4 sm:$0xff]  }
 0x1f1   : > { %v21871_v9 = vcombine.high %v21858_v48, %v21858_v48 }
 0x1f2   : > { %13521 = vmatpush2.bf16.msra.mxu0 %v18502_v46  ;;  %v18547_v46 = vld [vmem:[%s21189_s8 + $0x1b00] ss:$16 sps:$4 sm:$0xff]  }
 0x1f3   : > { %13562 = vmatpush2.bf16.msra.mxu1 %v18505_v52  ;;  %13522 = vmatprep.subr.bf16.mxu0 %v18510_v56  ;;  %v18552_v52 = vld [vmem:[%s21189_s8 + $0x1ce4] ss:$16 sps:$4 sm:$0xff]  }
 0x1f4   : > { %13563 = vmatprep.subr.bf16.mxu1 %v18513_v35  ;;  %v18555_v56 = vld [vmem:[%s21189_s8 + $0x1ee4] ss:$16 sps:$4 sm:$0xff]   ;;  %v18550_v35 = vld [vmem:[%s21189_s8 + $0x1ce0] ss:$16 sps:$4 sm:$0xff]  }
 0x1f6   : > { %13523 = vmatpush2.bf16.msra.mxu0 %v18508_v58  ;;  %v18553_v58 = vld [vmem:[%s21189_s8 + $0x1ee0] ss:$16 sps:$4 sm:$0xff]  }
 0x1f7   : > { %13564 = vmatpush2.bf16.msra.mxu1 %v18511_v61  ;;  %13524 = vmatprep.subr.bf16.mxu0 %v18516_v45  ;;  %v21867_v61 = vrot.slane %v2479_v47, %v21248_v49  ;;  %v18558_v45 = vld [vmem:[%s21189_s8 + $0x1cc4] ss:$16 sps:$4 sm:$0xff]  }
 0x1f8   : > { %13565 = vmatprep.subr.bf16.mxu1 %v18519_v62  ;;  %v18561_v62 = vld [vmem:[%s21189_s8 + $0x1ec4] ss:$16 sps:$4 sm:$0xff]  }
 0x1f9   : > { %v18576_v47 = vld [vmem:[%s21189_s8 + $0x1c64] ss:$16 sps:$4 sm:$0xff]  }
 0x1fa   : > { %13525 = vmatpush2.bf16.msra.mxu0 %v18514_v3  ;;  %v18556_v3 = vld [vmem:[%s21189_s8 + $0x1cc0] ss:$16 sps:$4 sm:$0xff]  }
 0x1fb   : > { %13566 = vmatpush2.bf16.msra.mxu1 %v18517_v5  ;;  %13526 = vmatprep.subr.bf16.mxu0 %v18522_v53  ;;  %v18559_v5 = vld [vmem:[%s21189_s8 + $0x1ec0] ss:$16 sps:$4 sm:$0xff]   ;;  %v21879_v53 = vcombine.high %v21867_v61, %v21867_v61 }
 0x1fc   : > { %13567 = vmatprep.subr.bf16.mxu1 %v18525_v1 }
 0x1fe   : > { %13527 = vmatpush2.bf16.msra.mxu0 %v18520_v8 }
 0x1ff   : > { %13568 = vmatpush2.bf16.msra.mxu1 %v18523_v10  ;;  %13528 = vmatprep.subr.bf16.mxu0 %v18528_v11 }
 0x200   : > { %13569 = vmatprep.subr.bf16.mxu1 %v18531_v14 }
 0x202   : > { %13529 = vmatpush2.bf16.msra.mxu0 %v18526_v16  ;;  %v18564_v16 = vld [vmem:[%s21189_s8 + $0x1ca4] ss:$16 sps:$4 sm:$0xff]  }
 0x203   : > { %13570 = vmatpush2.bf16.msra.mxu1 %v18529_v19  ;;  %13530 = vmatprep.subr.bf16.mxu0 %v18534_v21  ;;  %v18567_v19 = vld [vmem:[%s21189_s8 + $0x1ea4] ss:$16 sps:$4 sm:$0xff]  }
 0x204   : > { %13571 = vmatprep.subr.bf16.mxu1 %v18537_v40 }
 0x206   : > { %13531 = vmatpush2.bf16.msra.mxu0 %v18532_v28  ;;  %v18565_v28 = vld [vmem:[%s21189_s8 + $0x1ea0] ss:$16 sps:$4 sm:$0xff]  }
 0x207   : > { %13572 = vmatpush2.bf16.msra.mxu1 %v18535_v29  ;;  %13532 = vmatprep.subr.bf16.mxu0 %v18540_v31 }
 0x208   : > { %13573 = vmatprep.subr.bf16.mxu1 %v18543_v36 }
 0x20a   : > { %13533 = vmatpush2.bf16.msra.mxu0 %v18538_v2 }
 0x20b   : > { %13574 = vmatpush2.bf16.msra.mxu1 %v18541_v38  ;;  %13534 = vmatprep.subr.bf16.mxu0 %v18546_v39  ;;  %v18573_v38 = vld [vmem:[%s21189_s8 + $0x1e84] ss:$16 sps:$4 sm:$0xff]   ;;  %v18568_v39 = vld [vmem:[%s21189_s8 + $0x1c80] ss:$16 sps:$4 sm:$0xff]  }
 0x20c   : > { %13575 = vmatprep.subr.bf16.mxu1 %v18549_v32  ;;  %v18571_v32 = vld [vmem:[%s21189_s8 + $0x1e80] ss:$16 sps:$4 sm:$0xff]  }
 0x20e   : > { %13535 = vmatpush2.bf16.msra.mxu0 %v18544_v51  ;;  %v18579_v51 = vld [vmem:[%s21189_s8 + $0x1e64] ss:$16 sps:$4 sm:$0xff]  }
 0x20f   : > { %13576 = vmatpush2.bf16.msra.mxu1 %v18547_v46  ;;  %13586 = vmatprep.subr.bf16.mxu0 %v18552_v52  ;;  %v18574_v46 = vld [vmem:[%s21189_s8 + $0x1c60] ss:$16 sps:$4 sm:$0xff]  }
 0x210   : > { %13627 = vmatprep.subr.bf16.mxu1 %v18555_v56  ;;  %v18577_v52 = vld [vmem:[%s21189_s8 + $0x1e60] ss:$16 sps:$4 sm:$0xff]   ;;  %v18582_v56 = vld [vmem:[%s21189_s8 + $0x1c44] ss:$16 sps:$4 sm:$0xff]  }
 0x211   : > { %v13292_v1 = vpop.f32.mrf.mxu0  ;;  %13537 = vmatmul.mubr.bf16.vlgmr.msra.gmra.mxu0 %v21858_v48 }
 0x212   : > { %v13333_v8 = vpop.f32.mrf.mxu1  ;;  %13578 = vmatmul.mubr.bf16.vlgmr.msra.gmra.mxu1 %v21871_v9  ;;  %v13293_v10 = vadd.f32 %v13292_v1, %v21790_v57  ;;  %13587 = vmatpush1.bf16.msra.mxu0 %v18550_v35  ;;  %v18585_v35 = vld [vmem:[%s21189_s8 + $0x1e44] ss:$16 sps:$4 sm:$0xff]   ;;  %v18589_v1 = vld [vmem:[%s21189_s8 + $0x1e20] ss:$16 sps:$4 sm:$0xff]  }
 0x213   : > { %13628 = vmatpush1.bf16.msra.mxu1 %v18553_v58  ;;  %v13294_v11 = vpop.f32.mrf.mxu0  ;;  %13588 = vmatprep.subr.bf16.mxu0 %v18558_v45  ;;  %v18580_v58 = vld [vmem:[%s21189_s8 + $0x1c40] ss:$16 sps:$4 sm:$0xff]  }
 0x214   : > { %v13335_v14 = vpop.f32.mrf.mxu1  ;;  %13629 = vmatprep.subr.bf16.mxu1 %v18561_v62  ;;  %v21886_v21 = vadd.f32 %v13333_v8, %v13293_v10  ;;  %v13295_v40 = vadd.f32 %v13294_v11, %v21797_v63  ;;  %13618 = vmatprep.mubr.bf16.mxu0 %v21867_v61  ;;  %v18570_v63 = vld [vmem:[%s21189_s8 + $0x1c84] ss:$16 sps:$4 sm:$0xff]   ;;  %v18583_v45 = vld [vmem:[%s21189_s8 + $0x1e40] ss:$16 sps:$4 sm:$0xff]  }
 0x215   : > { %13659 = vmatprep.mubr.bf16.mxu1 %v21879_v53  ;;  %v13296_v57 = vpop.f32.mrf.mxu0  ;;  %v18588_v62 = vld [vmem:[%s21189_s8 + $0x1c24] ss:$16 sps:$4 sm:$0xff]   ;;  %v18592_v11 = vld [vmem:[%s21189_s8 + $0x1c00] ss:$16 sps:$4 sm:$0xff]  }
 0x216   : > { %v13337_v29 = vpop.f32.mrf.mxu1  ;;  %v21893_v31 = vadd.f32 %v13335_v14, %v13295_v40  ;;  %13589 = vmatpush1.bf16.msra.mxu0 %v18556_v3  ;;  %v18591_v3 = vld [vmem:[%s21189_s8 + $0x1e24] ss:$16 sps:$4 sm:$0xff]   ;;  %v18595_v14 = vld [vmem:[%s21189_s8 + $0x1e00] ss:$16 sps:$4 sm:$0xff]  }
 0x217   : > { %13630 = vmatpush1.bf16.msra.mxu1 %v18559_v5  ;;  %v13297_v36 = vpop.f32.mrf.mxu0  ;;  %13590 = vmatprep.subr.bf16.mxu0 %v18564_v16  ;;  %v18586_v5 = vld [vmem:[%s21189_s8 + $0x1c20] ss:$16 sps:$4 sm:$0xff]   ;;  %v18594_v8 = vld [vmem:[%s21189_s8 + $0x1c04] ss:$16 sps:$4 sm:$0xff]  }
 0x218   : > { %v13338_v2 = vpop.f32.mrf.mxu1  ;;  %13631 = vmatprep.subr.bf16.mxu1 %v18567_v19  ;;  %v18597_v10 = vld [vmem:[%s21189_s8 + $0x1e04] ss:$16 sps:$4 sm:$0xff]   ;;  %v18598_v40 = vld [vmem:[%s21189_s8 + $0x1de0] ss:$16 sps:$4 sm:$0xff]  }
 0x219   : > { %v18600_v16 = vld [vmem:[%s21189_s8 + $0x1de4] ss:$16 sps:$4 sm:$0xff]   ;;  %v18604_v29 = vld [vmem:[%s21189_s8 + $0x1dc0] ss:$16 sps:$4 sm:$0xff]  }
 0x21a   : > { %13591 = vmatpush1.bf16.msra.mxu0 %v18562_v27  ;;  %v18603_v19 = vld [vmem:[%s21189_s8 + $0x1fe4] ss:$16 sps:$4 sm:$0xff]   ;;  %v18601_v27 = vld [vmem:[%s21189_s8 + $0x1fe0] ss:$16 sps:$4 sm:$0xff]  }
 0x21b   : > { %13632 = vmatpush1.bf16.msra.mxu1 %v18565_v28  ;;  %13592 = vmatprep.subr.bf16.mxu0 %v18570_v63  ;;  %v18606_v28 = vld [vmem:[%s21189_s8 + $0x1dc4] ss:$16 sps:$4 sm:$0xff]   ;;  %v18607_v36 = vld [vmem:[%s21189_s8 + $0x1fc0] ss:$16 sps:$4 sm:$0xff]  }
 0x21c   : > { %13633 = vmatprep.subr.bf16.mxu1 %v18573_v38  ;;  %v18609_v57 = vld [vmem:[%s21189_s8 + $0x1fc4] ss:$16 sps:$4 sm:$0xff]   ;;  %v18610_v38 = vld [vmem:[%s21189_s8 + $0x1da0] ss:$16 sps:$4 sm:$0xff]  }
 0x21d   : > { %v18612_v2 = vld [vmem:[%s21189_s8 + $0x1da4] ss:$16 sps:$4 sm:$0xff]  }
 0x21e   : > { %13593 = vmatpush1.bf16.msra.mxu0 %v18568_v39  ;;  %v18615_v63 = vld [vmem:[%s21189_s8 + $0x1fa4] ss:$16 sps:$4 sm:$0xff]   ;;  %v18613_v39 = vld [vmem:[%s21189_s8 + $0x1fa0] ss:$16 sps:$4 sm:$0xff]  }
 0x21f   : > { %13634 = vmatpush1.bf16.msra.mxu1 %v18571_v32  ;;  %13594 = vmatprep.subr.bf16.mxu0 %v18576_v47  ;;  %v18618_v32 = vld [vmem:[%s21189_s8 + $0x1d84] ss:$16 sps:$4 sm:$0xff]  }
 0x220   : > { %13635 = vmatprep.subr.bf16.mxu1 %v18579_v51  ;;  %v18621_v47 = vld [vmem:[%s21189_s8 + $0x1f84] ss:$16 sps:$4 sm:$0xff]   ;;  %v18616_v51 = vld [vmem:[%s21189_s8 + $0x1d80] ss:$16 sps:$4 sm:$0xff]  }
 0x222   : > { %13595 = vmatpush1.bf16.msra.mxu0 %v18574_v46  ;;  %v18619_v46 = vld [vmem:[%s21189_s8 + $0x1f80] ss:$16 sps:$4 sm:$0xff]  }
 0x223   : > { %13636 = vmatpush1.bf16.msra.mxu1 %v18577_v52  ;;  %13596 = vmatprep.subr.bf16.mxu0 %v18582_v56  ;;  %v18624_v52 = vld [vmem:[%s21189_s8 + $0x1d64] ss:$16 sps:$4 sm:$0xff]  }
 0x224   : > { %13637 = vmatprep.subr.bf16.mxu1 %v18585_v35  ;;  %v18627_v56 = vld [vmem:[%s21189_s8 + $0x1f64] ss:$16 sps:$4 sm:$0xff]   ;;  %v18622_v35 = vld [vmem:[%s21189_s8 + $0x1d60] ss:$16 sps:$4 sm:$0xff]  }
 0x226   : > { %13597 = vmatpush1.bf16.msra.mxu0 %v18580_v58  ;;  %v18625_v58 = vld [vmem:[%s21189_s8 + $0x1f60] ss:$16 sps:$4 sm:$0xff]  }
 0x227   : > { %13638 = vmatpush1.bf16.msra.mxu1 %v18583_v45  ;;  %13598 = vmatprep.subr.bf16.mxu0 %v18588_v62  ;;  %v18630_v45 = vld [vmem:[%s21189_s8 + $0x1d44] ss:$16 sps:$4 sm:$0xff]  }
 0x228   : > { %13639 = vmatprep.subr.bf16.mxu1 %v18591_v3  ;;  %v18633_v62 = vld [vmem:[%s21189_s8 + $0x1f44] ss:$16 sps:$4 sm:$0xff]  }
 0x229   : > { %v21940_v3 = vld [vmem:[%s23947_s0 + $0x20] sm:$0xff] }
 0x22a   : > { %13599 = vmatpush1.bf16.msra.mxu0 %v18586_v5  ;;  %v18628_v5 = vld [vmem:[%s21189_s8 + $0x1d40] ss:$16 sps:$4 sm:$0xff]  }
 0x22b   : > { %13640 = vmatpush1.bf16.msra.mxu1 %v18589_v1  ;;  %13600 = vmatprep.subr.bf16.mxu0 %v18594_v8  ;;  %v18631_v1 = vld [vmem:[%s21189_s8 + $0x1f40] ss:$16 sps:$4 sm:$0xff]   ;;  %v18636_v8 = vld [vmem:[%s21189_s8 + $0x1d24] ss:$16 sps:$4 sm:$0xff]  }
 0x22c   : > { %13641 = vmatprep.subr.bf16.mxu1 %v18597_v10  ;;  %v18639_v10 = vld [vmem:[%s21189_s8 + $0x1f24] ss:$16 sps:$4 sm:$0xff]  }
 0x22e   : > { %13601 = vmatpush1.bf16.msra.mxu0 %v18592_v11  ;;  %v21948_v11 = vrot.slane %v21940_v3, %v21248_v49 }
 0x22f   : > { %13642 = vmatpush1.bf16.msra.mxu1 %v18595_v14  ;;  %13602 = vmatprep.subr.bf16.mxu0 %v18600_v16  ;;  %v18634_v14 = vld [vmem:[%s21189_s8 + $0x1d20] ss:$16 sps:$4 sm:$0xff]  }
 0x230   : > { %13643 = vmatprep.subr.bf16.mxu1 %v18603_v19  ;;  %v18637_v16 = vld [vmem:[%s21189_s8 + $0x1f20] ss:$16 sps:$4 sm:$0xff]   ;;  %v18642_v19 = vld [vmem:[%s21189_s8 + $0x1d04] ss:$16 sps:$4 sm:$0xff]  }
 0x232   : > { %13603 = vmatpush2.bf16.msra.mxu0 %v18598_v40  ;;  %v18645_v40 = vld [vmem:[%s21189_s8 + $0x1f04] ss:$16 sps:$4 sm:$0xff]  }
 0x233   : > { %13644 = vmatpush2.bf16.msra.mxu1 %v18601_v27  ;;  %13604 = vmatprep.subr.bf16.mxu0 %v18606_v28  ;;  %v2527_v27 = vcombine.high %v21948_v11, %v21948_v11  ;;  %v21958_v28 = vrot.slane %v21848_v37, %v21248_v49 }
 0x234   : > { %13645 = vmatprep.subr.bf16.mxu1 %v18609_v57  ;;  %v18640_v57 = vld [vmem:[%s21189_s8 + $0x1d00] ss:$16 sps:$4 sm:$0xff]  }
 0x235   : > { %v21971_v37 = vcombine.high %v21958_v28, %v21958_v28 }
 0x236   : > { %13605 = vmatpush2.bf16.msra.mxu0 %v18604_v29  ;;  %v18643_v29 = vld [vmem:[%s21189_s8 + $0x1f00] ss:$16 sps:$4 sm:$0xff]  }
 0x237   : > { %13646 = vmatpush2.bf16.msra.mxu1 %v18607_v36  ;;  %13606 = vmatprep.subr.bf16.mxu0 %v18612_v2  ;;  %v18649_v36 = vld [vmem:[%s21189_s8 + $0x20e4] ss:$16 sps:$4 sm:$0xff]  }
 0x238   : > { %13647 = vmatprep.subr.bf16.mxu1 %v18615_v63  ;;  %v18652_v2 = vld [vmem:[%s21189_s8 + $0x22e4] ss:$16 sps:$4 sm:$0xff]   ;;  %v18647_v63 = vld [vmem:[%s21189_s8 + $0x20e0] ss:$16 sps:$4 sm:$0xff]  }
 0x23a   : > { %13607 = vmatpush2.bf16.msra.mxu0 %v18610_v38  ;;  %v18650_v38 = vld [vmem:[%s21189_s8 + $0x22e0] ss:$16 sps:$4 sm:$0xff]  }
 0x23b   : > { %13648 = vmatpush2.bf16.msra.mxu1 %v18613_v39  ;;  %13608 = vmatprep.subr.bf16.mxu0 %v18618_v32  ;;  %v21967_v39 = vrot.slane %v2527_v27, %v21248_v49  ;;  %v18655_v32 = vld [vmem:[%s21189_s8 + $0x20c4] ss:$16 sps:$4 sm:$0xff]  }
 0x23c   : > { %13649 = vmatprep.subr.bf16.mxu1 %v18621_v47  ;;  %v18658_v47 = vld [vmem:[%s21189_s8 + $0x22c4] ss:$16 sps:$4 sm:$0xff]  }
 0x23e   : > { %13609 = vmatpush2.bf16.msra.mxu0 %v18616_v51  ;;  %v18653_v51 = vld [vmem:[%s21189_s8 + $0x20c0] ss:$16 sps:$4 sm:$0xff]  }
 0x23f   : > { %13650 = vmatpush2.bf16.msra.mxu1 %v18619_v46  ;;  %13610 = vmatprep.subr.bf16.mxu0 %v18624_v52  ;;  %v18656_v46 = vld [vmem:[%s21189_s8 + $0x22c0] ss:$16 sps:$4 sm:$0xff]   ;;  %v21979_v52 = vcombine.high %v21967_v39, %v21967_v39 }
 0x240   : > { %13651 = vmatprep.subr.bf16.mxu1 %v18627_v56 }
 0x242   : > { %13611 = vmatpush2.bf16.msra.mxu0 %v18622_v35 }
 0x243   : > { %13652 = vmatpush2.bf16.msra.mxu1 %v18625_v58  ;;  %13612 = vmatprep.subr.bf16.mxu0 %v18630_v45 }
 0x244   : > { %13653 = vmatprep.subr.bf16.mxu1 %v18633_v62 }
 0x246   : > { %13613 = vmatpush2.bf16.msra.mxu0 %v18628_v5  ;;  %v18661_v5 = vld [vmem:[%s21189_s8 + $0x20a4] ss:$16 sps:$4 sm:$0xff]  }
 0x247   : > { %13654 = vmatpush2.bf16.msra.mxu1 %v18631_v1  ;;  %13614 = vmatprep.subr.bf16.mxu0 %v18636_v8  ;;  %v18664_v1 = vld [vmem:[%s21189_s8 + $0x22a4] ss:$16 sps:$4 sm:$0xff]  }
 0x248   : > { %13655 = vmatprep.subr.bf16.mxu1 %v18639_v10 }
 0x24a   : > { %13615 = vmatpush2.bf16.msra.mxu0 %v18634_v14  ;;  %v18659_v14 = vld [vmem:[%s21189_s8 + $0x20a0] ss:$16 sps:$4 sm:$0xff]  }
 0x24b   : > { %13656 = vmatpush2.bf16.msra.mxu1 %v18637_v16  ;;  %13616 = vmatprep.subr.bf16.mxu0 %v18642_v19  ;;  %v18662_v16 = vld [vmem:[%s21189_s8 + $0x22a0] ss:$16 sps:$4 sm:$0xff]  }
 0x24c   : > { %13657 = vmatprep.subr.bf16.mxu1 %v18645_v40 }
 0x24e   : > { %13617 = vmatpush2.bf16.msra.mxu0 %v18640_v57 }
 0x24f   : > { %13658 = vmatpush2.bf16.msra.mxu1 %v18643_v29  ;;  %13668 = vmatprep.subr.bf16.mxu0 %v18649_v36  ;;  %v18670_v29 = vld [vmem:[%s21189_s8 + $0x2284] ss:$16 sps:$4 sm:$0xff]   ;;  %v18665_v36 = vld [vmem:[%s21189_s8 + $0x2080] ss:$16 sps:$4 sm:$0xff]  }
 0x250   : > { %13709 = vmatprep.subr.bf16.mxu1 %v18652_v2  ;;  %v18668_v2 = vld [vmem:[%s21189_s8 + $0x2280] ss:$16 sps:$4 sm:$0xff]  }
 0x251   : > { %v13374_v56 = vpop.f32.mrf.mxu0  ;;  %13619 = vmatmul.mubr.bf16.vlgmr.msra.gmra.mxu0 %v21958_v28 }
 0x252   : > { %v13415_v35 = vpop.f32.mrf.mxu1  ;;  %13660 = vmatmul.mubr.bf16.vlgmr.msra.gmra.mxu1 %v21971_v37  ;;  %v13375_v58 = vadd.f32 %v13374_v56, %v21886_v21  ;;  %13669 = vmatpush1.bf16.msra.mxu0 %v18647_v63  ;;  %v18673_v63 = vld [vmem:[%s21189_s8 + $0x2064] ss:$16 sps:$4 sm:$0xff]   ;;  %v18677_v56 = vld [vmem:[%s21189_s8 + $0x2040] ss:$16 sps:$4 sm:$0xff]  }
 0x253   : > { %13710 = vmatpush1.bf16.msra.mxu1 %v18650_v38  ;;  %v13376_v45 = vpop.f32.mrf.mxu0  ;;  %13670 = vmatprep.subr.bf16.mxu0 %v18655_v32  ;;  %v18676_v38 = vld [vmem:[%s21189_s8 + $0x2264] ss:$16 sps:$4 sm:$0xff]   ;;  %v18671_v32 = vld [vmem:[%s21189_s8 + $0x2060] ss:$16 sps:$4 sm:$0xff]  }
 0x254   : > { %v13417_v62 = vpop.f32.mrf.mxu1  ;;  %13711 = vmatprep.subr.bf16.mxu1 %v18658_v47  ;;  %v21986_v8 = vadd.f32 %v13415_v35, %v13375_v58  ;;  %v13377_v10 = vadd.f32 %v13376_v45, %v21893_v31  ;;  %13700 = vmatprep.mubr.bf16.mxu0 %v21967_v39  ;;  %v18667_v31 = vld [vmem:[%s21189_s8 + $0x2084] ss:$16 sps:$4 sm:$0xff]   ;;  %v18674_v47 = vld [vmem:[%s21189_s8 + $0x2260] ss:$16 sps:$4 sm:$0xff]  }
 0x255   : > { %13741 = vmatprep.mubr.bf16.mxu1 %v21979_v52  ;;  %v13378_v21 = vpop.f32.mrf.mxu0  ;;  %v18680_v35 = vld [vmem:[%s21189_s8 + $0x2240] ss:$16 sps:$4 sm:$0xff]   ;;  %v18685_v58 = vld [vmem:[%s21189_s8 + $0x2024] ss:$16 sps:$4 sm:$0xff]  }
 0x256   : > { %v13419_v19 = vpop.f32.mrf.mxu1  ;;  %v21993_v40 = vadd.f32 %v13417_v62, %v13377_v10  ;;  %13671 = vmatpush1.bf16.msra.mxu0 %v18653_v51  ;;  %v18679_v51 = vld [vmem:[%s21189_s8 + $0x2044] ss:$16 sps:$4 sm:$0xff]   ;;  %v18683_v62 = vld [vmem:[%s21189_s8 + $0x2020] ss:$16 sps:$4 sm:$0xff]  }
 0x257   : > { %13712 = vmatpush1.bf16.msra.mxu1 %v18656_v46  ;;  %v13379_v27 = vpop.f32.mrf.mxu0  ;;  %13672 = vmatprep.subr.bf16.mxu0 %v18661_v5  ;;  %v18682_v46 = vld [vmem:[%s21189_s8 + $0x2244] ss:$16 sps:$4 sm:$0xff]   ;;  %v18686_v5 = vld [vmem:[%s21189_s8 + $0x2220] ss:$16 sps:$4 sm:$0xff]  }
 0x258   : > { %v13420_v57 = vpop.f32.mrf.mxu1  ;;  %13713 = vmatprep.subr.bf16.mxu1 %v18664_v1  ;;  %v18688_v45 = vld [vmem:[%s21189_s8 + $0x2224] ss:$16 sps:$4 sm:$0xff]   ;;  %v18695_v27 = vld [vmem:[%s21189_s8 + $0x21e0] ss:$16 sps:$4 sm:$0xff]  }
 0x259   : > { %v18691_v1 = vld [vmem:[%s21189_s8 + $0x2004] ss:$16 sps:$4 sm:$0xff]   ;;  %v18698_v57 = vld [vmem:[%s21189_s8 + $0x23e0] ss:$16 sps:$4 sm:$0xff]  }
 0x25a   : > { %13673 = vmatpush1.bf16.msra.mxu0 %v18659_v14  ;;  %v18694_v10 = vld [vmem:[%s21189_s8 + $0x2204] ss:$16 sps:$4 sm:$0xff]   ;;  %v18689_v14 = vld [vmem:[%s21189_s8 + $0x2000] ss:$16 sps:$4 sm:$0xff]  }
 0x25b   : > { %13714 = vmatpush1.bf16.msra.mxu1 %v18662_v16  ;;  %13674 = vmatprep.subr.bf16.mxu0 %v18667_v31  ;;  %v18692_v16 = vld [vmem:[%s21189_s8 + $0x2200] ss:$16 sps:$4 sm:$0xff]   ;;  %v18697_v21 = vld [vmem:[%s21189_s8 + $0x21e4] ss:$16 sps:$4 sm:$0xff]  }
 0x25c   : > { %13715 = vmatprep.subr.bf16.mxu1 %v18670_v29  ;;  %v18700_v19 = vld [vmem:[%s21189_s8 + $0x23e4] ss:$16 sps:$4 sm:$0xff]  }
 0x25d   : > { %v18703_v31 = vld [vmem:[%s21189_s8 + $0x21c4] ss:$16 sps:$4 sm:$0xff]  }
 0x25e   : > { %13675 = vmatpush1.bf16.msra.mxu0 %v18665_v36  ;;  %v18706_v29 = vld [vmem:[%s21189_s8 + $0x23c4] ss:$16 sps:$4 sm:$0xff]   ;;  %v18701_v36 = vld [vmem:[%s21189_s8 + $0x21c0] ss:$16 sps:$4 sm:$0xff]  }
 0x25f   : > { %13716 = vmatpush1.bf16.msra.mxu1 %v18668_v2  ;;  %13676 = vmatprep.subr.bf16.mxu0 %v18673_v63  ;;  %v18704_v2 = vld [vmem:[%s21189_s8 + $0x23c0] ss:$16 sps:$4 sm:$0xff]   ;;  %v18709_v63 = vld [vmem:[%s21189_s8 + $0x21a4] ss:$16 sps:$4 sm:$0xff]  }
 0x260   : > { %13717 = vmatprep.subr.bf16.mxu1 %v18676_v38  ;;  %v18712_v38 = vld [vmem:[%s21189_s8 + $0x23a4] ss:$16 sps:$4 sm:$0xff]  }
 0x262   : > { %13677 = vmatpush1.bf16.msra.mxu0 %v18671_v32  ;;  %v18707_v32 = vld [vmem:[%s21189_s8 + $0x21a0] ss:$16 sps:$4 sm:$0xff]  }
 0x263   : > { %13718 = vmatpush1.bf16.msra.mxu1 %v18674_v47  ;;  %13678 = vmatprep.subr.bf16.mxu0 %v18679_v51  ;;  %v18710_v47 = vld [vmem:[%s21189_s8 + $0x23a0] ss:$16 sps:$4 sm:$0xff]   ;;  %v18715_v51 = vld [vmem:[%s21189_s8 + $0x2184] ss:$16 sps:$4 sm:$0xff]  }
 0x264   : > { %13719 = vmatprep.subr.bf16.mxu1 %v18682_v46  ;;  %v18718_v46 = vld [vmem:[%s21189_s8 + $0x2384] ss:$16 sps:$4 sm:$0xff]  }
 0x266   : > { %13679 = vmatpush1.bf16.msra.mxu0 %v18677_v56  ;;  %v18713_v56 = vld [vmem:[%s21189_s8 + $0x2180] ss:$16 sps:$4 sm:$0xff]  }
 0x267   : > { %13720 = vmatpush1.bf16.msra.mxu1 %v18680_v35  ;;  %13680 = vmatprep.subr.bf16.mxu0 %v18685_v58  ;;  %v18716_v35 = vld [vmem:[%s21189_s8 + $0x2380] ss:$16 sps:$4 sm:$0xff]   ;;  %v18721_v58 = vld [vmem:[%s21189_s8 + $0x2164] ss:$16 sps:$4 sm:$0xff]  }
 0x268   : > { %13721 = vmatprep.subr.bf16.mxu1 %v18688_v45  ;;  %v18724_v45 = vld [vmem:[%s21189_s8 + $0x2364] ss:$16 sps:$4 sm:$0xff]  }
 0x26a   : > { %13681 = vmatpush1.bf16.msra.mxu0 %v18683_v62  ;;  %v18719_v62 = vld [vmem:[%s21189_s8 + $0x2160] ss:$16 sps:$4 sm:$0xff]  }
 0x26b   : > { %13722 = vmatpush1.bf16.msra.mxu1 %v18686_v5  ;;  %13682 = vmatprep.subr.bf16.mxu0 %v18691_v1  ;;  %v18722_v5 = vld [vmem:[%s21189_s8 + $0x2360] ss:$16 sps:$4 sm:$0xff]   ;;  %v18727_v1 = vld [vmem:[%s21189_s8 + $0x2144] ss:$16 sps:$4 sm:$0xff]  }
 0x26c   : > { %13723 = vmatprep.subr.bf16.mxu1 %v18694_v10  ;;  %v18730_v10 = vld [vmem:[%s21189_s8 + $0x2344] ss:$16 sps:$4 sm:$0xff]  }
 0x26e   : > { %13683 = vmatpush1.bf16.msra.mxu0 %v18689_v14  ;;  %v2512_v14 = vcombine.high %v21940_v3, %v21940_v3  ;;  %v18731_v3 = vld [vmem:[%s21189_s8 + $0x2120] ss:$16 sps:$4 sm:$0xff]  }
 0x26f   : > { %13724 = vmatpush1.bf16.msra.mxu1 %v18692_v16  ;;  %13684 = vmatprep.subr.bf16.mxu0 %v18697_v21  ;;  %v18725_v16 = vld [vmem:[%s21189_s8 + $0x2140] ss:$16 sps:$4 sm:$0xff]  }
 0x270   : > { %13725 = vmatprep.subr.bf16.mxu1 %v18700_v19  ;;  %v18728_v21 = vld [vmem:[%s21189_s8 + $0x2340] ss:$16 sps:$4 sm:$0xff]   ;;  %v18733_v19 = vld [vmem:[%s21189_s8 + $0x2124] ss:$16 sps:$4 sm:$0xff]  }
 0x272   : > { %13685 = vmatpush2.bf16.msra.mxu0 %v18695_v27  ;;  %v18736_v27 = vld [vmem:[%s21189_s8 + $0x2324] ss:$16 sps:$4 sm:$0xff]  }
 0x273   : > { %13726 = vmatpush2.bf16.msra.mxu1 %v18698_v57  ;;  %13686 = vmatprep.subr.bf16.mxu0 %v18703_v31  ;;  %v22044_v57 = vrot.slane %v2512_v14, %v21248_v49  ;;  %v18734_v31 = vld [vmem:[%s21189_s8 + $0x2320] ss:$16 sps:$4 sm:$0xff]  }
 0x274   : > { %13727 = vmatprep.subr.bf16.mxu1 %v18706_v29  ;;  %v18739_v29 = vld [vmem:[%s21189_s8 + $0x2104] ss:$16 sps:$4 sm:$0xff]  }
 0x276   : > { %13687 = vmatpush2.bf16.msra.mxu0 %v18701_v36  ;;  %v18742_v36 = vld [vmem:[%s21189_s8 + $0x2304] ss:$16 sps:$4 sm:$0xff]  }
 0x277   : > { %13728 = vmatpush2.bf16.msra.mxu1 %v18704_v2  ;;  %13688 = vmatprep.subr.bf16.mxu0 %v18709_v63  ;;  %v2528_v2 = vcombine.high %v22044_v57, %v22044_v57  ;;  %v22054_v63 = vrot.slane %v21948_v11, %v21248_v49 }
 0x278   : > { %13729 = vmatprep.subr.bf16.mxu1 %v18712_v38  ;;  %v18737_v38 = vld [vmem:[%s21189_s8 + $0x2100] ss:$16 sps:$4 sm:$0xff]  }
 0x279   : > { %v22067_v11 = vcombine.high %v22054_v63, %v22054_v63 }
 0x27a   : > { %13689 = vmatpush2.bf16.msra.mxu0 %v18707_v32  ;;  %v18740_v32 = vld [vmem:[%s21189_s8 + $0x2300] ss:$16 sps:$4 sm:$0xff]  }
 0x27b   : > { %13730 = vmatpush2.bf16.msra.mxu1 %v18710_v47  ;;  %13690 = vmatprep.subr.bf16.mxu0 %v18715_v51  ;;  %v18745_v47 = vld [vmem:[%s21189_s8 + $0x24e4] ss:$16 sps:$4 sm:$0xff]  }
 0x27c   : > { %13731 = vmatprep.subr.bf16.mxu1 %v18718_v46  ;;  %v18748_v51 = vld [vmem:[%s21189_s8 + $0x26e4] ss:$16 sps:$4 sm:$0xff]   ;;  %v18743_v46 = vld [vmem:[%s21189_s8 + $0x24e0] ss:$16 sps:$4 sm:$0xff]  }
 0x27e   : > { %13691 = vmatpush2.bf16.msra.mxu0 %v18713_v56  ;;  %v18746_v56 = vld [vmem:[%s21189_s8 + $0x26e0] ss:$16 sps:$4 sm:$0xff]  }
 0x27f   : > { %13732 = vmatpush2.bf16.msra.mxu1 %v18716_v35  ;;  %13692 = vmatprep.subr.bf16.mxu0 %v18721_v58  ;;  %v22063_v35 = vrot.slane %v2528_v2, %v21248_v49  ;;  %v18751_v58 = vld [vmem:[%s21189_s8 + $0x24c4] ss:$16 sps:$4 sm:$0xff]   ;;  %v18758_v2 = vld [vmem:[%s21189_s8 + $0x26a0] ss:$16 sps:$4 sm:$0xff]  }
 0x280   : > { %13733 = vmatprep.subr.bf16.mxu1 %v18724_v45  ;;  %v18754_v45 = vld [vmem:[%s21189_s8 + $0x26c4] ss:$16 sps:$4 sm:$0xff]  }
 0x282   : > { %13693 = vmatpush2.bf16.msra.mxu0 %v18719_v62  ;;  %v18749_v62 = vld [vmem:[%s21189_s8 + $0x24c0] ss:$16 sps:$4 sm:$0xff]  }
 0x283   : > { %13734 = vmatpush2.bf16.msra.mxu1 %v18722_v5  ;;  %13694 = vmatprep.subr.bf16.mxu0 %v18727_v1  ;;  %v18752_v5 = vld [vmem:[%s21189_s8 + $0x26c0] ss:$16 sps:$4 sm:$0xff]   ;;  %v22075_v1 = vcombine.high %v22063_v35, %v22063_v35 }
 0x284   : > { %13735 = vmatprep.subr.bf16.mxu1 %v18730_v10 }
 0x286   : > { %13695 = vmatpush2.bf16.msra.mxu0 %v18725_v16 }
 0x287   : > { %13736 = vmatpush2.bf16.msra.mxu1 %v18728_v21  ;;  %13696 = vmatprep.subr.bf16.mxu0 %v18733_v19 }
 0x288   : > { %13737 = vmatprep.subr.bf16.mxu1 %v18736_v27  ;;  %v18757_v27 = vld [vmem:[%s21189_s8 + $0x24a4] ss:$16 sps:$4 sm:$0xff]  }
 0x28a   : > { %13697 = vmatpush2.bf16.msra.mxu0 %v18731_v3  ;;  %v18760_v3 = vld [vmem:[%s21189_s8 + $0x26a4] ss:$16 sps:$4 sm:$0xff]  }
 0x28b   : > { %13738 = vmatpush2.bf16.msra.mxu1 %v18734_v31  ;;  %13698 = vmatprep.subr.bf16.mxu0 %v18739_v29 }
 0x28c   : > { %13739 = vmatprep.subr.bf16.mxu1 %v18742_v36  ;;  %v18755_v36 = vld [vmem:[%s21189_s8 + $0x24a0] ss:$16 sps:$4 sm:$0xff]  }
 0x28e   : > { %13699 = vmatpush2.bf16.msra.mxu0 %v18737_v38 }
 0x28f   : > { %13740 = vmatpush2.bf16.msra.mxu1 %v18740_v32  ;;  %13750 = vmatprep.subr.bf16.mxu0 %v18745_v47 }
 0x290   : > { %13791 = vmatprep.subr.bf16.mxu1 %v18748_v51 }
 0x291   : > { %v13456_v10 = vpop.f32.mrf.mxu0  ;;  %13701 = vmatmul.mubr.bf16.vlgmr.msra.gmra.mxu0 %v22054_v63 }
 0x292   : > { %v13497_v14 = vpop.f32.mrf.mxu1  ;;  %13742 = vmatmul.mubr.bf16.vlgmr.msra.gmra.mxu1 %v22067_v11  ;;  %v13457_v16 = vadd.f32 %v13456_v10, %v21986_v8  ;;  %13751 = vmatpush1.bf16.msra.mxu0 %v18743_v46  ;;  %v18766_v46 = vld [vmem:[%s21189_s8 + $0x2684] ss:$16 sps:$4 sm:$0xff]   ;;  %v18770_v10 = vld [vmem:[%s21189_s8 + $0x2660] ss:$16 sps:$4 sm:$0xff]  }
 0x293   : > { %13792 = vmatpush1.bf16.msra.mxu1 %v18746_v56  ;;  %v13458_v21 = vpop.f32.mrf.mxu0  ;;  %13752 = vmatprep.subr.bf16.mxu0 %v18751_v58  ;;  %v18761_v56 = vld [vmem:[%s21189_s8 + $0x2480] ss:$16 sps:$4 sm:$0xff]  }
 0x294   : > { %v13499_v19 = vpop.f32.mrf.mxu1  ;;  %13793 = vmatprep.subr.bf16.mxu1 %v18754_v45  ;;  %v22082_v31 = vadd.f32 %v13497_v14, %v13457_v16  ;;  %v13459_v29 = vadd.f32 %v13458_v21, %v21993_v40  ;;  %13782 = vmatprep.mubr.bf16.mxu0 %v22063_v35  ;;  %v18763_v40 = vld [vmem:[%s21189_s8 + $0x2484] ss:$16 sps:$4 sm:$0xff]   ;;  %v18764_v58 = vld [vmem:[%s21189_s8 + $0x2680] ss:$16 sps:$4 sm:$0xff]  }
 0x295   : > { %13823 = vmatprep.mubr.bf16.mxu1 %v22075_v1  ;;  %v13460_v8 = vpop.f32.mrf.mxu0  ;;  %v18769_v45 = vld [vmem:[%s21189_s8 + $0x2464] ss:$16 sps:$4 sm:$0xff]   ;;  %v18773_v21 = vld [vmem:[%s21189_s8 + $0x2440] ss:$16 sps:$4 sm:$0xff]  }
 0x296   : > { %v13501_v38 = vpop.f32.mrf.mxu1  ;;  %v22089_v32 = vadd.f32 %v13499_v19, %v13459_v29  ;;  %13753 = vmatpush1.bf16.msra.mxu0 %v18749_v62  ;;  %v18772_v62 = vld [vmem:[%s21189_s8 + $0x2664] ss:$16 sps:$4 sm:$0xff]   ;;  %v18776_v19 = vld [vmem:[%s21189_s8 + $0x2640] ss:$16 sps:$4 sm:$0xff]  }
 0x297   : > { %13794 = vmatpush1.bf16.msra.mxu1 %v18752_v5  ;;  %v13461_v47 = vpop.f32.mrf.mxu0  ;;  %13754 = vmatprep.subr.bf16.mxu0 %v18757_v27  ;;  %v18767_v5 = vld [vmem:[%s21189_s8 + $0x2460] ss:$16 sps:$4 sm:$0xff]   ;;  %v18775_v14 = vld [vmem:[%s21189_s8 + $0x2444] ss:$16 sps:$4 sm:$0xff]  }
 0x298   : > { %v13502_v51 = vpop.f32.mrf.mxu1  ;;  %13795 = vmatprep.subr.bf16.mxu1 %v18760_v3  ;;  %v18778_v16 = vld [vmem:[%s21189_s8 + $0x2644] ss:$16 sps:$4 sm:$0xff]   ;;  %v18779_v29 = vld [vmem:[%s21189_s8 + $0x2420] ss:$16 sps:$4 sm:$0xff]  }
 0x299   : > { %v18781_v27 = vld [vmem:[%s21189_s8 + $0x2424] ss:$16 sps:$4 sm:$0xff]   ;;  %v18785_v38 = vld [vmem:[%s21189_s8 + $0x2400] ss:$16 sps:$4 sm:$0xff]  }
 0x29a   : > { %13755 = vmatpush1.bf16.msra.mxu0 %v18755_v36  ;;  %v18784_v3 = vld [vmem:[%s21189_s8 + $0x2624] ss:$16 sps:$4 sm:$0xff]   ;;  %v18782_v36 = vld [vmem:[%s21189_s8 + $0x2620] ss:$16 sps:$4 sm:$0xff]  }
 0x29b   : > { %13796 = vmatpush1.bf16.msra.mxu1 %v18758_v2  ;;  %13756 = vmatprep.subr.bf16.mxu0 %v18763_v40  ;;  %v18787_v2 = vld [vmem:[%s21189_s8 + $0x2404] ss:$16 sps:$4 sm:$0xff]   ;;  %v18788_v47 = vld [vmem:[%s21189_s8 + $0x2600] ss:$16 sps:$4 sm:$0xff]  }
 0x29c   : > { %13797 = vmatprep.subr.bf16.mxu1 %v18766_v46  ;;  %v18790_v8 = vld [vmem:[%s21189_s8 + $0x2604] ss:$16 sps:$4 sm:$0xff]   ;;  %v18791_v46 = vld [vmem:[%s21189_s8 + $0x25e0] ss:$16 sps:$4 sm:$0xff]  }
 0x29d   : > { %v18793_v51 = vld [vmem:[%s21189_s8 + $0x25e4] ss:$16 sps:$4 sm:$0xff]  }
 0x29e   : > { %13757 = vmatpush1.bf16.msra.mxu0 %v18761_v56  ;;  %v18796_v40 = vld [vmem:[%s21189_s8 + $0x27e4] ss:$16 sps:$4 sm:$0xff]   ;;  %v18794_v56 = vld [vmem:[%s21189_s8 + $0x27e0] ss:$16 sps:$4 sm:$0xff]  }
 0x29f   : > { %13798 = vmatpush1.bf16.msra.mxu1 %v18764_v58  ;;  %13758 = vmatprep.subr.bf16.mxu0 %v18769_v45  ;;  %v18799_v58 = vld [vmem:[%s21189_s8 + $0x25c4] ss:$16 sps:$4 sm:$0xff]  }
 0x2a0   : > { %13799 = vmatprep.subr.bf16.mxu1 %v18772_v62  ;;  %v18802_v45 = vld [vmem:[%s21189_s8 + $0x27c4] ss:$16 sps:$4 sm:$0xff]   ;;  %v18797_v62 = vld [vmem:[%s21189_s8 + $0x25c0] ss:$16 sps:$4 sm:$0xff]  }
 0x2a2   : > { %13759 = vmatpush1.bf16.msra.mxu0 %v18767_v5  ;;  %v18800_v5 = vld [vmem:[%s21189_s8 + $0x27c0] ss:$16 sps:$4 sm:$0xff]  }
 0x2a3   : > { %13800 = vmatpush1.bf16.msra.mxu1 %v18770_v10  ;;  %13760 = vmatprep.subr.bf16.mxu0 %v18775_v14  ;;  %v18805_v10 = vld [vmem:[%s21189_s8 + $0x25a4] ss:$16 sps:$4 sm:$0xff]  }
 0x2a4   : > { %13801 = vmatprep.subr.bf16.mxu1 %v18778_v16  ;;  %v18808_v14 = vld [vmem:[%s21189_s8 + $0x27a4] ss:$16 sps:$4 sm:$0xff]   ;;  %v18803_v16 = vld [vmem:[%s21189_s8 + $0x25a0] ss:$16 sps:$4 sm:$0xff]  }
 0x2a6   : > { %13761 = vmatpush1.bf16.msra.mxu0 %v18773_v21  ;;  %v18806_v21 = vld [vmem:[%s21189_s8 + $0x27a0] ss:$16 sps:$4 sm:$0xff]  }
 0x2a7   : > { %13802 = vmatpush1.bf16.msra.mxu1 %v18776_v19  ;;  %13762 = vmatprep.subr.bf16.mxu0 %v18781_v27  ;;  %v18811_v19 = vld [vmem:[%s21189_s8 + $0x2584] ss:$16 sps:$4 sm:$0xff]  }
 0x2a8   : > { %13803 = vmatprep.subr.bf16.mxu1 %v18784_v3  ;;  %v18814_v27 = vld [vmem:[%s21189_s8 + $0x2784] ss:$16 sps:$4 sm:$0xff]   ;;  %v18809_v3 = vld [vmem:[%s21189_s8 + $0x2580] ss:$16 sps:$4 sm:$0xff]  }
 0x2aa   : > { %13763 = vmatpush1.bf16.msra.mxu0 %v18779_v29  ;;  %v18812_v29 = vld [vmem:[%s21189_s8 + $0x2780] ss:$16 sps:$4 sm:$0xff]  }
 0x2ab   : > { %13804 = vmatpush1.bf16.msra.mxu1 %v18782_v36  ;;  %13764 = vmatprep.subr.bf16.mxu0 %v18787_v2  ;;  %v18817_v36 = vld [vmem:[%s21189_s8 + $0x2564] ss:$16 sps:$4 sm:$0xff]  }
 0x2ac   : > { %13805 = vmatprep.subr.bf16.mxu1 %v18790_v8  ;;  %v18820_v2 = vld [vmem:[%s21189_s8 + $0x2764] ss:$16 sps:$4 sm:$0xff]   ;;  %v18815_v8 = vld [vmem:[%s21189_s8 + $0x2560] ss:$16 sps:$4 sm:$0xff]  }
 0x2ae   : > { %13765 = vmatpush1.bf16.msra.mxu0 %v18785_v38  ;;  %v18818_v38 = vld [vmem:[%s21189_s8 + $0x2760] ss:$16 sps:$4 sm:$0xff]  }
 0x2af   : > { %13806 = vmatpush1.bf16.msra.mxu1 %v18788_v47  ;;  %13766 = vmatprep.subr.bf16.mxu0 %v18793_v51  ;;  %v18823_v47 = vld [vmem:[%s21189_s8 + $0x2544] ss:$16 sps:$4 sm:$0xff]  }
 0x2b0   : > { %13807 = vmatprep.subr.bf16.mxu1 %v18796_v40  ;;  %v18826_v51 = vld [vmem:[%s21189_s8 + $0x2744] ss:$16 sps:$4 sm:$0xff]   ;;  %v22136_v40 = vld [vmem:[%s23947_s0 + $0x28] sm:$0xff] }
 0x2b2   : > { %13767 = vmatpush2.bf16.msra.mxu0 %v18791_v46  ;;  %v18821_v46 = vld [vmem:[%s21189_s8 + $0x2540] ss:$16 sps:$4 sm:$0xff]  }
 0x2b3   : > { %13808 = vmatpush2.bf16.msra.mxu1 %v18794_v56  ;;  %13768 = vmatprep.subr.bf16.mxu0 %v18799_v58  ;;  %v18824_v56 = vld [vmem:[%s21189_s8 + $0x2740] ss:$16 sps:$4 sm:$0xff]   ;;  %v18829_v58 = vld [vmem:[%s21189_s8 + $0x2524] ss:$16 sps:$4 sm:$0xff]  }
 0x2b4   : > { %13809 = vmatprep.subr.bf16.mxu1 %v18802_v45  ;;  %v18832_v45 = vld [vmem:[%s21189_s8 + $0x2724] ss:$16 sps:$4 sm:$0xff]  }
 0x2b6   : > { %13769 = vmatpush2.bf16.msra.mxu0 %v18797_v62  ;;  %v22144_v62 = vrot.slane %v22136_v40, %v21248_v49 }
 0x2b7   : > { %13810 = vmatpush2.bf16.msra.mxu1 %v18800_v5  ;;  %13770 = vmatprep.subr.bf16.mxu0 %v18805_v10  ;;  %v18827_v5 = vld [vmem:[%s21189_s8 + $0x2520] ss:$16 sps:$4 sm:$0xff]  }
 0x2b8   : > { %13811 = vmatprep.subr.bf16.mxu1 %v18808_v14  ;;  %v18830_v10 = vld [vmem:[%s21189_s8 + $0x2720] ss:$16 sps:$4 sm:$0xff]   ;;  %v18835_v14 = vld [vmem:[%s21189_s8 + $0x2504] ss:$16 sps:$4 sm:$0xff]  }
 0x2ba   : > { %13771 = vmatpush2.bf16.msra.mxu0 %v18803_v16  ;;  %v18838_v16 = vld [vmem:[%s21189_s8 + $0x2704] ss:$16 sps:$4 sm:$0xff]  }
 0x2bb   : > { %13812 = vmatpush2.bf16.msra.mxu1 %v18806_v21  ;;  %13772 = vmatprep.subr.bf16.mxu0 %v18811_v19  ;;  %v2576_v21 = vcombine.high %v22144_v62, %v22144_v62  ;;  %v22154_v19 = vrot.slane %v22044_v57, %v21248_v49 }
 0x2bc   : > { %13813 = vmatprep.subr.bf16.mxu1 %v18814_v27  ;;  %v18833_v27 = vld [vmem:[%s21189_s8 + $0x2500] ss:$16 sps:$4 sm:$0xff]  }
 0x2bd   : > { %23980 = vst [vmem:[#allocation9_spill] sm:$0xff] %v22154_v19  ;;  %v22167_v57 = vcombine.high %v22154_v19, %v22154_v19 }
 0x2be   : > { %13773 = vmatpush2.bf16.msra.mxu0 %v18809_v3  ;;  %v18836_v3 = vld [vmem:[%s21189_s8 + $0x2700] ss:$16 sps:$4 sm:$0xff]  }
 0x2bf   : > { %13814 = vmatpush2.bf16.msra.mxu1 %v18812_v29  ;;  %13774 = vmatprep.subr.bf16.mxu0 %v18817_v36  ;;  %v18842_v29 = vld [vmem:[%s21189_s8 + $0x28e4] ss:$16 sps:$4 sm:$0xff]   ;;  %23982 = vst [vmem:[#allocation11_spill] sm:$0xff] %v22167_v57 }
 0x2c0   : > { %13815 = vmatprep.subr.bf16.mxu1 %v18820_v2  ;;  %v18845_v36 = vld [vmem:[%s21189_s8 + $0x2ae4] ss:$16 sps:$4 sm:$0xff]   ;;  %v18840_v2 = vld [vmem:[%s21189_s8 + $0x28e0] ss:$16 sps:$4 sm:$0xff]  }
 0x2c2   : > { %13775 = vmatpush2.bf16.msra.mxu0 %v18815_v8  ;;  %v18843_v8 = vld [vmem:[%s21189_s8 + $0x2ae0] ss:$16 sps:$4 sm:$0xff]  }
 0x2c3   : > { %13816 = vmatpush2.bf16.msra.mxu1 %v18818_v38  ;;  %13776 = vmatprep.subr.bf16.mxu0 %v18823_v47  ;;  %v22163_v38 = vrot.slane %v2576_v21, %v21248_v49  ;;  %v18848_v47 = vld [vmem:[%s21189_s8 + $0x28c4] ss:$16 sps:$4 sm:$0xff]  }
 0x2c4   : > { %13817 = vmatprep.subr.bf16.mxu1 %v18826_v51  ;;  %v18851_v51 = vld [vmem:[%s21189_s8 + $0x2ac4] ss:$16 sps:$4 sm:$0xff]  }
 0x2c5   : > { %23981 = vst [vmem:[#allocation10_spill] sm:$0xff] %v22163_v38  ;;  %v18854_v21 = vld [vmem:[%s21189_s8 + $0x28a4] ss:$16 sps:$4 sm:$0xff]  }
 0x2c6   : > { %13777 = vmatpush2.bf16.msra.mxu0 %v18821_v46  ;;  %v18846_v46 = vld [vmem:[%s21189_s8 + $0x28c0] ss:$16 sps:$4 sm:$0xff]  }
 0x2c7   : > { %13818 = vmatpush2.bf16.msra.mxu1 %v18824_v56  ;;  %13778 = vmatprep.subr.bf16.mxu0 %v18829_v58  ;;  %v18849_v56 = vld [vmem:[%s21189_s8 + $0x2ac0] ss:$16 sps:$4 sm:$0xff]   ;;  %v22175_v58 = vcombine.high %v22163_v38, %v22163_v38 }
 0x2c8   : > { %13819 = vmatprep.subr.bf16.mxu1 %v18832_v45 }
 0x2c9   : > { %23983 = vst [vmem:[#allocation12_spill] sm:$0xff] %v22175_v58 }
 0x2ca   : > { %13779 = vmatpush2.bf16.msra.mxu0 %v18827_v5 }
 0x2cb   : > { %13820 = vmatpush2.bf16.msra.mxu1 %v18830_v10  ;;  %13780 = vmatprep.subr.bf16.mxu0 %v18835_v14 }
 0x2cc   : > { %13821 = vmatprep.subr.bf16.mxu1 %v18838_v16 }
 0x2ce   : > { %13781 = vmatpush2.bf16.msra.mxu0 %v18833_v27  ;;  %v18857_v27 = vld [vmem:[%s21189_s8 + $0x2aa4] ss:$16 sps:$4 sm:$0xff]  }
 0x2cf   : > { %13822 = vmatpush2.bf16.msra.mxu1 %v18836_v3  ;;  %13832 = vmatprep.subr.bf16.mxu0 %v18842_v29 }
 0x2d0   : > { %13873 = vmatprep.subr.bf16.mxu1 %v18845_v36  ;;  %v18852_v36 = vld [vmem:[%s21189_s8 + $0x28a0] ss:$16 sps:$4 sm:$0xff]  }
 0x2d1   : > { %v13538_v45 = vpop.f32.mrf.mxu0  ;;  %13783 = vmatmul.mubr.bf16.vlgmr.msra.gmra.mxu0 %v22154_v19  ;;  %v18855_v19 = vld [vmem:[%s21189_s8 + $0x2aa0] ss:$16 sps:$4 sm:$0xff]  }
 0x2d2   : > { %v13579_v5 = vpop.f32.mrf.mxu1  ;;  %13824 = vmatmul.mubr.bf16.vlgmr.msra.gmra.mxu1 %v22167_v57  ;;  %v13539_v10 = vadd.f32 %v13538_v45, %v22082_v31  ;;  %13833 = vmatpush1.bf16.msra.mxu0 %v18840_v2  ;;  %v18863_v45 = vld [vmem:[%s21189_s8 + $0x2a84] ss:$16 sps:$4 sm:$0xff]   ;;  %v19045_v57 = vld [vmem:[%s21189_s8 + $0x30a0] ss:$16 sps:$4 sm:$0xff]  }
 0x2d3   : > { %13874 = vmatpush1.bf16.msra.mxu1 %v18843_v8  ;;  %v13540_v14 = vpop.f32.mrf.mxu0  ;;  %13834 = vmatprep.subr.bf16.mxu0 %v18848_v47 }
 0x2d4   : > { %v13581_v16 = vpop.f32.mrf.mxu1  ;;  %13875 = vmatprep.subr.bf16.mxu1 %v18851_v51  ;;  %v22182_v3 = vadd.f32 %v13579_v5, %v13539_v10  ;;  %v13541_v29 = vadd.f32 %v13540_v14, %v22089_v32  ;;  %13864 = vmatprep.mubr.bf16.mxu0 %v22163_v38  ;;  %v18860_v32 = vld [vmem:[%s21189_s8 + $0x2884] ss:$16 sps:$4 sm:$0xff]   ;;  %v18858_v5 = vld [vmem:[%s21189_s8 + $0x2880] ss:$16 sps:$4 sm:$0xff]  }
 0x2d5   : > { %13905 = vmatprep.mubr.bf16.mxu1 %v22175_v58  ;;  %v13542_v31 = vpop.f32.mrf.mxu0  ;;  %v18861_v10 = vld [vmem:[%s21189_s8 + $0x2a80] ss:$16 sps:$4 sm:$0xff]  }
 0x2d6   : > { %v13583_v2 = vpop.f32.mrf.mxu1  ;;  %v22189_v8 = vadd.f32 %v13581_v16, %v13541_v29  ;;  %13835 = vmatpush1.bf16.msra.mxu0 %v18846_v46  ;;  %v18866_v46 = vld [vmem:[%s21189_s8 + $0x2864] ss:$16 sps:$4 sm:$0xff]   ;;  %v18864_v14 = vld [vmem:[%s21189_s8 + $0x2860] ss:$16 sps:$4 sm:$0xff]  }
 0x2d7   : > { %13876 = vmatpush1.bf16.msra.mxu1 %v18849_v56  ;;  %v13543_v47 = vpop.f32.mrf.mxu0  ;;  %13836 = vmatprep.subr.bf16.mxu0 %v18854_v21  ;;  %v18869_v56 = vld [vmem:[%s21189_s8 + $0x2a64] ss:$16 sps:$4 sm:$0xff]   ;;  %v18867_v16 = vld [vmem:[%s21189_s8 + $0x2a60] ss:$16 sps:$4 sm:$0xff]  }
 0x2d8   : > { %v13584_v51 = vpop.f32.mrf.mxu1  ;;  %13877 = vmatprep.subr.bf16.mxu1 %v18857_v27  ;;  %v18872_v21 = vld [vmem:[%s21189_s8 + $0x2844] ss:$16 sps:$4 sm:$0xff]   ;;  %v18870_v27 = vld [vmem:[%s21189_s8 + $0x2840] ss:$16 sps:$4 sm:$0xff]  }
 0x2d9   : > { %v18873_v29 = vld [vmem:[%s21189_s8 + $0x2a40] ss:$16 sps:$4 sm:$0xff]   ;;  %v18881_v31 = vld [vmem:[%s21189_s8 + $0x2a24] ss:$16 sps:$4 sm:$0xff]  }
 0x2da   : > { %13837 = vmatpush1.bf16.msra.mxu0 %v18852_v36  ;;  %v18878_v36 = vld [vmem:[%s21189_s8 + $0x2824] ss:$16 sps:$4 sm:$0xff]   ;;  %v18876_v2 = vld [vmem:[%s21189_s8 + $0x2820] ss:$16 sps:$4 sm:$0xff]  }
 0x2db   : > { %13878 = vmatpush1.bf16.msra.mxu1 %v18855_v19  ;;  %13838 = vmatprep.subr.bf16.mxu0 %v18860_v32  ;;  %v18875_v19 = vld [vmem:[%s21189_s8 + $0x2a44] ss:$16 sps:$4 sm:$0xff]   ;;  %v18879_v47 = vld [vmem:[%s21189_s8 + $0x2a20] ss:$16 sps:$4 sm:$0xff]  }
 0x2dc   : > { %13879 = vmatprep.subr.bf16.mxu1 %v18863_v45  ;;  %v18884_v51 = vld [vmem:[%s21189_s8 + $0x2804] ss:$16 sps:$4 sm:$0xff]   ;;  %v18882_v45 = vld [vmem:[%s21189_s8 + $0x2800] ss:$16 sps:$4 sm:$0xff]  }
 0x2dd   : > { %v18887_v32 = vld [vmem:[%s21189_s8 + $0x2a04] ss:$16 sps:$4 sm:$0xff]   ;;  %v18948_v38 = vld [vmem:[%s21189_s8 + $0x2ca0] ss:$16 sps:$4 sm:$0xff]  }
 0x2de   : > { %13839 = vmatpush1.bf16.msra.mxu0 %v18858_v5  ;;  %v18885_v5 = vld [vmem:[%s21189_s8 + $0x2a00] ss:$16 sps:$4 sm:$0xff]  }
 0x2df   : > { %13880 = vmatpush1.bf16.msra.mxu1 %v18861_v10  ;;  %13840 = vmatprep.subr.bf16.mxu0 %v18866_v46  ;;  %v18890_v10 = vld [vmem:[%s21189_s8 + $0x29e4] ss:$16 sps:$4 sm:$0xff]  }
 0x2e0   : > { %13881 = vmatprep.subr.bf16.mxu1 %v18869_v56  ;;  %v18893_v46 = vld [vmem:[%s21189_s8 + $0x2be4] ss:$16 sps:$4 sm:$0xff]   ;;  %v18888_v56 = vld [vmem:[%s21189_s8 + $0x29e0] ss:$16 sps:$4 sm:$0xff]  }
 0x2e2   : > { %13841 = vmatpush1.bf16.msra.mxu0 %v18864_v14  ;;  %v18891_v14 = vld [vmem:[%s21189_s8 + $0x2be0] ss:$16 sps:$4 sm:$0xff]  }
 0x2e3   : > { %13882 = vmatpush1.bf16.msra.mxu1 %v18867_v16  ;;  %13842 = vmatprep.subr.bf16.mxu0 %v18872_v21  ;;  %v18896_v16 = vld [vmem:[%s21189_s8 + $0x29c4] ss:$16 sps:$4 sm:$0xff]  }
 0x2e4   : > { %13883 = vmatprep.subr.bf16.mxu1 %v18875_v19  ;;  %v18899_v21 = vld [vmem:[%s21189_s8 + $0x2bc4] ss:$16 sps:$4 sm:$0xff]   ;;  %v18894_v19 = vld [vmem:[%s21189_s8 + $0x29c0] ss:$16 sps:$4 sm:$0xff]  }
 0x2e6   : > { %13843 = vmatpush1.bf16.msra.mxu0 %v18870_v27  ;;  %v18897_v27 = vld [vmem:[%s21189_s8 + $0x2bc0] ss:$16 sps:$4 sm:$0xff]  }
 0x2e7   : > { %13884 = vmatpush1.bf16.msra.mxu1 %v18873_v29  ;;  %13844 = vmatprep.subr.bf16.mxu0 %v18878_v36  ;;  %v18902_v29 = vld [vmem:[%s21189_s8 + $0x29a4] ss:$16 sps:$4 sm:$0xff]  }
 0x2e8   : > { %13885 = vmatprep.subr.bf16.mxu1 %v18881_v31  ;;  %v18905_v36 = vld [vmem:[%s21189_s8 + $0x2ba4] ss:$16 sps:$4 sm:$0xff]   ;;  %v18900_v31 = vld [vmem:[%s21189_s8 + $0x29a0] ss:$16 sps:$4 sm:$0xff]  }
 0x2ea   : > { %13845 = vmatpush1.bf16.msra.mxu0 %v18876_v2  ;;  %v18903_v2 = vld [vmem:[%s21189_s8 + $0x2ba0] ss:$16 sps:$4 sm:$0xff]  }
 0x2eb   : > { %13886 = vmatpush1.bf16.msra.mxu1 %v18879_v47  ;;  %13846 = vmatprep.subr.bf16.mxu0 %v18884_v51  ;;  %v18908_v47 = vld [vmem:[%s21189_s8 + $0x2984] ss:$16 sps:$4 sm:$0xff]  }
 0x2ec   : > { %13887 = vmatprep.subr.bf16.mxu1 %v18887_v32  ;;  %v18911_v51 = vld [vmem:[%s21189_s8 + $0x2b84] ss:$16 sps:$4 sm:$0xff]   ;;  %v18906_v32 = vld [vmem:[%s21189_s8 + $0x2980] ss:$16 sps:$4 sm:$0xff]  }
 0x2ee   : > { %13847 = vmatpush1.bf16.msra.mxu0 %v18882_v45  ;;  %v18909_v45 = vld [vmem:[%s21189_s8 + $0x2b80] ss:$16 sps:$4 sm:$0xff]  }
 0x2ef   : > { %13888 = vmatpush1.bf16.msra.mxu1 %v18885_v5  ;;  %13848 = vmatprep.subr.bf16.mxu0 %v18890_v10  ;;  %v18914_v5 = vld [vmem:[%s21189_s8 + $0x2964] ss:$16 sps:$4 sm:$0xff]  }
 0x2f0   : > { %13889 = vmatprep.subr.bf16.mxu1 %v18893_v46  ;;  %v18917_v10 = vld [vmem:[%s21189_s8 + $0x2b64] ss:$16 sps:$4 sm:$0xff]   ;;  %v18912_v46 = vld [vmem:[%s21189_s8 + $0x2960] ss:$16 sps:$4 sm:$0xff]  }
 0x2f2   : > { %13849 = vmatpush2.bf16.msra.mxu0 %v18888_v56  ;;  %v18915_v56 = vld [vmem:[%s21189_s8 + $0x2b60] ss:$16 sps:$4 sm:$0xff]  }
 0x2f3   : > { %13890 = vmatpush2.bf16.msra.mxu1 %v18891_v14  ;;  %13850 = vmatprep.subr.bf16.mxu0 %v18896_v16  ;;  %v18920_v14 = vld [vmem:[%s21189_s8 + $0x2944] ss:$16 sps:$4 sm:$0xff]  }
 0x2f4   : > { %13891 = vmatprep.subr.bf16.mxu1 %v18899_v21  ;;  %v18923_v16 = vld [vmem:[%s21189_s8 + $0x2b44] ss:$16 sps:$4 sm:$0xff]   ;;  %v2561_v21 = vcombine.high %v22136_v40, %v22136_v40  ;;  %v18924_v40 = vld [vmem:[%s21189_s8 + $0x2920] ss:$16 sps:$4 sm:$0xff]  }
 0x2f6   : > { %13851 = vmatpush2.bf16.msra.mxu0 %v18894_v19  ;;  %v18918_v19 = vld [vmem:[%s21189_s8 + $0x2940] ss:$16 sps:$4 sm:$0xff]  }
 0x2f7   : > { %13892 = vmatpush2.bf16.msra.mxu1 %v18897_v27  ;;  %13852 = vmatprep.subr.bf16.mxu0 %v18902_v29  ;;  %v18921_v27 = vld [vmem:[%s21189_s8 + $0x2b40] ss:$16 sps:$4 sm:$0xff]   ;;  %v18926_v29 = vld [vmem:[%s21189_s8 + $0x2924] ss:$16 sps:$4 sm:$0xff]  }
 0x2f8   : > { %13893 = vmatprep.subr.bf16.mxu1 %v18905_v36  ;;  %v18929_v36 = vld [vmem:[%s21189_s8 + $0x2b24] ss:$16 sps:$4 sm:$0xff]  }
 0x2fa   : > { %13853 = vmatpush2.bf16.msra.mxu0 %v18900_v31  ;;  %v22240_v31 = vrot.slane %v2561_v21, %v21248_v49 }
 0x2fb   : > { %13894 = vmatpush2.bf16.msra.mxu1 %v18903_v2  ;;  %13854 = vmatprep.subr.bf16.mxu0 %v18908_v47  ;;  %v18927_v2 = vld [vmem:[%s21189_s8 + $0x2b20] ss:$16 sps:$4 sm:$0xff]   ;;  %v18932_v47 = vld [vmem:[%s21189_s8 + $0x2904] ss:$16 sps:$4 sm:$0xff]  }
 0x2fc   : > { %13895 = vmatprep.subr.bf16.mxu1 %v18911_v51  ;;  %v18935_v51 = vld [vmem:[%s21189_s8 + $0x2b04] ss:$16 sps:$4 sm:$0xff]  }
 0x2fe   : > { %13855 = vmatpush2.bf16.msra.mxu0 %v18906_v32  ;;  %v2577_v32 = vcombine.high %v22240_v31, %v22240_v31 }
 0x2ff   : > { %13896 = vmatpush2.bf16.msra.mxu1 %v18909_v45  ;;  %13856 = vmatprep.subr.bf16.mxu0 %v18914_v5  ;;  %v22250_v45 = vrot.slane %v22144_v62, %v21248_v49  ;;  %v18930_v5 = vld [vmem:[%s21189_s8 + $0x2900] ss:$16 sps:$4 sm:$0xff]  }
 0x300   : > { %13897 = vmatprep.subr.bf16.mxu1 %v18917_v10  ;;  %v18933_v10 = vld [vmem:[%s21189_s8 + $0x2b00] ss:$16 sps:$4 sm:$0xff]   ;;  %v22259_v21 = vrot.slane %v2577_v32, %v21248_v49 }
 0x301   : > { %23984 = vst [vmem:[#allocation13_spill] sm:$0xff] %v22250_v45  ;;  %v22263_v62 = vcombine.high %v22250_v45, %v22250_v45 }
 0x302   : > { %13857 = vmatpush2.bf16.msra.mxu0 %v18912_v46  ;;  %v18938_v46 = vld [vmem:[%s21189_s8 + $0x2ce4] ss:$16 sps:$4 sm:$0xff]   ;;  %23985 = vst [vmem:[#allocation14_spill] sm:$0xff] %v22259_v21 }
 0x303   : > { %13898 = vmatpush2.bf16.msra.mxu1 %v18915_v56  ;;  %13858 = vmatprep.subr.bf16.mxu0 %v18920_v14  ;;  %v18941_v56 = vld [vmem:[%s21189_s8 + $0x2ee4] ss:$16 sps:$4 sm:$0xff]   ;;  %v18936_v14 = vld [vmem:[%s21189_s8 + $0x2ce0] ss:$16 sps:$4 sm:$0xff]   ;;  %23986 = vst [vmem:[#allocation15_spill] sm:$0xff] %v22263_v62 }
 0x304   : > { %13899 = vmatprep.subr.bf16.mxu1 %v18923_v16  ;;  %v18939_v16 = vld [vmem:[%s21189_s8 + $0x2ee0] ss:$16 sps:$4 sm:$0xff]  }
 0x306   : > { %13859 = vmatpush2.bf16.msra.mxu0 %v18918_v19  ;;  %v18944_v19 = vld [vmem:[%s21189_s8 + $0x2cc4] ss:$16 sps:$4 sm:$0xff]  }
 0x307   : > { %13900 = vmatpush2.bf16.msra.mxu1 %v18921_v27  ;;  %13860 = vmatprep.subr.bf16.mxu0 %v18926_v29  ;;  %v18947_v27 = vld [vmem:[%s21189_s8 + $0x2ec4] ss:$16 sps:$4 sm:$0xff]   ;;  %v18942_v29 = vld [vmem:[%s21189_s8 + $0x2cc0] ss:$16 sps:$4 sm:$0xff]  }
 0x308   : > { %13901 = vmatprep.subr.bf16.mxu1 %v18929_v36  ;;  %v18945_v36 = vld [vmem:[%s21189_s8 + $0x2ec0] ss:$16 sps:$4 sm:$0xff]  }
 0x30a   : > { %13861 = vmatpush2.bf16.msra.mxu0 %v18924_v40  ;;  %v22271_v40 = vcombine.high %v22259_v21, %v22259_v21 }
 0x30b   : > { %13902 = vmatpush2.bf16.msra.mxu1 %v18927_v2  ;;  %13862 = vmatprep.subr.bf16.mxu0 %v18932_v47 }
 0x30c   : > { %13903 = vmatprep.subr.bf16.mxu1 %v18935_v51  ;;  %23987 = vst [vmem:[#allocation16_spill] sm:$0xff] %v22271_v40 }
 0x30e   : > { %13863 = vmatpush2.bf16.msra.mxu0 %v18930_v5 }
 0x30f   : > { %13904 = vmatpush2.bf16.msra.mxu1 %v18933_v10  ;;  %13914 = vmatprep.subr.bf16.mxu0 %v18938_v46  ;;  %v18950_v10 = vld [vmem:[%s21189_s8 + $0x2ca4] ss:$16 sps:$4 sm:$0xff]  }
 0x310   : > { %13955 = vmatprep.subr.bf16.mxu1 %v18941_v56  ;;  %v18953_v46 = vld [vmem:[%s21189_s8 + $0x2ea4] ss:$16 sps:$4 sm:$0xff]  }
 0x311   : > { %v13620_v2 = vpop.f32.mrf.mxu0  ;;  %13865 = vmatmul.mubr.bf16.vlgmr.msra.gmra.mxu0 %v22250_v45  ;;  %v18951_v45 = vld [vmem:[%s21189_s8 + $0x2ea0] ss:$16 sps:$4 sm:$0xff]  }
 0x312   : > { %v13661_v47 = vpop.f32.mrf.mxu1  ;;  %13906 = vmatmul.mubr.bf16.vlgmr.msra.gmra.mxu1 %v22263_v62  ;;  %v13621_v51 = vadd.f32 %v13620_v2, %v22182_v3  ;;  %13915 = vmatpush1.bf16.msra.mxu0 %v18936_v14  ;;  %v18959_v2 = vld [vmem:[%s21189_s8 + $0x2e84] ss:$16 sps:$4 sm:$0xff]  }
 0x313   : > { %13956 = vmatpush1.bf16.msra.mxu1 %v18939_v16  ;;  %v13622_v32 = vpop.f32.mrf.mxu0  ;;  %13916 = vmatprep.subr.bf16.mxu0 %v18944_v19 }
 0x314   : > { %v13663_v5 = vpop.f32.mrf.mxu1  ;;  %13957 = vmatprep.subr.bf16.mxu1 %v18947_v27  ;;  %v22278_v56 = vadd.f32 %v13661_v47, %v13621_v51  ;;  %v13623_v58 = vadd.f32 %v13622_v32, %v22189_v8  ;;  %13946 = vmatprep.mubr.bf16.mxu0 %v22259_v21  ;;  %v18956_v8 = vld [vmem:[%s21189_s8 + $0x2c84] ss:$16 sps:$4 sm:$0xff]   ;;  %v18954_v47 = vld [vmem:[%s21189_s8 + $0x2c80] ss:$16 sps:$4 sm:$0xff]  }
 0x315   : > { %13987 = vmatprep.mubr.bf16.mxu1 %v22271_v40  ;;  %v13624_v3 = vpop.f32.mrf.mxu0  ;;  %v18957_v51 = vld [vmem:[%s21189_s8 + $0x2e80] ss:$16 sps:$4 sm:$0xff]   ;;  %v19050_v40 = vld [vmem:[%s21189_s8 + $0x32a4] ss:$16 sps:$4 sm:$0xff]  }
 0x316   : > { %v13665_v14 = vpop.f32.mrf.mxu1  ;;  %v22285_v16 = vadd.f32 %v13663_v5, %v13623_v58  ;;  %13917 = vmatpush1.bf16.msra.mxu0 %v18942_v29  ;;  %v18962_v58 = vld [vmem:[%s21189_s8 + $0x2c64] ss:$16 sps:$4 sm:$0xff]   ;;  %v18963_v32 = vld [vmem:[%s21189_s8 + $0x2e60] ss:$16 sps:$4 sm:$0xff]  }
 0x317   : > { %13958 = vmatpush1.bf16.msra.mxu1 %v18945_v36  ;;  %v13625_v19 = vpop.f32.mrf.mxu0  ;;  %13918 = vmatprep.subr.bf16.mxu0 %v18950_v10  ;;  %v18965_v29 = vld [vmem:[%s21189_s8 + $0x2e64] ss:$16 sps:$4 sm:$0xff]   ;;  %v18960_v36 = vld [vmem:[%s21189_s8 + $0x2c60] ss:$16 sps:$4 sm:$0xff]  }
 0x318   : > { %v13666_v27 = vpop.f32.mrf.mxu1  ;;  %13959 = vmatprep.subr.bf16.mxu1 %v18953_v46  ;;  %v18966_v5 = vld [vmem:[%s21189_s8 + $0x2c40] ss:$16 sps:$4 sm:$0xff]   ;;  %v18974_v46 = vld [vmem:[%s21189_s8 + $0x2c24] ss:$16 sps:$4 sm:$0xff]  }
 0x319   : > { %v18969_v10 = vld [vmem:[%s21189_s8 + $0x2e40] ss:$16 sps:$4 sm:$0xff]   ;;  %v18977_v3 = vld [vmem:[%s21189_s8 + $0x2e24] ss:$16 sps:$4 sm:$0xff]  }
 0x31a   : > { %13919 = vmatpush1.bf16.msra.mxu0 %v18948_v38  ;;  %v18968_v38 = vld [vmem:[%s21189_s8 + $0x2c44] ss:$16 sps:$4 sm:$0xff]   ;;  %v18972_v14 = vld [vmem:[%s21189_s8 + $0x2c20] ss:$16 sps:$4 sm:$0xff]  }
 0x31b   : > { %13960 = vmatpush1.bf16.msra.mxu1 %v18951_v45  ;;  %13920 = vmatprep.subr.bf16.mxu0 %v18956_v8  ;;  %v18971_v45 = vld [vmem:[%s21189_s8 + $0x2e44] ss:$16 sps:$4 sm:$0xff]   ;;  %v18975_v19 = vld [vmem:[%s21189_s8 + $0x2e20] ss:$16 sps:$4 sm:$0xff]  }
 0x31c   : > { %13961 = vmatprep.subr.bf16.mxu1 %v18959_v2  ;;  %v18980_v27 = vld [vmem:[%s21189_s8 + $0x2c04] ss:$16 sps:$4 sm:$0xff]   ;;  %v18978_v2 = vld [vmem:[%s21189_s8 + $0x2c00] ss:$16 sps:$4 sm:$0xff]  }
 0x31d   : > { %v18983_v8 = vld [vmem:[%s21189_s8 + $0x2e04] ss:$16 sps:$4 sm:$0xff]  }
 0x31e   : > { %13921 = vmatpush1.bf16.msra.mxu0 %v18954_v47  ;;  %v18981_v47 = vld [vmem:[%s21189_s8 + $0x2e00] ss:$16 sps:$4 sm:$0xff]  }
 0x31f   : > { %13962 = vmatpush1.bf16.msra.mxu1 %v18957_v51  ;;  %13922 = vmatprep.subr.bf16.mxu0 %v18962_v58  ;;  %v18986_v51 = vld [vmem:[%s21189_s8 + $0x2de4] ss:$16 sps:$4 sm:$0xff]  }
 0x320   : > { %13963 = vmatprep.subr.bf16.mxu1 %v18965_v29  ;;  %v18989_v58 = vld [vmem:[%s21189_s8 + $0x2fe4] ss:$16 sps:$4 sm:$0xff]   ;;  %v18984_v29 = vld [vmem:[%s21189_s8 + $0x2de0] ss:$16 sps:$4 sm:$0xff]  }
 0x322   : > { %13923 = vmatpush1.bf16.msra.mxu0 %v18960_v36  ;;  %v18987_v36 = vld [vmem:[%s21189_s8 + $0x2fe0] ss:$16 sps:$4 sm:$0xff]  }
 0x323   : > { %13964 = vmatpush1.bf16.msra.mxu1 %v18963_v32  ;;  %13924 = vmatprep.subr.bf16.mxu0 %v18968_v38  ;;  %v18992_v32 = vld [vmem:[%s21189_s8 + $0x2dc4] ss:$16 sps:$4 sm:$0xff]  }
 0x324   : > { %13965 = vmatprep.subr.bf16.mxu1 %v18971_v45  ;;  %v18995_v38 = vld [vmem:[%s21189_s8 + $0x2fc4] ss:$16 sps:$4 sm:$0xff]   ;;  %v18990_v45 = vld [vmem:[%s21189_s8 + $0x2dc0] ss:$16 sps:$4 sm:$0xff]  }
 0x326   : > { %13925 = vmatpush1.bf16.msra.mxu0 %v18966_v5  ;;  %v18993_v5 = vld [vmem:[%s21189_s8 + $0x2fc0] ss:$16 sps:$4 sm:$0xff]  }
 0x327   : > { %13966 = vmatpush1.bf16.msra.mxu1 %v18969_v10  ;;  %13926 = vmatprep.subr.bf16.mxu0 %v18974_v46  ;;  %v18998_v10 = vld [vmem:[%s21189_s8 + $0x2da4] ss:$16 sps:$4 sm:$0xff]  }
 0x328   : > { %13967 = vmatprep.subr.bf16.mxu1 %v18977_v3  ;;  %v19001_v46 = vld [vmem:[%s21189_s8 + $0x2fa4] ss:$16 sps:$4 sm:$0xff]   ;;  %v18996_v3 = vld [vmem:[%s21189_s8 + $0x2da0] ss:$16 sps:$4 sm:$0xff]  }
 0x32a   : > { %13927 = vmatpush1.bf16.msra.mxu0 %v18972_v14  ;;  %v18999_v14 = vld [vmem:[%s21189_s8 + $0x2fa0] ss:$16 sps:$4 sm:$0xff]  }
 0x32b   : > { %13968 = vmatpush1.bf16.msra.mxu1 %v18975_v19  ;;  %13928 = vmatprep.subr.bf16.mxu0 %v18980_v27  ;;  %v19004_v19 = vld [vmem:[%s21189_s8 + $0x2d84] ss:$16 sps:$4 sm:$0xff]  }
 0x32c   : > { %13969 = vmatprep.subr.bf16.mxu1 %v18983_v8  ;;  %v19007_v27 = vld [vmem:[%s21189_s8 + $0x2f84] ss:$16 sps:$4 sm:$0xff]   ;;  %v19002_v8 = vld [vmem:[%s21189_s8 + $0x2d80] ss:$16 sps:$4 sm:$0xff]  }
 0x32e   : > { %13929 = vmatpush1.bf16.msra.mxu0 %v18978_v2  ;;  %v19005_v2 = vld [vmem:[%s21189_s8 + $0x2f80] ss:$16 sps:$4 sm:$0xff]  }
 0x32f   : > { %13970 = vmatpush1.bf16.msra.mxu1 %v18981_v47  ;;  %13930 = vmatprep.subr.bf16.mxu0 %v18986_v51  ;;  %v19010_v47 = vld [vmem:[%s21189_s8 + $0x2d64] ss:$16 sps:$4 sm:$0xff]  }
 0x330   : > { %13971 = vmatprep.subr.bf16.mxu1 %v18989_v58  ;;  %v19013_v51 = vld [vmem:[%s21189_s8 + $0x2f64] ss:$16 sps:$4 sm:$0xff]   ;;  %v19008_v58 = vld [vmem:[%s21189_s8 + $0x2d60] ss:$16 sps:$4 sm:$0xff]  }
 0x332   : > { %13931 = vmatpush2.bf16.msra.mxu0 %v18984_v29  ;;  %v19011_v29 = vld [vmem:[%s21189_s8 + $0x2f60] ss:$16 sps:$4 sm:$0xff]  }
 0x333   : > { %13972 = vmatpush2.bf16.msra.mxu1 %v18987_v36  ;;  %13932 = vmatprep.subr.bf16.mxu0 %v18992_v32  ;;  %v19016_v36 = vld [vmem:[%s21189_s8 + $0x2d44] ss:$16 sps:$4 sm:$0xff]  }
 0x334   : > { %13973 = vmatprep.subr.bf16.mxu1 %v18995_v38  ;;  %v19019_v32 = vld [vmem:[%s21189_s8 + $0x2f44] ss:$16 sps:$4 sm:$0xff]  }
 0x335   : > { %v22332_v38 = vld [vmem:[%s23947_s0 + $0x30] sm:$0xff] }
 0x336   : > { %13933 = vmatpush2.bf16.msra.mxu0 %v18990_v45  ;;  %v19014_v45 = vld [vmem:[%s21189_s8 + $0x2d40] ss:$16 sps:$4 sm:$0xff]  }
 0x337   : > { %13974 = vmatpush2.bf16.msra.mxu1 %v18993_v5  ;;  %13934 = vmatprep.subr.bf16.mxu0 %v18998_v10  ;;  %v19017_v5 = vld [vmem:[%s21189_s8 + $0x2f40] ss:$16 sps:$4 sm:$0xff]   ;;  %v19022_v10 = vld [vmem:[%s21189_s8 + $0x2d24] ss:$16 sps:$4 sm:$0xff]  }
 0x338   : > { %13975 = vmatprep.subr.bf16.mxu1 %v19001_v46  ;;  %v19025_v46 = vld [vmem:[%s21189_s8 + $0x2f24] ss:$16 sps:$4 sm:$0xff]  }
 0x33a   : > { %13935 = vmatpush2.bf16.msra.mxu0 %v18996_v3  ;;  %v22340_v3 = vrot.slane %v22332_v38, %v21248_v49 }
 0x33b   : > { %13976 = vmatpush2.bf16.msra.mxu1 %v18999_v14  ;;  %13936 = vmatprep.subr.bf16.mxu0 %v19004_v19  ;;  %v19020_v14 = vld [vmem:[%s21189_s8 + $0x2d20] ss:$16 sps:$4 sm:$0xff]  }
 0x33c   : > { %13977 = vmatprep.subr.bf16.mxu1 %v19007_v27  ;;  %v19023_v19 = vld [vmem:[%s21189_s8 + $0x2f20] ss:$16 sps:$4 sm:$0xff]   ;;  %v19028_v27 = vld [vmem:[%s21189_s8 + $0x2d04] ss:$16 sps:$4 sm:$0xff]  }
 0x33e   : > { %13937 = vmatpush2.bf16.msra.mxu0 %v19002_v8  ;;  %v19031_v8 = vld [vmem:[%s21189_s8 + $0x2f04] ss:$16 sps:$4 sm:$0xff]  }
 0x33f   : > { %13978 = vmatpush2.bf16.msra.mxu1 %v19005_v2  ;;  %13938 = vmatprep.subr.bf16.mxu0 %v19010_v47  ;;  %v2625_v2 = vcombine.high %v22340_v3, %v22340_v3  ;;  %v22350_v47 = vrot.slane %v22240_v31, %v21248_v49 }
 0x340   : > { %13979 = vmatprep.subr.bf16.mxu1 %v19013_v51  ;;  %v19026_v51 = vld [vmem:[%s21189_s8 + $0x2d00] ss:$16 sps:$4 sm:$0xff]  }
 0x341   : > { %23988 = vst [vmem:[#allocation17_spill] sm:$0xff] %v22350_v47  ;;  %v22363_v31 = vcombine.high %v22350_v47, %v22350_v47 }
 0x342   : > { %13939 = vmatpush2.bf16.msra.mxu0 %v19008_v58  ;;  %v19029_v58 = vld [vmem:[%s21189_s8 + $0x2f00] ss:$16 sps:$4 sm:$0xff]  }
 0x343   : > { %13980 = vmatpush2.bf16.msra.mxu1 %v19011_v29  ;;  %13940 = vmatprep.subr.bf16.mxu0 %v19016_v36  ;;  %v19035_v29 = vld [vmem:[%s21189_s8 + $0x30e4] ss:$16 sps:$4 sm:$0xff]   ;;  %23990 = vst [vmem:[#allocation19_spill] sm:$0xff] %v22363_v31 }
 0x344   : > { %13981 = vmatprep.subr.bf16.mxu1 %v19019_v32  ;;  %v19038_v36 = vld [vmem:[%s21189_s8 + $0x32e4] ss:$16 sps:$4 sm:$0xff]   ;;  %v19033_v32 = vld [vmem:[%s21189_s8 + $0x30e0] ss:$16 sps:$4 sm:$0xff]  }
 0x346   : > { %13941 = vmatpush2.bf16.msra.mxu0 %v19014_v45  ;;  %v19036_v45 = vld [vmem:[%s21189_s8 + $0x32e0] ss:$16 sps:$4 sm:$0xff]  }
 0x347   : > { %13982 = vmatpush2.bf16.msra.mxu1 %v19017_v5  ;;  %13942 = vmatprep.subr.bf16.mxu0 %v19022_v10  ;;  %v22359_v5 = vrot.slane %v2625_v2, %v21248_v49  ;;  %v19041_v10 = vld [vmem:[%s21189_s8 + $0x30c4] ss:$16 sps:$4 sm:$0xff]  }
 0x348   : > { %13983 = vmatprep.subr.bf16.mxu1 %v19025_v46  ;;  %v19044_v46 = vld [vmem:[%s21189_s8 + $0x32c4] ss:$16 sps:$4 sm:$0xff]  }
 0x349   : > { %23989 = vst [vmem:[#allocation18_spill] sm:$0xff] %v22359_v5 }
 0x34a   : > { %13943 = vmatpush2.bf16.msra.mxu0 %v19020_v14  ;;  %v19039_v14 = vld [vmem:[%s21189_s8 + $0x30c0] ss:$16 sps:$4 sm:$0xff]  }
 0x34b   : > { %13984 = vmatpush2.bf16.msra.mxu1 %v19023_v19  ;;  %13944 = vmatprep.subr.bf16.mxu0 %v19028_v27  ;;  %v19042_v19 = vld [vmem:[%s21189_s8 + $0x32c0] ss:$16 sps:$4 sm:$0xff]   ;;  %v22371_v27 = vcombine.high %v22359_v5, %v22359_v5 }
 0x34c   : > { %13985 = vmatprep.subr.bf16.mxu1 %v19031_v8 }
 0x34d   : > { %23991 = vst [vmem:[#allocation20_spill] sm:$0xff] %v22371_v27 }
 0x34e   : > { %13945 = vmatpush2.bf16.msra.mxu0 %v19026_v51 }
 0x34f   : > { %13986 = vmatpush2.bf16.msra.mxu1 %v19029_v58  ;;  %13996 = vmatprep.subr.bf16.mxu0 %v19035_v29 }
 0x350   : > { %14037 = vmatprep.subr.bf16.mxu1 %v19038_v36  ;;  %v19047_v36 = vld [vmem:[%s21189_s8 + $0x30a4] ss:$16 sps:$4 sm:$0xff]  }
 0x351   : > { %v13702_v8 = vpop.f32.mrf.mxu0  ;;  %13947 = vmatmul.mubr.bf16.vlgmr.msra.gmra.mxu0 %v22350_v47  ;;  %v19048_v47 = vld [vmem:[%s21189_s8 + $0x32a0] ss:$16 sps:$4 sm:$0xff]  }
 0x352   : > { %v13743_v2 = vpop.f32.mrf.mxu1  ;;  %13988 = vmatmul.mubr.bf16.vlgmr.msra.gmra.mxu1 %v22363_v31  ;;  %v13703_v51 = vadd.f32 %v13702_v8, %v22278_v56  ;;  %13997 = vmatpush1.bf16.msra.mxu0 %v19033_v32  ;;  %v19056_v8 = vld [vmem:[%s21189_s8 + $0x3284] ss:$16 sps:$4 sm:$0xff]   ;;  %v19238_v31 = vld [vmem:[%s21189_s8 + $0x38a0] ss:$16 sps:$4 sm:$0xff]  }
 0x353   : > { %14038 = vmatpush1.bf16.msra.mxu1 %v19036_v45  ;;  %v13704_v58 = vpop.f32.mrf.mxu0  ;;  %13998 = vmatprep.subr.bf16.mxu0 %v19041_v10 }
 0x354   : > { %v13745_v29 = vpop.f32.mrf.mxu1  ;;  %14039 = vmatprep.subr.bf16.mxu1 %v19044_v46  ;;  %v22378_v21 = vadd.f32 %v13743_v2, %v13703_v51  ;;  %v13705_v62 = vadd.f32 %v13704_v58, %v22285_v16  ;;  %14028 = vmatprep.mubr.bf16.mxu0 %v22359_v5  ;;  %v19053_v16 = vld [vmem:[%s21189_s8 + $0x3084] ss:$16 sps:$4 sm:$0xff]   ;;  %v19051_v2 = vld [vmem:[%s21189_s8 + $0x3080] ss:$16 sps:$4 sm:$0xff]  }
 0x355   : > { %14069 = vmatprep.mubr.bf16.mxu1 %v22371_v27  ;;  %v13706_v56 = vpop.f32.mrf.mxu0  ;;  %v19054_v51 = vld [vmem:[%s21189_s8 + $0x3280] ss:$16 sps:$4 sm:$0xff]  }
 0x356   : > { %v13747_v32 = vpop.f32.mrf.mxu1  ;;  %v22385_v45 = vadd.f32 %v13745_v29, %v13705_v62  ;;  %13999 = vmatpush1.bf16.msra.mxu0 %v19039_v14  ;;  %v19059_v62 = vld [vmem:[%s21189_s8 + $0x3064] ss:$16 sps:$4 sm:$0xff]   ;;  %v19063_v58 = vld [vmem:[%s21189_s8 + $0x3040] ss:$16 sps:$4 sm:$0xff]  }
 0x357   : > { %14040 = vmatpush1.bf16.msra.mxu1 %v19042_v19  ;;  %v13707_v10 = vpop.f32.mrf.mxu0  ;;  %14000 = vmatprep.subr.bf16.mxu0 %v19047_v36  ;;  %v19062_v14 = vld [vmem:[%s21189_s8 + $0x3264] ss:$16 sps:$4 sm:$0xff]   ;;  %v19057_v19 = vld [vmem:[%s21189_s8 + $0x3060] ss:$16 sps:$4 sm:$0xff]  }
 0x358   : > { %v13748_v46 = vpop.f32.mrf.mxu1  ;;  %14041 = vmatprep.subr.bf16.mxu1 %v19050_v40  ;;  %v19060_v40 = vld [vmem:[%s21189_s8 + $0x3260] ss:$16 sps:$4 sm:$0xff]   ;;  %v19071_v36 = vld [vmem:[%s21189_s8 + $0x3024] ss:$16 sps:$4 sm:$0xff]  }
 0x359   : > { %v19066_v29 = vld [vmem:[%s21189_s8 + $0x3240] ss:$16 sps:$4 sm:$0xff]   ;;  %v19074_v56 = vld [vmem:[%s21189_s8 + $0x3224] ss:$16 sps:$4 sm:$0xff]  }
 0x35a   : > { %14001 = vmatpush1.bf16.msra.mxu0 %v19045_v57  ;;  %v19065_v57 = vld [vmem:[%s21189_s8 + $0x3044] ss:$16 sps:$4 sm:$0xff]   ;;  %v19069_v32 = vld [vmem:[%s21189_s8 + $0x3020] ss:$16 sps:$4 sm:$0xff]  }
 0x35b   : > { %14042 = vmatpush1.bf16.msra.mxu1 %v19048_v47  ;;  %14002 = vmatprep.subr.bf16.mxu0 %v19053_v16  ;;  %v19068_v47 = vld [vmem:[%s21189_s8 + $0x3244] ss:$16 sps:$4 sm:$0xff]   ;;  %v19072_v10 = vld [vmem:[%s21189_s8 + $0x3220] ss:$16 sps:$4 sm:$0xff]  }
 0x35c   : > { %14043 = vmatprep.subr.bf16.mxu1 %v19056_v8  ;;  %v19077_v46 = vld [vmem:[%s21189_s8 + $0x3004] ss:$16 sps:$4 sm:$0xff]   ;;  %v19075_v8 = vld [vmem:[%s21189_s8 + $0x3000] ss:$16 sps:$4 sm:$0xff]  }
 0x35d   : > { %v19080_v16 = vld [vmem:[%s21189_s8 + $0x3204] ss:$16 sps:$4 sm:$0xff]   ;;  %v19141_v5 = vld [vmem:[%s21189_s8 + $0x34a0] ss:$16 sps:$4 sm:$0xff]  }
 0x35e   : > { %14003 = vmatpush1.bf16.msra.mxu0 %v19051_v2  ;;  %v19078_v2 = vld [vmem:[%s21189_s8 + $0x3200] ss:$16 sps:$4 sm:$0xff]  }
 0x35f   : > { %14044 = vmatpush1.bf16.msra.mxu1 %v19054_v51  ;;  %14004 = vmatprep.subr.bf16.mxu0 %v19059_v62  ;;  %v19083_v51 = vld [vmem:[%s21189_s8 + $0x31e4] ss:$16 sps:$4 sm:$0xff]  }
 0x360   : > { %14045 = vmatprep.subr.bf16.mxu1 %v19062_v14  ;;  %v19086_v62 = vld [vmem:[%s21189_s8 + $0x33e4] ss:$16 sps:$4 sm:$0xff]   ;;  %v19081_v14 = vld [vmem:[%s21189_s8 + $0x31e0] ss:$16 sps:$4 sm:$0xff]  }
 0x362   : > { %14005 = vmatpush1.bf16.msra.mxu0 %v19057_v19  ;;  %v19084_v19 = vld [vmem:[%s21189_s8 + $0x33e0] ss:$16 sps:$4 sm:$0xff]  }
 0x363   : > { %14046 = vmatpush1.bf16.msra.mxu1 %v19060_v40  ;;  %14006 = vmatprep.subr.bf16.mxu0 %v19065_v57  ;;  %v19089_v40 = vld [vmem:[%s21189_s8 + $0x31c4] ss:$16 sps:$4 sm:$0xff]  }
 0x364   : > { %14047 = vmatprep.subr.bf16.mxu1 %v19068_v47  ;;  %v19092_v57 = vld [vmem:[%s21189_s8 + $0x33c4] ss:$16 sps:$4 sm:$0xff]   ;;  %v19087_v47 = vld [vmem:[%s21189_s8 + $0x31c0] ss:$16 sps:$4 sm:$0xff]  }
 0x366   : > { %14007 = vmatpush1.bf16.msra.mxu0 %v19063_v58  ;;  %v19090_v58 = vld [vmem:[%s21189_s8 + $0x33c0] ss:$16 sps:$4 sm:$0xff]  }
 0x367   : > { %14048 = vmatpush1.bf16.msra.mxu1 %v19066_v29  ;;  %14008 = vmatprep.subr.bf16.mxu0 %v19071_v36  ;;  %v19095_v29 = vld [vmem:[%s21189_s8 + $0x31a4] ss:$16 sps:$4 sm:$0xff]  }
 0x368   : > { %14049 = vmatprep.subr.bf16.mxu1 %v19074_v56  ;;  %v19098_v36 = vld [vmem:[%s21189_s8 + $0x33a4] ss:$16 sps:$4 sm:$0xff]   ;;  %v19093_v56 = vld [vmem:[%s21189_s8 + $0x31a0] ss:$16 sps:$4 sm:$0xff]  }
 0x36a   : > { %14009 = vmatpush1.bf16.msra.mxu0 %v19069_v32  ;;  %v19096_v32 = vld [vmem:[%s21189_s8 + $0x33a0] ss:$16 sps:$4 sm:$0xff]  }
 0x36b   : > { %14050 = vmatpush1.bf16.msra.mxu1 %v19072_v10  ;;  %14010 = vmatprep.subr.bf16.mxu0 %v19077_v46  ;;  %v19101_v10 = vld [vmem:[%s21189_s8 + $0x3184] ss:$16 sps:$4 sm:$0xff]  }
 0x36c   : > { %14051 = vmatprep.subr.bf16.mxu1 %v19080_v16  ;;  %v19104_v46 = vld [vmem:[%s21189_s8 + $0x3384] ss:$16 sps:$4 sm:$0xff]   ;;  %v19099_v16 = vld [vmem:[%s21189_s8 + $0x3180] ss:$16 sps:$4 sm:$0xff]  }
 0x36e   : > { %14011 = vmatpush1.bf16.msra.mxu0 %v19075_v8  ;;  %v19102_v8 = vld [vmem:[%s21189_s8 + $0x3380] ss:$16 sps:$4 sm:$0xff]  }
 0x36f   : > { %14052 = vmatpush1.bf16.msra.mxu1 %v19078_v2  ;;  %14012 = vmatprep.subr.bf16.mxu0 %v19083_v51  ;;  %v19107_v2 = vld [vmem:[%s21189_s8 + $0x3164] ss:$16 sps:$4 sm:$0xff]  }
 0x370   : > { %14053 = vmatprep.subr.bf16.mxu1 %v19086_v62  ;;  %v19110_v51 = vld [vmem:[%s21189_s8 + $0x3364] ss:$16 sps:$4 sm:$0xff]   ;;  %v19105_v62 = vld [vmem:[%s21189_s8 + $0x3160] ss:$16 sps:$4 sm:$0xff]  }
 0x372   : > { %14013 = vmatpush2.bf16.msra.mxu0 %v19081_v14  ;;  %v19108_v14 = vld [vmem:[%s21189_s8 + $0x3360] ss:$16 sps:$4 sm:$0xff]  }
 0x373   : > { %14054 = vmatpush2.bf16.msra.mxu1 %v19084_v19  ;;  %14014 = vmatprep.subr.bf16.mxu0 %v19089_v40  ;;  %v19113_v19 = vld [vmem:[%s21189_s8 + $0x3144] ss:$16 sps:$4 sm:$0xff]  }
 0x374   : > { %14055 = vmatprep.subr.bf16.mxu1 %v19092_v57  ;;  %v19116_v40 = vld [vmem:[%s21189_s8 + $0x3344] ss:$16 sps:$4 sm:$0xff]   ;;  %v2610_v57 = vcombine.high %v22332_v38, %v22332_v38  ;;  %v19117_v38 = vld [vmem:[%s21189_s8 + $0x3120] ss:$16 sps:$4 sm:$0xff]  }
 0x376   : > { %14015 = vmatpush2.bf16.msra.mxu0 %v19087_v47  ;;  %v19111_v47 = vld [vmem:[%s21189_s8 + $0x3140] ss:$16 sps:$4 sm:$0xff]  }
 0x377   : > { %14056 = vmatpush2.bf16.msra.mxu1 %v19090_v58  ;;  %14016 = vmatprep.subr.bf16.mxu0 %v19095_v29  ;;  %v19114_v58 = vld [vmem:[%s21189_s8 + $0x3340] ss:$16 sps:$4 sm:$0xff]   ;;  %v19119_v29 = vld [vmem:[%s21189_s8 + $0x3124] ss:$16 sps:$4 sm:$0xff]  }
 0x378   : > { %14057 = vmatprep.subr.bf16.mxu1 %v19098_v36  ;;  %v19122_v36 = vld [vmem:[%s21189_s8 + $0x3324] ss:$16 sps:$4 sm:$0xff]  }
 0x37a   : > { %14017 = vmatpush2.bf16.msra.mxu0 %v19093_v56  ;;  %v22436_v56 = vrot.slane %v2610_v57, %v21248_v49 }
 0x37b   : > { %14058 = vmatpush2.bf16.msra.mxu1 %v19096_v32  ;;  %14018 = vmatprep.subr.bf16.mxu0 %v19101_v10  ;;  %v19120_v32 = vld [vmem:[%s21189_s8 + $0x3320] ss:$16 sps:$4 sm:$0xff]   ;;  %v19125_v10 = vld [vmem:[%s21189_s8 + $0x3104] ss:$16 sps:$4 sm:$0xff]  }
 0x37c   : > { %14059 = vmatprep.subr.bf16.mxu1 %v19104_v46  ;;  %v19128_v46 = vld [vmem:[%s21189_s8 + $0x3304] ss:$16 sps:$4 sm:$0xff]  }
 0x37e   : > { %14019 = vmatpush2.bf16.msra.mxu0 %v19099_v16  ;;  %v2626_v16 = vcombine.high %v22436_v56, %v22436_v56 }
 0x37f   : > { %14060 = vmatpush2.bf16.msra.mxu1 %v19102_v8  ;;  %14020 = vmatprep.subr.bf16.mxu0 %v19107_v2  ;;  %v22446_v8 = vrot.slane %v22340_v3, %v21248_v49  ;;  %v19123_v2 = vld [vmem:[%s21189_s8 + $0x3100] ss:$16 sps:$4 sm:$0xff]  }
 0x380   : > { %14061 = vmatprep.subr.bf16.mxu1 %v19110_v51  ;;  %v19126_v51 = vld [vmem:[%s21189_s8 + $0x3300] ss:$16 sps:$4 sm:$0xff]   ;;  %v22455_v57 = vrot.slane %v2626_v16, %v21248_v49 }
 0x381   : > { %23992 = vst [vmem:[#allocation21_spill] sm:$0xff] %v22446_v8  ;;  %v22459_v3 = vcombine.high %v22446_v8, %v22446_v8 }
 0x382   : > { %14021 = vmatpush2.bf16.msra.mxu0 %v19105_v62  ;;  %v19131_v62 = vld [vmem:[%s21189_s8 + $0x34e4] ss:$16 sps:$4 sm:$0xff]   ;;  %23993 = vst [vmem:[#allocation22_spill] sm:$0xff] %v22455_v57 }
 0x383   : > { %14062 = vmatpush2.bf16.msra.mxu1 %v19108_v14  ;;  %14022 = vmatprep.subr.bf16.mxu0 %v19113_v19  ;;  %v19134_v14 = vld [vmem:[%s21189_s8 + $0x36e4] ss:$16 sps:$4 sm:$0xff]   ;;  %v19129_v19 = vld [vmem:[%s21189_s8 + $0x34e0] ss:$16 sps:$4 sm:$0xff]   ;;  %23994 = vst [vmem:[#allocation23_spill] sm:$0xff] %v22459_v3 }
 0x384   : > { %14063 = vmatprep.subr.bf16.mxu1 %v19116_v40  ;;  %v19132_v40 = vld [vmem:[%s21189_s8 + $0x36e0] ss:$16 sps:$4 sm:$0xff]  }
 0x386   : > { %14023 = vmatpush2.bf16.msra.mxu0 %v19111_v47  ;;  %v19137_v47 = vld [vmem:[%s21189_s8 + $0x34c4] ss:$16 sps:$4 sm:$0xff]  }
 0x387   : > { %14064 = vmatpush2.bf16.msra.mxu1 %v19114_v58  ;;  %14024 = vmatprep.subr.bf16.mxu0 %v19119_v29  ;;  %v19140_v58 = vld [vmem:[%s21189_s8 + $0x36c4] ss:$16 sps:$4 sm:$0xff]   ;;  %v19135_v29 = vld [vmem:[%s21189_s8 + $0x34c0] ss:$16 sps:$4 sm:$0xff]  }
 0x388   : > { %14065 = vmatprep.subr.bf16.mxu1 %v19122_v36  ;;  %v19138_v36 = vld [vmem:[%s21189_s8 + $0x36c0] ss:$16 sps:$4 sm:$0xff]  }
 0x38a   : > { %14025 = vmatpush2.bf16.msra.mxu0 %v19117_v38  ;;  %v22467_v38 = vcombine.high %v22455_v57, %v22455_v57 }
 0x38b   : > { %14066 = vmatpush2.bf16.msra.mxu1 %v19120_v32  ;;  %14026 = vmatprep.subr.bf16.mxu0 %v19125_v10 }
 0x38c   : > { %14067 = vmatprep.subr.bf16.mxu1 %v19128_v46  ;;  %23995 = vst [vmem:[#allocation24_spill] sm:$0xff] %v22467_v38 }
 0x38e   : > { %14027 = vmatpush2.bf16.msra.mxu0 %v19123_v2 }
 0x38f   : > { %14068 = vmatpush2.bf16.msra.mxu1 %v19126_v51  ;;  %14078 = vmatprep.subr.bf16.mxu0 %v19131_v62  ;;  %v19143_v51 = vld [vmem:[%s21189_s8 + $0x34a4] ss:$16 sps:$4 sm:$0xff]  }
 0x390   : > { %14119 = vmatprep.subr.bf16.mxu1 %v19134_v14  ;;  %v19146_v62 = vld [vmem:[%s21189_s8 + $0x36a4] ss:$16 sps:$4 sm:$0xff]  }
 0x391   : > { %v13784_v32 = vpop.f32.mrf.mxu0  ;;  %14029 = vmatmul.mubr.bf16.vlgmr.msra.gmra.mxu0 %v22446_v8  ;;  %v19144_v8 = vld [vmem:[%s21189_s8 + $0x36a0] ss:$16 sps:$4 sm:$0xff]  }
 0x392   : > { %v13825_v10 = vpop.f32.mrf.mxu1  ;;  %14070 = vmatmul.mubr.bf16.vlgmr.msra.gmra.mxu1 %v22459_v3  ;;  %v13785_v46 = vadd.f32 %v13784_v32, %v22378_v21  ;;  %14079 = vmatpush1.bf16.msra.mxu0 %v19129_v19  ;;  %v19152_v32 = vld [vmem:[%s21189_s8 + $0x3684] ss:$16 sps:$4 sm:$0xff]  }
 0x393   : > { %14120 = vmatpush1.bf16.msra.mxu1 %v19132_v40  ;;  %v13786_v16 = vpop.f32.mrf.mxu0  ;;  %14080 = vmatprep.subr.bf16.mxu0 %v19137_v47 }
 0x394   : > { %v13827_v2 = vpop.f32.mrf.mxu1  ;;  %14121 = vmatprep.subr.bf16.mxu1 %v19140_v58  ;;  %v22474_v14 = vadd.f32 %v13825_v10, %v13785_v46  ;;  %v13787_v27 = vadd.f32 %v13786_v16, %v22385_v45  ;;  %14110 = vmatprep.mubr.bf16.mxu0 %v22455_v57  ;;  %v19149_v45 = vld [vmem:[%s21189_s8 + $0x3484] ss:$16 sps:$4 sm:$0xff]   ;;  %v19147_v10 = vld [vmem:[%s21189_s8 + $0x3480] ss:$16 sps:$4 sm:$0xff]  }
 0x395   : > { %14151 = vmatprep.mubr.bf16.mxu1 %v22467_v38  ;;  %v13788_v21 = vpop.f32.mrf.mxu0  ;;  %v19150_v46 = vld [vmem:[%s21189_s8 + $0x3680] ss:$16 sps:$4 sm:$0xff]   ;;  %v19243_v38 = vld [vmem:[%s21189_s8 + $0x3aa4] ss:$16 sps:$4 sm:$0xff]  }
 0x396   : > { %v13829_v19 = vpop.f32.mrf.mxu1  ;;  %v22481_v40 = vadd.f32 %v13827_v2, %v13787_v27  ;;  %14081 = vmatpush1.bf16.msra.mxu0 %v19135_v29  ;;  %v19155_v27 = vld [vmem:[%s21189_s8 + $0x3464] ss:$16 sps:$4 sm:$0xff]   ;;  %v19156_v16 = vld [vmem:[%s21189_s8 + $0x3660] ss:$16 sps:$4 sm:$0xff]  }
 0x397   : > { %14122 = vmatpush1.bf16.msra.mxu1 %v19138_v36  ;;  %v13789_v47 = vpop.f32.mrf.mxu0  ;;  %14082 = vmatprep.subr.bf16.mxu0 %v19143_v51  ;;  %v19158_v29 = vld [vmem:[%s21189_s8 + $0x3664] ss:$16 sps:$4 sm:$0xff]   ;;  %v19153_v36 = vld [vmem:[%s21189_s8 + $0x3460] ss:$16 sps:$4 sm:$0xff]  }
 0x398   : > { %v13830_v58 = vpop.f32.mrf.mxu1  ;;  %14123 = vmatprep.subr.bf16.mxu1 %v19146_v62  ;;  %v19159_v2 = vld [vmem:[%s21189_s8 + $0x3440] ss:$16 sps:$4 sm:$0xff]   ;;  %v19167_v62 = vld [vmem:[%s21189_s8 + $0x3424] ss:$16 sps:$4 sm:$0xff]  }
 0x399   : > { %v19162_v51 = vld [vmem:[%s21189_s8 + $0x3640] ss:$16 sps:$4 sm:$0xff]   ;;  %v19170_v21 = vld [vmem:[%s21189_s8 + $0x3624] ss:$16 sps:$4 sm:$0xff]  }
 0x39a   : > { %14083 = vmatpush1.bf16.msra.mxu0 %v19141_v5  ;;  %v19161_v5 = vld [vmem:[%s21189_s8 + $0x3444] ss:$16 sps:$4 sm:$0xff]   ;;  %v19165_v19 = vld [vmem:[%s21189_s8 + $0x3420] ss:$16 sps:$4 sm:$0xff]  }
 0x39b   : > { %14124 = vmatpush1.bf16.msra.mxu1 %v19144_v8  ;;  %14084 = vmatprep.subr.bf16.mxu0 %v19149_v45  ;;  %v19164_v8 = vld [vmem:[%s21189_s8 + $0x3644] ss:$16 sps:$4 sm:$0xff]   ;;  %v19168_v47 = vld [vmem:[%s21189_s8 + $0x3620] ss:$16 sps:$4 sm:$0xff]  }
 0x39c   : > { %14125 = vmatprep.subr.bf16.mxu1 %v19152_v32  ;;  %v19173_v58 = vld [vmem:[%s21189_s8 + $0x3404] ss:$16 sps:$4 sm:$0xff]   ;;  %v19171_v32 = vld [vmem:[%s21189_s8 + $0x3400] ss:$16 sps:$4 sm:$0xff]  }
 0x39d   : > { %v19176_v45 = vld [vmem:[%s21189_s8 + $0x3604] ss:$16 sps:$4 sm:$0xff]  }
 0x39e   : > { %14085 = vmatpush1.bf16.msra.mxu0 %v19147_v10  ;;  %v19174_v10 = vld [vmem:[%s21189_s8 + $0x3600] ss:$16 sps:$4 sm:$0xff]  }
 0x39f   : > { %14126 = vmatpush1.bf16.msra.mxu1 %v19150_v46  ;;  %14086 = vmatprep.subr.bf16.mxu0 %v19155_v27  ;;  %v19179_v46 = vld [vmem:[%s21189_s8 + $0x35e4] ss:$16 sps:$4 sm:$0xff]  }
 0x3a0   : > { %14127 = vmatprep.subr.bf16.mxu1 %v19158_v29  ;;  %v19182_v27 = vld [vmem:[%s21189_s8 + $0x37e4] ss:$16 sps:$4 sm:$0xff]   ;;  %v19177_v29 = vld [vmem:[%s21189_s8 + $0x35e0] ss:$16 sps:$4 sm:$0xff]  }
 0x3a2   : > { %14087 = vmatpush1.bf16.msra.mxu0 %v19153_v36  ;;  %v19180_v36 = vld [vmem:[%s21189_s8 + $0x37e0] ss:$16 sps:$4 sm:$0xff]  }
 0x3a3   : > { %14128 = vmatpush1.bf16.msra.mxu1 %v19156_v16  ;;  %14088 = vmatprep.subr.bf16.mxu0 %v19161_v5  ;;  %v19185_v16 = vld [vmem:[%s21189_s8 + $0x35c4] ss:$16 sps:$4 sm:$0xff]  }
 0x3a4   : > { %14129 = vmatprep.subr.bf16.mxu1 %v19164_v8  ;;  %v19188_v5 = vld [vmem:[%s21189_s8 + $0x37c4] ss:$16 sps:$4 sm:$0xff]   ;;  %v19183_v8 = vld [vmem:[%s21189_s8 + $0x35c0] ss:$16 sps:$4 sm:$0xff]  }
 0x3a6   : > { %14089 = vmatpush1.bf16.msra.mxu0 %v19159_v2  ;;  %v19186_v2 = vld [vmem:[%s21189_s8 + $0x37c0] ss:$16 sps:$4 sm:$0xff]  }
 0x3a7   : > { %14130 = vmatpush1.bf16.msra.mxu1 %v19162_v51  ;;  %14090 = vmatprep.subr.bf16.mxu0 %v19167_v62  ;;  %v19191_v51 = vld [vmem:[%s21189_s8 + $0x35a4] ss:$16 sps:$4 sm:$0xff]  }
 0x3a8   : > { %14131 = vmatprep.subr.bf16.mxu1 %v19170_v21  ;;  %v19194_v62 = vld [vmem:[%s21189_s8 + $0x37a4] ss:$16 sps:$4 sm:$0xff]   ;;  %v19189_v21 = vld [vmem:[%s21189_s8 + $0x35a0] ss:$16 sps:$4 sm:$0xff]  }
 0x3aa   : > { %14091 = vmatpush1.bf16.msra.mxu0 %v19165_v19  ;;  %v19192_v19 = vld [vmem:[%s21189_s8 + $0x37a0] ss:$16 sps:$4 sm:$0xff]  }
 0x3ab   : > { %14132 = vmatpush1.bf16.msra.mxu1 %v19168_v47  ;;  %14092 = vmatprep.subr.bf16.mxu0 %v19173_v58  ;;  %v19197_v47 = vld [vmem:[%s21189_s8 + $0x3584] ss:$16 sps:$4 sm:$0xff]  }
 0x3ac   : > { %14133 = vmatprep.subr.bf16.mxu1 %v19176_v45  ;;  %v19200_v58 = vld [vmem:[%s21189_s8 + $0x3784] ss:$16 sps:$4 sm:$0xff]   ;;  %v19195_v45 = vld [vmem:[%s21189_s8 + $0x3580] ss:$16 sps:$4 sm:$0xff]  }
 0x3ae   : > { %14093 = vmatpush1.bf16.msra.mxu0 %v19171_v32  ;;  %v19198_v32 = vld [vmem:[%s21189_s8 + $0x3780] ss:$16 sps:$4 sm:$0xff]  }
 0x3af   : > { %14134 = vmatpush1.bf16.msra.mxu1 %v19174_v10  ;;  %14094 = vmatprep.subr.bf16.mxu0 %v19179_v46  ;;  %v19203_v10 = vld [vmem:[%s21189_s8 + $0x3564] ss:$16 sps:$4 sm:$0xff]  }
 0x3b0   : > { %14135 = vmatprep.subr.bf16.mxu1 %v19182_v27  ;;  %v19206_v46 = vld [vmem:[%s21189_s8 + $0x3764] ss:$16 sps:$4 sm:$0xff]   ;;  %v19201_v27 = vld [vmem:[%s21189_s8 + $0x3560] ss:$16 sps:$4 sm:$0xff]  }
 0x3b2   : > { %14095 = vmatpush2.bf16.msra.mxu0 %v19177_v29  ;;  %v19204_v29 = vld [vmem:[%s21189_s8 + $0x3760] ss:$16 sps:$4 sm:$0xff]  }
 0x3b3   : > { %14136 = vmatpush2.bf16.msra.mxu1 %v19180_v36  ;;  %14096 = vmatprep.subr.bf16.mxu0 %v19185_v16  ;;  %v19209_v36 = vld [vmem:[%s21189_s8 + $0x3544] ss:$16 sps:$4 sm:$0xff]  }
 0x3b4   : > { %14137 = vmatprep.subr.bf16.mxu1 %v19188_v5  ;;  %v19212_v16 = vld [vmem:[%s21189_s8 + $0x3744] ss:$16 sps:$4 sm:$0xff]   ;;  %v22528_v5 = vld [vmem:[%s23947_s0 + $0x38] sm:$0xff] }
 0x3b6   : > { %14097 = vmatpush2.bf16.msra.mxu0 %v19183_v8  ;;  %v19207_v8 = vld [vmem:[%s21189_s8 + $0x3540] ss:$16 sps:$4 sm:$0xff]  }
 0x3b7   : > { %14138 = vmatpush2.bf16.msra.mxu1 %v19186_v2  ;;  %14098 = vmatprep.subr.bf16.mxu0 %v19191_v51  ;;  %v19210_v2 = vld [vmem:[%s21189_s8 + $0x3740] ss:$16 sps:$4 sm:$0xff]   ;;  %v19215_v51 = vld [vmem:[%s21189_s8 + $0x3524] ss:$16 sps:$4 sm:$0xff]  }
 0x3b8   : > { %14139 = vmatprep.subr.bf16.mxu1 %v19194_v62  ;;  %v19218_v62 = vld [vmem:[%s21189_s8 + $0x3724] ss:$16 sps:$4 sm:$0xff]  }
 0x3ba   : > { %14099 = vmatpush2.bf16.msra.mxu0 %v19189_v21  ;;  %v22536_v21 = vrot.slane %v22528_v5, %v21248_v49 }
 0x3bb   : > { %14140 = vmatpush2.bf16.msra.mxu1 %v19192_v19  ;;  %14100 = vmatprep.subr.bf16.mxu0 %v19197_v47  ;;  %v19213_v19 = vld [vmem:[%s21189_s8 + $0x3520] ss:$16 sps:$4 sm:$0xff]  }
 0x3bc   : > { %14141 = vmatprep.subr.bf16.mxu1 %v19200_v58  ;;  %v19216_v47 = vld [vmem:[%s21189_s8 + $0x3720] ss:$16 sps:$4 sm:$0xff]   ;;  %v19221_v58 = vld [vmem:[%s21189_s8 + $0x3504] ss:$16 sps:$4 sm:$0xff]  }
 0x3be   : > { %14101 = vmatpush2.bf16.msra.mxu0 %v19195_v45  ;;  %v19224_v45 = vld [vmem:[%s21189_s8 + $0x3704] ss:$16 sps:$4 sm:$0xff]  }
 0x3bf   : > { %14142 = vmatpush2.bf16.msra.mxu1 %v19198_v32  ;;  %14102 = vmatprep.subr.bf16.mxu0 %v19203_v10  ;;  %v2674_v32 = vcombine.high %v22536_v21, %v22536_v21  ;;  %v22546_v10 = vrot.slane %v22436_v56, %v21248_v49 }
 0x3c0   : > { %14143 = vmatprep.subr.bf16.mxu1 %v19206_v46  ;;  %v19219_v46 = vld [vmem:[%s21189_s8 + $0x3500] ss:$16 sps:$4 sm:$0xff]  }
 0x3c1   : > { %23996 = vst [vmem:[#allocation25_spill] sm:$0xff] %v22546_v10  ;;  %v22559_v56 = vcombine.high %v22546_v10, %v22546_v10 }
 0x3c2   : > { %14103 = vmatpush2.bf16.msra.mxu0 %v19201_v27  ;;  %v19222_v27 = vld [vmem:[%s21189_s8 + $0x3700] ss:$16 sps:$4 sm:$0xff]  }
 0x3c3   : > { %14144 = vmatpush2.bf16.msra.mxu1 %v19204_v29  ;;  %14104 = vmatprep.subr.bf16.mxu0 %v19209_v36  ;;  %v19228_v29 = vld [vmem:[%s21189_s8 + $0x38e4] ss:$16 sps:$4 sm:$0xff]  }
 0x3c4   : > { %14145 = vmatprep.subr.bf16.mxu1 %v19212_v16  ;;  %v19231_v36 = vld [vmem:[%s21189_s8 + $0x3ae4] ss:$16 sps:$4 sm:$0xff]   ;;  %v19226_v16 = vld [vmem:[%s21189_s8 + $0x38e0] ss:$16 sps:$4 sm:$0xff]  }
 0x3c6   : > { %14105 = vmatpush2.bf16.msra.mxu0 %v19207_v8  ;;  %v19229_v8 = vld [vmem:[%s21189_s8 + $0x3ae0] ss:$16 sps:$4 sm:$0xff]  }
 0x3c7   : > { %14146 = vmatpush2.bf16.msra.mxu1 %v19210_v2  ;;  %14106 = vmatprep.subr.bf16.mxu0 %v19215_v51  ;;  %v22555_v2 = vrot.slane %v2674_v32, %v21248_v49  ;;  %v19234_v51 = vld [vmem:[%s21189_s8 + $0x38c4] ss:$16 sps:$4 sm:$0xff]  }
 0x3c8   : > { %14147 = vmatprep.subr.bf16.mxu1 %v19218_v62  ;;  %v19237_v62 = vld [vmem:[%s21189_s8 + $0x3ac4] ss:$16 sps:$4 sm:$0xff]  }
 0x3c9   : > { %23997 = vst [vmem:[#allocation26_spill] sm:$0xff] %v22555_v2 }
 0x3ca   : > { %14107 = vmatpush2.bf16.msra.mxu0 %v19213_v19  ;;  %v19232_v19 = vld [vmem:[%s21189_s8 + $0x38c0] ss:$16 sps:$4 sm:$0xff]  }
 0x3cb   : > { %14148 = vmatpush2.bf16.msra.mxu1 %v19216_v47  ;;  %14108 = vmatprep.subr.bf16.mxu0 %v19221_v58  ;;  %v19235_v47 = vld [vmem:[%s21189_s8 + $0x3ac0] ss:$16 sps:$4 sm:$0xff]   ;;  %v22567_v58 = vcombine.high %v22555_v2, %v22555_v2 }
 0x3cc   : > { %14149 = vmatprep.subr.bf16.mxu1 %v19224_v45 }
 0x3cd   : > { %23998 = vst [vmem:[#allocation27_spill] sm:$0xff] %v22567_v58 }
 0x3ce   : > { %14109 = vmatpush2.bf16.msra.mxu0 %v19219_v46 }
 0x3cf   : > { %14150 = vmatpush2.bf16.msra.mxu1 %v19222_v27  ;;  %14160 = vmatprep.subr.bf16.mxu0 %v19228_v29 }
 0x3d0   : > { %14201 = vmatprep.subr.bf16.mxu1 %v19231_v36  ;;  %v19240_v36 = vld [vmem:[%s21189_s8 + $0x38a4] ss:$16 sps:$4 sm:$0xff]  }
 0x3d1   : > { %v13866_v45 = vpop.f32.mrf.mxu0  ;;  %14111 = vmatmul.mubr.bf16.vlgmr.msra.gmra.mxu0 %v22546_v10  ;;  %v19241_v10 = vld [vmem:[%s21189_s8 + $0x3aa0] ss:$16 sps:$4 sm:$0xff]  }
 0x3d2   : > { %v13907_v32 = vpop.f32.mrf.mxu1  ;;  %14152 = vmatmul.mubr.bf16.vlgmr.msra.gmra.mxu1 %v22559_v56  ;;  %v13867_v46 = vadd.f32 %v13866_v45, %v22474_v14  ;;  %14161 = vmatpush1.bf16.msra.mxu0 %v19226_v16  ;;  %v19249_v45 = vld [vmem:[%s21189_s8 + $0x3a84] ss:$16 sps:$4 sm:$0xff]  }
 0x3d3   : > { %14202 = vmatpush1.bf16.msra.mxu1 %v19229_v8  ;;  %v13868_v27 = vpop.f32.mrf.mxu0  ;;  %14162 = vmatprep.subr.bf16.mxu0 %v19234_v51 }
 0x3d4   : > { %v13909_v29 = vpop.f32.mrf.mxu1  ;;  %14203 = vmatprep.subr.bf16.mxu1 %v19237_v62  ;;  %v22574_v57 = vadd.f32 %v13907_v32, %v13867_v46  ;;  %v13869_v3 = vadd.f32 %v13868_v27, %v22481_v40  ;;  %14192 = vmatprep.mubr.bf16.mxu0 %v22555_v2  ;;  %v19246_v40 = vld [vmem:[%s21189_s8 + $0x3884] ss:$16 sps:$4 sm:$0xff]   ;;  %v19244_v32 = vld [vmem:[%s21189_s8 + $0x3880] ss:$16 sps:$4 sm:$0xff]  }
 0x3d5   : > { %14233 = vmatprep.mubr.bf16.mxu1 %v22567_v58  ;;  %v13870_v14 = vpop.f32.mrf.mxu0  ;;  %v19247_v46 = vld [vmem:[%s21189_s8 + $0x3a80] ss:$16 sps:$4 sm:$0xff]  }
 0x3d6   : > { %v13911_v16 = vpop.f32.mrf.mxu1  ;;  %v22581_v8 = vadd.f32 %v13909_v29, %v13869_v3  ;;  %14163 = vmatpush1.bf16.msra.mxu0 %v19232_v19  ;;  %v19252_v3 = vld [vmem:[%s21189_s8 + $0x3864] ss:$16 sps:$4 sm:$0xff]   ;;  %v19256_v27 = vld [vmem:[%s21189_s8 + $0x3840] ss:$16 sps:$4 sm:$0xff]  }
 0x3d7   : > { %14204 = vmatpush1.bf16.msra.mxu1 %v19235_v47  ;;  %v13871_v51 = vpop.f32.mrf.mxu0  ;;  %14164 = vmatprep.subr.bf16.mxu0 %v19240_v36  ;;  %v19255_v19 = vld [vmem:[%s21189_s8 + $0x3a64] ss:$16 sps:$4 sm:$0xff]   ;;  %v19250_v47 = vld [vmem:[%s21189_s8 + $0x3860] ss:$16 sps:$4 sm:$0xff]  }
 0x3d8   : > { %v13912_v62 = vpop.f32.mrf.mxu1  ;;  %14205 = vmatprep.subr.bf16.mxu1 %v19243_v38  ;;  %v19253_v38 = vld [vmem:[%s21189_s8 + $0x3a60] ss:$16 sps:$4 sm:$0xff]   ;;  %v19264_v36 = vld [vmem:[%s21189_s8 + $0x3824] ss:$16 sps:$4 sm:$0xff]  }
 0x3d9   : > { %v19259_v29 = vld [vmem:[%s21189_s8 + $0x3a40] ss:$16 sps:$4 sm:$0xff]   ;;  %v19267_v14 = vld [vmem:[%s21189_s8 + $0x3a24] ss:$16 sps:$4 sm:$0xff]  }
 0x3da   : > { %14165 = vmatpush1.bf16.msra.mxu0 %v19238_v31  ;;  %v19258_v31 = vld [vmem:[%s21189_s8 + $0x3844] ss:$16 sps:$4 sm:$0xff]   ;;  %v19262_v16 = vld [vmem:[%s21189_s8 + $0x3820] ss:$16 sps:$4 sm:$0xff]  }
 0x3db   : > { %14206 = vmatpush1.bf16.msra.mxu1 %v19241_v10  ;;  %14166 = vmatprep.subr.bf16.mxu0 %v19246_v40  ;;  %v19261_v10 = vld [vmem:[%s21189_s8 + $0x3a44] ss:$16 sps:$4 sm:$0xff]   ;;  %v19265_v51 = vld [vmem:[%s21189_s8 + $0x3a20] ss:$16 sps:$4 sm:$0xff]  }
 0x3dc   : > { %14207 = vmatprep.subr.bf16.mxu1 %v19249_v45  ;;  %v19270_v62 = vld [vmem:[%s21189_s8 + $0x3804] ss:$16 sps:$4 sm:$0xff]   ;;  %v19268_v45 = vld [vmem:[%s21189_s8 + $0x3800] ss:$16 sps:$4 sm:$0xff]  }
 0x3dd   : > { %v19273_v40 = vld [vmem:[%s21189_s8 + $0x3a04] ss:$16 sps:$4 sm:$0xff]   ;;  %v19334_v2 = vld [vmem:[%s21189_s8 + $0x3ca0] ss:$16 sps:$4 sm:$0xff]  }
 0x3de   : > { %14167 = vmatpush1.bf16.msra.mxu0 %v19244_v32  ;;  %v19271_v32 = vld [vmem:[%s21189_s8 + $0x3a00] ss:$16 sps:$4 sm:$0xff]  }
 0x3df   : > { %14208 = vmatpush1.bf16.msra.mxu1 %v19247_v46  ;;  %14168 = vmatprep.subr.bf16.mxu0 %v19252_v3  ;;  %v19276_v46 = vld [vmem:[%s21189_s8 + $0x39e4] ss:$16 sps:$4 sm:$0xff]  }
 0x3e0   : > { %14209 = vmatprep.subr.bf16.mxu1 %v19255_v19  ;;  %v19279_v3 = vld [vmem:[%s21189_s8 + $0x3be4] ss:$16 sps:$4 sm:$0xff]   ;;  %v19274_v19 = vld [vmem:[%s21189_s8 + $0x39e0] ss:$16 sps:$4 sm:$0xff]  }
 0x3e2   : > { %14169 = vmatpush1.bf16.msra.mxu0 %v19250_v47  ;;  %v19277_v47 = vld [vmem:[%s21189_s8 + $0x3be0] ss:$16 sps:$4 sm:$0xff]  }
 0x3e3   : > { %14210 = vmatpush1.bf16.msra.mxu1 %v19253_v38  ;;  %14170 = vmatprep.subr.bf16.mxu0 %v19258_v31  ;;  %v19282_v38 = vld [vmem:[%s21189_s8 + $0x39c4] ss:$16 sps:$4 sm:$0xff]  }
 0x3e4   : > { %14211 = vmatprep.subr.bf16.mxu1 %v19261_v10  ;;  %v19285_v31 = vld [vmem:[%s21189_s8 + $0x3bc4] ss:$16 sps:$4 sm:$0xff]   ;;  %v19280_v10 = vld [vmem:[%s21189_s8 + $0x39c0] ss:$16 sps:$4 sm:$0xff]  }
 0x3e6   : > { %14171 = vmatpush1.bf16.msra.mxu0 %v19256_v27  ;;  %v19283_v27 = vld [vmem:[%s21189_s8 + $0x3bc0] ss:$16 sps:$4 sm:$0xff]  }
 0x3e7   : > { %14212 = vmatpush1.bf16.msra.mxu1 %v19259_v29  ;;  %14172 = vmatprep.subr.bf16.mxu0 %v19264_v36  ;;  %v19288_v29 = vld [vmem:[%s21189_s8 + $0x39a4] ss:$16 sps:$4 sm:$0xff]  }
 0x3e8   : > { %14213 = vmatprep.subr.bf16.mxu1 %v19267_v14  ;;  %v19291_v36 = vld [vmem:[%s21189_s8 + $0x3ba4] ss:$16 sps:$4 sm:$0xff]   ;;  %v19286_v14 = vld [vmem:[%s21189_s8 + $0x39a0] ss:$16 sps:$4 sm:$0xff]  }
 0x3ea   : > { %14173 = vmatpush1.bf16.msra.mxu0 %v19262_v16  ;;  %v19289_v16 = vld [vmem:[%s21189_s8 + $0x3ba0] ss:$16 sps:$4 sm:$0xff]  }
 0x3eb   : > { %14214 = vmatpush1.bf16.msra.mxu1 %v19265_v51  ;;  %14174 = vmatprep.subr.bf16.mxu0 %v19270_v62  ;;  %v19294_v51 = vld [vmem:[%s21189_s8 + $0x3984] ss:$16 sps:$4 sm:$0xff]  }
 0x3ec   : > { %14215 = vmatprep.subr.bf16.mxu1 %v19273_v40  ;;  %v19297_v62 = vld [vmem:[%s21189_s8 + $0x3b84] ss:$16 sps:$4 sm:$0xff]   ;;  %v19292_v40 = vld [vmem:[%s21189_s8 + $0x3980] ss:$16 sps:$4 sm:$0xff]  }
 0x3ee   : > { %14175 = vmatpush1.bf16.msra.mxu0 %v19268_v45  ;;  %v19295_v45 = vld [vmem:[%s21189_s8 + $0x3b80] ss:$16 sps:$4 sm:$0xff]  }
 0x3ef   : > { %14216 = vmatpush1.bf16.msra.mxu1 %v19271_v32  ;;  %14176 = vmatprep.subr.bf16.mxu0 %v19276_v46  ;;  %v19300_v32 = vld [vmem:[%s21189_s8 + $0x3964] ss:$16 sps:$4 sm:$0xff]  }
 0x3f0   : > { %14217 = vmatprep.subr.bf16.mxu1 %v19279_v3  ;;  %v19303_v46 = vld [vmem:[%s21189_s8 + $0x3b64] ss:$16 sps:$4 sm:$0xff]   ;;  %v19298_v3 = vld [vmem:[%s21189_s8 + $0x3960] ss:$16 sps:$4 sm:$0xff]  }
 0x3f2   : > { %14177 = vmatpush2.bf16.msra.mxu0 %v19274_v19  ;;  %v19301_v19 = vld [vmem:[%s21189_s8 + $0x3b60] ss:$16 sps:$4 sm:$0xff]  }
 0x3f3   : > { %14218 = vmatpush2.bf16.msra.mxu1 %v19277_v47  ;;  %14178 = vmatprep.subr.bf16.mxu0 %v19282_v38  ;;  %v19306_v47 = vld [vmem:[%s21189_s8 + $0x3944] ss:$16 sps:$4 sm:$0xff]  }
 0x3f4   : > { %14219 = vmatprep.subr.bf16.mxu1 %v19285_v31  ;;  %v19309_v38 = vld [vmem:[%s21189_s8 + $0x3b44] ss:$16 sps:$4 sm:$0xff]   ;;  %v2659_v31 = vcombine.high %v22528_v5, %v22528_v5  ;;  %v19310_v5 = vld [vmem:[%s21189_s8 + $0x3920] ss:$16 sps:$4 sm:$0xff]  }
 0x3f6   : > { %14179 = vmatpush2.bf16.msra.mxu0 %v19280_v10  ;;  %v19304_v10 = vld [vmem:[%s21189_s8 + $0x3940] ss:$16 sps:$4 sm:$0xff]  }
 0x3f7   : > { %14220 = vmatpush2.bf16.msra.mxu1 %v19283_v27  ;;  %14180 = vmatprep.subr.bf16.mxu0 %v19288_v29  ;;  %v19307_v27 = vld [vmem:[%s21189_s8 + $0x3b40] ss:$16 sps:$4 sm:$0xff]   ;;  %v19312_v29 = vld [vmem:[%s21189_s8 + $0x3924] ss:$16 sps:$4 sm:$0xff]  }
 0x3f8   : > { %14221 = vmatprep.subr.bf16.mxu1 %v19291_v36  ;;  %v19315_v36 = vld [vmem:[%s21189_s8 + $0x3b24] ss:$16 sps:$4 sm:$0xff]  }
 0x3fa   : > { %14181 = vmatpush2.bf16.msra.mxu0 %v19286_v14  ;;  %v22632_v14 = vrot.slane %v2659_v31, %v21248_v49 }
 0x3fb   : > { %14222 = vmatpush2.bf16.msra.mxu1 %v19289_v16  ;;  %14182 = vmatprep.subr.bf16.mxu0 %v19294_v51  ;;  %v19313_v16 = vld [vmem:[%s21189_s8 + $0x3b20] ss:$16 sps:$4 sm:$0xff]   ;;  %v19318_v51 = vld [vmem:[%s21189_s8 + $0x3904] ss:$16 sps:$4 sm:$0xff]  }
 0x3fc   : > { %14223 = vmatprep.subr.bf16.mxu1 %v19297_v62  ;;  %v19321_v62 = vld [vmem:[%s21189_s8 + $0x3b04] ss:$16 sps:$4 sm:$0xff]  }
 0x3fe   : > { %14183 = vmatpush2.bf16.msra.mxu0 %v19292_v40  ;;  %v2675_v40 = vcombine.high %v22632_v14, %v22632_v14 }
 0x3ff   : > { %14224 = vmatpush2.bf16.msra.mxu1 %v19295_v45  ;;  %14184 = vmatprep.subr.bf16.mxu0 %v19300_v32  ;;  %v22642_v45 = vrot.slane %v22536_v21, %v21248_v49  ;;  %v19316_v32 = vld [vmem:[%s21189_s8 + $0x3900] ss:$16 sps:$4 sm:$0xff]  }
 0x400   : > { %14225 = vmatprep.subr.bf16.mxu1 %v19303_v46  ;;  %v19319_v46 = vld [vmem:[%s21189_s8 + $0x3b00] ss:$16 sps:$4 sm:$0xff]   ;;  %v22651_v31 = vrot.slane %v2675_v40, %v21248_v49 }
 0x401   : > { %23999 = vst [vmem:[#allocation28_spill] sm:$0xff] %v22642_v45  ;;  %v22655_v21 = vcombine.high %v22642_v45, %v22642_v45 }
 0x402   : > { %14185 = vmatpush2.bf16.msra.mxu0 %v19298_v3  ;;  %v19324_v3 = vld [vmem:[%s21189_s8 + $0x3ce4] ss:$16 sps:$4 sm:$0xff]  }
 0x403   : > { %14226 = vmatpush2.bf16.msra.mxu1 %v19301_v19  ;;  %14186 = vmatprep.subr.bf16.mxu0 %v19306_v47  ;;  %v19327_v19 = vld [vmem:[%s21189_s8 + $0x3ee4] ss:$16 sps:$4 sm:$0xff]   ;;  %v19322_v47 = vld [vmem:[%s21189_s8 + $0x3ce0] ss:$16 sps:$4 sm:$0xff]  }
 0x404   : > { %14227 = vmatprep.subr.bf16.mxu1 %v19309_v38  ;;  %v19325_v38 = vld [vmem:[%s21189_s8 + $0x3ee0] ss:$16 sps:$4 sm:$0xff]  }
 0x406   : > { %14187 = vmatpush2.bf16.msra.mxu0 %v19304_v10  ;;  %v19330_v10 = vld [vmem:[%s21189_s8 + $0x3cc4] ss:$16 sps:$4 sm:$0xff]  }
 0x407   : > { %14228 = vmatpush2.bf16.msra.mxu1 %v19307_v27  ;;  %14188 = vmatprep.subr.bf16.mxu0 %v19312_v29  ;;  %v19333_v27 = vld [vmem:[%s21189_s8 + $0x3ec4] ss:$16 sps:$4 sm:$0xff]   ;;  %v19328_v29 = vld [vmem:[%s21189_s8 + $0x3cc0] ss:$16 sps:$4 sm:$0xff]  }
 0x408   : > { %14229 = vmatprep.subr.bf16.mxu1 %v19315_v36  ;;  %v19331_v36 = vld [vmem:[%s21189_s8 + $0x3ec0] ss:$16 sps:$4 sm:$0xff]  }
 0x40a   : > { %14189 = vmatpush2.bf16.msra.mxu0 %v19310_v5  ;;  %v22663_v5 = vcombine.high %v22651_v31, %v22651_v31 }
 0x40b   : > { %14230 = vmatpush2.bf16.msra.mxu1 %v19313_v16  ;;  %14190 = vmatprep.subr.bf16.mxu0 %v19318_v51 }
 0x40c   : > { %14231 = vmatprep.subr.bf16.mxu1 %v19321_v62 }
 0x40e   : > { %14191 = vmatpush2.bf16.msra.mxu0 %v19316_v32 }
 0x40f   : > { %14232 = vmatpush2.bf16.msra.mxu1 %v19319_v46  ;;  %14242 = vmatprep.subr.bf16.mxu0 %v19324_v3  ;;  %v19336_v46 = vld [vmem:[%s21189_s8 + $0x3ca4] ss:$16 sps:$4 sm:$0xff]  }
 0x410   : > { %14283 = vmatprep.subr.bf16.mxu1 %v19327_v19  ;;  %v19339_v3 = vld [vmem:[%s21189_s8 + $0x3ea4] ss:$16 sps:$4 sm:$0xff]  }
 0x411   : > { %v13948_v16 = vpop.f32.mrf.mxu0  ;;  %14193 = vmatmul.mubr.bf16.vlgmr.msra.gmra.mxu0 %v22642_v45  ;;  %v19337_v45 = vld [vmem:[%s21189_s8 + $0x3ea0] ss:$16 sps:$4 sm:$0xff]  }
 0x412   : > { %v13989_v51 = vpop.f32.mrf.mxu1  ;;  %14234 = vmatmul.mubr.bf16.vlgmr.msra.gmra.mxu1 %v22655_v21  ;;  %v13949_v62 = vadd.f32 %v13948_v16, %v22574_v57  ;;  %14243 = vmatpush1.bf16.msra.mxu0 %v19322_v47  ;;  %v19345_v16 = vld [vmem:[%s21189_s8 + $0x3e84] ss:$16 sps:$4 sm:$0xff]  }
 0x413   : > { %14284 = vmatpush1.bf16.msra.mxu1 %v19325_v38  ;;  %v13950_v40 = vpop.f32.mrf.mxu0  ;;  %14244 = vmatprep.subr.bf16.mxu0 %v19330_v10 }
 0x414   : > { %v13991_v32 = vpop.f32.mrf.mxu1  ;;  %14285 = vmatprep.subr.bf16.mxu1 %v19333_v27  ;;  %v22670_v19 = vadd.f32 %v13989_v51, %v13949_v62  ;;  %v13951_v58 = vadd.f32 %v13950_v40, %v22581_v8  ;;  %14274 = vmatprep.mubr.bf16.mxu0 %v22651_v31  ;;  %v19342_v8 = vld [vmem:[%s21189_s8 + $0x3c84] ss:$16 sps:$4 sm:$0xff]   ;;  %v19340_v51 = vld [vmem:[%s21189_s8 + $0x3c80] ss:$16 sps:$4 sm:$0xff]  }
 0x415   : > { %14315 = vmatprep.mubr.bf16.mxu1 %v22663_v5  ;;  %v13952_v57 = vpop.f32.mrf.mxu0  ;;  %v19343_v62 = vld [vmem:[%s21189_s8 + $0x3e80] ss:$16 sps:$4 sm:$0xff]  }
 0x416   : > { %v13993_v47 = vpop.f32.mrf.mxu1  ;;  %v22677_v38 = vadd.f32 %v13991_v32, %v13951_v58  ;;  %14245 = vmatpush1.bf16.msra.mxu0 %v19328_v29  ;;  %v19348_v58 = vld [vmem:[%s21189_s8 + $0x3c64] ss:$16 sps:$4 sm:$0xff]   ;;  %v19349_v40 = vld [vmem:[%s21189_s8 + $0x3e60] ss:$16 sps:$4 sm:$0xff]  }
 0x417   : > { %14286 = vmatpush1.bf16.msra.mxu1 %v19331_v36  ;;  %v13953_v10 = vpop.f32.mrf.mxu0  ;;  %14246 = vmatprep.subr.bf16.mxu0 %v19336_v46  ;;  %v19351_v29 = vld [vmem:[%s21189_s8 + $0x3e64] ss:$16 sps:$4 sm:$0xff]   ;;  %v19346_v36 = vld [vmem:[%s21189_s8 + $0x3c60] ss:$16 sps:$4 sm:$0xff]  }
 0x418   : > { %v13994_v27 = vpop.f32.mrf.mxu1  ;;  %14287 = vmatprep.subr.bf16.mxu1 %v19339_v3  ;;  %v19352_v32 = vld [vmem:[%s21189_s8 + $0x3c40] ss:$16 sps:$4 sm:$0xff]   ;;  %v19360_v3 = vld [vmem:[%s21189_s8 + $0x3c24] ss:$16 sps:$4 sm:$0xff]  }
 0x419   : > { %v19355_v46 = vld [vmem:[%s21189_s8 + $0x3e40] ss:$16 sps:$4 sm:$0xff]   ;;  %v19363_v57 = vld [vmem:[%s21189_s8 + $0x3e24] ss:$16 sps:$4 sm:$0xff]  }
 0x41a   : > { %14247 = vmatpush1.bf16.msra.mxu0 %v19334_v2  ;;  %v19354_v2 = vld [vmem:[%s21189_s8 + $0x3c44] ss:$16 sps:$4 sm:$0xff]   ;;  %v19358_v47 = vld [vmem:[%s21189_s8 + $0x3c20] ss:$16 sps:$4 sm:$0xff]  }
 0x41b   : > { %14288 = vmatpush1.bf16.msra.mxu1 %v19337_v45  ;;  %14248 = vmatprep.subr.bf16.mxu0 %v19342_v8  ;;  %v19357_v45 = vld [vmem:[%s21189_s8 + $0x3e44] ss:$16 sps:$4 sm:$0xff]   ;;  %v19361_v10 = vld [vmem:[%s21189_s8 + $0x3e20] ss:$16 sps:$4 sm:$0xff]  }
 0x41c   : > { %14289 = vmatprep.subr.bf16.mxu1 %v19345_v16  ;;  %v19366_v27 = vld [vmem:[%s21189_s8 + $0x3c04] ss:$16 sps:$4 sm:$0xff]   ;;  %v19364_v16 = vld [vmem:[%s21189_s8 + $0x3c00] ss:$16 sps:$4 sm:$0xff]  }
 0x41d   : > { %v19369_v8 = vld [vmem:[%s21189_s8 + $0x3e04] ss:$16 sps:$4 sm:$0xff]  }
 0x41e   : > { %14249 = vmatpush1.bf16.msra.mxu0 %v19340_v51  ;;  %v19367_v51 = vld [vmem:[%s21189_s8 + $0x3e00] ss:$16 sps:$4 sm:$0xff]  }
 0x41f   : > { %14290 = vmatpush1.bf16.msra.mxu1 %v19343_v62  ;;  %14250 = vmatprep.subr.bf16.mxu0 %v19348_v58  ;;  %v19372_v62 = vld [vmem:[%s21189_s8 + $0x3de4] ss:$16 sps:$4 sm:$0xff]  }
 0x420   : > { %14291 = vmatprep.subr.bf16.mxu1 %v19351_v29  ;;  %v19375_v58 = vld [vmem:[%s21189_s8 + $0x3fe4] ss:$16 sps:$4 sm:$0xff]   ;;  %v19370_v29 = vld [vmem:[%s21189_s8 + $0x3de0] ss:$16 sps:$4 sm:$0xff]  }
 0x422   : > { %14251 = vmatpush1.bf16.msra.mxu0 %v19346_v36  ;;  %v19373_v36 = vld [vmem:[%s21189_s8 + $0x3fe0] ss:$16 sps:$4 sm:$0xff]  }
 0x423   : > { %14292 = vmatpush1.bf16.msra.mxu1 %v19349_v40  ;;  %14252 = vmatprep.subr.bf16.mxu0 %v19354_v2  ;;  %v19378_v40 = vld [vmem:[%s21189_s8 + $0x3dc4] ss:$16 sps:$4 sm:$0xff]  }
 0x424   : > { %14293 = vmatprep.subr.bf16.mxu1 %v19357_v45  ;;  %v19381_v2 = vld [vmem:[%s21189_s8 + $0x3fc4] ss:$16 sps:$4 sm:$0xff]   ;;  %v19376_v45 = vld [vmem:[%s21189_s8 + $0x3dc0] ss:$16 sps:$4 sm:$0xff]  }
 0x426   : > { %14253 = vmatpush1.bf16.msra.mxu0 %v19352_v32  ;;  %v19379_v32 = vld [vmem:[%s21189_s8 + $0x3fc0] ss:$16 sps:$4 sm:$0xff]  }
 0x427   : > { %14294 = vmatpush1.bf16.msra.mxu1 %v19355_v46  ;;  %14254 = vmatprep.subr.bf16.mxu0 %v19360_v3  ;;  %v19384_v46 = vld [vmem:[%s21189_s8 + $0x3da4] ss:$16 sps:$4 sm:$0xff]  }
 0x428   : > { %14295 = vmatprep.subr.bf16.mxu1 %v19363_v57  ;;  %v19387_v3 = vld [vmem:[%s21189_s8 + $0x3fa4] ss:$16 sps:$4 sm:$0xff]   ;;  %v19382_v57 = vld [vmem:[%s21189_s8 + $0x3da0] ss:$16 sps:$4 sm:$0xff]  }
 0x42a   : > { %14255 = vmatpush1.bf16.msra.mxu0 %v19358_v47  ;;  %v19385_v47 = vld [vmem:[%s21189_s8 + $0x3fa0] ss:$16 sps:$4 sm:$0xff]  }
 0x42b   : > { %14296 = vmatpush1.bf16.msra.mxu1 %v19361_v10  ;;  %14256 = vmatprep.subr.bf16.mxu0 %v19366_v27  ;;  %v19390_v10 = vld [vmem:[%s21189_s8 + $0x3d84] ss:$16 sps:$4 sm:$0xff]  }
 0x42c   : > { %14297 = vmatprep.subr.bf16.mxu1 %v19369_v8  ;;  %v19393_v27 = vld [vmem:[%s21189_s8 + $0x3f84] ss:$16 sps:$4 sm:$0xff]   ;;  %v19388_v8 = vld [vmem:[%s21189_s8 + $0x3d80] ss:$16 sps:$4 sm:$0xff]  }
 0x42e   : > { %14257 = vmatpush1.bf16.msra.mxu0 %v19364_v16  ;;  %v19391_v16 = vld [vmem:[%s21189_s8 + $0x3f80] ss:$16 sps:$4 sm:$0xff]  }
 0x42f   : > { %14298 = vmatpush1.bf16.msra.mxu1 %v19367_v51  ;;  %14258 = vmatprep.subr.bf16.mxu0 %v19372_v62  ;;  %v19396_v51 = vld [vmem:[%s21189_s8 + $0x3d64] ss:$16 sps:$4 sm:$0xff]  }
 0x430   : > { %14299 = vmatprep.subr.bf16.mxu1 %v19375_v58  ;;  %v19399_v62 = vld [vmem:[%s21189_s8 + $0x3f64] ss:$16 sps:$4 sm:$0xff]   ;;  %v19394_v58 = vld [vmem:[%s21189_s8 + $0x3d60] ss:$16 sps:$4 sm:$0xff]  }
 0x432   : > { %14259 = vmatpush2.bf16.msra.mxu0 %v19370_v29  ;;  %v19397_v29 = vld [vmem:[%s21189_s8 + $0x3f60] ss:$16 sps:$4 sm:$0xff]  }
 0x433   : > { %14300 = vmatpush2.bf16.msra.mxu1 %v19373_v36  ;;  %14260 = vmatprep.subr.bf16.mxu0 %v19378_v40  ;;  %v19402_v36 = vld [vmem:[%s21189_s8 + $0x3d44] ss:$16 sps:$4 sm:$0xff]  }
 0x434   : > { %14301 = vmatprep.subr.bf16.mxu1 %v19381_v2  ;;  %v19405_v40 = vld [vmem:[%s21189_s8 + $0x3f44] ss:$16 sps:$4 sm:$0xff]   ;;  %v19400_v2 = vld [vmem:[%s21189_s8 + $0x3d40] ss:$16 sps:$4 sm:$0xff]  }
 0x436   : > { %14261 = vmatpush2.bf16.msra.mxu0 %v19376_v45  ;;  %v19403_v45 = vld [vmem:[%s21189_s8 + $0x3f40] ss:$16 sps:$4 sm:$0xff]  }
 0x437   : > { %14302 = vmatpush2.bf16.msra.mxu1 %v19379_v32  ;;  %14262 = vmatprep.subr.bf16.mxu0 %v19384_v46  ;;  %v19408_v32 = vld [vmem:[%s21189_s8 + $0x3d24] ss:$16 sps:$4 sm:$0xff]  }
 0x438   : > { %14303 = vmatprep.subr.bf16.mxu1 %v19387_v3  ;;  %v19411_v46 = vld [vmem:[%s21189_s8 + $0x3f24] ss:$16 sps:$4 sm:$0xff]   ;;  %v19406_v3 = vld [vmem:[%s21189_s8 + $0x3d20] ss:$16 sps:$4 sm:$0xff]  }
 0x43a   : > { %14263 = vmatpush2.bf16.msra.mxu0 %v19382_v57  ;;  %v19409_v57 = vld [vmem:[%s21189_s8 + $0x3f20] ss:$16 sps:$4 sm:$0xff]  }
 0x43b   : > { %14304 = vmatpush2.bf16.msra.mxu1 %v19385_v47  ;;  %14264 = vmatprep.subr.bf16.mxu0 %v19390_v10  ;;  %v19414_v47 = vld [vmem:[%s21189_s8 + $0x3d04] ss:$16 sps:$4 sm:$0xff]  }
 0x43c   : > { %14305 = vmatprep.subr.bf16.mxu1 %v19393_v27  ;;  %v19417_v10 = vld [vmem:[%s21189_s8 + $0x3f04] ss:$16 sps:$4 sm:$0xff]   ;;  %v22731_v27 = vrot.slane %v22632_v14, %v21248_v49  ;;  %v19427_v14 = vld [vmem:[%s21189_s8 + $0xcc] ss:$16 sps:$4 sm:$0xff]   ;;  %v19434_v49 = vld [vmem:[%s21189_s8 + $0x2a8] ss:$16 sps:$4 sm:$0xff]  }
 0x43e   : > { %14265 = vmatpush2.bf16.msra.mxu0 %v19388_v8  ;;  %v19412_v8 = vld [vmem:[%s21189_s8 + $0x3d00] ss:$16 sps:$4 sm:$0xff]  }
 0x43f   : > { %14306 = vmatpush2.bf16.msra.mxu1 %v19391_v16  ;;  %14266 = vmatprep.subr.bf16.mxu0 %v19396_v51  ;;  %v19415_v16 = vld [vmem:[%s21189_s8 + $0x3f00] ss:$16 sps:$4 sm:$0xff]   ;;  %v19421_v51 = vld [vmem:[%s21189_s8 + $0xec] ss:$16 sps:$4 sm:$0xff]  }
 0x440   : > { %14307 = vmatprep.subr.bf16.mxu1 %v19399_v62  ;;  %v19424_v62 = vld [vmem:[%s21189_s8 + $0x2ec] ss:$16 sps:$4 sm:$0xff]  }
 0x442   : > { %14267 = vmatpush2.bf16.msra.mxu0 %v19394_v58  ;;  %v19419_v58 = vld [vmem:[%s21189_s8 + $0xe8] ss:$16 sps:$4 sm:$0xff]  }
 0x443   : > { %14308 = vmatpush2.bf16.msra.mxu1 %v19397_v29  ;;  %14268 = vmatprep.subr.bf16.mxu0 %v19402_v36  ;;  %v19422_v29 = vld [vmem:[%s21189_s8 + $0x2e8] ss:$16 sps:$4 sm:$0xff]   ;;  %v22741_v36 = vcombine.high %v22731_v27, %v22731_v27 }
 0x444   : > { %14309 = vmatprep.subr.bf16.mxu1 %v19405_v40  ;;  %v19430_v40 = vld [vmem:[%s21189_s8 + $0x2cc] ss:$16 sps:$4 sm:$0xff]  }
 0x446   : > { %14269 = vmatpush2.bf16.msra.mxu0 %v19400_v2  ;;  %v19425_v2 = vld [vmem:[%s21189_s8 + $0xc8] ss:$16 sps:$4 sm:$0xff]  }
 0x447   : > { %14310 = vmatpush2.bf16.msra.mxu1 %v19403_v45  ;;  %14270 = vmatprep.subr.bf16.mxu0 %v19408_v32  ;;  %v19428_v45 = vld [vmem:[%s21189_s8 + $0x2c8] ss:$16 sps:$4 sm:$0xff]  }
 0x448   : > { %14311 = vmatprep.subr.bf16.mxu1 %v19411_v46 }
 0x44a   : > { %14271 = vmatpush2.bf16.msra.mxu0 %v19406_v3 }
 0x44b   : > { %14312 = vmatpush2.bf16.msra.mxu1 %v19409_v57  ;;  %14272 = vmatprep.subr.bf16.mxu0 %v19414_v47 }
 0x44c   : > { %14313 = vmatprep.subr.bf16.mxu1 %v19417_v10  ;;  %v19433_v10 = vld [vmem:[%s21189_s8 + $0xac] ss:$16 sps:$4 sm:$0xff]  }
 0x44e   : > { %14273 = vmatpush2.bf16.msra.mxu0 %v19412_v8  ;;  %v19436_v8 = vld [vmem:[%s21189_s8 + $0x2ac] ss:$16 sps:$4 sm:$0xff]  }
 0x44f   : > { %14314 = vmatpush2.bf16.msra.mxu1 %v19415_v16  ;;  %14324 = vmatprep.subr.bf16.mxu0 %v19421_v51 }
 0x450   : > { %14365 = vmatprep.subr.bf16.mxu1 %v19424_v62  ;;  %v19431_v62 = vld [vmem:[%s21189_s8 + $0xa8] ss:$16 sps:$4 sm:$0xff]  }
 0x451   : > { %v14030_v32 = vpop.f32.mrf.mxu0  ;;  %14275 = vmatmul.mubr.bf16.vlgmr.msra.gmra.mxu0 %v22731_v27 }
 0x452   : > { %v14071_v46 = vpop.f32.mrf.mxu1  ;;  %14316 = vmatmul.mubr.bf16.vlgmr.msra.gmra.mxu1 %v22741_v36  ;;  %v14031_v3 = vadd.f32 %v14030_v32, %v22670_v19  ;;  %14325 = vmatpush1.bf16.msra.mxu0 %v19419_v58  ;;  %v19440_v32 = vld [vmem:[%s21189_s8 + $0x288] ss:$16 sps:$4 sm:$0xff]  }
 0x453   : > { %14366 = vmatpush1.bf16.msra.mxu1 %v19422_v29  ;;  %v14032_v57 = vpop.f32.mrf.mxu0  ;;  %14326 = vmatprep.subr.bf16.mxu0 %v19427_v14 }
 0x454   : > { %v14073_v47 = vpop.f32.mrf.mxu1  ;;  %14367 = vmatprep.subr.bf16.mxu1 %v19430_v40  ;;  %v22752_v16 = vadd.f32 %v14071_v46, %v14031_v3  ;;  %v14033_v51 = vadd.f32 %v14032_v57, %v22677_v38  ;;  %14356 = vmatprep.mubr.bf16.mxu0 %v21262_v60  ;;  %v19439_v38 = vld [vmem:[%s21189_s8 + $0x8c] ss:$16 sps:$4 sm:$0xff]   ;;  %v19443_v46 = vld [vmem:[%s21189_s8 + $0x68] ss:$16 sps:$4 sm:$0xff]  }
 0x455   : > { %14397 = vmatprep.mubr.bf16.mxu1 %v21269_v0  ;;  %v14034_v19 = vpop.f32.mrf.mxu0  ;;  %v19442_v60 = vld [vmem:[%s21189_s8 + $0x28c] ss:$16 sps:$4 sm:$0xff]   ;;  %v19437_v0 = vld [vmem:[%s21189_s8 + $0x88] ss:$16 sps:$4 sm:$0xff]  }
 0x456   : > { %v14075_v58 = vpop.f32.mrf.mxu1  ;;  %v22759_v29 = vadd.f32 %v14073_v47, %v14033_v51  ;;  %14327 = vmatpush1.bf16.msra.mxu0 %v19425_v2  ;;  %v19445_v2 = vld [vmem:[%s21189_s8 + $0x6c] ss:$16 sps:$4 sm:$0xff]   ;;  %v19446_v3 = vld [vmem:[%s21189_s8 + $0x268] ss:$16 sps:$4 sm:$0xff]  }
 0x457   : > { %14368 = vmatpush1.bf16.msra.mxu1 %v19428_v45  ;;  %v14035_v14 = vpop.f32.mrf.mxu0  ;;  %14328 = vmatprep.subr.bf16.mxu0 %v19433_v10  ;;  %v19448_v45 = vld [vmem:[%s21189_s8 + $0x26c] ss:$16 sps:$4 sm:$0xff]   ;;  %v19449_v47 = vld [vmem:[%s21189_s8 + $0x48] ss:$16 sps:$4 sm:$0xff]  }
 0x458   : > { %v14076_v40 = vpop.f32.mrf.mxu1  ;;  %14369 = vmatprep.subr.bf16.mxu1 %v19436_v8  ;;  %v19451_v57 = vld [vmem:[%s21189_s8 + $0x4c] ss:$16 sps:$4 sm:$0xff]   ;;  %v19452_v10 = vld [vmem:[%s21189_s8 + $0x248] ss:$16 sps:$4 sm:$0xff]  }
 0x459   : > { %v19457_v8 = vld [vmem:[%s21189_s8 + $0x2c] ss:$16 sps:$4 sm:$0xff]   ;;  %v19458_v19 = vld [vmem:[%s21189_s8 + $0x228] ss:$16 sps:$4 sm:$0xff]  }
 0x45a   : > { %14329 = vmatpush1.bf16.msra.mxu0 %v19431_v62  ;;  %v19460_v51 = vld [vmem:[%s21189_s8 + $0x22c] ss:$16 sps:$4 sm:$0xff]   ;;  %v19455_v62 = vld [vmem:[%s21189_s8 + $0x28] ss:$16 sps:$4 sm:$0xff]  }
 0x45b   : > { %14370 = vmatpush1.bf16.msra.mxu1 %v19434_v49  ;;  %14330 = vmatprep.subr.bf16.mxu0 %v19439_v38  ;;  %v19454_v49 = vld [vmem:[%s21189_s8 + $0x24c] ss:$16 sps:$4 sm:$0xff]   ;;  %v19461_v40 = vld [vmem:[%s21189_s8 + $0x8] ss:$16 sps:$4 sm:$0xff]  }
 0x45c   : > { %14371 = vmatprep.subr.bf16.mxu1 %v19442_v60  ;;  %v19463_v58 = vld [vmem:[%s21189_s8 + $0xc] ss:$16 sps:$4 sm:$0xff]   ;;  %v19464_v38 = vld [vmem:[%s21189_s8 + $0x208] ss:$16 sps:$4 sm:$0xff]  }
 0x45d   : > { %v19466_v14 = vld [vmem:[%s21189_s8 + $0x20c] ss:$16 sps:$4 sm:$0xff]  }
 0x45e   : > { %14331 = vmatpush1.bf16.msra.mxu0 %v19437_v0  ;;  %v19469_v60 = vld [vmem:[%s21189_s8 + $0x1ec] ss:$16 sps:$4 sm:$0xff]  }
 0x45f   : > { %14372 = vmatpush1.bf16.msra.mxu1 %v19440_v32  ;;  %14332 = vmatprep.subr.bf16.mxu0 %v19445_v2  ;;  %v19472_v0 = vld [vmem:[%s21189_s8 + $0x3ec] ss:$16 sps:$4 sm:$0xff]   ;;  %v19467_v32 = vld [vmem:[%s21189_s8 + $0x1e8] ss:$16 sps:$4 sm:$0xff]  }
 0x460   : > { %14373 = vmatprep.subr.bf16.mxu1 %v19448_v45  ;;  %v19470_v2 = vld [vmem:[%s21189_s8 + $0x3e8] ss:$16 sps:$4 sm:$0xff]   ;;  %v19475_v45 = vld [vmem:[%s21189_s8 + $0x1cc] ss:$16 sps:$4 sm:$0xff]  }
 0x462   : > { %14333 = vmatpush1.bf16.msra.mxu0 %v19443_v46  ;;  %v19478_v46 = vld [vmem:[%s21189_s8 + $0x3cc] ss:$16 sps:$4 sm:$0xff]  }
 0x463   : > { %14374 = vmatpush1.bf16.msra.mxu1 %v19446_v3  ;;  %14334 = vmatprep.subr.bf16.mxu0 %v19451_v57  ;;  %v19473_v3 = vld [vmem:[%s21189_s8 + $0x1c8] ss:$16 sps:$4 sm:$0xff]  }
 0x464   : > { %14375 = vmatprep.subr.bf16.mxu1 %v19454_v49  ;;  %v19476_v57 = vld [vmem:[%s21189_s8 + $0x3c8] ss:$16 sps:$4 sm:$0xff]   ;;  %v19481_v49 = vld [vmem:[%s21189_s8 + $0x1ac] ss:$16 sps:$4 sm:$0xff]  }
 0x466   : > { %14335 = vmatpush1.bf16.msra.mxu0 %v19449_v47  ;;  %v19484_v47 = vld [vmem:[%s21189_s8 + $0x3ac] ss:$16 sps:$4 sm:$0xff]  }
 0x467   : > { %14376 = vmatpush1.bf16.msra.mxu1 %v19452_v10  ;;  %14336 = vmatprep.subr.bf16.mxu0 %v19457_v8  ;;  %v19479_v10 = vld [vmem:[%s21189_s8 + $0x1a8] ss:$16 sps:$4 sm:$0xff]  }
 0x468   : > { %14377 = vmatprep.subr.bf16.mxu1 %v19460_v51  ;;  %v19482_v8 = vld [vmem:[%s21189_s8 + $0x3a8] ss:$16 sps:$4 sm:$0xff]   ;;  %v19487_v51 = vld [vmem:[%s21189_s8 + $0x18c] ss:$16 sps:$4 sm:$0xff]  }
 0x46a   : > { %14337 = vmatpush1.bf16.msra.mxu0 %v19455_v62  ;;  %v19490_v62 = vld [vmem:[%s21189_s8 + $0x38c] ss:$16 sps:$4 sm:$0xff]  }
 0x46b   : > { %14378 = vmatpush1.bf16.msra.mxu1 %v19458_v19  ;;  %14338 = vmatprep.subr.bf16.mxu0 %v19463_v58  ;;  %v19485_v19 = vld [vmem:[%s21189_s8 + $0x188] ss:$16 sps:$4 sm:$0xff]  }
 0x46c   : > { %14379 = vmatprep.subr.bf16.mxu1 %v19466_v14  ;;  %v19488_v58 = vld [vmem:[%s21189_s8 + $0x388] ss:$16 sps:$4 sm:$0xff]   ;;  %v19493_v14 = vld [vmem:[%s21189_s8 + $0x16c] ss:$16 sps:$4 sm:$0xff]  }
 0x46e   : > { %14339 = vmatpush1.bf16.msra.mxu0 %v19461_v40  ;;  %v19496_v40 = vld [vmem:[%s21189_s8 + $0x36c] ss:$16 sps:$4 sm:$0xff]  }
 0x46f   : > { %14380 = vmatpush1.bf16.msra.mxu1 %v19464_v38  ;;  %14340 = vmatprep.subr.bf16.mxu0 %v19469_v60  ;;  %v19491_v38 = vld [vmem:[%s21189_s8 + $0x168] ss:$16 sps:$4 sm:$0xff]  }
 0x470   : > { %14381 = vmatprep.subr.bf16.mxu1 %v19472_v0  ;;  %v19494_v60 = vld [vmem:[%s21189_s8 + $0x368] ss:$16 sps:$4 sm:$0xff]   ;;  %v19499_v0 = vld [vmem:[%s21189_s8 + $0x14c] ss:$16 sps:$4 sm:$0xff]  }
 0x472   : > { %14341 = vmatpush2.bf16.msra.mxu0 %v19467_v32  ;;  %v19502_v32 = vld [vmem:[%s21189_s8 + $0x34c] ss:$16 sps:$4 sm:$0xff]  }
 0x473   : > { %14382 = vmatpush2.bf16.msra.mxu1 %v19470_v2  ;;  %14342 = vmatprep.subr.bf16.mxu0 %v19475_v45  ;;  %v19497_v2 = vld [vmem:[%s21189_s8 + $0x148] ss:$16 sps:$4 sm:$0xff]  }
 0x474   : > { %14383 = vmatprep.subr.bf16.mxu1 %v19478_v46  ;;  %v19500_v45 = vld [vmem:[%s21189_s8 + $0x348] ss:$16 sps:$4 sm:$0xff]   ;;  %v19505_v46 = vld [vmem:[%s21189_s8 + $0x12c] ss:$16 sps:$4 sm:$0xff]  }
 0x476   : > { %14343 = vmatpush2.bf16.msra.mxu0 %v19473_v3  ;;  %v19508_v3 = vld [vmem:[%s21189_s8 + $0x32c] ss:$16 sps:$4 sm:$0xff]  }
 0x477   : > { %14384 = vmatpush2.bf16.msra.mxu1 %v19476_v57  ;;  %14344 = vmatprep.subr.bf16.mxu0 %v19481_v49  ;;  %v19503_v57 = vld [vmem:[%s21189_s8 + $0x128] ss:$16 sps:$4 sm:$0xff]  }
 0x478   : > { %14385 = vmatprep.subr.bf16.mxu1 %v19484_v47  ;;  %v19506_v49 = vld [vmem:[%s21189_s8 + $0x328] ss:$16 sps:$4 sm:$0xff]   ;;  %v19511_v47 = vld [vmem:[%s21189_s8 + $0x10c] ss:$16 sps:$4 sm:$0xff]  }
 0x47a   : > { %14345 = vmatpush2.bf16.msra.mxu0 %v19479_v10  ;;  %v19514_v10 = vld [vmem:[%s21189_s8 + $0x30c] ss:$16 sps:$4 sm:$0xff]  }
 0x47b   : > { %14386 = vmatpush2.bf16.msra.mxu1 %v19482_v8  ;;  %14346 = vmatprep.subr.bf16.mxu0 %v19487_v51  ;;  %v19509_v8 = vld [vmem:[%s21189_s8 + $0x108] ss:$16 sps:$4 sm:$0xff]  }
 0x47c   : > { %14387 = vmatprep.subr.bf16.mxu1 %v19490_v62  ;;  %v19512_v51 = vld [vmem:[%s21189_s8 + $0x308] ss:$16 sps:$4 sm:$0xff]   ;;  %v19517_v62 = vld [vmem:[%s21189_s8 + $0x4ec] ss:$16 sps:$4 sm:$0xff]  }
 0x47e   : > { %14347 = vmatpush2.bf16.msra.mxu0 %v19485_v19  ;;  %v19520_v19 = vld [vmem:[%s21189_s8 + $0x6ec] ss:$16 sps:$4 sm:$0xff]  }
 0x47f   : > { %14388 = vmatpush2.bf16.msra.mxu1 %v19488_v58  ;;  %14348 = vmatprep.subr.bf16.mxu0 %v19493_v14  ;;  %v19515_v58 = vld [vmem:[%s21189_s8 + $0x4e8] ss:$16 sps:$4 sm:$0xff]  }
 0x480   : > { %14389 = vmatprep.subr.bf16.mxu1 %v19496_v40  ;;  %v19518_v14 = vld [vmem:[%s21189_s8 + $0x6e8] ss:$16 sps:$4 sm:$0xff]   ;;  %v19523_v40 = vld [vmem:[%s21189_s8 + $0x4cc] ss:$16 sps:$4 sm:$0xff]  }
 0x482   : > { %14349 = vmatpush2.bf16.msra.mxu0 %v19491_v38  ;;  %v19526_v38 = vld [vmem:[%s21189_s8 + $0x6cc] ss:$16 sps:$4 sm:$0xff]  }
 0x483   : > { %14390 = vmatpush2.bf16.msra.mxu1 %v19494_v60  ;;  %14350 = vmatprep.subr.bf16.mxu0 %v19499_v0 }
 0x484   : > { %14391 = vmatprep.subr.bf16.mxu1 %v19502_v32 }
 0x486   : > { %14351 = vmatpush2.bf16.msra.mxu0 %v19497_v2  ;;  %v19521_v2 = vld [vmem:[%s21189_s8 + $0x4c8] ss:$16 sps:$4 sm:$0xff]  }
 0x487   : > { %14392 = vmatpush2.bf16.msra.mxu1 %v19500_v45  ;;  %14352 = vmatprep.subr.bf16.mxu0 %v19505_v46  ;;  %v19524_v45 = vld [vmem:[%s21189_s8 + $0x6c8] ss:$16 sps:$4 sm:$0xff]  }
 0x488   : > { %14393 = vmatprep.subr.bf16.mxu1 %v19508_v3 }
 0x48a   : > { %14353 = vmatpush2.bf16.msra.mxu0 %v19503_v57  ;;  %v19529_v57 = vld [vmem:[%s21189_s8 + $0x4ac] ss:$16 sps:$4 sm:$0xff]  }
 0x48b   : > { %14394 = vmatpush2.bf16.msra.mxu1 %v19506_v49  ;;  %14354 = vmatprep.subr.bf16.mxu0 %v19511_v47  ;;  %v19532_v49 = vld [vmem:[%s21189_s8 + $0x6ac] ss:$16 sps:$4 sm:$0xff]  }
 0x48c   : > { %14395 = vmatprep.subr.bf16.mxu1 %v19514_v10 }
 0x48e   : > { %14355 = vmatpush2.bf16.msra.mxu0 %v19509_v8  ;;  %v19527_v8 = vld [vmem:[%s21189_s8 + $0x4a8] ss:$16 sps:$4 sm:$0xff]  }
 0x48f   : > { %14396 = vmatpush2.bf16.msra.mxu1 %v19512_v51  ;;  %14406 = vmatprep.subr.bf16.mxu0 %v19517_v62  ;;  %v19530_v51 = vld [vmem:[%s21189_s8 + $0x6a8] ss:$16 sps:$4 sm:$0xff]  }
 0x490   : > { %14447 = vmatprep.subr.bf16.mxu1 %v19520_v19 }
 0x491   : > { %v14112_v60 = vpop.f32.mrf.mxu0  ;;  %14357 = vmatmul.mubr.bf16.vlgmr.msra.gmra.mxu0 %v21288_v13 }
 0x492   : > { %v14153_v0 = vpop.f32.mrf.mxu1  ;;  %14398 = vmatmul.mubr.bf16.vlgmr.msra.gmra.mxu1 %v21298_v18  ;;  %v14113_v32 = vadd.f32 %v14112_v60, %v22752_v16  ;;  %14407 = vmatpush1.bf16.msra.mxu0 %v19515_v58  ;;  %v19536_v58 = vld [vmem:[%s21189_s8 + $0x688] ss:$16 sps:$4 sm:$0xff]  }
 0x493   : > { %14448 = vmatpush1.bf16.msra.mxu1 %v19518_v14  ;;  %v14114_v46 = vpop.f32.mrf.mxu0  ;;  %14408 = vmatprep.subr.bf16.mxu0 %v19523_v40  ;;  %v19541_v14 = vld [vmem:[%s21189_s8 + $0x46c] ss:$16 sps:$4 sm:$0xff]   ;;  %v19542_v60 = vld [vmem:[%s21189_s8 + $0x668] ss:$16 sps:$4 sm:$0xff]  }
 0x494   : > { %v14155_v3 = vpop.f32.mrf.mxu1  ;;  %14449 = vmatprep.subr.bf16.mxu1 %v19526_v38  ;;  %v22826_v47 = vadd.f32 %v14153_v0, %v14113_v32  ;;  %v14115_v13 = vadd.f32 %v14114_v46, %v22759_v29  ;;  %14438 = vmatprep.mubr.bf16.mxu0 %v21294_v17  ;;  %v19535_v17 = vld [vmem:[%s21189_s8 + $0x48c] ss:$16 sps:$4 sm:$0xff]   ;;  %v19533_v29 = vld [vmem:[%s21189_s8 + $0x488] ss:$16 sps:$4 sm:$0xff]  }
 0x495   : > { %14479 = vmatprep.mubr.bf16.mxu1 %v21306_v23  ;;  %v14116_v18 = vpop.f32.mrf.mxu0  ;;  %v19538_v23 = vld [vmem:[%s21189_s8 + $0x68c] ss:$16 sps:$4 sm:$0xff]   ;;  %v19539_v38 = vld [vmem:[%s21189_s8 + $0x468] ss:$16 sps:$4 sm:$0xff]  }
 0x496   : > { %v14157_v16 = vpop.f32.mrf.mxu1  ;;  %v22831_v10 = vadd.f32 %v14155_v3, %v14115_v13  ;;  %14409 = vmatpush1.bf16.msra.mxu0 %v19521_v2  ;;  %v19544_v40 = vld [vmem:[%s21189_s8 + $0x66c] ss:$16 sps:$4 sm:$0xff]   ;;  %v19545_v2 = vld [vmem:[%s21189_s8 + $0x448] ss:$16 sps:$4 sm:$0xff]  }
 0x497   : > { %14450 = vmatpush1.bf16.msra.mxu1 %v19524_v45  ;;  %v14117_v62 = vpop.f32.mrf.mxu0  ;;  %14410 = vmatprep.subr.bf16.mxu0 %v19529_v57  ;;  %v19547_v0 = vld [vmem:[%s21189_s8 + $0x44c] ss:$16 sps:$4 sm:$0xff]   ;;  %v19548_v45 = vld [vmem:[%s21189_s8 + $0x648] ss:$16 sps:$4 sm:$0xff]  }
 0x498   : > { %v14158_v19 = vpop.f32.mrf.mxu1  ;;  %14451 = vmatprep.subr.bf16.mxu1 %v19532_v49  ;;  %v19550_v32 = vld [vmem:[%s21189_s8 + $0x64c] ss:$16 sps:$4 sm:$0xff]   ;;  %v19551_v57 = vld [vmem:[%s21189_s8 + $0x428] ss:$16 sps:$4 sm:$0xff]  }
 0x499   : > { %v19553_v46 = vld [vmem:[%s21189_s8 + $0x42c] ss:$16 sps:$4 sm:$0xff]   ;;  %v19554_v49 = vld [vmem:[%s21189_s8 + $0x628] ss:$16 sps:$4 sm:$0xff]  }
 0x49a   : > { %14411 = vmatpush1.bf16.msra.mxu0 %v19527_v8  ;;  %v19556_v3 = vld [vmem:[%s21189_s8 + $0x62c] ss:$16 sps:$4 sm:$0xff]   ;;  %v19557_v16 = vld [vmem:[%s21189_s8 + $0x408] ss:$16 sps:$4 sm:$0xff]  }
 0x49b   : > { %14452 = vmatpush1.bf16.msra.mxu1 %v19530_v51  ;;  %14412 = vmatprep.subr.bf16.mxu0 %v19535_v17  ;;  %v19559_v13 = vld [vmem:[%s21189_s8 + $0x40c] ss:$16 sps:$4 sm:$0xff]   ;;  %v19560_v8 = vld [vmem:[%s21189_s8 + $0x608] ss:$16 sps:$4 sm:$0xff]  }
 0x49c   : > { %14453 = vmatprep.subr.bf16.mxu1 %v19538_v23  ;;  %v19562_v18 = vld [vmem:[%s21189_s8 + $0x60c] ss:$16 sps:$4 sm:$0xff]   ;;  %v19563_v19 = vld [vmem:[%s21189_s8 + $0x5e8] ss:$16 sps:$4 sm:$0xff]  }
 0x49d   : > { %v19565_v51 = vld [vmem:[%s21189_s8 + $0x5ec] ss:$16 sps:$4 sm:$0xff]   ;;  %v19566_v17 = vld [vmem:[%s21189_s8 + $0x7e8] ss:$16 sps:$4 sm:$0xff]  }
 0x49e   : > { %14413 = vmatpush1.bf16.msra.mxu0 %v19533_v29  ;;  %v19568_v62 = vld [vmem:[%s21189_s8 + $0x7ec] ss:$16 sps:$4 sm:$0xff]  }
 0x49f   : > { %14454 = vmatpush1.bf16.msra.mxu1 %v19536_v58  ;;  %14414 = vmatprep.subr.bf16.mxu0 %v19541_v14  ;;  %v19571_v23 = vld [vmem:[%s21189_s8 + $0x5cc] ss:$16 sps:$4 sm:$0xff]   ;;  %v19569_v58 = vld [vmem:[%s21189_s8 + $0x5c8] ss:$16 sps:$4 sm:$0xff]  }
 0x4a0   : > { %14455 = vmatprep.subr.bf16.mxu1 %v19544_v40  ;;  %v19574_v29 = vld [vmem:[%s21189_s8 + $0x7cc] ss:$16 sps:$4 sm:$0xff]   ;;  %v19572_v14 = vld [vmem:[%s21189_s8 + $0x7c8] ss:$16 sps:$4 sm:$0xff]  }
 0x4a1   : > { %v19577_v40 = vld [vmem:[%s21189_s8 + $0x5ac] ss:$16 sps:$4 sm:$0xff]  }
 0x4a2   : > { %14415 = vmatpush1.bf16.msra.mxu0 %v19539_v38  ;;  %v19580_v38 = vld [vmem:[%s21189_s8 + $0x7ac] ss:$16 sps:$4 sm:$0xff]  }
 0x4a3   : > { %14456 = vmatpush1.bf16.msra.mxu1 %v19542_v60  ;;  %14416 = vmatprep.subr.bf16.mxu0 %v19547_v0  ;;  %v19575_v60 = vld [vmem:[%s21189_s8 + $0x5a8] ss:$16 sps:$4 sm:$0xff]  }
 0x4a4   : > { %14457 = vmatprep.subr.bf16.mxu1 %v19550_v32  ;;  %v19578_v0 = vld [vmem:[%s21189_s8 + $0x7a8] ss:$16 sps:$4 sm:$0xff]   ;;  %v19583_v32 = vld [vmem:[%s21189_s8 + $0x58c] ss:$16 sps:$4 sm:$0xff]  }
 0x4a6   : > { %14417 = vmatpush1.bf16.msra.mxu0 %v19545_v2  ;;  %v19586_v2 = vld [vmem:[%s21189_s8 + $0x78c] ss:$16 sps:$4 sm:$0xff]  }
 0x4a7   : > { %14458 = vmatpush1.bf16.msra.mxu1 %v19548_v45  ;;  %14418 = vmatprep.subr.bf16.mxu0 %v19553_v46  ;;  %v19581_v45 = vld [vmem:[%s21189_s8 + $0x588] ss:$16 sps:$4 sm:$0xff]  }
 0x4a8   : > { %14459 = vmatprep.subr.bf16.mxu1 %v19556_v3  ;;  %v19584_v46 = vld [vmem:[%s21189_s8 + $0x788] ss:$16 sps:$4 sm:$0xff]   ;;  %v19589_v3 = vld [vmem:[%s21189_s8 + $0x56c] ss:$16 sps:$4 sm:$0xff]  }
 0x4aa   : > { %14419 = vmatpush1.bf16.msra.mxu0 %v19551_v57  ;;  %v19592_v57 = vld [vmem:[%s21189_s8 + $0x76c] ss:$16 sps:$4 sm:$0xff]  }
 0x4ab   : > { %14460 = vmatpush1.bf16.msra.mxu1 %v19554_v49  ;;  %14420 = vmatprep.subr.bf16.mxu0 %v19559_v13  ;;  %v19587_v49 = vld [vmem:[%s21189_s8 + $0x568] ss:$16 sps:$4 sm:$0xff]  }
 0x4ac   : > { %14461 = vmatprep.subr.bf16.mxu1 %v19562_v18  ;;  %v19590_v13 = vld [vmem:[%s21189_s8 + $0x768] ss:$16 sps:$4 sm:$0xff]   ;;  %v19595_v18 = vld [vmem:[%s21189_s8 + $0x54c] ss:$16 sps:$4 sm:$0xff]  }
 0x4ae   : > { %14421 = vmatpush1.bf16.msra.mxu0 %v19557_v16  ;;  %v19598_v16 = vld [vmem:[%s21189_s8 + $0x74c] ss:$16 sps:$4 sm:$0xff]  }
 0x4af   : > { %14462 = vmatpush1.bf16.msra.mxu1 %v19560_v8  ;;  %14422 = vmatprep.subr.bf16.mxu0 %v19565_v51  ;;  %v19593_v8 = vld [vmem:[%s21189_s8 + $0x548] ss:$16 sps:$4 sm:$0xff]  }
 0x4b0   : > { %14463 = vmatprep.subr.bf16.mxu1 %v19568_v62  ;;  %v19596_v51 = vld [vmem:[%s21189_s8 + $0x748] ss:$16 sps:$4 sm:$0xff]   ;;  %v19601_v62 = vld [vmem:[%s21189_s8 + $0x52c] ss:$16 sps:$4 sm:$0xff]  }
 0x4b2   : > { %14423 = vmatpush2.bf16.msra.mxu0 %v19563_v19  ;;  %v19604_v19 = vld [vmem:[%s21189_s8 + $0x72c] ss:$16 sps:$4 sm:$0xff]  }
 0x4b3   : > { %14464 = vmatpush2.bf16.msra.mxu1 %v19566_v17  ;;  %14424 = vmatprep.subr.bf16.mxu0 %v19571_v23  ;;  %v19599_v17 = vld [vmem:[%s21189_s8 + $0x528] ss:$16 sps:$4 sm:$0xff]  }
 0x4b4   : > { %14465 = vmatprep.subr.bf16.mxu1 %v19574_v29  ;;  %v19602_v23 = vld [vmem:[%s21189_s8 + $0x728] ss:$16 sps:$4 sm:$0xff]   ;;  %v19607_v29 = vld [vmem:[%s21189_s8 + $0x50c] ss:$16 sps:$4 sm:$0xff]  }
 0x4b6   : > { %14425 = vmatpush2.bf16.msra.mxu0 %v19569_v58  ;;  %v19610_v58 = vld [vmem:[%s21189_s8 + $0x70c] ss:$16 sps:$4 sm:$0xff]  }
 0x4b7   : > { %14466 = vmatpush2.bf16.msra.mxu1 %v19572_v14  ;;  %14426 = vmatprep.subr.bf16.mxu0 %v19577_v40  ;;  %v19605_v14 = vld [vmem:[%s21189_s8 + $0x508] ss:$16 sps:$4 sm:$0xff]  }
 0x4b8   : > { %14467 = vmatprep.subr.bf16.mxu1 %v19580_v38  ;;  %v19608_v40 = vld [vmem:[%s21189_s8 + $0x708] ss:$16 sps:$4 sm:$0xff]   ;;  %v19613_v38 = vld [vmem:[%s21189_s8 + $0x8ec] ss:$16 sps:$4 sm:$0xff]  }
 0x4ba   : > { %14427 = vmatpush2.bf16.msra.mxu0 %v19575_v60  ;;  %v19616_v60 = vld [vmem:[%s21189_s8 + $0xaec] ss:$16 sps:$4 sm:$0xff]  }
 0x4bb   : > { %14468 = vmatpush2.bf16.msra.mxu1 %v19578_v0  ;;  %14428 = vmatprep.subr.bf16.mxu0 %v19583_v32  ;;  %v19611_v0 = vld [vmem:[%s21189_s8 + $0x8e8] ss:$16 sps:$4 sm:$0xff]  }
 0x4bc   : > { %14469 = vmatprep.subr.bf16.mxu1 %v19586_v2  ;;  %v19614_v32 = vld [vmem:[%s21189_s8 + $0xae8] ss:$16 sps:$4 sm:$0xff]   ;;  %v19619_v2 = vld [vmem:[%s21189_s8 + $0x8cc] ss:$16 sps:$4 sm:$0xff]  }
 0x4be   : > { %14429 = vmatpush2.bf16.msra.mxu0 %v19581_v45  ;;  %v19622_v45 = vld [vmem:[%s21189_s8 + $0xacc] ss:$16 sps:$4 sm:$0xff]  }
 0x4bf   : > { %14470 = vmatpush2.bf16.msra.mxu1 %v19584_v46  ;;  %14430 = vmatprep.subr.bf16.mxu0 %v19589_v3 }
 0x4c0   : > { %14471 = vmatprep.subr.bf16.mxu1 %v19592_v57 }
 0x4c2   : > { %14431 = vmatpush2.bf16.msra.mxu0 %v19587_v49  ;;  %v19617_v49 = vld [vmem:[%s21189_s8 + $0x8c8] ss:$16 sps:$4 sm:$0xff]  }
 0x4c3   : > { %14472 = vmatpush2.bf16.msra.mxu1 %v19590_v13  ;;  %14432 = vmatprep.subr.bf16.mxu0 %v19595_v18  ;;  %v19620_v13 = vld [vmem:[%s21189_s8 + $0xac8] ss:$16 sps:$4 sm:$0xff]  }
 0x4c4   : > { %14473 = vmatprep.subr.bf16.mxu1 %v19598_v16 }
 0x4c6   : > { %14433 = vmatpush2.bf16.msra.mxu0 %v19593_v8  ;;  %v19625_v8 = vld [vmem:[%s21189_s8 + $0x8ac] ss:$16 sps:$4 sm:$0xff]  }
 0x4c7   : > { %14474 = vmatpush2.bf16.msra.mxu1 %v19596_v51  ;;  %14434 = vmatprep.subr.bf16.mxu0 %v19601_v62  ;;  %v19628_v51 = vld [vmem:[%s21189_s8 + $0xaac] ss:$16 sps:$4 sm:$0xff]  }
 0x4c8   : > { %14475 = vmatprep.subr.bf16.mxu1 %v19604_v19 }
 0x4ca   : > { %14435 = vmatpush2.bf16.msra.mxu0 %v19599_v17  ;;  %v19623_v17 = vld [vmem:[%s21189_s8 + $0x8a8] ss:$16 sps:$4 sm:$0xff]  }
 0x4cb   : > { %14476 = vmatpush2.bf16.msra.mxu1 %v19602_v23  ;;  %14436 = vmatprep.subr.bf16.mxu0 %v19607_v29  ;;  %v19626_v23 = vld [vmem:[%s21189_s8 + $0xaa8] ss:$16 sps:$4 sm:$0xff]  }
 0x4cc   : > { %14477 = vmatprep.subr.bf16.mxu1 %v19610_v58 }
 0x4ce   : > { %14437 = vmatpush2.bf16.msra.mxu0 %v19605_v14  ;;  %v19632_v14 = vld [vmem:[%s21189_s8 + $0xa88] ss:$16 sps:$4 sm:$0xff]  }
 0x4cf   : > { %14478 = vmatpush2.bf16.msra.mxu1 %v19608_v40  ;;  %14488 = vmatprep.subr.bf16.mxu0 %v19613_v38  ;;  %v19637_v40 = vld [vmem:[%s21189_s8 + $0x86c] ss:$16 sps:$4 sm:$0xff]  }
 0x4d0   : > { %14529 = vmatprep.subr.bf16.mxu1 %v19616_v60  ;;  %v19640_v38 = vld [vmem:[%s21189_s8 + $0xa6c] ss:$16 sps:$4 sm:$0xff]   ;;  %v19635_v60 = vld [vmem:[%s21189_s8 + $0x868] ss:$16 sps:$4 sm:$0xff]  }
 0x4d1   : > { %v14194_v46 = vpop.f32.mrf.mxu0  ;;  %14439 = vmatmul.mubr.bf16.vlgmr.msra.gmra.mxu0 %v21371_v26 }
 0x4d2   : > { %v14235_v3 = vpop.f32.mrf.mxu1  ;;  %14480 = vmatmul.mubr.bf16.vlgmr.msra.gmra.mxu1 %v21378_v30  ;;  %v14195_v57 = vadd.f32 %v14194_v46, %v22826_v47  ;;  %14489 = vmatpush1.bf16.msra.mxu0 %v19611_v0  ;;  %v19638_v0 = vld [vmem:[%s21189_s8 + $0xa68] ss:$16 sps:$4 sm:$0xff]  }
 0x4d3   : > { %14530 = vmatpush1.bf16.msra.mxu1 %v19614_v32  ;;  %v14196_v18 = vpop.f32.mrf.mxu0  ;;  %14490 = vmatprep.subr.bf16.mxu0 %v19619_v2  ;;  %v19643_v32 = vld [vmem:[%s21189_s8 + $0x84c] ss:$16 sps:$4 sm:$0xff]   ;;  %v19644_v46 = vld [vmem:[%s21189_s8 + $0xa48] ss:$16 sps:$4 sm:$0xff]  }
 0x4d4   : > { %v14237_v16 = vpop.f32.mrf.mxu1  ;;  %14531 = vmatprep.subr.bf16.mxu1 %v19622_v45  ;;  %v22900_v62 = vadd.f32 %v14235_v3, %v14195_v57  ;;  %v14197_v26 = vadd.f32 %v14196_v18, %v22831_v10  ;;  %14520 = vmatprep.mubr.bf16.mxu0 %v21402_v41  ;;  %v19631_v41 = vld [vmem:[%s21189_s8 + $0x88c] ss:$16 sps:$4 sm:$0xff]   ;;  %v19629_v10 = vld [vmem:[%s21189_s8 + $0x888] ss:$16 sps:$4 sm:$0xff]  }
 0x4d5   : > { %14561 = vmatprep.mubr.bf16.mxu1 %v21407_v43  ;;  %v14198_v30 = vpop.f32.mrf.mxu0  ;;  %v19634_v43 = vld [vmem:[%s21189_s8 + $0xa8c] ss:$16 sps:$4 sm:$0xff]   ;;  %v19641_v45 = vld [vmem:[%s21189_s8 + $0x848] ss:$16 sps:$4 sm:$0xff]  }
 0x4d6   : > { %v14239_v47 = vpop.f32.mrf.mxu1  ;;  %v22905_v19 = vadd.f32 %v14237_v16, %v14197_v26  ;;  %14491 = vmatpush1.bf16.msra.mxu0 %v19617_v49  ;;  %v19646_v2 = vld [vmem:[%s21189_s8 + $0xa4c] ss:$16 sps:$4 sm:$0xff]   ;;  %v19647_v49 = vld [vmem:[%s21189_s8 + $0x828] ss:$16 sps:$4 sm:$0xff]  }
 0x4d7   : > { %14532 = vmatpush1.bf16.msra.mxu1 %v19620_v13  ;;  %v14199_v29 = vpop.f32.mrf.mxu0  ;;  %14492 = vmatprep.subr.bf16.mxu0 %v19625_v8  ;;  %v19649_v3 = vld [vmem:[%s21189_s8 + $0x82c] ss:$16 sps:$4 sm:$0xff]   ;;  %v19650_v13 = vld [vmem:[%s21189_s8 + $0xa28] ss:$16 sps:$4 sm:$0xff]  }
 0x4d8   : > { %v14240_v58 = vpop.f32.mrf.mxu1  ;;  %14533 = vmatprep.subr.bf16.mxu1 %v19628_v51  ;;  %v19652_v57 = vld [vmem:[%s21189_s8 + $0xa2c] ss:$16 sps:$4 sm:$0xff]   ;;  %v19653_v8 = vld [vmem:[%s21189_s8 + $0x808] ss:$16 sps:$4 sm:$0xff]  }
 0x4d9   : > { %v19655_v18 = vld [vmem:[%s21189_s8 + $0x80c] ss:$16 sps:$4 sm:$0xff]   ;;  %v19656_v51 = vld [vmem:[%s21189_s8 + $0xa08] ss:$16 sps:$4 sm:$0xff]  }
 0x4da   : > { %14493 = vmatpush1.bf16.msra.mxu0 %v19623_v17  ;;  %v19658_v16 = vld [vmem:[%s21189_s8 + $0xa0c] ss:$16 sps:$4 sm:$0xff]   ;;  %v19659_v47 = vld [vmem:[%s21189_s8 + $0x9e8] ss:$16 sps:$4 sm:$0xff]  }
 0x4db   : > { %14534 = vmatpush1.bf16.msra.mxu1 %v19626_v23  ;;  %14494 = vmatprep.subr.bf16.mxu0 %v19631_v41  ;;  %v19661_v26 = vld [vmem:[%s21189_s8 + $0x9ec] ss:$16 sps:$4 sm:$0xff]   ;;  %v19662_v17 = vld [vmem:[%s21189_s8 + $0xbe8] ss:$16 sps:$4 sm:$0xff]  }
 0x4dc   : > { %14535 = vmatprep.subr.bf16.mxu1 %v19634_v43  ;;  %v19664_v30 = vld [vmem:[%s21189_s8 + $0xbec] ss:$16 sps:$4 sm:$0xff]   ;;  %v19665_v58 = vld [vmem:[%s21189_s8 + $0x9c8] ss:$16 sps:$4 sm:$0xff]  }
 0x4dd   : > { %v19667_v23 = vld [vmem:[%s21189_s8 + $0x9cc] ss:$16 sps:$4 sm:$0xff]   ;;  %v19668_v41 = vld [vmem:[%s21189_s8 + $0xbc8] ss:$16 sps:$4 sm:$0xff]  }
 0x4de   : > { %14495 = vmatpush1.bf16.msra.mxu0 %v19629_v10  ;;  %v19670_v29 = vld [vmem:[%s21189_s8 + $0xbcc] ss:$16 sps:$4 sm:$0xff]  }
 0x4df   : > { %14536 = vmatpush1.bf16.msra.mxu1 %v19632_v14  ;;  %14496 = vmatprep.subr.bf16.mxu0 %v19637_v40  ;;  %v19673_v43 = vld [vmem:[%s21189_s8 + $0x9ac] ss:$16 sps:$4 sm:$0xff]   ;;  %v19671_v14 = vld [vmem:[%s21189_s8 + $0x9a8] ss:$16 sps:$4 sm:$0xff]  }
 0x4e0   : > { %14537 = vmatprep.subr.bf16.mxu1 %v19640_v38  ;;  %v19676_v10 = vld [vmem:[%s21189_s8 + $0xbac] ss:$16 sps:$4 sm:$0xff]   ;;  %v19674_v40 = vld [vmem:[%s21189_s8 + $0xba8] ss:$16 sps:$4 sm:$0xff]  }
 0x4e1   : > { %v19679_v38 = vld [vmem:[%s21189_s8 + $0x98c] ss:$16 sps:$4 sm:$0xff]  }
 0x4e2   : > { %14497 = vmatpush1.bf16.msra.mxu0 %v19635_v60  ;;  %v19682_v60 = vld [vmem:[%s21189_s8 + $0xb8c] ss:$16 sps:$4 sm:$0xff]  }
 0x4e3   : > { %14538 = vmatpush1.bf16.msra.mxu1 %v19638_v0  ;;  %14498 = vmatprep.subr.bf16.mxu0 %v19643_v32  ;;  %v19677_v0 = vld [vmem:[%s21189_s8 + $0x988] ss:$16 sps:$4 sm:$0xff]  }
 0x4e4   : > { %14539 = vmatprep.subr.bf16.mxu1 %v19646_v2  ;;  %v19680_v32 = vld [vmem:[%s21189_s8 + $0xb88] ss:$16 sps:$4 sm:$0xff]   ;;  %v19685_v2 = vld [vmem:[%s21189_s8 + $0x96c] ss:$16 sps:$4 sm:$0xff]  }
 0x4e6   : > { %14499 = vmatpush1.bf16.msra.mxu0 %v19641_v45  ;;  %v19688_v45 = vld [vmem:[%s21189_s8 + $0xb6c] ss:$16 sps:$4 sm:$0xff]  }
 0x4e7   : > { %14540 = vmatpush1.bf16.msra.mxu1 %v19644_v46  ;;  %14500 = vmatprep.subr.bf16.mxu0 %v19649_v3  ;;  %v19683_v46 = vld [vmem:[%s21189_s8 + $0x968] ss:$16 sps:$4 sm:$0xff]  }
 0x4e8   : > { %14541 = vmatprep.subr.bf16.mxu1 %v19652_v57  ;;  %v19686_v3 = vld [vmem:[%s21189_s8 + $0xb68] ss:$16 sps:$4 sm:$0xff]   ;;  %v19691_v57 = vld [vmem:[%s21189_s8 + $0x94c] ss:$16 sps:$4 sm:$0xff]  }
 0x4ea   : > { %14501 = vmatpush1.bf16.msra.mxu0 %v19647_v49  ;;  %v19694_v49 = vld [vmem:[%s21189_s8 + $0xb4c] ss:$16 sps:$4 sm:$0xff]  }
 0x4eb   : > { %14542 = vmatpush1.bf16.msra.mxu1 %v19650_v13  ;;  %14502 = vmatprep.subr.bf16.mxu0 %v19655_v18  ;;  %v19689_v13 = vld [vmem:[%s21189_s8 + $0x948] ss:$16 sps:$4 sm:$0xff]  }
 0x4ec   : > { %14543 = vmatprep.subr.bf16.mxu1 %v19658_v16  ;;  %v19692_v18 = vld [vmem:[%s21189_s8 + $0xb48] ss:$16 sps:$4 sm:$0xff]   ;;  %v19697_v16 = vld [vmem:[%s21189_s8 + $0x92c] ss:$16 sps:$4 sm:$0xff]  }
 0x4ee   : > { %14503 = vmatpush1.bf16.msra.mxu0 %v19653_v8  ;;  %v19700_v8 = vld [vmem:[%s21189_s8 + $0xb2c] ss:$16 sps:$4 sm:$0xff]  }
 0x4ef   : > { %14544 = vmatpush1.bf16.msra.mxu1 %v19656_v51  ;;  %14504 = vmatprep.subr.bf16.mxu0 %v19661_v26  ;;  %v19695_v51 = vld [vmem:[%s21189_s8 + $0x928] ss:$16 sps:$4 sm:$0xff]  }
 0x4f0   : > { %14545 = vmatprep.subr.bf16.mxu1 %v19664_v30  ;;  %v19698_v26 = vld [vmem:[%s21189_s8 + $0xb28] ss:$16 sps:$4 sm:$0xff]   ;;  %v19703_v30 = vld [vmem:[%s21189_s8 + $0x90c] ss:$16 sps:$4 sm:$0xff]  }
 0x4f2   : > { %14505 = vmatpush2.bf16.msra.mxu0 %v19659_v47  ;;  %v19706_v47 = vld [vmem:[%s21189_s8 + $0xb0c] ss:$16 sps:$4 sm:$0xff]  }
 0x4f3   : > { %14546 = vmatpush2.bf16.msra.mxu1 %v19662_v17  ;;  %14506 = vmatprep.subr.bf16.mxu0 %v19667_v23  ;;  %v19701_v17 = vld [vmem:[%s21189_s8 + $0x908] ss:$16 sps:$4 sm:$0xff]  }
 0x4f4   : > { %14547 = vmatprep.subr.bf16.mxu1 %v19670_v29  ;;  %v19704_v23 = vld [vmem:[%s21189_s8 + $0xb08] ss:$16 sps:$4 sm:$0xff]   ;;  %v19709_v29 = vld [vmem:[%s21189_s8 + $0xcec] ss:$16 sps:$4 sm:$0xff]  }
 0x4f6   : > { %14507 = vmatpush2.bf16.msra.mxu0 %v19665_v58  ;;  %v19712_v58 = vld [vmem:[%s21189_s8 + $0xeec] ss:$16 sps:$4 sm:$0xff]  }
 0x4f7   : > { %14548 = vmatpush2.bf16.msra.mxu1 %v19668_v41  ;;  %14508 = vmatprep.subr.bf16.mxu0 %v19673_v43  ;;  %v19707_v41 = vld [vmem:[%s21189_s8 + $0xce8] ss:$16 sps:$4 sm:$0xff]  }
 0x4f8   : > { %14549 = vmatprep.subr.bf16.mxu1 %v19676_v10  ;;  %v19710_v43 = vld [vmem:[%s21189_s8 + $0xee8] ss:$16 sps:$4 sm:$0xff]   ;;  %v19715_v10 = vld [vmem:[%s21189_s8 + $0xccc] ss:$16 sps:$4 sm:$0xff]  }
 0x4fa   : > { %14509 = vmatpush2.bf16.msra.mxu0 %v19671_v14  ;;  %v19718_v14 = vld [vmem:[%s21189_s8 + $0xecc] ss:$16 sps:$4 sm:$0xff]  }
 0x4fb   : > { %14550 = vmatpush2.bf16.msra.mxu1 %v19674_v40  ;;  %14510 = vmatprep.subr.bf16.mxu0 %v19679_v38 }
 0x4fc   : > { %14551 = vmatprep.subr.bf16.mxu1 %v19682_v60 }
 0x4fe   : > { %14511 = vmatpush2.bf16.msra.mxu0 %v19677_v0  ;;  %v19713_v0 = vld [vmem:[%s21189_s8 + $0xcc8] ss:$16 sps:$4 sm:$0xff]  }
 0x4ff   : > { %14552 = vmatpush2.bf16.msra.mxu1 %v19680_v32  ;;  %14512 = vmatprep.subr.bf16.mxu0 %v19685_v2  ;;  %v19716_v32 = vld [vmem:[%s21189_s8 + $0xec8] ss:$16 sps:$4 sm:$0xff]  }
 0x500   : > { %14553 = vmatprep.subr.bf16.mxu1 %v19688_v45 }
 0x502   : > { %14513 = vmatpush2.bf16.msra.mxu0 %v19683_v46  ;;  %v19721_v46 = vld [vmem:[%s21189_s8 + $0xcac] ss:$16 sps:$4 sm:$0xff]  }
 0x503   : > { %14554 = vmatpush2.bf16.msra.mxu1 %v19686_v3  ;;  %14514 = vmatprep.subr.bf16.mxu0 %v19691_v57  ;;  %v19724_v3 = vld [vmem:[%s21189_s8 + $0xeac] ss:$16 sps:$4 sm:$0xff]  }
 0x504   : > { %14555 = vmatprep.subr.bf16.mxu1 %v19694_v49 }
 0x506   : > { %14515 = vmatpush2.bf16.msra.mxu0 %v19689_v13  ;;  %v19719_v13 = vld [vmem:[%s21189_s8 + $0xca8] ss:$16 sps:$4 sm:$0xff]  }
 0x507   : > { %14556 = vmatpush2.bf16.msra.mxu1 %v19692_v18  ;;  %14516 = vmatprep.subr.bf16.mxu0 %v19697_v16  ;;  %v19722_v18 = vld [vmem:[%s21189_s8 + $0xea8] ss:$16 sps:$4 sm:$0xff]  }
 0x508   : > { %14557 = vmatprep.subr.bf16.mxu1 %v19700_v8 }
 0x50a   : > { %14517 = vmatpush2.bf16.msra.mxu0 %v19695_v51 }
 0x50b   : > { %14558 = vmatpush2.bf16.msra.mxu1 %v19698_v26  ;;  %14518 = vmatprep.subr.bf16.mxu0 %v19703_v30  ;;  %v19725_v30 = vld [vmem:[%s21189_s8 + $0xc88] ss:$16 sps:$4 sm:$0xff]  }
 0x50c   : > { %14559 = vmatprep.subr.bf16.mxu1 %v19706_v47  ;;  %v19728_v47 = vld [vmem:[%s21189_s8 + $0xe88] ss:$16 sps:$4 sm:$0xff]  }
 0x50e   : > { %14519 = vmatpush2.bf16.msra.mxu0 %v19701_v17  ;;  %v19733_v17 = vld [vmem:[%s21189_s8 + $0xc6c] ss:$16 sps:$4 sm:$0xff]  }
 0x50f   : > { %14560 = vmatpush2.bf16.msra.mxu1 %v19704_v23  ;;  %14570 = vmatprep.subr.bf16.mxu0 %v19709_v29  ;;  %v19736_v23 = vld [vmem:[%s21189_s8 + $0xe6c] ss:$16 sps:$4 sm:$0xff]   ;;  %v19731_v29 = vld [vmem:[%s21189_s8 + $0xc68] ss:$16 sps:$4 sm:$0xff]  }
 0x510   : > { %14611 = vmatprep.subr.bf16.mxu1 %v19712_v58  ;;  %v19734_v58 = vld [vmem:[%s21189_s8 + $0xe68] ss:$16 sps:$4 sm:$0xff]  }
 0x511   : > { %v14276_v40 = vpop.f32.mrf.mxu0  ;;  %14521 = vmatmul.mubr.bf16.vlgmr.msra.gmra.mxu0 %v21472_v50 }
 0x512   : > { %v14317_v38 = vpop.f32.mrf.mxu1  ;;  %14562 = vmatmul.mubr.bf16.vlgmr.msra.gmra.mxu1 %v21482_v55  ;;  %v14277_v60 = vadd.f32 %v14276_v40, %v22900_v62  ;;  %14571 = vmatpush1.bf16.msra.mxu0 %v19707_v41  ;;  %v19739_v41 = vld [vmem:[%s21189_s8 + $0xc4c] ss:$16 sps:$4 sm:$0xff]  }
 0x513   : > { %14612 = vmatpush1.bf16.msra.mxu1 %v19710_v43  ;;  %v14278_v2 = vpop.f32.mrf.mxu0  ;;  %14572 = vmatprep.subr.bf16.mxu0 %v19715_v10  ;;  %v19742_v43 = vld [vmem:[%s21189_s8 + $0xe4c] ss:$16 sps:$4 sm:$0xff]   ;;  %v19737_v10 = vld [vmem:[%s21189_s8 + $0xc48] ss:$16 sps:$4 sm:$0xff]  }
 0x514   : > { %v14319_v45 = vpop.f32.mrf.mxu1  ;;  %14613 = vmatprep.subr.bf16.mxu1 %v19718_v14  ;;  %v14318_v57 = vadd.f32 %v14317_v38, %v14277_v60  ;;  %v14279_v50 = vadd.f32 %v14278_v2, %v22905_v19  ;;  %14602 = vmatprep.mubr.bf16.mxu0 %v21478_v54  ;;  %v19727_v19 = vld [vmem:[%s21189_s8 + $0xc8c] ss:$16 sps:$4 sm:$0xff]   ;;  %v19740_v14 = vld [vmem:[%s21189_s8 + $0xe48] ss:$16 sps:$4 sm:$0xff]  }
 0x515   : > { %14643 = vmatprep.mubr.bf16.mxu1 %v21490_v59  ;;  %v14280_v55 = vpop.f32.mrf.mxu0  ;;  %v19730_v54 = vld [vmem:[%s21189_s8 + $0xe8c] ss:$16 sps:$4 sm:$0xff]   ;;  %v19743_v60 = vld [vmem:[%s21189_s8 + $0xc28] ss:$16 sps:$4 sm:$0xff]  }
 0x516   : > { %v14321_v62 = vpop.f32.mrf.mxu1  ;;  %v14320_v49 = vadd.f32 %v14319_v45, %v14279_v50  ;;  %14573 = vmatpush1.bf16.msra.mxu0 %v19713_v0  ;;  %v15636_v59 = vmax.f32 %v14318_v57, 0.0  ;;  %v19745_v40 = vld [vmem:[%s21189_s8 + $0xc2c] ss:$16 sps:$4 sm:$0xff]   ;;  %v19746_v0 = vld [vmem:[%s21189_s8 + $0xe28] ss:$16 sps:$4 sm:$0xff]  }
 0x517   : > { %14614 = vmatpush1.bf16.msra.mxu1 %v19716_v32  ;;  %v14281_v16 = vpop.f32.mrf.mxu0  ;;  %14574 = vmatprep.subr.bf16.mxu0 %v19721_v46  ;;  %v19748_v38 = vld [vmem:[%s21189_s8 + $0xe2c] ss:$16 sps:$4 sm:$0xff]   ;;  %v19749_v45 = vld [vmem:[%s21189_s8 + $0xc08] ss:$16 sps:$4 sm:$0xff]  }
 0x518   : > { %v14322_v8 = vpop.f32.mrf.mxu1  ;;  %14615 = vmatprep.subr.bf16.mxu1 %v19724_v3  ;;  %v15637_v51 = vmax.f32 %v14320_v49, 0.0  ;;  %v19751_v32 = vld [vmem:[%s21189_s8 + $0xc0c] ss:$16 sps:$4 sm:$0xff]   ;;  %v19752_v46 = vld [vmem:[%s21189_s8 + $0xe08] ss:$16 sps:$4 sm:$0xff]  }
 0x519   : > { %v19754_v2 = vld [vmem:[%s21189_s8 + $0xe0c] ss:$16 sps:$4 sm:$0xff]   ;;  %v19755_v50 = vld [vmem:[%s21189_s8 + $0xde8] ss:$16 sps:$4 sm:$0xff]  }
 0x51a   : > { %v22981_v26 = vpack.c.bf16 %v15637_v51, %v15636_v59  ;;  %14575 = vmatpush1.bf16.msra.mxu0 %v19719_v13  ;;  %v19757_v3 = vld [vmem:[%s21189_s8 + $0xdec] ss:$16 sps:$4 sm:$0xff]   ;;  %v19758_v55 = vld [vmem:[%s21189_s8 + $0xfe8] ss:$16 sps:$4 sm:$0xff]  }
 0x51b   : > { %14616 = vmatpush1.bf16.msra.mxu1 %v19722_v18  ;;  %14576 = vmatprep.subr.bf16.mxu0 %v19727_v19  ;;  %v19760_v57 = vld [vmem:[%s21189_s8 + $0xfec] ss:$16 sps:$4 sm:$0xff]   ;;  %v19761_v13 = vld [vmem:[%s21189_s8 + $0xdc8] ss:$16 sps:$4 sm:$0xff]  }
 0x51c   : > { %14617 = vmatprep.subr.bf16.mxu1 %v19730_v54  ;;  %v19763_v62 = vld [vmem:[%s21189_s8 + $0xdcc] ss:$16 sps:$4 sm:$0xff]   ;;  %v19764_v18 = vld [vmem:[%s21189_s8 + $0xfc8] ss:$16 sps:$4 sm:$0xff]  }
 0x51d   : > { %v19766_v49 = vld [vmem:[%s21189_s8 + $0xfcc] ss:$16 sps:$4 sm:$0xff]   ;;  %v19767_v19 = vld [vmem:[%s21189_s8 + $0xda8] ss:$16 sps:$4 sm:$0xff]  }
 0x51e   : > { %14577 = vmatpush1.bf16.msra.mxu0 %v19725_v30  ;;  %v19769_v16 = vld [vmem:[%s21189_s8 + $0xdac] ss:$16 sps:$4 sm:$0xff]   ;;  %v19770_v54 = vld [vmem:[%s21189_s8 + $0xfa8] ss:$16 sps:$4 sm:$0xff]  }
 0x51f   : > { %14618 = vmatpush1.bf16.msra.mxu1 %v19728_v47  ;;  %14578 = vmatprep.subr.bf16.mxu0 %v19733_v17  ;;  %v19772_v8 = vld [vmem:[%s21189_s8 + $0xfac] ss:$16 sps:$4 sm:$0xff]   ;;  %v19773_v30 = vld [vmem:[%s21189_s8 + $0xd88] ss:$16 sps:$4 sm:$0xff]  }
 0x520   : > { %14619 = vmatprep.subr.bf16.mxu1 %v19736_v23  ;;  %v19775_v59 = vld [vmem:[%s21189_s8 + $0xd8c] ss:$16 sps:$4 sm:$0xff]   ;;  %v19776_v47 = vld [vmem:[%s21189_s8 + $0xf88] ss:$16 sps:$4 sm:$0xff]  }
 0x521   : > { %v19778_v51 = vld [vmem:[%s21189_s8 + $0xf8c] ss:$16 sps:$4 sm:$0xff]  }
 0x522   : > { %14579 = vmatpush1.bf16.msra.mxu0 %v19731_v29  ;;  %v19781_v17 = vld [vmem:[%s21189_s8 + $0xd6c] ss:$16 sps:$4 sm:$0xff]   ;;  %v19779_v29 = vld [vmem:[%s21189_s8 + $0xd68] ss:$16 sps:$4 sm:$0xff]  }
 0x523   : > { %14620 = vmatpush1.bf16.msra.mxu1 %v19734_v58  ;;  %14580 = vmatprep.subr.bf16.mxu0 %v19739_v41  ;;  %v19784_v23 = vld [vmem:[%s21189_s8 + $0xf6c] ss:$16 sps:$4 sm:$0xff]   ;;  %v19782_v58 = vld [vmem:[%s21189_s8 + $0xf68] ss:$16 sps:$4 sm:$0xff]  }
 0x524   : > { %14621 = vmatprep.subr.bf16.mxu1 %v19742_v43  ;;  %v19787_v41 = vld [vmem:[%s21189_s8 + $0xd4c] ss:$16 sps:$4 sm:$0xff]  }
 0x525   : > { %v19790_v43 = vld [vmem:[%s21189_s8 + $0xf4c] ss:$16 sps:$4 sm:$0xff]  }
 0x526   : > { %14581 = vmatpush1.bf16.msra.mxu0 %v19737_v10  ;;  %v19785_v10 = vld [vmem:[%s21189_s8 + $0xd48] ss:$16 sps:$4 sm:$0xff]  }
 0x527   : > { %14622 = vmatpush1.bf16.msra.mxu1 %v19740_v14  ;;  %14582 = vmatprep.subr.bf16.mxu0 %v19745_v40  ;;  %v19788_v14 = vld [vmem:[%s21189_s8 + $0xf48] ss:$16 sps:$4 sm:$0xff]   ;;  %v19793_v40 = vld [vmem:[%s21189_s8 + $0xd2c] ss:$16 sps:$4 sm:$0xff]  }
 0x528   : > { %14623 = vmatprep.subr.bf16.mxu1 %v19748_v38  ;;  %v19796_v38 = vld [vmem:[%s21189_s8 + $0xf2c] ss:$16 sps:$4 sm:$0xff]  }
 0x52a   : > { %14583 = vmatpush1.bf16.msra.mxu0 %v19743_v60  ;;  %v19791_v60 = vld [vmem:[%s21189_s8 + $0xd28] ss:$16 sps:$4 sm:$0xff]  }
 0x52b   : > { %14624 = vmatpush1.bf16.msra.mxu1 %v19746_v0  ;;  %14584 = vmatprep.subr.bf16.mxu0 %v19751_v32  ;;  %v19794_v0 = vld [vmem:[%s21189_s8 + $0xf28] ss:$16 sps:$4 sm:$0xff]   ;;  %v19799_v32 = vld [vmem:[%s21189_s8 + $0xd0c] ss:$16 sps:$4 sm:$0xff]  }
 0x52c   : > { %14625 = vmatprep.subr.bf16.mxu1 %v19754_v2  ;;  %v19802_v2 = vld [vmem:[%s21189_s8 + $0xf0c] ss:$16 sps:$4 sm:$0xff]  }
 0x52e   : > { %14585 = vmatpush1.bf16.msra.mxu0 %v19749_v45  ;;  %v19797_v45 = vld [vmem:[%s21189_s8 + $0xd08] ss:$16 sps:$4 sm:$0xff]  }
 0x52f   : > { %14626 = vmatpush1.bf16.msra.mxu1 %v19752_v46  ;;  %14586 = vmatprep.subr.bf16.mxu0 %v19757_v3  ;;  %v19800_v46 = vld [vmem:[%s21189_s8 + $0xf08] ss:$16 sps:$4 sm:$0xff]   ;;  %v2298_v3 = vsub.s32 2, %v21240_v42 }
 0x530   : > { %14627 = vmatprep.subr.bf16.mxu1 %v19760_v57  ;;  %v19805_v57 = vld [vmem:[%s21189_s8 + $0x10ec] ss:$16 sps:$4 sm:$0xff]  }
 0x532   : > { %14587 = vmatpush2.bf16.msra.mxu0 %v19755_v50  ;;  %v19808_v50 = vld [vmem:[%s21189_s8 + $0x12ec] ss:$16 sps:$4 sm:$0xff]  }
 0x533   : > { %14628 = vmatpush2.bf16.msra.mxu1 %v19758_v55  ;;  %14588 = vmatprep.subr.bf16.mxu0 %v19763_v62  ;;  %v2302_v55 = vsub.s32 3, %v21240_v42  ;;  %v20955_v62 = vld [vmem:[%s21195_s30] sm:$0xf] }
 0x534   : > { %14629 = vmatprep.subr.bf16.mxu1 %v19766_v49  ;;  %v2299_v49 = vrot.slane %v20955_v62, %v2298_v3  ;;  %v19835_v3 = vld [vmem:[%s21189_s8 + $0x104c] ss:$16 sps:$4 sm:$0xff]  }
 0x536   : > { %14589 = vmatpush2.bf16.msra.mxu0 %v19761_v13  ;;  %v19803_v13 = vld [vmem:[%s21189_s8 + $0x10e8] ss:$16 sps:$4 sm:$0xff]  }
 0x537   : > { %14630 = vmatpush2.bf16.msra.mxu1 %v19764_v18  ;;  %14590 = vmatprep.subr.bf16.mxu0 %v19769_v16  ;;  %v19806_v18 = vld [vmem:[%s21189_s8 + $0x12e8] ss:$16 sps:$4 sm:$0xff]   ;;  %v19811_v16 = vld [vmem:[%s21189_s8 + $0x10cc] ss:$16 sps:$4 sm:$0xff]  }
 0x538   : > { %14631 = vmatprep.subr.bf16.mxu1 %v19772_v8  ;;  %v19814_v8 = vld [vmem:[%s21189_s8 + $0x12cc] ss:$16 sps:$4 sm:$0xff]  }
 0x53a   : > { %14591 = vmatpush2.bf16.msra.mxu0 %v19767_v19  ;;  %v2303_v19 = vrot.slane %v20955_v62, %v2302_v55  ;;  %v19836_v55 = vld [vmem:[%s21189_s8 + $0x1248] ss:$16 sps:$4 sm:$0xff]   ;;  %v19841_v62 = vld [vmem:[%s21189_s8 + $0x102c] ss:$16 sps:$4 sm:$0xff]  }
 0x53b   : > { %14632 = vmatpush2.bf16.msra.mxu1 %v19770_v54  ;;  %14592 = vmatprep.subr.bf16.mxu0 %v19775_v59 }
 0x53c   : > { %14633 = vmatprep.subr.bf16.mxu1 %v19778_v51  ;;  %v19809_v51 = vld [vmem:[%s21189_s8 + $0x10c8] ss:$16 sps:$4 sm:$0xff]  }
 0x53e   : > { %14593 = vmatpush2.bf16.msra.mxu0 %v19773_v30  ;;  %v19812_v30 = vld [vmem:[%s21189_s8 + $0x12c8] ss:$16 sps:$4 sm:$0xff]  }
 0x53f   : > { %14634 = vmatpush2.bf16.msra.mxu1 %v19776_v47  ;;  %14594 = vmatprep.subr.bf16.mxu0 %v19781_v17 }
 0x540   : > { %14635 = vmatprep.subr.bf16.mxu1 %v19784_v23  ;;  %v19817_v23 = vld [vmem:[%s21189_s8 + $0x10ac] ss:$16 sps:$4 sm:$0xff]  }
 0x542   : > { %14595 = vmatpush2.bf16.msra.mxu0 %v19779_v29  ;;  %v19820_v29 = vld [vmem:[%s21189_s8 + $0x12ac] ss:$16 sps:$4 sm:$0xff]  }
 0x543   : > { %14636 = vmatpush2.bf16.msra.mxu1 %v19782_v58  ;;  %14596 = vmatprep.subr.bf16.mxu0 %v19787_v41 }
 0x544   : > { %14637 = vmatprep.subr.bf16.mxu1 %v19790_v43 }
 0x546   : > { %14597 = vmatpush2.bf16.msra.mxu0 %v19785_v10  ;;  %v19815_v10 = vld [vmem:[%s21189_s8 + $0x10a8] ss:$16 sps:$4 sm:$0xff]  }
 0x547   : > { %14638 = vmatpush2.bf16.msra.mxu1 %v19788_v14  ;;  %14598 = vmatprep.subr.bf16.mxu0 %v19793_v40  ;;  %v19818_v14 = vld [vmem:[%s21189_s8 + $0x12a8] ss:$16 sps:$4 sm:$0xff]  }
 0x548   : > { %14639 = vmatprep.subr.bf16.mxu1 %v19796_v38 }
 0x54a   : > { %14599 = vmatpush2.bf16.msra.mxu0 %v19791_v60  ;;  %v19821_v60 = vld [vmem:[%s21189_s8 + $0x1088] ss:$16 sps:$4 sm:$0xff]  }
 0x54b   : > { %14640 = vmatpush2.bf16.msra.mxu1 %v19794_v0  ;;  %14600 = vmatprep.subr.bf16.mxu0 %v19799_v32  ;;  %v19824_v0 = vld [vmem:[%s21189_s8 + $0x1288] ss:$16 sps:$4 sm:$0xff]   ;;  %v19829_v32 = vld [vmem:[%s21189_s8 + $0x106c] ss:$16 sps:$4 sm:$0xff]  }
 0x54c   : > { %14641 = vmatprep.subr.bf16.mxu1 %v19802_v2  ;;  %v19832_v2 = vld [vmem:[%s21189_s8 + $0x126c] ss:$16 sps:$4 sm:$0xff]  }
 0x54e   : > { %14601 = vmatpush2.bf16.msra.mxu0 %v19797_v45  ;;  %v19827_v45 = vld [vmem:[%s21189_s8 + $0x1068] ss:$16 sps:$4 sm:$0xff]  }
 0x54f   : > { %14642 = vmatpush2.bf16.msra.mxu1 %v19800_v46  ;;  %14652 = vmatprep.subr.bf16.mxu0 %v19805_v57  ;;  %v19830_v46 = vld [vmem:[%s21189_s8 + $0x1268] ss:$16 sps:$4 sm:$0xff]   ;;  %v19838_v57 = vld [vmem:[%s21189_s8 + $0x124c] ss:$16 sps:$4 sm:$0xff]  }
 0x550   : > { %14693 = vmatprep.subr.bf16.mxu1 %v19808_v50  ;;  %v19833_v50 = vld [vmem:[%s21189_s8 + $0x1048] ss:$16 sps:$4 sm:$0xff]  }
 0x551   : > { %v14358_v54 = vpop.f32.mrf.mxu0  ;;  %14603 = vmatmul.mubr.bf16.vlgmr.msra.gmra.mxu0 %v21568_v15 }
 0x552   : > { %v14399_v59 = vpop.f32.mrf.mxu1  ;;  %14644 = vmatmul.mubr.bf16.vlgmr.msra.gmra.mxu1 %v21579_v24  ;;  %v14359_v42 = vadd.f32 %v14358_v54, %v2299_v49  ;;  %14653 = vmatpush1.bf16.msra.mxu0 %v19803_v13  ;;  %v19844_v49 = vld [vmem:[%s21189_s8 + $0x122c] ss:$16 sps:$4 sm:$0xff]   ;;  %v19839_v13 = vld [vmem:[%s21189_s8 + $0x1028] ss:$16 sps:$4 sm:$0xff]  }
 0x553   : > { %14694 = vmatpush1.bf16.msra.mxu1 %v19806_v18  ;;  %v14360_v47 = vpop.f32.mrf.mxu0  ;;  %14654 = vmatprep.subr.bf16.mxu0 %v19811_v16  ;;  %v19842_v18 = vld [vmem:[%s21189_s8 + $0x1228] ss:$16 sps:$4 sm:$0xff]   ;;  %v19847_v16 = vld [vmem:[%s21189_s8 + $0x100c] ss:$16 sps:$4 sm:$0xff]  }
 0x554   : > { %v14401_v17 = vpop.f32.mrf.mxu1  ;;  %14695 = vmatprep.subr.bf16.mxu1 %v19814_v8  ;;  %v23048_v58 = vadd.f32 %v14399_v59, %v14359_v42  ;;  %v14361_v15 = vadd.f32 %v14360_v47, %v2303_v19  ;;  %14684 = vmatprep.mubr.bf16.mxu0 %v21575_v22  ;;  %v19823_v22 = vld [vmem:[%s21189_s8 + $0x108c] ss:$16 sps:$4 sm:$0xff]   ;;  %v19845_v19 = vld [vmem:[%s21189_s8 + $0x1008] ss:$16 sps:$4 sm:$0xff]  }
 0x555   : > { %14725 = vmatprep.mubr.bf16.mxu1 %v21587_v6  ;;  %v14362_v24 = vpop.f32.mrf.mxu0  ;;  %v19826_v6 = vld [vmem:[%s21189_s8 + $0x128c] ss:$16 sps:$4 sm:$0xff]   ;;  %v19848_v54 = vld [vmem:[%s21189_s8 + $0x1208] ss:$16 sps:$4 sm:$0xff]  }
 0x556   : > { %v14403_v41 = vpop.f32.mrf.mxu1  ;;  %v23052_v43 = vadd.f32 %v14401_v17, %v14361_v15  ;;  %14655 = vmatpush1.bf16.msra.mxu0 %v19809_v51  ;;  %v19850_v8 = vld [vmem:[%s21189_s8 + $0x120c] ss:$16 sps:$4 sm:$0xff]   ;;  %v19851_v51 = vld [vmem:[%s21189_s8 + $0x11e8] ss:$16 sps:$4 sm:$0xff]  }
 0x557   : > { %14696 = vmatpush1.bf16.msra.mxu1 %v19812_v30  ;;  %v14363_v40 = vpop.f32.mrf.mxu0  ;;  %14656 = vmatprep.subr.bf16.mxu0 %v19817_v23  ;;  %v19853_v59 = vld [vmem:[%s21189_s8 + $0x11ec] ss:$16 sps:$4 sm:$0xff]   ;;  %v19854_v30 = vld [vmem:[%s21189_s8 + $0x13e8] ss:$16 sps:$4 sm:$0xff]  }
 0x558   : > { %v14404_v38 = vpop.f32.mrf.mxu1  ;;  %14697 = vmatprep.subr.bf16.mxu1 %v19820_v29  ;;  %v19856_v42 = vld [vmem:[%s21189_s8 + $0x13ec] ss:$16 sps:$4 sm:$0xff]   ;;  %v19857_v23 = vld [vmem:[%s21189_s8 + $0x11c8] ss:$16 sps:$4 sm:$0xff]  }
 0x559   : > { %v19859_v47 = vld [vmem:[%s21189_s8 + $0x11cc] ss:$16 sps:$4 sm:$0xff]   ;;  %v19860_v29 = vld [vmem:[%s21189_s8 + $0x13c8] ss:$16 sps:$4 sm:$0xff]  }
 0x55a   : > { %14657 = vmatpush1.bf16.msra.mxu0 %v19815_v10  ;;  %v19862_v17 = vld [vmem:[%s21189_s8 + $0x13cc] ss:$16 sps:$4 sm:$0xff]   ;;  %v19863_v41 = vld [vmem:[%s21189_s8 + $0x11a8] ss:$16 sps:$4 sm:$0xff]  }
 0x55b   : > { %14698 = vmatpush1.bf16.msra.mxu1 %v19818_v14  ;;  %14658 = vmatprep.subr.bf16.mxu0 %v19823_v22  ;;  %v19865_v15 = vld [vmem:[%s21189_s8 + $0x11ac] ss:$16 sps:$4 sm:$0xff]   ;;  %v19866_v10 = vld [vmem:[%s21189_s8 + $0x13a8] ss:$16 sps:$4 sm:$0xff]  }
 0x55c   : > { %14699 = vmatprep.subr.bf16.mxu1 %v19826_v6  ;;  %v19868_v24 = vld [vmem:[%s21189_s8 + $0x13ac] ss:$16 sps:$4 sm:$0xff]   ;;  %v19869_v38 = vld [vmem:[%s21189_s8 + $0x1188] ss:$16 sps:$4 sm:$0xff]  }
 0x55d   : > { %v19871_v14 = vld [vmem:[%s21189_s8 + $0x118c] ss:$16 sps:$4 sm:$0xff]   ;;  %v19872_v22 = vld [vmem:[%s21189_s8 + $0x1388] ss:$16 sps:$4 sm:$0xff]  }
 0x55e   : > { %14659 = vmatpush1.bf16.msra.mxu0 %v19821_v60  ;;  %v19874_v40 = vld [vmem:[%s21189_s8 + $0x138c] ss:$16 sps:$4 sm:$0xff]  }
 0x55f   : > { %14700 = vmatpush1.bf16.msra.mxu1 %v19824_v0  ;;  %14660 = vmatprep.subr.bf16.mxu0 %v19829_v32  ;;  %v19877_v6 = vld [vmem:[%s21189_s8 + $0x116c] ss:$16 sps:$4 sm:$0xff]   ;;  %v19875_v0 = vld [vmem:[%s21189_s8 + $0x1168] ss:$16 sps:$4 sm:$0xff]  }
 0x560   : > { %14701 = vmatprep.subr.bf16.mxu1 %v19832_v2  ;;  %v19880_v60 = vld [vmem:[%s21189_s8 + $0x136c] ss:$16 sps:$4 sm:$0xff]   ;;  %v19878_v32 = vld [vmem:[%s21189_s8 + $0x1368] ss:$16 sps:$4 sm:$0xff]  }
 0x561   : > { %v19883_v2 = vld [vmem:[%s21189_s8 + $0x114c] ss:$16 sps:$4 sm:$0xff]  }
 0x562   : > { %14661 = vmatpush1.bf16.msra.mxu0 %v19827_v45  ;;  %v19886_v45 = vld [vmem:[%s21189_s8 + $0x134c] ss:$16 sps:$4 sm:$0xff]  }
 0x563   : > { %14702 = vmatpush1.bf16.msra.mxu1 %v19830_v46  ;;  %14662 = vmatprep.subr.bf16.mxu0 %v19835_v3  ;;  %v19881_v46 = vld [vmem:[%s21189_s8 + $0x1148] ss:$16 sps:$4 sm:$0xff]  }
 0x564   : > { %14703 = vmatprep.subr.bf16.mxu1 %v19838_v57  ;;  %v19884_v3 = vld [vmem:[%s21189_s8 + $0x1348] ss:$16 sps:$4 sm:$0xff]   ;;  %v19889_v57 = vld [vmem:[%s21189_s8 + $0x112c] ss:$16 sps:$4 sm:$0xff]  }
 0x566   : > { %14663 = vmatpush1.bf16.msra.mxu0 %v19833_v50  ;;  %v19892_v50 = vld [vmem:[%s21189_s8 + $0x132c] ss:$16 sps:$4 sm:$0xff]  }
 0x567   : > { %14704 = vmatpush1.bf16.msra.mxu1 %v19836_v55  ;;  %14664 = vmatprep.subr.bf16.mxu0 %v19841_v62  ;;  %v19887_v55 = vld [vmem:[%s21189_s8 + $0x1128] ss:$16 sps:$4 sm:$0xff]  }
 0x568   : > { %14705 = vmatprep.subr.bf16.mxu1 %v19844_v49  ;;  %v19890_v62 = vld [vmem:[%s21189_s8 + $0x1328] ss:$16 sps:$4 sm:$0xff]   ;;  %v19895_v49 = vld [vmem:[%s21189_s8 + $0x110c] ss:$16 sps:$4 sm:$0xff]  }
 0x56a   : > { %14665 = vmatpush1.bf16.msra.mxu0 %v19839_v13  ;;  %v19898_v13 = vld [vmem:[%s21189_s8 + $0x130c] ss:$16 sps:$4 sm:$0xff]  }
 0x56b   : > { %14706 = vmatpush1.bf16.msra.mxu1 %v19842_v18  ;;  %14666 = vmatprep.subr.bf16.mxu0 %v19847_v16  ;;  %v19893_v18 = vld [vmem:[%s21189_s8 + $0x1108] ss:$16 sps:$4 sm:$0xff]  }
 0x56c   : > { %14707 = vmatprep.subr.bf16.mxu1 %v19850_v8  ;;  %v19896_v16 = vld [vmem:[%s21189_s8 + $0x1308] ss:$16 sps:$4 sm:$0xff]   ;;  %v19901_v8 = vld [vmem:[%s21189_s8 + $0x14ec] ss:$16 sps:$4 sm:$0xff]  }
 0x56e   : > { %14667 = vmatpush1.bf16.msra.mxu0 %v19845_v19  ;;  %v19904_v19 = vld [vmem:[%s21189_s8 + $0x16ec] ss:$16 sps:$4 sm:$0xff]  }
 0x56f   : > { %14708 = vmatpush1.bf16.msra.mxu1 %v19848_v54  ;;  %14668 = vmatprep.subr.bf16.mxu0 %v19853_v59  ;;  %v19899_v54 = vld [vmem:[%s21189_s8 + $0x14e8] ss:$16 sps:$4 sm:$0xff]  }
 0x570   : > { %14709 = vmatprep.subr.bf16.mxu1 %v19856_v42  ;;  %v19902_v59 = vld [vmem:[%s21189_s8 + $0x16e8] ss:$16 sps:$4 sm:$0xff]   ;;  %v19907_v42 = vld [vmem:[%s21189_s8 + $0x14cc] ss:$16 sps:$4 sm:$0xff]  }
 0x572   : > { %14669 = vmatpush2.bf16.msra.mxu0 %v19851_v51  ;;  %v19910_v51 = vld [vmem:[%s21189_s8 + $0x16cc] ss:$16 sps:$4 sm:$0xff]  }
 0x573   : > { %14710 = vmatpush2.bf16.msra.mxu1 %v19854_v30  ;;  %14670 = vmatprep.subr.bf16.mxu0 %v19859_v47 }
 0x574   : > { %14711 = vmatprep.subr.bf16.mxu1 %v19862_v17 }
 0x576   : > { %14671 = vmatpush2.bf16.msra.mxu0 %v19857_v23  ;;  %v19905_v23 = vld [vmem:[%s21189_s8 + $0x14c8] ss:$16 sps:$4 sm:$0xff]  }
 0x577   : > { %14712 = vmatpush2.bf16.msra.mxu1 %v19860_v29  ;;  %14672 = vmatprep.subr.bf16.mxu0 %v19865_v15  ;;  %v19908_v29 = vld [vmem:[%s21189_s8 + $0x16c8] ss:$16 sps:$4 sm:$0xff]  }
 0x578   : > { %14713 = vmatprep.subr.bf16.mxu1 %v19868_v24 }
 0x57a   : > { %14673 = vmatpush2.bf16.msra.mxu0 %v19863_v41  ;;  %v19913_v41 = vld [vmem:[%s21189_s8 + $0x14ac] ss:$16 sps:$4 sm:$0xff]  }
 0x57b   : > { %14714 = vmatpush2.bf16.msra.mxu1 %v19866_v10  ;;  %14674 = vmatprep.subr.bf16.mxu0 %v19871_v14  ;;  %v19916_v10 = vld [vmem:[%s21189_s8 + $0x16ac] ss:$16 sps:$4 sm:$0xff]  }
 0x57c   : > { %14715 = vmatprep.subr.bf16.mxu1 %v19874_v40 }
 0x57e   : > { %14675 = vmatpush2.bf16.msra.mxu0 %v19869_v38  ;;  %v19911_v38 = vld [vmem:[%s21189_s8 + $0x14a8] ss:$16 sps:$4 sm:$0xff]  }
 0x57f   : > { %14716 = vmatpush2.bf16.msra.mxu1 %v19872_v22  ;;  %14676 = vmatprep.subr.bf16.mxu0 %v19877_v6  ;;  %v19914_v22 = vld [vmem:[%s21189_s8 + $0x16a8] ss:$16 sps:$4 sm:$0xff]  }
 0x580   : > { %14717 = vmatprep.subr.bf16.mxu1 %v19880_v60 }
 0x582   : > { %14677 = vmatpush2.bf16.msra.mxu0 %v19875_v0  ;;  %v19920_v0 = vld [vmem:[%s21189_s8 + $0x1688] ss:$16 sps:$4 sm:$0xff]  }
 0x583   : > { %14718 = vmatpush2.bf16.msra.mxu1 %v19878_v32  ;;  %14678 = vmatprep.subr.bf16.mxu0 %v19883_v2  ;;  %v19925_v32 = vld [vmem:[%s21189_s8 + $0x146c] ss:$16 sps:$4 sm:$0xff]  }
 0x584   : > { %14719 = vmatprep.subr.bf16.mxu1 %v19886_v45  ;;  %v19928_v2 = vld [vmem:[%s21189_s8 + $0x166c] ss:$16 sps:$4 sm:$0xff]   ;;  %v19923_v45 = vld [vmem:[%s21189_s8 + $0x1468] ss:$16 sps:$4 sm:$0xff]  }
 0x586   : > { %14679 = vmatpush2.bf16.msra.mxu0 %v19881_v46  ;;  %v19926_v46 = vld [vmem:[%s21189_s8 + $0x1668] ss:$16 sps:$4 sm:$0xff]  }
 0x587   : > { %14720 = vmatpush2.bf16.msra.mxu1 %v19884_v3  ;;  %14680 = vmatprep.subr.bf16.mxu0 %v19889_v57  ;;  %v19931_v3 = vld [vmem:[%s21189_s8 + $0x144c] ss:$16 sps:$4 sm:$0xff]  }
 0x588   : > { %14721 = vmatprep.subr.bf16.mxu1 %v19892_v50  ;;  %v19934_v57 = vld [vmem:[%s21189_s8 + $0x164c] ss:$16 sps:$4 sm:$0xff]   ;;  %v19929_v50 = vld [vmem:[%s21189_s8 + $0x1448] ss:$16 sps:$4 sm:$0xff]  }
 0x58a   : > { %14681 = vmatpush2.bf16.msra.mxu0 %v19887_v55  ;;  %v19932_v55 = vld [vmem:[%s21189_s8 + $0x1648] ss:$16 sps:$4 sm:$0xff]  }
 0x58b   : > { %14722 = vmatpush2.bf16.msra.mxu1 %v19890_v62  ;;  %14682 = vmatprep.subr.bf16.mxu0 %v19895_v49  ;;  %v19937_v62 = vld [vmem:[%s21189_s8 + $0x142c] ss:$16 sps:$4 sm:$0xff]  }
 0x58c   : > { %14723 = vmatprep.subr.bf16.mxu1 %v19898_v13  ;;  %v19940_v49 = vld [vmem:[%s21189_s8 + $0x162c] ss:$16 sps:$4 sm:$0xff]   ;;  %v19935_v13 = vld [vmem:[%s21189_s8 + $0x1428] ss:$16 sps:$4 sm:$0xff]  }
 0x58e   : > { %14683 = vmatpush2.bf16.msra.mxu0 %v19893_v18  ;;  %v19938_v18 = vld [vmem:[%s21189_s8 + $0x1628] ss:$16 sps:$4 sm:$0xff]  }
 0x58f   : > { %14724 = vmatpush2.bf16.msra.mxu1 %v19896_v16  ;;  %14734 = vmatprep.subr.bf16.mxu0 %v19901_v8  ;;  %v19943_v16 = vld [vmem:[%s21189_s8 + $0x140c] ss:$16 sps:$4 sm:$0xff]  }
 0x590   : > { %14775 = vmatprep.subr.bf16.mxu1 %v19904_v19  ;;  %v19946_v8 = vld [vmem:[%s21189_s8 + $0x160c] ss:$16 sps:$4 sm:$0xff]   ;;  %v19941_v19 = vld [vmem:[%s21189_s8 + $0x1408] ss:$16 sps:$4 sm:$0xff]  }
 0x591   : > { %v14440_v30 = vpop.f32.mrf.mxu0  ;;  %14685 = vmatmul.mubr.bf16.vlgmr.msra.gmra.mxu0 %v21662_v12 }
 0x592   : > { %v14481_v47 = vpop.f32.mrf.mxu1  ;;  %14726 = vmatmul.mubr.bf16.vlgmr.msra.gmra.mxu1 %v21675_v4  ;;  %v14441_v17 = vadd.f32 %v14440_v30, %v23048_v58  ;;  %14735 = vmatpush1.bf16.msra.mxu0 %v19899_v54  ;;  %v19944_v54 = vld [vmem:[%s21189_s8 + $0x1608] ss:$16 sps:$4 sm:$0xff]  }
 0x593   : > { %14776 = vmatpush1.bf16.msra.mxu1 %v19902_v59  ;;  %v14442_v15 = vpop.f32.mrf.mxu0  ;;  %14736 = vmatprep.subr.bf16.mxu0 %v19907_v42  ;;  %v19949_v59 = vld [vmem:[%s21189_s8 + $0x15ec] ss:$16 sps:$4 sm:$0xff]   ;;  %v19950_v30 = vld [vmem:[%s21189_s8 + $0x17e8] ss:$16 sps:$4 sm:$0xff]  }
 0x594   : > { %v14483_v24 = vpop.f32.mrf.mxu1  ;;  %14777 = vmatprep.subr.bf16.mxu1 %v19910_v51  ;;  %v23121_v14 = vadd.f32 %v14481_v47, %v14441_v17  ;;  %v14443_v12 = vadd.f32 %v14442_v15, %v23052_v43  ;;  %14766 = vmatprep.mubr.bf16.mxu0 %v21671_v25  ;;  %v19919_v25 = vld [vmem:[%s21189_s8 + $0x148c] ss:$16 sps:$4 sm:$0xff]   ;;  %v19917_v43 = vld [vmem:[%s21189_s8 + $0x1488] ss:$16 sps:$4 sm:$0xff]  }
 0x595   : > { %14807 = vmatprep.mubr.bf16.mxu1 %v21683_v33  ;;  %v14444_v4 = vpop.f32.mrf.mxu0  ;;  %v19922_v33 = vld [vmem:[%s21189_s8 + $0x168c] ss:$16 sps:$4 sm:$0xff]   ;;  %v19947_v51 = vld [vmem:[%s21189_s8 + $0x15e8] ss:$16 sps:$4 sm:$0xff]  }
 0x596   : > { %v14485_v58 = vpop.f32.mrf.mxu1  ;;  %v23126_v40 = vadd.f32 %v14483_v24, %v14443_v12  ;;  %14737 = vmatpush1.bf16.msra.mxu0 %v19905_v23  ;;  %v19952_v42 = vld [vmem:[%s21189_s8 + $0x17ec] ss:$16 sps:$4 sm:$0xff]   ;;  %v19953_v23 = vld [vmem:[%s21189_s8 + $0x15c8] ss:$16 sps:$4 sm:$0xff]  }
 0x597   : > { %14778 = vmatpush1.bf16.msra.mxu1 %v19908_v29  ;;  %v14445_v6 = vpop.f32.mrf.mxu0  ;;  %14738 = vmatprep.subr.bf16.mxu0 %v19913_v41  ;;  %v19955_v47 = vld [vmem:[%s21189_s8 + $0x15cc] ss:$16 sps:$4 sm:$0xff]   ;;  %v19956_v29 = vld [vmem:[%s21189_s8 + $0x17c8] ss:$16 sps:$4 sm:$0xff]  }
 0x598   : > { %v14486_v60 = vpop.f32.mrf.mxu1  ;;  %14779 = vmatprep.subr.bf16.mxu1 %v19916_v10  ;;  %v19958_v17 = vld [vmem:[%s21189_s8 + $0x17cc] ss:$16 sps:$4 sm:$0xff]   ;;  %v19959_v41 = vld [vmem:[%s21189_s8 + $0x15a8] ss:$16 sps:$4 sm:$0xff]  }
 0x599   : > { %v19961_v15 = vld [vmem:[%s21189_s8 + $0x15ac] ss:$16 sps:$4 sm:$0xff]   ;;  %v19962_v10 = vld [vmem:[%s21189_s8 + $0x17a8] ss:$16 sps:$4 sm:$0xff]  }
 0x59a   : > { %14739 = vmatpush1.bf16.msra.mxu0 %v19911_v38  ;;  %v19964_v24 = vld [vmem:[%s21189_s8 + $0x17ac] ss:$16 sps:$4 sm:$0xff]   ;;  %v19965_v58 = vld [vmem:[%s21189_s8 + $0x1588] ss:$16 sps:$4 sm:$0xff]  }
 0x59b   : > { %14780 = vmatpush1.bf16.msra.mxu1 %v19914_v22  ;;  %14740 = vmatprep.subr.bf16.mxu0 %v19919_v25  ;;  %v19967_v12 = vld [vmem:[%s21189_s8 + $0x158c] ss:$16 sps:$4 sm:$0xff]   ;;  %v19968_v38 = vld [vmem:[%s21189_s8 + $0x1788] ss:$16 sps:$4 sm:$0xff]  }
 0x59c   : > { %14781 = vmatprep.subr.bf16.mxu1 %v19922_v33  ;;  %v19970_v4 = vld [vmem:[%s21189_s8 + $0x178c] ss:$16 sps:$4 sm:$0xff]   ;;  %v19971_v60 = vld [vmem:[%s21189_s8 + $0x1568] ss:$16 sps:$4 sm:$0xff]  }
 0x59d   : > { %v19973_v22 = vld [vmem:[%s21189_s8 + $0x156c] ss:$16 sps:$4 sm:$0xff]   ;;  %v19974_v25 = vld [vmem:[%s21189_s8 + $0x1768] ss:$16 sps:$4 sm:$0xff]  }
 0x59e   : > { %14741 = vmatpush1.bf16.msra.mxu0 %v19917_v43  ;;  %v19976_v6 = vld [vmem:[%s21189_s8 + $0x176c] ss:$16 sps:$4 sm:$0xff]  }
 0x59f   : > { %14782 = vmatpush1.bf16.msra.mxu1 %v19920_v0  ;;  %14742 = vmatprep.subr.bf16.mxu0 %v19925_v32  ;;  %v19979_v33 = vld [vmem:[%s21189_s8 + $0x154c] ss:$16 sps:$4 sm:$0xff]   ;;  %v19977_v0 = vld [vmem:[%s21189_s8 + $0x1548] ss:$16 sps:$4 sm:$0xff]  }
 0x5a0   : > { %14783 = vmatprep.subr.bf16.mxu1 %v19928_v2  ;;  %v19982_v43 = vld [vmem:[%s21189_s8 + $0x174c] ss:$16 sps:$4 sm:$0xff]   ;;  %v19980_v32 = vld [vmem:[%s21189_s8 + $0x1748] ss:$16 sps:$4 sm:$0xff]  }
 0x5a1   : > { %v19985_v2 = vld [vmem:[%s21189_s8 + $0x152c] ss:$16 sps:$4 sm:$0xff]  }
 0x5a2   : > { %14743 = vmatpush1.bf16.msra.mxu0 %v19923_v45  ;;  %v19988_v45 = vld [vmem:[%s21189_s8 + $0x172c] ss:$16 sps:$4 sm:$0xff]  }
 0x5a3   : > { %14784 = vmatpush1.bf16.msra.mxu1 %v19926_v46  ;;  %14744 = vmatprep.subr.bf16.mxu0 %v19931_v3  ;;  %v19983_v46 = vld [vmem:[%s21189_s8 + $0x1528] ss:$16 sps:$4 sm:$0xff]  }
 0x5a4   : > { %14785 = vmatprep.subr.bf16.mxu1 %v19934_v57  ;;  %v19986_v3 = vld [vmem:[%s21189_s8 + $0x1728] ss:$16 sps:$4 sm:$0xff]   ;;  %v19991_v57 = vld [vmem:[%s21189_s8 + $0x150c] ss:$16 sps:$4 sm:$0xff]  }
 0x5a6   : > { %14745 = vmatpush1.bf16.msra.mxu0 %v19929_v50  ;;  %v19994_v50 = vld [vmem:[%s21189_s8 + $0x170c] ss:$16 sps:$4 sm:$0xff]  }
 0x5a7   : > { %14786 = vmatpush1.bf16.msra.mxu1 %v19932_v55  ;;  %14746 = vmatprep.subr.bf16.mxu0 %v19937_v62  ;;  %v19989_v55 = vld [vmem:[%s21189_s8 + $0x1508] ss:$16 sps:$4 sm:$0xff]  }
 0x5a8   : > { %14787 = vmatprep.subr.bf16.mxu1 %v19940_v49  ;;  %v19992_v62 = vld [vmem:[%s21189_s8 + $0x1708] ss:$16 sps:$4 sm:$0xff]   ;;  %v19997_v49 = vld [vmem:[%s21189_s8 + $0x18ec] ss:$16 sps:$4 sm:$0xff]  }
 0x5aa   : > { %14747 = vmatpush1.bf16.msra.mxu0 %v19935_v13  ;;  %v20000_v13 = vld [vmem:[%s21189_s8 + $0x1aec] ss:$16 sps:$4 sm:$0xff]  }
 0x5ab   : > { %14788 = vmatpush1.bf16.msra.mxu1 %v19938_v18  ;;  %14748 = vmatprep.subr.bf16.mxu0 %v19943_v16  ;;  %v19995_v18 = vld [vmem:[%s21189_s8 + $0x18e8] ss:$16 sps:$4 sm:$0xff]  }
 0x5ac   : > { %14789 = vmatprep.subr.bf16.mxu1 %v19946_v8  ;;  %v19998_v16 = vld [vmem:[%s21189_s8 + $0x1ae8] ss:$16 sps:$4 sm:$0xff]   ;;  %v20003_v8 = vld [vmem:[%s21189_s8 + $0x18cc] ss:$16 sps:$4 sm:$0xff]  }
 0x5ae   : > { %14749 = vmatpush1.bf16.msra.mxu0 %v19941_v19  ;;  %v20006_v19 = vld [vmem:[%s21189_s8 + $0x1acc] ss:$16 sps:$4 sm:$0xff]  }
 0x5af   : > { %14790 = vmatpush1.bf16.msra.mxu1 %v19944_v54  ;;  %14750 = vmatprep.subr.bf16.mxu0 %v19949_v59 }
 0x5b0   : > { %14791 = vmatprep.subr.bf16.mxu1 %v19952_v42 }
 0x5b2   : > { %14751 = vmatpush2.bf16.msra.mxu0 %v19947_v51  ;;  %v20001_v51 = vld [vmem:[%s21189_s8 + $0x18c8] ss:$16 sps:$4 sm:$0xff]  }
 0x5b3   : > { %14792 = vmatpush2.bf16.msra.mxu1 %v19950_v30  ;;  %14752 = vmatprep.subr.bf16.mxu0 %v19955_v47  ;;  %v20004_v30 = vld [vmem:[%s21189_s8 + $0x1ac8] ss:$16 sps:$4 sm:$0xff]  }
 0x5b4   : > { %14793 = vmatprep.subr.bf16.mxu1 %v19958_v17 }
 0x5b6   : > { %14753 = vmatpush2.bf16.msra.mxu0 %v19953_v23  ;;  %v20009_v23 = vld [vmem:[%s21189_s8 + $0x18ac] ss:$16 sps:$4 sm:$0xff]  }
 0x5b7   : > { %14794 = vmatpush2.bf16.msra.mxu1 %v19956_v29  ;;  %14754 = vmatprep.subr.bf16.mxu0 %v19961_v15  ;;  %v20012_v29 = vld [vmem:[%s21189_s8 + $0x1aac] ss:$16 sps:$4 sm:$0xff]  }
 0x5b8   : > { %14795 = vmatprep.subr.bf16.mxu1 %v19964_v24 }
 0x5ba   : > { %14755 = vmatpush2.bf16.msra.mxu0 %v19959_v41  ;;  %v20007_v41 = vld [vmem:[%s21189_s8 + $0x18a8] ss:$16 sps:$4 sm:$0xff]  }
 0x5bb   : > { %14796 = vmatpush2.bf16.msra.mxu1 %v19962_v10  ;;  %14756 = vmatprep.subr.bf16.mxu0 %v19967_v12  ;;  %v20010_v10 = vld [vmem:[%s21189_s8 + $0x1aa8] ss:$16 sps:$4 sm:$0xff]  }
 0x5bc   : > { %14797 = vmatprep.subr.bf16.mxu1 %v19970_v4 }
 0x5be   : > { %14757 = vmatpush2.bf16.msra.mxu0 %v19965_v58  ;;  %v20016_v58 = vld [vmem:[%s21189_s8 + $0x1a88] ss:$16 sps:$4 sm:$0xff]  }
 0x5bf   : > { %14798 = vmatpush2.bf16.msra.mxu1 %v19968_v38  ;;  %14758 = vmatprep.subr.bf16.mxu0 %v19973_v22  ;;  %v20021_v38 = vld [vmem:[%s21189_s8 + $0x186c] ss:$16 sps:$4 sm:$0xff]  }
 0x5c0   : > { %14799 = vmatprep.subr.bf16.mxu1 %v19976_v6  ;;  %v20024_v22 = vld [vmem:[%s21189_s8 + $0x1a6c] ss:$16 sps:$4 sm:$0xff]   ;;  %v20019_v6 = vld [vmem:[%s21189_s8 + $0x1868] ss:$16 sps:$4 sm:$0xff]  }
 0x5c2   : > { %14759 = vmatpush2.bf16.msra.mxu0 %v19971_v60  ;;  %v20022_v60 = vld [vmem:[%s21189_s8 + $0x1a68] ss:$16 sps:$4 sm:$0xff]  }
 0x5c3   : > { %14800 = vmatpush2.bf16.msra.mxu1 %v19974_v25  ;;  %14760 = vmatprep.subr.bf16.mxu0 %v19979_v33  ;;  %v20027_v25 = vld [vmem:[%s21189_s8 + $0x184c] ss:$16 sps:$4 sm:$0xff]  }
 0x5c4   : > { %14801 = vmatprep.subr.bf16.mxu1 %v19982_v43  ;;  %v20030_v33 = vld [vmem:[%s21189_s8 + $0x1a4c] ss:$16 sps:$4 sm:$0xff]   ;;  %v20025_v43 = vld [vmem:[%s21189_s8 + $0x1848] ss:$16 sps:$4 sm:$0xff]  }
 0x5c6   : > { %14761 = vmatpush2.bf16.msra.mxu0 %v19977_v0  ;;  %v20028_v0 = vld [vmem:[%s21189_s8 + $0x1a48] ss:$16 sps:$4 sm:$0xff]  }
 0x5c7   : > { %14802 = vmatpush2.bf16.msra.mxu1 %v19980_v32  ;;  %14762 = vmatprep.subr.bf16.mxu0 %v19985_v2  ;;  %v20033_v32 = vld [vmem:[%s21189_s8 + $0x182c] ss:$16 sps:$4 sm:$0xff]  }
 0x5c8   : > { %14803 = vmatprep.subr.bf16.mxu1 %v19988_v45  ;;  %v20036_v2 = vld [vmem:[%s21189_s8 + $0x1a2c] ss:$16 sps:$4 sm:$0xff]   ;;  %v20031_v45 = vld [vmem:[%s21189_s8 + $0x1828] ss:$16 sps:$4 sm:$0xff]  }
 0x5ca   : > { %14763 = vmatpush2.bf16.msra.mxu0 %v19983_v46  ;;  %v20034_v46 = vld [vmem:[%s21189_s8 + $0x1a28] ss:$16 sps:$4 sm:$0xff]  }
 0x5cb   : > { %14804 = vmatpush2.bf16.msra.mxu1 %v19986_v3  ;;  %14764 = vmatprep.subr.bf16.mxu0 %v19991_v57  ;;  %v20039_v3 = vld [vmem:[%s21189_s8 + $0x180c] ss:$16 sps:$4 sm:$0xff]  }
 0x5cc   : > { %14805 = vmatprep.subr.bf16.mxu1 %v19994_v50  ;;  %v20042_v57 = vld [vmem:[%s21189_s8 + $0x1a0c] ss:$16 sps:$4 sm:$0xff]   ;;  %v20037_v50 = vld [vmem:[%s21189_s8 + $0x1808] ss:$16 sps:$4 sm:$0xff]  }
 0x5ce   : > { %14765 = vmatpush2.bf16.msra.mxu0 %v19989_v55  ;;  %v20040_v55 = vld [vmem:[%s21189_s8 + $0x1a08] ss:$16 sps:$4 sm:$0xff]  }
 0x5cf   : > { %14806 = vmatpush2.bf16.msra.mxu1 %v19992_v62  ;;  %14816 = vmatprep.subr.bf16.mxu0 %v19997_v49  ;;  %v20045_v62 = vld [vmem:[%s21189_s8 + $0x19ec] ss:$16 sps:$4 sm:$0xff]  }
 0x5d0   : > { %14857 = vmatprep.subr.bf16.mxu1 %v20000_v13  ;;  %v20048_v49 = vld [vmem:[%s21189_s8 + $0x1bec] ss:$16 sps:$4 sm:$0xff]   ;;  %v20043_v13 = vld [vmem:[%s21189_s8 + $0x19e8] ss:$16 sps:$4 sm:$0xff]  }
 0x5d1   : > { %v14522_v54 = vpop.f32.mrf.mxu0  ;;  %14767 = vmatmul.mubr.bf16.vlgmr.msra.gmra.mxu0 %v21762_v20 }
 0x5d2   : > { %v14563_v59 = vpop.f32.mrf.mxu1  ;;  %14808 = vmatmul.mubr.bf16.vlgmr.msra.gmra.mxu1 %v21775_v7  ;;  %v14523_v42 = vadd.f32 %v14522_v54, %v23121_v14  ;;  %14817 = vmatpush1.bf16.msra.mxu0 %v19995_v18  ;;  %v20046_v18 = vld [vmem:[%s21189_s8 + $0x1be8] ss:$16 sps:$4 sm:$0xff]  }
 0x5d3   : > { %14858 = vmatpush1.bf16.msra.mxu1 %v19998_v16  ;;  %v14524_v47 = vpop.f32.mrf.mxu0  ;;  %14818 = vmatprep.subr.bf16.mxu0 %v20003_v8  ;;  %v20051_v16 = vld [vmem:[%s21189_s8 + $0x19cc] ss:$16 sps:$4 sm:$0xff]   ;;  %v20052_v54 = vld [vmem:[%s21189_s8 + $0x1bc8] ss:$16 sps:$4 sm:$0xff]  }
 0x5d4   : > { %v14565_v17 = vpop.f32.mrf.mxu1  ;;  %14859 = vmatprep.subr.bf16.mxu1 %v20006_v19  ;;  %v23195_v15 = vadd.f32 %v14563_v59, %v14523_v42  ;;  %v14525_v20 = vadd.f32 %v14524_v47, %v23126_v40  ;;  %14848 = vmatprep.mubr.bf16.mxu0 %v21771_v34  ;;  %v20015_v34 = vld [vmem:[%s21189_s8 + $0x188c] ss:$16 sps:$4 sm:$0xff]   ;;  %v20013_v40 = vld [vmem:[%s21189_s8 + $0x1888] ss:$16 sps:$4 sm:$0xff]  }
 0x5d5   : > { %14889 = vmatprep.mubr.bf16.mxu1 %v21783_v44  ;;  %v14526_v7 = vpop.f32.mrf.mxu0  ;;  %v20018_v44 = vld [vmem:[%s21189_s8 + $0x1a8c] ss:$16 sps:$4 sm:$0xff]   ;;  %v20049_v19 = vld [vmem:[%s21189_s8 + $0x19c8] ss:$16 sps:$4 sm:$0xff]  }
 0x5d6   : > { %v14567_v14 = vpop.f32.mrf.mxu1  ;;  %v23200_v24 = vadd.f32 %v14565_v17, %v14525_v20  ;;  %14819 = vmatpush1.bf16.msra.mxu0 %v20001_v51  ;;  %v20054_v8 = vld [vmem:[%s21189_s8 + $0x1bcc] ss:$16 sps:$4 sm:$0xff]   ;;  %v20055_v51 = vld [vmem:[%s21189_s8 + $0x19a8] ss:$16 sps:$4 sm:$0xff]  }
 0x5d7   : > { %14860 = vmatpush1.bf16.msra.mxu1 %v20004_v30  ;;  %v14527_v12 = vpop.f32.mrf.mxu0  ;;  %14820 = vmatprep.subr.bf16.mxu0 %v20009_v23  ;;  %v20057_v59 = vld [vmem:[%s21189_s8 + $0x19ac] ss:$16 sps:$4 sm:$0xff]   ;;  %v20058_v30 = vld [vmem:[%s21189_s8 + $0x1ba8] ss:$16 sps:$4 sm:$0xff]  }
 0x5d8   : > { %v14568_v4 = vpop.f32.mrf.mxu1  ;;  %14861 = vmatprep.subr.bf16.mxu1 %v20012_v29  ;;  %v20060_v42 = vld [vmem:[%s21189_s8 + $0x1bac] ss:$16 sps:$4 sm:$0xff]   ;;  %v20061_v23 = vld [vmem:[%s21189_s8 + $0x1988] ss:$16 sps:$4 sm:$0xff]  }
 0x5d9   : > { %v20063_v47 = vld [vmem:[%s21189_s8 + $0x198c] ss:$16 sps:$4 sm:$0xff]   ;;  %v20064_v29 = vld [vmem:[%s21189_s8 + $0x1b88] ss:$16 sps:$4 sm:$0xff]  }
 0x5da   : > { %14821 = vmatpush1.bf16.msra.mxu0 %v20007_v41  ;;  %v20066_v17 = vld [vmem:[%s21189_s8 + $0x1b8c] ss:$16 sps:$4 sm:$0xff]   ;;  %v20067_v14 = vld [vmem:[%s21189_s8 + $0x1968] ss:$16 sps:$4 sm:$0xff]  }
 0x5db   : > { %14862 = vmatpush1.bf16.msra.mxu1 %v20010_v10  ;;  %14822 = vmatprep.subr.bf16.mxu0 %v20015_v34  ;;  %v20069_v20 = vld [vmem:[%s21189_s8 + $0x196c] ss:$16 sps:$4 sm:$0xff]   ;;  %v20070_v41 = vld [vmem:[%s21189_s8 + $0x1b68] ss:$16 sps:$4 sm:$0xff]  }
 0x5dc   : > { %14863 = vmatprep.subr.bf16.mxu1 %v20018_v44  ;;  %v20072_v7 = vld [vmem:[%s21189_s8 + $0x1b6c] ss:$16 sps:$4 sm:$0xff]   ;;  %v20073_v4 = vld [vmem:[%s21189_s8 + $0x1948] ss:$16 sps:$4 sm:$0xff]  }
 0x5dd   : > { %v20075_v10 = vld [vmem:[%s21189_s8 + $0x194c] ss:$16 sps:$4 sm:$0xff]   ;;  %v20076_v34 = vld [vmem:[%s21189_s8 + $0x1b48] ss:$16 sps:$4 sm:$0xff]  }
 0x5de   : > { %14823 = vmatpush1.bf16.msra.mxu0 %v20013_v40  ;;  %v20078_v12 = vld [vmem:[%s21189_s8 + $0x1b4c] ss:$16 sps:$4 sm:$0xff]  }
 0x5df   : > { %14864 = vmatpush1.bf16.msra.mxu1 %v20016_v58  ;;  %14824 = vmatprep.subr.bf16.mxu0 %v20021_v38  ;;  %v20081_v44 = vld [vmem:[%s21189_s8 + $0x192c] ss:$16 sps:$4 sm:$0xff]   ;;  %v20079_v58 = vld [vmem:[%s21189_s8 + $0x1928] ss:$16 sps:$4 sm:$0xff]  }
 0x5e0   : > { %14865 = vmatprep.subr.bf16.mxu1 %v20024_v22  ;;  %v20084_v40 = vld [vmem:[%s21189_s8 + $0x1b2c] ss:$16 sps:$4 sm:$0xff]   ;;  %v20082_v38 = vld [vmem:[%s21189_s8 + $0x1b28] ss:$16 sps:$4 sm:$0xff]  }
 0x5e1   : > { %v20087_v22 = vld [vmem:[%s21189_s8 + $0x190c] ss:$16 sps:$4 sm:$0xff]  }
 0x5e2   : > { %14825 = vmatpush1.bf16.msra.mxu0 %v20019_v6  ;;  %v20090_v6 = vld [vmem:[%s21189_s8 + $0x1b0c] ss:$16 sps:$4 sm:$0xff]  }
 0x5e3   : > { %14866 = vmatpush1.bf16.msra.mxu1 %v20022_v60  ;;  %14826 = vmatprep.subr.bf16.mxu0 %v20027_v25  ;;  %v20085_v60 = vld [vmem:[%s21189_s8 + $0x1908] ss:$16 sps:$4 sm:$0xff]  }
 0x5e4   : > { %14867 = vmatprep.subr.bf16.mxu1 %v20030_v33  ;;  %v20088_v25 = vld [vmem:[%s21189_s8 + $0x1b08] ss:$16 sps:$4 sm:$0xff]   ;;  %v20093_v33 = vld [vmem:[%s21189_s8 + $0x1cec] ss:$16 sps:$4 sm:$0xff]  }
 0x5e6   : > { %14827 = vmatpush1.bf16.msra.mxu0 %v20025_v43  ;;  %v20096_v43 = vld [vmem:[%s21189_s8 + $0x1eec] ss:$16 sps:$4 sm:$0xff]  }
 0x5e7   : > { %14868 = vmatpush1.bf16.msra.mxu1 %v20028_v0  ;;  %14828 = vmatprep.subr.bf16.mxu0 %v20033_v32  ;;  %v20091_v0 = vld [vmem:[%s21189_s8 + $0x1ce8] ss:$16 sps:$4 sm:$0xff]  }
 0x5e8   : > { %14869 = vmatprep.subr.bf16.mxu1 %v20036_v2  ;;  %v20094_v32 = vld [vmem:[%s21189_s8 + $0x1ee8] ss:$16 sps:$4 sm:$0xff]   ;;  %v20099_v2 = vld [vmem:[%s21189_s8 + $0x1ccc] ss:$16 sps:$4 sm:$0xff]  }
 0x5ea   : > { %14829 = vmatpush1.bf16.msra.mxu0 %v20031_v45  ;;  %v20102_v45 = vld [vmem:[%s21189_s8 + $0x1ecc] ss:$16 sps:$4 sm:$0xff]  }
 0x5eb   : > { %14870 = vmatpush1.bf16.msra.mxu1 %v20034_v46  ;;  %14830 = vmatprep.subr.bf16.mxu0 %v20039_v3 }
 0x5ec   : > { %14871 = vmatprep.subr.bf16.mxu1 %v20042_v57 }
 0x5ee   : > { %14831 = vmatpush1.bf16.msra.mxu0 %v20037_v50  ;;  %v20097_v50 = vld [vmem:[%s21189_s8 + $0x1cc8] ss:$16 sps:$4 sm:$0xff]  }
 0x5ef   : > { %14872 = vmatpush1.bf16.msra.mxu1 %v20040_v55  ;;  %14832 = vmatprep.subr.bf16.mxu0 %v20045_v62  ;;  %v20100_v55 = vld [vmem:[%s21189_s8 + $0x1ec8] ss:$16 sps:$4 sm:$0xff]  }
 0x5f0   : > { %14873 = vmatprep.subr.bf16.mxu1 %v20048_v49 }
 0x5f2   : > { %14833 = vmatpush2.bf16.msra.mxu0 %v20043_v13  ;;  %v20105_v13 = vld [vmem:[%s21189_s8 + $0x1cac] ss:$16 sps:$4 sm:$0xff]  }
 0x5f3   : > { %14874 = vmatpush2.bf16.msra.mxu1 %v20046_v18  ;;  %14834 = vmatprep.subr.bf16.mxu0 %v20051_v16  ;;  %v20108_v18 = vld [vmem:[%s21189_s8 + $0x1eac] ss:$16 sps:$4 sm:$0xff]  }
 0x5f4   : > { %14875 = vmatprep.subr.bf16.mxu1 %v20054_v8 }
 0x5f6   : > { %14835 = vmatpush2.bf16.msra.mxu0 %v20049_v19  ;;  %v20103_v19 = vld [vmem:[%s21189_s8 + $0x1ca8] ss:$16 sps:$4 sm:$0xff]  }
 0x5f7   : > { %14876 = vmatpush2.bf16.msra.mxu1 %v20052_v54  ;;  %14836 = vmatprep.subr.bf16.mxu0 %v20057_v59  ;;  %v20106_v54 = vld [vmem:[%s21189_s8 + $0x1ea8] ss:$16 sps:$4 sm:$0xff]  }
 0x5f8   : > { %14877 = vmatprep.subr.bf16.mxu1 %v20060_v42 }
 0x5fa   : > { %14837 = vmatpush2.bf16.msra.mxu0 %v20055_v51  ;;  %v20112_v51 = vld [vmem:[%s21189_s8 + $0x1e88] ss:$16 sps:$4 sm:$0xff]  }
 0x5fb   : > { %14878 = vmatpush2.bf16.msra.mxu1 %v20058_v30  ;;  %14838 = vmatprep.subr.bf16.mxu0 %v20063_v47  ;;  %v20117_v30 = vld [vmem:[%s21189_s8 + $0x1c6c] ss:$16 sps:$4 sm:$0xff]  }
 0x5fc   : > { %14879 = vmatprep.subr.bf16.mxu1 %v20066_v17  ;;  %v20120_v47 = vld [vmem:[%s21189_s8 + $0x1e6c] ss:$16 sps:$4 sm:$0xff]   ;;  %v20115_v17 = vld [vmem:[%s21189_s8 + $0x1c68] ss:$16 sps:$4 sm:$0xff]  }
 0x5fe   : > { %14839 = vmatpush2.bf16.msra.mxu0 %v20061_v23  ;;  %v20118_v23 = vld [vmem:[%s21189_s8 + $0x1e68] ss:$16 sps:$4 sm:$0xff]  }
 0x5ff   : > { %14880 = vmatpush2.bf16.msra.mxu1 %v20064_v29  ;;  %14840 = vmatprep.subr.bf16.mxu0 %v20069_v20  ;;  %v20123_v29 = vld [vmem:[%s21189_s8 + $0x1c4c] ss:$16 sps:$4 sm:$0xff]  }
 0x600   : > { %14881 = vmatprep.subr.bf16.mxu1 %v20072_v7  ;;  %v20126_v20 = vld [vmem:[%s21189_s8 + $0x1e4c] ss:$16 sps:$4 sm:$0xff]   ;;  %v20121_v7 = vld [vmem:[%s21189_s8 + $0x1c48] ss:$16 sps:$4 sm:$0xff]  }
 0x602   : > { %14841 = vmatpush2.bf16.msra.mxu0 %v20067_v14  ;;  %v20124_v14 = vld [vmem:[%s21189_s8 + $0x1e48] ss:$16 sps:$4 sm:$0xff]  }
 0x603   : > { %14882 = vmatpush2.bf16.msra.mxu1 %v20070_v41  ;;  %14842 = vmatprep.subr.bf16.mxu0 %v20075_v10  ;;  %v20129_v41 = vld [vmem:[%s21189_s8 + $0x1c2c] ss:$16 sps:$4 sm:$0xff]  }
 0x604   : > { %14883 = vmatprep.subr.bf16.mxu1 %v20078_v12  ;;  %v20132_v10 = vld [vmem:[%s21189_s8 + $0x1e2c] ss:$16 sps:$4 sm:$0xff]   ;;  %v20127_v12 = vld [vmem:[%s21189_s8 + $0x1c28] ss:$16 sps:$4 sm:$0xff]  }
 0x606   : > { %14843 = vmatpush2.bf16.msra.mxu0 %v20073_v4  ;;  %v20130_v4 = vld [vmem:[%s21189_s8 + $0x1e28] ss:$16 sps:$4 sm:$0xff]  }
 0x607   : > { %14884 = vmatpush2.bf16.msra.mxu1 %v20076_v34  ;;  %14844 = vmatprep.subr.bf16.mxu0 %v20081_v44  ;;  %v20135_v34 = vld [vmem:[%s21189_s8 + $0x1c0c] ss:$16 sps:$4 sm:$0xff]  }
 0x608   : > { %14885 = vmatprep.subr.bf16.mxu1 %v20084_v40  ;;  %v20138_v44 = vld [vmem:[%s21189_s8 + $0x1e0c] ss:$16 sps:$4 sm:$0xff]   ;;  %v20133_v40 = vld [vmem:[%s21189_s8 + $0x1c08] ss:$16 sps:$4 sm:$0xff]  }
 0x60a   : > { %14845 = vmatpush2.bf16.msra.mxu0 %v20079_v58  ;;  %v20136_v58 = vld [vmem:[%s21189_s8 + $0x1e08] ss:$16 sps:$4 sm:$0xff]  }
 0x60b   : > { %14886 = vmatpush2.bf16.msra.mxu1 %v20082_v38  ;;  %14846 = vmatprep.subr.bf16.mxu0 %v20087_v22  ;;  %v20141_v38 = vld [vmem:[%s21189_s8 + $0x1dec] ss:$16 sps:$4 sm:$0xff]  }
 0x60c   : > { %14887 = vmatprep.subr.bf16.mxu1 %v20090_v6  ;;  %v20144_v22 = vld [vmem:[%s21189_s8 + $0x1fec] ss:$16 sps:$4 sm:$0xff]   ;;  %v20139_v6 = vld [vmem:[%s21189_s8 + $0x1de8] ss:$16 sps:$4 sm:$0xff]  }
 0x60e   : > { %14847 = vmatpush2.bf16.msra.mxu0 %v20085_v60  ;;  %v20142_v60 = vld [vmem:[%s21189_s8 + $0x1fe8] ss:$16 sps:$4 sm:$0xff]  }
 0x60f   : > { %14888 = vmatpush2.bf16.msra.mxu1 %v20088_v25  ;;  %14898 = vmatprep.subr.bf16.mxu0 %v20093_v33  ;;  %v20147_v25 = vld [vmem:[%s21189_s8 + $0x1dcc] ss:$16 sps:$4 sm:$0xff]  }
 0x610   : > { %14939 = vmatprep.subr.bf16.mxu1 %v20096_v43  ;;  %v20150_v33 = vld [vmem:[%s21189_s8 + $0x1fcc] ss:$16 sps:$4 sm:$0xff]   ;;  %v20145_v43 = vld [vmem:[%s21189_s8 + $0x1dc8] ss:$16 sps:$4 sm:$0xff]  }
 0x611   : > { %v14604_v46 = vpop.f32.mrf.mxu0  ;;  %14849 = vmatmul.mubr.bf16.vlgmr.msra.gmra.mxu0 %v21858_v48 }
 0x612   : > { %v14645_v3 = vpop.f32.mrf.mxu1  ;;  %14890 = vmatmul.mubr.bf16.vlgmr.msra.gmra.mxu1 %v21871_v9  ;;  %v14605_v57 = vadd.f32 %v14604_v46, %v23195_v15  ;;  %14899 = vmatpush1.bf16.msra.mxu0 %v20091_v0  ;;  %v20148_v0 = vld [vmem:[%s21189_s8 + $0x1fc8] ss:$16 sps:$4 sm:$0xff]  }
 0x613   : > { %14940 = vmatpush1.bf16.msra.mxu1 %v20094_v32  ;;  %v14606_v62 = vpop.f32.mrf.mxu0  ;;  %14900 = vmatprep.subr.bf16.mxu0 %v20099_v2  ;;  %v20153_v32 = vld [vmem:[%s21189_s8 + $0x1dac] ss:$16 sps:$4 sm:$0xff]   ;;  %v20154_v46 = vld [vmem:[%s21189_s8 + $0x1fa8] ss:$16 sps:$4 sm:$0xff]  }
 0x614   : > { %v14647_v49 = vpop.f32.mrf.mxu1  ;;  %14941 = vmatprep.subr.bf16.mxu1 %v20102_v45  ;;  %v23269_v16 = vadd.f32 %v14645_v3, %v14605_v57  ;;  %v14607_v48 = vadd.f32 %v14606_v62, %v23200_v24  ;;  %14930 = vmatprep.mubr.bf16.mxu0 %v21867_v61  ;;  %v20111_v61 = vld [vmem:[%s21189_s8 + $0x1c8c] ss:$16 sps:$4 sm:$0xff]   ;;  %v20109_v24 = vld [vmem:[%s21189_s8 + $0x1c88] ss:$16 sps:$4 sm:$0xff]  }
 0x615   : > { %14971 = vmatprep.mubr.bf16.mxu1 %v21879_v53  ;;  %v14608_v9 = vpop.f32.mrf.mxu0  ;;  %v20114_v53 = vld [vmem:[%s21189_s8 + $0x1e8c] ss:$16 sps:$4 sm:$0xff]   ;;  %v20151_v45 = vld [vmem:[%s21189_s8 + $0x1da8] ss:$16 sps:$4 sm:$0xff]  }
 0x616   : > { %v14649_v15 = vpop.f32.mrf.mxu1  ;;  %v23274_v8 = vadd.f32 %v14647_v49, %v14607_v48  ;;  %14901 = vmatpush1.bf16.msra.mxu0 %v20097_v50  ;;  %v20156_v2 = vld [vmem:[%s21189_s8 + $0x1fac] ss:$16 sps:$4 sm:$0xff]   ;;  %v20157_v50 = vld [vmem:[%s21189_s8 + $0x1d88] ss:$16 sps:$4 sm:$0xff]  }
 0x617   : > { %14942 = vmatpush1.bf16.msra.mxu1 %v20100_v55  ;;  %v14609_v59 = vpop.f32.mrf.mxu0  ;;  %14902 = vmatprep.subr.bf16.mxu0 %v20105_v13  ;;  %v20159_v3 = vld [vmem:[%s21189_s8 + $0x1d8c] ss:$16 sps:$4 sm:$0xff]   ;;  %v20160_v55 = vld [vmem:[%s21189_s8 + $0x1f88] ss:$16 sps:$4 sm:$0xff]  }
 0x618   : > { %v14650_v42 = vpop.f32.mrf.mxu1  ;;  %14943 = vmatprep.subr.bf16.mxu1 %v20108_v18  ;;  %v20162_v57 = vld [vmem:[%s21189_s8 + $0x1f8c] ss:$16 sps:$4 sm:$0xff]   ;;  %v20163_v13 = vld [vmem:[%s21189_s8 + $0x1d68] ss:$16 sps:$4 sm:$0xff]  }
 0x619   : > { %v20165_v62 = vld [vmem:[%s21189_s8 + $0x1d6c] ss:$16 sps:$4 sm:$0xff]   ;;  %v20166_v18 = vld [vmem:[%s21189_s8 + $0x1f68] ss:$16 sps:$4 sm:$0xff]  }
 0x61a   : > { %14903 = vmatpush1.bf16.msra.mxu0 %v20103_v19  ;;  %v20168_v49 = vld [vmem:[%s21189_s8 + $0x1f6c] ss:$16 sps:$4 sm:$0xff]   ;;  %v20169_v15 = vld [vmem:[%s21189_s8 + $0x1d48] ss:$16 sps:$4 sm:$0xff]  }
 0x61b   : > { %14944 = vmatpush1.bf16.msra.mxu1 %v20106_v54  ;;  %14904 = vmatprep.subr.bf16.mxu0 %v20111_v61  ;;  %v20171_v48 = vld [vmem:[%s21189_s8 + $0x1d4c] ss:$16 sps:$4 sm:$0xff]   ;;  %v20172_v19 = vld [vmem:[%s21189_s8 + $0x1f48] ss:$16 sps:$4 sm:$0xff]  }
 0x61c   : > { %14945 = vmatprep.subr.bf16.mxu1 %v20114_v53  ;;  %v20174_v9 = vld [vmem:[%s21189_s8 + $0x1f4c] ss:$16 sps:$4 sm:$0xff]   ;;  %v20175_v42 = vld [vmem:[%s21189_s8 + $0x1d28] ss:$16 sps:$4 sm:$0xff]  }
 0x61d   : > { %v20177_v54 = vld [vmem:[%s21189_s8 + $0x1d2c] ss:$16 sps:$4 sm:$0xff]   ;;  %v20178_v61 = vld [vmem:[%s21189_s8 + $0x1f28] ss:$16 sps:$4 sm:$0xff]  }
 0x61e   : > { %14905 = vmatpush1.bf16.msra.mxu0 %v20109_v24  ;;  %v20180_v59 = vld [vmem:[%s21189_s8 + $0x1f2c] ss:$16 sps:$4 sm:$0xff]  }
 0x61f   : > { %14946 = vmatpush1.bf16.msra.mxu1 %v20112_v51  ;;  %14906 = vmatprep.subr.bf16.mxu0 %v20117_v30  ;;  %v20183_v53 = vld [vmem:[%s21189_s8 + $0x1d0c] ss:$16 sps:$4 sm:$0xff]   ;;  %v20181_v51 = vld [vmem:[%s21189_s8 + $0x1d08] ss:$16 sps:$4 sm:$0xff]  }
 0x620   : > { %14947 = vmatprep.subr.bf16.mxu1 %v20120_v47  ;;  %v20186_v24 = vld [vmem:[%s21189_s8 + $0x1f0c] ss:$16 sps:$4 sm:$0xff]   ;;  %v20184_v30 = vld [vmem:[%s21189_s8 + $0x1f08] ss:$16 sps:$4 sm:$0xff]  }
 0x621   : > { %v20189_v47 = vld [vmem:[%s21189_s8 + $0x20ec] ss:$16 sps:$4 sm:$0xff]  }
 0x622   : > { %14907 = vmatpush1.bf16.msra.mxu0 %v20115_v17  ;;  %v20192_v17 = vld [vmem:[%s21189_s8 + $0x22ec] ss:$16 sps:$4 sm:$0xff]  }
 0x623   : > { %14948 = vmatpush1.bf16.msra.mxu1 %v20118_v23  ;;  %14908 = vmatprep.subr.bf16.mxu0 %v20123_v29  ;;  %v20187_v23 = vld [vmem:[%s21189_s8 + $0x20e8] ss:$16 sps:$4 sm:$0xff]  }
 0x624   : > { %14949 = vmatprep.subr.bf16.mxu1 %v20126_v20  ;;  %v20190_v29 = vld [vmem:[%s21189_s8 + $0x22e8] ss:$16 sps:$4 sm:$0xff]   ;;  %v20195_v20 = vld [vmem:[%s21189_s8 + $0x20cc] ss:$16 sps:$4 sm:$0xff]  }
 0x626   : > { %14909 = vmatpush1.bf16.msra.mxu0 %v20121_v7  ;;  %v20198_v7 = vld [vmem:[%s21189_s8 + $0x22cc] ss:$16 sps:$4 sm:$0xff]  }
 0x627   : > { %14950 = vmatpush1.bf16.msra.mxu1 %v20124_v14  ;;  %14910 = vmatprep.subr.bf16.mxu0 %v20129_v41 }
 0x628   : > { %14951 = vmatprep.subr.bf16.mxu1 %v20132_v10 }
 0x62a   : > { %14911 = vmatpush1.bf16.msra.mxu0 %v20127_v12  ;;  %v20193_v12 = vld [vmem:[%s21189_s8 + $0x20c8] ss:$16 sps:$4 sm:$0xff]  }
 0x62b   : > { %14952 = vmatpush1.bf16.msra.mxu1 %v20130_v4  ;;  %14912 = vmatprep.subr.bf16.mxu0 %v20135_v34  ;;  %v20196_v4 = vld [vmem:[%s21189_s8 + $0x22c8] ss:$16 sps:$4 sm:$0xff]  }
 0x62c   : > { %14953 = vmatprep.subr.bf16.mxu1 %v20138_v44 }
 0x62e   : > { %14913 = vmatpush1.bf16.msra.mxu0 %v20133_v40  ;;  %v20201_v40 = vld [vmem:[%s21189_s8 + $0x20ac] ss:$16 sps:$4 sm:$0xff]  }
 0x62f   : > { %14954 = vmatpush1.bf16.msra.mxu1 %v20136_v58  ;;  %14914 = vmatprep.subr.bf16.mxu0 %v20141_v38  ;;  %v20204_v58 = vld [vmem:[%s21189_s8 + $0x22ac] ss:$16 sps:$4 sm:$0xff]  }
 0x630   : > { %14955 = vmatprep.subr.bf16.mxu1 %v20144_v22 }
 0x632   : > { %14915 = vmatpush2.bf16.msra.mxu0 %v20139_v6  ;;  %v20199_v6 = vld [vmem:[%s21189_s8 + $0x20a8] ss:$16 sps:$4 sm:$0xff]  }
 0x633   : > { %14956 = vmatpush2.bf16.msra.mxu1 %v20142_v60  ;;  %14916 = vmatprep.subr.bf16.mxu0 %v20147_v25  ;;  %v20202_v60 = vld [vmem:[%s21189_s8 + $0x22a8] ss:$16 sps:$4 sm:$0xff]  }
 0x634   : > { %14957 = vmatprep.subr.bf16.mxu1 %v20150_v33 }
 0x636   : > { %14917 = vmatpush2.bf16.msra.mxu0 %v20145_v43  ;;  %v20208_v43 = vld [vmem:[%s21189_s8 + $0x2288] ss:$16 sps:$4 sm:$0xff]  }
 0x637   : > { %14958 = vmatpush2.bf16.msra.mxu1 %v20148_v0  ;;  %14918 = vmatprep.subr.bf16.mxu0 %v20153_v32  ;;  %v20213_v0 = vld [vmem:[%s21189_s8 + $0x206c] ss:$16 sps:$4 sm:$0xff]  }
 0x638   : > { %14959 = vmatprep.subr.bf16.mxu1 %v20156_v2  ;;  %v20216_v32 = vld [vmem:[%s21189_s8 + $0x226c] ss:$16 sps:$4 sm:$0xff]   ;;  %v20211_v2 = vld [vmem:[%s21189_s8 + $0x2068] ss:$16 sps:$4 sm:$0xff]  }
 0x63a   : > { %14919 = vmatpush2.bf16.msra.mxu0 %v20151_v45  ;;  %v20214_v45 = vld [vmem:[%s21189_s8 + $0x2268] ss:$16 sps:$4 sm:$0xff]  }
 0x63b   : > { %14960 = vmatpush2.bf16.msra.mxu1 %v20154_v46  ;;  %14920 = vmatprep.subr.bf16.mxu0 %v20159_v3  ;;  %v20219_v46 = vld [vmem:[%s21189_s8 + $0x204c] ss:$16 sps:$4 sm:$0xff]  }
 0x63c   : > { %14961 = vmatprep.subr.bf16.mxu1 %v20162_v57  ;;  %v20222_v3 = vld [vmem:[%s21189_s8 + $0x224c] ss:$16 sps:$4 sm:$0xff]   ;;  %v20217_v57 = vld [vmem:[%s21189_s8 + $0x2048] ss:$16 sps:$4 sm:$0xff]  }
 0x63e   : > { %14921 = vmatpush2.bf16.msra.mxu0 %v20157_v50  ;;  %v20220_v50 = vld [vmem:[%s21189_s8 + $0x2248] ss:$16 sps:$4 sm:$0xff]  }
 0x63f   : > { %14962 = vmatpush2.bf16.msra.mxu1 %v20160_v55  ;;  %14922 = vmatprep.subr.bf16.mxu0 %v20165_v62  ;;  %v20225_v55 = vld [vmem:[%s21189_s8 + $0x202c] ss:$16 sps:$4 sm:$0xff]  }
 0x640   : > { %14963 = vmatprep.subr.bf16.mxu1 %v20168_v49  ;;  %v20228_v62 = vld [vmem:[%s21189_s8 + $0x222c] ss:$16 sps:$4 sm:$0xff]   ;;  %v20223_v49 = vld [vmem:[%s21189_s8 + $0x2028] ss:$16 sps:$4 sm:$0xff]  }
 0x642   : > { %14923 = vmatpush2.bf16.msra.mxu0 %v20163_v13  ;;  %v20226_v13 = vld [vmem:[%s21189_s8 + $0x2228] ss:$16 sps:$4 sm:$0xff]  }
 0x643   : > { %14964 = vmatpush2.bf16.msra.mxu1 %v20166_v18  ;;  %14924 = vmatprep.subr.bf16.mxu0 %v20171_v48  ;;  %v20231_v18 = vld [vmem:[%s21189_s8 + $0x200c] ss:$16 sps:$4 sm:$0xff]  }
 0x644   : > { %14965 = vmatprep.subr.bf16.mxu1 %v20174_v9  ;;  %v20234_v48 = vld [vmem:[%s21189_s8 + $0x220c] ss:$16 sps:$4 sm:$0xff]   ;;  %v20229_v9 = vld [vmem:[%s21189_s8 + $0x2008] ss:$16 sps:$4 sm:$0xff]  }
 0x646   : > { %14925 = vmatpush2.bf16.msra.mxu0 %v20169_v15  ;;  %v20232_v15 = vld [vmem:[%s21189_s8 + $0x2208] ss:$16 sps:$4 sm:$0xff]  }
 0x647   : > { %14966 = vmatpush2.bf16.msra.mxu1 %v20172_v19  ;;  %14926 = vmatprep.subr.bf16.mxu0 %v20177_v54  ;;  %v20237_v19 = vld [vmem:[%s21189_s8 + $0x21ec] ss:$16 sps:$4 sm:$0xff]  }
 0x648   : > { %14967 = vmatprep.subr.bf16.mxu1 %v20180_v59  ;;  %v20240_v54 = vld [vmem:[%s21189_s8 + $0x23ec] ss:$16 sps:$4 sm:$0xff]   ;;  %v20235_v59 = vld [vmem:[%s21189_s8 + $0x21e8] ss:$16 sps:$4 sm:$0xff]  }
 0x64a   : > { %14927 = vmatpush2.bf16.msra.mxu0 %v20175_v42  ;;  %v20238_v42 = vld [vmem:[%s21189_s8 + $0x23e8] ss:$16 sps:$4 sm:$0xff]  }
 0x64b   : > { %14968 = vmatpush2.bf16.msra.mxu1 %v20178_v61  ;;  %14928 = vmatprep.subr.bf16.mxu0 %v20183_v53  ;;  %v20243_v61 = vld [vmem:[%s21189_s8 + $0x21cc] ss:$16 sps:$4 sm:$0xff]  }
 0x64c   : > { %14969 = vmatprep.subr.bf16.mxu1 %v20186_v24  ;;  %v20246_v53 = vld [vmem:[%s21189_s8 + $0x23cc] ss:$16 sps:$4 sm:$0xff]   ;;  %v20241_v24 = vld [vmem:[%s21189_s8 + $0x21c8] ss:$16 sps:$4 sm:$0xff]  }
 0x64e   : > { %14929 = vmatpush2.bf16.msra.mxu0 %v20181_v51  ;;  %v20244_v51 = vld [vmem:[%s21189_s8 + $0x23c8] ss:$16 sps:$4 sm:$0xff]  }
 0x64f   : > { %14970 = vmatpush2.bf16.msra.mxu1 %v20184_v30  ;;  %14980 = vmatprep.subr.bf16.mxu0 %v20189_v47  ;;  %v20249_v30 = vld [vmem:[%s21189_s8 + $0x21ac] ss:$16 sps:$4 sm:$0xff]  }
 0x650   : > { %15021 = vmatprep.subr.bf16.mxu1 %v20192_v17  ;;  %v20252_v47 = vld [vmem:[%s21189_s8 + $0x23ac] ss:$16 sps:$4 sm:$0xff]   ;;  %v20247_v17 = vld [vmem:[%s21189_s8 + $0x21a8] ss:$16 sps:$4 sm:$0xff]  }
 0x651   : > { %v14686_v14 = vpop.f32.mrf.mxu0  ;;  %14931 = vmatmul.mubr.bf16.vlgmr.msra.gmra.mxu0 %v21958_v28 }
 0x652   : > { %v14727_v41 = vpop.f32.mrf.mxu1  ;;  %14972 = vmatmul.mubr.bf16.vlgmr.msra.gmra.mxu1 %v21971_v37  ;;  %v14687_v10 = vadd.f32 %v14686_v14, %v23269_v16  ;;  %14981 = vmatpush1.bf16.msra.mxu0 %v20187_v23  ;;  %v20250_v23 = vld [vmem:[%s21189_s8 + $0x23a8] ss:$16 sps:$4 sm:$0xff]  }
 0x653   : > { %15022 = vmatpush1.bf16.msra.mxu1 %v20190_v29  ;;  %v14688_v34 = vpop.f32.mrf.mxu0  ;;  %14982 = vmatprep.subr.bf16.mxu0 %v20195_v20  ;;  %v20255_v29 = vld [vmem:[%s21189_s8 + $0x218c] ss:$16 sps:$4 sm:$0xff]   ;;  %v20256_v14 = vld [vmem:[%s21189_s8 + $0x2388] ss:$16 sps:$4 sm:$0xff]  }
 0x654   : > { %v14729_v44 = vpop.f32.mrf.mxu1  ;;  %15023 = vmatprep.subr.bf16.mxu1 %v20198_v7  ;;  %v23343_v38 = vadd.f32 %v14727_v41, %v14687_v10  ;;  %v14689_v28 = vadd.f32 %v14688_v34, %v23274_v8  ;;  %15012 = vmatprep.mubr.bf16.mxu0 %v21967_v39  ;;  %v20207_v39 = vld [vmem:[%s21189_s8 + $0x208c] ss:$16 sps:$4 sm:$0xff]   ;;  %v20205_v8 = vld [vmem:[%s21189_s8 + $0x2088] ss:$16 sps:$4 sm:$0xff]  }
 0x655   : > { %15053 = vmatprep.mubr.bf16.mxu1 %v21979_v52  ;;  %v14690_v37 = vpop.f32.mrf.mxu0  ;;  %v20210_v52 = vld [vmem:[%s21189_s8 + $0x228c] ss:$16 sps:$4 sm:$0xff]   ;;  %v20253_v7 = vld [vmem:[%s21189_s8 + $0x2188] ss:$16 sps:$4 sm:$0xff]  }
 0x656   : > { %v14731_v16 = vpop.f32.mrf.mxu1  ;;  %v23348_v22 = vadd.f32 %v14729_v44, %v14689_v28  ;;  %14983 = vmatpush1.bf16.msra.mxu0 %v20193_v12  ;;  %v20258_v20 = vld [vmem:[%s21189_s8 + $0x238c] ss:$16 sps:$4 sm:$0xff]   ;;  %v20259_v12 = vld [vmem:[%s21189_s8 + $0x2168] ss:$16 sps:$4 sm:$0xff]  }
 0x657   : > { %15024 = vmatpush1.bf16.msra.mxu1 %v20196_v4  ;;  %v14691_v25 = vpop.f32.mrf.mxu0  ;;  %14984 = vmatprep.subr.bf16.mxu0 %v20201_v40  ;;  %v20261_v41 = vld [vmem:[%s21189_s8 + $0x216c] ss:$16 sps:$4 sm:$0xff]   ;;  %v20262_v4 = vld [vmem:[%s21189_s8 + $0x2368] ss:$16 sps:$4 sm:$0xff]  }
 0x658   : > { %v14732_v33 = vpop.f32.mrf.mxu1  ;;  %15025 = vmatprep.subr.bf16.mxu1 %v20204_v58  ;;  %v20264_v10 = vld [vmem:[%s21189_s8 + $0x236c] ss:$16 sps:$4 sm:$0xff]   ;;  %v20265_v40 = vld [vmem:[%s21189_s8 + $0x2148] ss:$16 sps:$4 sm:$0xff]  }
 0x659   : > { %v20267_v34 = vld [vmem:[%s21189_s8 + $0x214c] ss:$16 sps:$4 sm:$0xff]   ;;  %v20268_v58 = vld [vmem:[%s21189_s8 + $0x2348] ss:$16 sps:$4 sm:$0xff]  }
 0x65a   : > { %14985 = vmatpush1.bf16.msra.mxu0 %v20199_v6  ;;  %v20270_v44 = vld [vmem:[%s21189_s8 + $0x234c] ss:$16 sps:$4 sm:$0xff]   ;;  %v20271_v16 = vld [vmem:[%s21189_s8 + $0x2128] ss:$16 sps:$4 sm:$0xff]  }
 0x65b   : > { %15026 = vmatpush1.bf16.msra.mxu1 %v20202_v60  ;;  %14986 = vmatprep.subr.bf16.mxu0 %v20207_v39  ;;  %v20273_v28 = vld [vmem:[%s21189_s8 + $0x212c] ss:$16 sps:$4 sm:$0xff]   ;;  %v20274_v6 = vld [vmem:[%s21189_s8 + $0x2328] ss:$16 sps:$4 sm:$0xff]  }
 0x65c   : > { %15027 = vmatprep.subr.bf16.mxu1 %v20210_v52  ;;  %v20276_v37 = vld [vmem:[%s21189_s8 + $0x232c] ss:$16 sps:$4 sm:$0xff]   ;;  %v20277_v33 = vld [vmem:[%s21189_s8 + $0x2108] ss:$16 sps:$4 sm:$0xff]  }
 0x65d   : > { %v20279_v60 = vld [vmem:[%s21189_s8 + $0x210c] ss:$16 sps:$4 sm:$0xff]   ;;  %v20280_v39 = vld [vmem:[%s21189_s8 + $0x2308] ss:$16 sps:$4 sm:$0xff]  }
 0x65e   : > { %14987 = vmatpush1.bf16.msra.mxu0 %v20205_v8  ;;  %v20282_v25 = vld [vmem:[%s21189_s8 + $0x230c] ss:$16 sps:$4 sm:$0xff]  }
 0x65f   : > { %15028 = vmatpush1.bf16.msra.mxu1 %v20208_v43  ;;  %14988 = vmatprep.subr.bf16.mxu0 %v20213_v0  ;;  %v20285_v52 = vld [vmem:[%s21189_s8 + $0x24ec] ss:$16 sps:$4 sm:$0xff]   ;;  %v20283_v43 = vld [vmem:[%s21189_s8 + $0x24e8] ss:$16 sps:$4 sm:$0xff]  }
 0x660   : > { %15029 = vmatprep.subr.bf16.mxu1 %v20216_v32  ;;  %v20288_v8 = vld [vmem:[%s21189_s8 + $0x26ec] ss:$16 sps:$4 sm:$0xff]   ;;  %v20286_v0 = vld [vmem:[%s21189_s8 + $0x26e8] ss:$16 sps:$4 sm:$0xff]  }
 0x661   : > { %v20291_v32 = vld [vmem:[%s21189_s8 + $0x24cc] ss:$16 sps:$4 sm:$0xff]  }
 0x662   : > { %14989 = vmatpush1.bf16.msra.mxu0 %v20211_v2  ;;  %v20294_v2 = vld [vmem:[%s21189_s8 + $0x26cc] ss:$16 sps:$4 sm:$0xff]  }
 0x663   : > { %15030 = vmatpush1.bf16.msra.mxu1 %v20214_v45  ;;  %14990 = vmatprep.subr.bf16.mxu0 %v20219_v46 }
 0x664   : > { %15031 = vmatprep.subr.bf16.mxu1 %v20222_v3 }
 0x666   : > { %14991 = vmatpush1.bf16.msra.mxu0 %v20217_v57  ;;  %v20289_v57 = vld [vmem:[%s21189_s8 + $0x24c8] ss:$16 sps:$4 sm:$0xff]  }
 0x667   : > { %15032 = vmatpush1.bf16.msra.mxu1 %v20220_v50  ;;  %14992 = vmatprep.subr.bf16.mxu0 %v20225_v55  ;;  %v20292_v50 = vld [vmem:[%s21189_s8 + $0x26c8] ss:$16 sps:$4 sm:$0xff]  }
 0x668   : > { %15033 = vmatprep.subr.bf16.mxu1 %v20228_v62 }
 0x66a   : > { %14993 = vmatpush1.bf16.msra.mxu0 %v20223_v49  ;;  %v20297_v49 = vld [vmem:[%s21189_s8 + $0x24ac] ss:$16 sps:$4 sm:$0xff]  }
 0x66b   : > { %15034 = vmatpush1.bf16.msra.mxu1 %v20226_v13  ;;  %14994 = vmatprep.subr.bf16.mxu0 %v20231_v18  ;;  %v20300_v13 = vld [vmem:[%s21189_s8 + $0x26ac] ss:$16 sps:$4 sm:$0xff]  }
 0x66c   : > { %15035 = vmatprep.subr.bf16.mxu1 %v20234_v48 }
 0x66e   : > { %14995 = vmatpush1.bf16.msra.mxu0 %v20229_v9  ;;  %v20295_v9 = vld [vmem:[%s21189_s8 + $0x24a8] ss:$16 sps:$4 sm:$0xff]  }
 0x66f   : > { %15036 = vmatpush1.bf16.msra.mxu1 %v20232_v15  ;;  %14996 = vmatprep.subr.bf16.mxu0 %v20237_v19  ;;  %v20298_v15 = vld [vmem:[%s21189_s8 + $0x26a8] ss:$16 sps:$4 sm:$0xff]  }
 0x670   : > { %15037 = vmatprep.subr.bf16.mxu1 %v20240_v54 }
 0x672   : > { %14997 = vmatpush2.bf16.msra.mxu0 %v20235_v59  ;;  %v20304_v59 = vld [vmem:[%s21189_s8 + $0x2688] ss:$16 sps:$4 sm:$0xff]  }
 0x673   : > { %15038 = vmatpush2.bf16.msra.mxu1 %v20238_v42  ;;  %14998 = vmatprep.subr.bf16.mxu0 %v20243_v61  ;;  %v20309_v42 = vld [vmem:[%s21189_s8 + $0x246c] ss:$16 sps:$4 sm:$0xff]  }
 0x674   : > { %15039 = vmatprep.subr.bf16.mxu1 %v20246_v53  ;;  %v20312_v61 = vld [vmem:[%s21189_s8 + $0x266c] ss:$16 sps:$4 sm:$0xff]   ;;  %v20307_v53 = vld [vmem:[%s21189_s8 + $0x2468] ss:$16 sps:$4 sm:$0xff]  }
 0x676   : > { %14999 = vmatpush2.bf16.msra.mxu0 %v20241_v24  ;;  %v20310_v24 = vld [vmem:[%s21189_s8 + $0x2668] ss:$16 sps:$4 sm:$0xff]  }
 0x677   : > { %15040 = vmatpush2.bf16.msra.mxu1 %v20244_v51  ;;  %15000 = vmatprep.subr.bf16.mxu0 %v20249_v30  ;;  %v20315_v51 = vld [vmem:[%s21189_s8 + $0x244c] ss:$16 sps:$4 sm:$0xff]  }
 0x678   : > { %15041 = vmatprep.subr.bf16.mxu1 %v20252_v47  ;;  %v20318_v30 = vld [vmem:[%s21189_s8 + $0x264c] ss:$16 sps:$4 sm:$0xff]   ;;  %v20313_v47 = vld [vmem:[%s21189_s8 + $0x2448] ss:$16 sps:$4 sm:$0xff]  }
 0x67a   : > { %15001 = vmatpush2.bf16.msra.mxu0 %v20247_v17  ;;  %v20316_v17 = vld [vmem:[%s21189_s8 + $0x2648] ss:$16 sps:$4 sm:$0xff]  }
 0x67b   : > { %15042 = vmatpush2.bf16.msra.mxu1 %v20250_v23  ;;  %15002 = vmatprep.subr.bf16.mxu0 %v20255_v29  ;;  %v20321_v23 = vld [vmem:[%s21189_s8 + $0x242c] ss:$16 sps:$4 sm:$0xff]  }
 0x67c   : > { %15043 = vmatprep.subr.bf16.mxu1 %v20258_v20  ;;  %v20324_v29 = vld [vmem:[%s21189_s8 + $0x262c] ss:$16 sps:$4 sm:$0xff]   ;;  %v20319_v20 = vld [vmem:[%s21189_s8 + $0x2428] ss:$16 sps:$4 sm:$0xff]  }
 0x67e   : > { %15003 = vmatpush2.bf16.msra.mxu0 %v20253_v7  ;;  %v20322_v7 = vld [vmem:[%s21189_s8 + $0x2628] ss:$16 sps:$4 sm:$0xff]  }
 0x67f   : > { %15044 = vmatpush2.bf16.msra.mxu1 %v20256_v14  ;;  %15004 = vmatprep.subr.bf16.mxu0 %v20261_v41  ;;  %v20327_v14 = vld [vmem:[%s21189_s8 + $0x240c] ss:$16 sps:$4 sm:$0xff]  }
 0x680   : > { %15045 = vmatprep.subr.bf16.mxu1 %v20264_v10  ;;  %v20330_v41 = vld [vmem:[%s21189_s8 + $0x260c] ss:$16 sps:$4 sm:$0xff]   ;;  %v20325_v10 = vld [vmem:[%s21189_s8 + $0x2408] ss:$16 sps:$4 sm:$0xff]  }
 0x682   : > { %15005 = vmatpush2.bf16.msra.mxu0 %v20259_v12  ;;  %v20328_v12 = vld [vmem:[%s21189_s8 + $0x2608] ss:$16 sps:$4 sm:$0xff]  }
 0x683   : > { %15046 = vmatpush2.bf16.msra.mxu1 %v20262_v4  ;;  %15006 = vmatprep.subr.bf16.mxu0 %v20267_v34  ;;  %v20333_v4 = vld [vmem:[%s21189_s8 + $0x25ec] ss:$16 sps:$4 sm:$0xff]  }
 0x684   : > { %15047 = vmatprep.subr.bf16.mxu1 %v20270_v44  ;;  %v20336_v34 = vld [vmem:[%s21189_s8 + $0x27ec] ss:$16 sps:$4 sm:$0xff]   ;;  %v20331_v44 = vld [vmem:[%s21189_s8 + $0x25e8] ss:$16 sps:$4 sm:$0xff]  }
 0x686   : > { %15007 = vmatpush2.bf16.msra.mxu0 %v20265_v40  ;;  %v20334_v40 = vld [vmem:[%s21189_s8 + $0x27e8] ss:$16 sps:$4 sm:$0xff]  }
 0x687   : > { %15048 = vmatpush2.bf16.msra.mxu1 %v20268_v58  ;;  %15008 = vmatprep.subr.bf16.mxu0 %v20273_v28  ;;  %v20339_v58 = vld [vmem:[%s21189_s8 + $0x25cc] ss:$16 sps:$4 sm:$0xff]  }
 0x688   : > { %15049 = vmatprep.subr.bf16.mxu1 %v20276_v37  ;;  %v20342_v28 = vld [vmem:[%s21189_s8 + $0x27cc] ss:$16 sps:$4 sm:$0xff]   ;;  %v20337_v37 = vld [vmem:[%s21189_s8 + $0x25c8] ss:$16 sps:$4 sm:$0xff]  }
 0x68a   : > { %15009 = vmatpush2.bf16.msra.mxu0 %v20271_v16  ;;  %v20340_v16 = vld [vmem:[%s21189_s8 + $0x27c8] ss:$16 sps:$4 sm:$0xff]  }
 0x68b   : > { %15050 = vmatpush2.bf16.msra.mxu1 %v20274_v6  ;;  %15010 = vmatprep.subr.bf16.mxu0 %v20279_v60  ;;  %v20345_v6 = vld [vmem:[%s21189_s8 + $0x25ac] ss:$16 sps:$4 sm:$0xff]  }
 0x68c   : > { %15051 = vmatprep.subr.bf16.mxu1 %v20282_v25  ;;  %v20348_v60 = vld [vmem:[%s21189_s8 + $0x27ac] ss:$16 sps:$4 sm:$0xff]   ;;  %v20343_v25 = vld [vmem:[%s21189_s8 + $0x25a8] ss:$16 sps:$4 sm:$0xff]  }
 0x68e   : > { %15011 = vmatpush2.bf16.msra.mxu0 %v20277_v33  ;;  %v20346_v33 = vld [vmem:[%s21189_s8 + $0x27a8] ss:$16 sps:$4 sm:$0xff]  }
 0x68f   : > { %15052 = vmatpush2.bf16.msra.mxu1 %v20280_v39  ;;  %15062 = vmatprep.subr.bf16.mxu0 %v20285_v52  ;;  %v20351_v39 = vld [vmem:[%s21189_s8 + $0x258c] ss:$16 sps:$4 sm:$0xff]  }
 0x690   : > { %15103 = vmatprep.subr.bf16.mxu1 %v20288_v8  ;;  %v20354_v52 = vld [vmem:[%s21189_s8 + $0x278c] ss:$16 sps:$4 sm:$0xff]   ;;  %v20349_v8 = vld [vmem:[%s21189_s8 + $0x2588] ss:$16 sps:$4 sm:$0xff]  }
 0x691   : > { %v14768_v45 = vpop.f32.mrf.mxu0  ;;  %15013 = vmatmul.mubr.bf16.vlgmr.msra.gmra.mxu0 %v22054_v63 }
 0x692   : > { %v14809_v46 = vpop.f32.mrf.mxu1  ;;  %15054 = vmatmul.mubr.bf16.vlgmr.msra.gmra.mxu1 %v22067_v11  ;;  %v14769_v3 = vadd.f32 %v14768_v45, %v23343_v38  ;;  %15063 = vmatpush1.bf16.msra.mxu0 %v20283_v43  ;;  %v20352_v43 = vld [vmem:[%s21189_s8 + $0x2788] ss:$16 sps:$4 sm:$0xff]  }
 0x693   : > { %15104 = vmatpush1.bf16.msra.mxu1 %v20286_v0  ;;  %v14770_v55 = vpop.f32.mrf.mxu0  ;;  %15064 = vmatprep.subr.bf16.mxu0 %v20291_v32  ;;  %v20357_v0 = vld [vmem:[%s21189_s8 + $0x256c] ss:$16 sps:$4 sm:$0xff]   ;;  %v20358_v45 = vld [vmem:[%s21189_s8 + $0x2768] ss:$16 sps:$4 sm:$0xff]  }
 0x694   : > { %v14811_v62 = vpop.f32.mrf.mxu1  ;;  %15105 = vmatprep.subr.bf16.mxu1 %v20294_v2  ;;  %v23417_v18 = vadd.f32 %v14809_v46, %v14769_v3  ;;  %v14771_v63 = vadd.f32 %v14770_v55, %v23348_v22  ;;  %15094 = vmatprep.mubr.bf16.mxu0 %v22063_v35  ;;  %v20303_v35 = vld [vmem:[%s21189_s8 + $0x248c] ss:$16 sps:$4 sm:$0xff]   ;;  %v20301_v22 = vld [vmem:[%s21189_s8 + $0x2488] ss:$16 sps:$4 sm:$0xff]  }
 0x695   : > { %15135 = vmatprep.mubr.bf16.mxu1 %v22075_v1  ;;  %v14772_v11 = vpop.f32.mrf.mxu0  ;;  %v20306_v1 = vld [vmem:[%s21189_s8 + $0x268c] ss:$16 sps:$4 sm:$0xff]   ;;  %v20355_v2 = vld [vmem:[%s21189_s8 + $0x2568] ss:$16 sps:$4 sm:$0xff]  }
 0x696   : > { %v14813_v38 = vpop.f32.mrf.mxu1  ;;  %v23422_v48 = vadd.f32 %v14811_v62, %v14771_v63  ;;  %15065 = vmatpush1.bf16.msra.mxu0 %v20289_v57  ;;  %v20360_v32 = vld [vmem:[%s21189_s8 + $0x276c] ss:$16 sps:$4 sm:$0xff]   ;;  %v20361_v57 = vld [vmem:[%s21189_s8 + $0x2548] ss:$16 sps:$4 sm:$0xff]  }
 0x697   : > { %15106 = vmatpush1.bf16.msra.mxu1 %v20292_v50  ;;  %v14773_v19 = vpop.f32.mrf.mxu0  ;;  %15066 = vmatprep.subr.bf16.mxu0 %v20297_v49  ;;  %v20363_v46 = vld [vmem:[%s21189_s8 + $0x254c] ss:$16 sps:$4 sm:$0xff]   ;;  %v20364_v50 = vld [vmem:[%s21189_s8 + $0x2748] ss:$16 sps:$4 sm:$0xff]  }
 0x698   : > { %v14814_v54 = vpop.f32.mrf.mxu1  ;;  %15107 = vmatprep.subr.bf16.mxu1 %v20300_v13  ;;  %v20366_v3 = vld [vmem:[%s21189_s8 + $0x274c] ss:$16 sps:$4 sm:$0xff]   ;;  %v20367_v49 = vld [vmem:[%s21189_s8 + $0x2528] ss:$16 sps:$4 sm:$0xff]  }
 0x699   : > { %v20369_v55 = vld [vmem:[%s21189_s8 + $0x252c] ss:$16 sps:$4 sm:$0xff]   ;;  %v20370_v13 = vld [vmem:[%s21189_s8 + $0x2728] ss:$16 sps:$4 sm:$0xff]  }
 0x69a   : > { %15067 = vmatpush1.bf16.msra.mxu0 %v20295_v9  ;;  %v20372_v62 = vld [vmem:[%s21189_s8 + $0x272c] ss:$16 sps:$4 sm:$0xff]   ;;  %v20373_v38 = vld [vmem:[%s21189_s8 + $0x2508] ss:$16 sps:$4 sm:$0xff]  }
 0x69b   : > { %15108 = vmatpush1.bf16.msra.mxu1 %v20298_v15  ;;  %15068 = vmatprep.subr.bf16.mxu0 %v20303_v35  ;;  %v20375_v63 = vld [vmem:[%s21189_s8 + $0x250c] ss:$16 sps:$4 sm:$0xff]   ;;  %v20376_v9 = vld [vmem:[%s21189_s8 + $0x2708] ss:$16 sps:$4 sm:$0xff]  }
 0x69c   : > { %15109 = vmatprep.subr.bf16.mxu1 %v20306_v1  ;;  %v20378_v11 = vld [vmem:[%s21189_s8 + $0x270c] ss:$16 sps:$4 sm:$0xff]   ;;  %v20379_v54 = vld [vmem:[%s21189_s8 + $0x28e8] ss:$16 sps:$4 sm:$0xff]  }
 0x69d   : > { %v20381_v15 = vld [vmem:[%s21189_s8 + $0x28ec] ss:$16 sps:$4 sm:$0xff]   ;;  %v20382_v35 = vld [vmem:[%s21189_s8 + $0x2ae8] ss:$16 sps:$4 sm:$0xff]  }
 0x69e   : > { %15069 = vmatpush1.bf16.msra.mxu0 %v20301_v22  ;;  %v20384_v19 = vld [vmem:[%s21189_s8 + $0x2aec] ss:$16 sps:$4 sm:$0xff]  }
 0x69f   : > { %15110 = vmatpush1.bf16.msra.mxu1 %v20304_v59  ;;  %15070 = vmatprep.subr.bf16.mxu0 %v20309_v42  ;;  %v20387_v1 = vld [vmem:[%s21189_s8 + $0x28cc] ss:$16 sps:$4 sm:$0xff]  }
 0x6a0   : > { %15111 = vmatprep.subr.bf16.mxu1 %v20312_v61  ;;  %v20390_v22 = vld [vmem:[%s21189_s8 + $0x2acc] ss:$16 sps:$4 sm:$0xff]   ;;  %v24000_v61 = vld [vmem:[#allocation9_spill] sm:$0xff] }
 0x6a2   : > { %15071 = vmatpush1.bf16.msra.mxu0 %v20307_v53  ;;  %v24001_v53 = vld [vmem:[#allocation11_spill] sm:$0xff] }
 0x6a3   : > { %15112 = vmatpush1.bf16.msra.mxu1 %v20310_v24  ;;  %15072 = vmatprep.subr.bf16.mxu0 %v20315_v51  ;;  %v20385_v51 = vld [vmem:[%s21189_s8 + $0x28c8] ss:$16 sps:$4 sm:$0xff]  }
 0x6a4   : > { %15113 = vmatprep.subr.bf16.mxu1 %v20318_v30  ;;  %v20388_v30 = vld [vmem:[%s21189_s8 + $0x2ac8] ss:$16 sps:$4 sm:$0xff]  }
 0x6a6   : > { %15073 = vmatpush1.bf16.msra.mxu0 %v20313_v47 }
 0x6a7   : > { %15114 = vmatpush1.bf16.msra.mxu1 %v20316_v17  ;;  %15074 = vmatprep.subr.bf16.mxu0 %v20321_v23  ;;  %v20393_v23 = vld [vmem:[%s21189_s8 + $0x28ac] ss:$16 sps:$4 sm:$0xff]  }
 0x6a8   : > { %15115 = vmatprep.subr.bf16.mxu1 %v20324_v29  ;;  %v20396_v29 = vld [vmem:[%s21189_s8 + $0x2aac] ss:$16 sps:$4 sm:$0xff]  }
 0x6aa   : > { %15075 = vmatpush1.bf16.msra.mxu0 %v20319_v20 }
 0x6ab   : > { %15116 = vmatpush1.bf16.msra.mxu1 %v20322_v7  ;;  %15076 = vmatprep.subr.bf16.mxu0 %v20327_v14  ;;  %v24002_v14 = vld [vmem:[#allocation10_spill] sm:$0xff] }
 0x6ac   : > { %15117 = vmatprep.subr.bf16.mxu1 %v20330_v41 }
 0x6ae   : > { %15077 = vmatpush1.bf16.msra.mxu0 %v20325_v10 }
 0x6af   : > { %15118 = vmatpush1.bf16.msra.mxu1 %v20328_v12  ;;  %15078 = vmatprep.subr.bf16.mxu0 %v20333_v4  ;;  %v20391_v4 = vld [vmem:[%s21189_s8 + $0x28a8] ss:$16 sps:$4 sm:$0xff]  }
 0x6b0   : > { %15119 = vmatprep.subr.bf16.mxu1 %v20336_v34  ;;  %v20394_v34 = vld [vmem:[%s21189_s8 + $0x2aa8] ss:$16 sps:$4 sm:$0xff]  }
 0x6b2   : > { %15079 = vmatpush2.bf16.msra.mxu0 %v20331_v44 }
 0x6b3   : > { %15120 = vmatpush2.bf16.msra.mxu1 %v20334_v40  ;;  %15080 = vmatprep.subr.bf16.mxu0 %v20339_v58  ;;  %v20402_v58 = vld [vmem:[%s21189_s8 + $0x2a8c] ss:$16 sps:$4 sm:$0xff]  }
 0x6b4   : > { %15121 = vmatprep.subr.bf16.mxu1 %v20342_v28  ;;  %v20397_v28 = vld [vmem:[%s21189_s8 + $0x2888] ss:$16 sps:$4 sm:$0xff]  }
 0x6b6   : > { %15081 = vmatpush2.bf16.msra.mxu0 %v20337_v37  ;;  %v20400_v37 = vld [vmem:[%s21189_s8 + $0x2a88] ss:$16 sps:$4 sm:$0xff]  }
 0x6b7   : > { %15122 = vmatpush2.bf16.msra.mxu1 %v20340_v16  ;;  %15082 = vmatprep.subr.bf16.mxu0 %v20345_v6  ;;  %v20405_v16 = vld [vmem:[%s21189_s8 + $0x286c] ss:$16 sps:$4 sm:$0xff]  }
 0x6b8   : > { %15123 = vmatprep.subr.bf16.mxu1 %v20348_v60  ;;  %v20408_v6 = vld [vmem:[%s21189_s8 + $0x2a6c] ss:$16 sps:$4 sm:$0xff]   ;;  %v20403_v60 = vld [vmem:[%s21189_s8 + $0x2868] ss:$16 sps:$4 sm:$0xff]  }
 0x6ba   : > { %15083 = vmatpush2.bf16.msra.mxu0 %v20343_v25  ;;  %v20406_v25 = vld [vmem:[%s21189_s8 + $0x2a68] ss:$16 sps:$4 sm:$0xff]  }
 0x6bb   : > { %15124 = vmatpush2.bf16.msra.mxu1 %v20346_v33  ;;  %15084 = vmatprep.subr.bf16.mxu0 %v20351_v39  ;;  %v20411_v33 = vld [vmem:[%s21189_s8 + $0x284c] ss:$16 sps:$4 sm:$0xff]  }
 0x6bc   : > { %15125 = vmatprep.subr.bf16.mxu1 %v20354_v52  ;;  %v20414_v39 = vld [vmem:[%s21189_s8 + $0x2a4c] ss:$16 sps:$4 sm:$0xff]   ;;  %v20409_v52 = vld [vmem:[%s21189_s8 + $0x2848] ss:$16 sps:$4 sm:$0xff]  }
 0x6be   : > { %15085 = vmatpush2.bf16.msra.mxu0 %v20349_v8  ;;  %v20412_v8 = vld [vmem:[%s21189_s8 + $0x2a48] ss:$16 sps:$4 sm:$0xff]  }
 0x6bf   : > { %15126 = vmatpush2.bf16.msra.mxu1 %v20352_v43  ;;  %15086 = vmatprep.subr.bf16.mxu0 %v20357_v0  ;;  %v20417_v43 = vld [vmem:[%s21189_s8 + $0x282c] ss:$16 sps:$4 sm:$0xff]  }
 0x6c0   : > { %15127 = vmatprep.subr.bf16.mxu1 %v20360_v32  ;;  %v20420_v0 = vld [vmem:[%s21189_s8 + $0x2a2c] ss:$16 sps:$4 sm:$0xff]   ;;  %v20415_v32 = vld [vmem:[%s21189_s8 + $0x2828] ss:$16 sps:$4 sm:$0xff]  }
 0x6c2   : > { %15087 = vmatpush2.bf16.msra.mxu0 %v20355_v2  ;;  %v20418_v2 = vld [vmem:[%s21189_s8 + $0x2a28] ss:$16 sps:$4 sm:$0xff]  }
 0x6c3   : > { %15128 = vmatpush2.bf16.msra.mxu1 %v20358_v45  ;;  %15088 = vmatprep.subr.bf16.mxu0 %v20363_v46  ;;  %v20423_v45 = vld [vmem:[%s21189_s8 + $0x280c] ss:$16 sps:$4 sm:$0xff]  }
 0x6c4   : > { %15129 = vmatprep.subr.bf16.mxu1 %v20366_v3  ;;  %v20426_v46 = vld [vmem:[%s21189_s8 + $0x2a0c] ss:$16 sps:$4 sm:$0xff]   ;;  %v20421_v3 = vld [vmem:[%s21189_s8 + $0x2808] ss:$16 sps:$4 sm:$0xff]  }
 0x6c6   : > { %15089 = vmatpush2.bf16.msra.mxu0 %v20361_v57  ;;  %v20424_v57 = vld [vmem:[%s21189_s8 + $0x2a08] ss:$16 sps:$4 sm:$0xff]  }
 0x6c7   : > { %15130 = vmatpush2.bf16.msra.mxu1 %v20364_v50  ;;  %15090 = vmatprep.subr.bf16.mxu0 %v20369_v55  ;;  %v20429_v50 = vld [vmem:[%s21189_s8 + $0x29ec] ss:$16 sps:$4 sm:$0xff]  }
 0x6c8   : > { %15131 = vmatprep.subr.bf16.mxu1 %v20372_v62  ;;  %v20432_v55 = vld [vmem:[%s21189_s8 + $0x2bec] ss:$16 sps:$4 sm:$0xff]   ;;  %v20427_v62 = vld [vmem:[%s21189_s8 + $0x29e8] ss:$16 sps:$4 sm:$0xff]  }
 0x6ca   : > { %15091 = vmatpush2.bf16.msra.mxu0 %v20367_v49  ;;  %v20430_v49 = vld [vmem:[%s21189_s8 + $0x2be8] ss:$16 sps:$4 sm:$0xff]  }
 0x6cb   : > { %15132 = vmatpush2.bf16.msra.mxu1 %v20370_v13  ;;  %15092 = vmatprep.subr.bf16.mxu0 %v20375_v63  ;;  %v20435_v13 = vld [vmem:[%s21189_s8 + $0x29cc] ss:$16 sps:$4 sm:$0xff]  }
 0x6cc   : > { %15133 = vmatprep.subr.bf16.mxu1 %v20378_v11  ;;  %v20438_v63 = vld [vmem:[%s21189_s8 + $0x2bcc] ss:$16 sps:$4 sm:$0xff]   ;;  %v20433_v11 = vld [vmem:[%s21189_s8 + $0x29c8] ss:$16 sps:$4 sm:$0xff]  }
 0x6ce   : > { %15093 = vmatpush2.bf16.msra.mxu0 %v20373_v38  ;;  %v20436_v38 = vld [vmem:[%s21189_s8 + $0x2bc8] ss:$16 sps:$4 sm:$0xff]  }
 0x6cf   : > { %15134 = vmatpush2.bf16.msra.mxu1 %v20376_v9  ;;  %15144 = vmatprep.subr.bf16.mxu0 %v20381_v15  ;;  %v20441_v9 = vld [vmem:[%s21189_s8 + $0x29ac] ss:$16 sps:$4 sm:$0xff]  }
 0x6d0   : > { %15185 = vmatprep.subr.bf16.mxu1 %v20384_v19  ;;  %v20444_v15 = vld [vmem:[%s21189_s8 + $0x2bac] ss:$16 sps:$4 sm:$0xff]   ;;  %v20439_v19 = vld [vmem:[%s21189_s8 + $0x29a8] ss:$16 sps:$4 sm:$0xff]  }
 0x6d1   : > { %v14850_v59 = vpop.f32.mrf.mxu0  ;;  %15095 = vmatmul.mubr.bf16.vlgmr.msra.gmra.mxu0 %v24000_v61  ;;  %v20456_v61 = vld [vmem:[%s21189_s8 + $0x2b6c] ss:$16 sps:$4 sm:$0xff]  }
 0x6d2   : > { %v14891_v42 = vpop.f32.mrf.mxu1  ;;  %15136 = vmatmul.mubr.bf16.vlgmr.msra.gmra.mxu1 %v24001_v53  ;;  %v14851_v24 = vadd.f32 %v14850_v59, %v23417_v18  ;;  %15145 = vmatpush1.bf16.msra.mxu0 %v20379_v54  ;;  %v24003_v18 = vld [vmem:[#allocation12_spill] sm:$0xff] }
 0x6d3   : > { %15186 = vmatpush1.bf16.msra.mxu1 %v20382_v35  ;;  %v14852_v47 = vpop.f32.mrf.mxu0  ;;  %15146 = vmatprep.subr.bf16.mxu0 %v20387_v1  ;;  %v20442_v54 = vld [vmem:[%s21189_s8 + $0x2ba8] ss:$16 sps:$4 sm:$0xff]   ;;  %v20447_v35 = vld [vmem:[%s21189_s8 + $0x298c] ss:$16 sps:$4 sm:$0xff]  }
 0x6d4   : > { %v14893_v17 = vpop.f32.mrf.mxu1  ;;  %15187 = vmatprep.subr.bf16.mxu1 %v20390_v22  ;;  %v23491_v20 = vadd.f32 %v14891_v42, %v14851_v24  ;;  %v14853_v7 = vadd.f32 %v14852_v47, %v23422_v48  ;;  %15176 = vmatprep.mubr.bf16.mxu0 %v24002_v14  ;;  %v20399_v48 = vld [vmem:[%s21189_s8 + $0x288c] ss:$16 sps:$4 sm:$0xff]   ;;  %v20445_v22 = vld [vmem:[%s21189_s8 + $0x2988] ss:$16 sps:$4 sm:$0xff]  }
 0x6d5   : > { %15217 = vmatprep.mubr.bf16.mxu1 %v24003_v18  ;;  %v14854_v41 = vpop.f32.mrf.mxu0  ;;  %v20450_v1 = vld [vmem:[%s21189_s8 + $0x2b8c] ss:$16 sps:$4 sm:$0xff]   ;;  %v20448_v59 = vld [vmem:[%s21189_s8 + $0x2b88] ss:$16 sps:$4 sm:$0xff]  }
 0x6d6   : > { %v14895_v10 = vpop.f32.mrf.mxu1  ;;  %v23496_v12 = vadd.f32 %v14893_v17, %v14853_v7  ;;  %15147 = vmatpush1.bf16.msra.mxu0 %v20385_v51  ;;  %v20453_v42 = vld [vmem:[%s21189_s8 + $0x296c] ss:$16 sps:$4 sm:$0xff]   ;;  %v20451_v53 = vld [vmem:[%s21189_s8 + $0x2968] ss:$16 sps:$4 sm:$0xff]  }
 0x6d7   : > { %15188 = vmatpush1.bf16.msra.mxu1 %v20388_v30  ;;  %v14855_v44 = vpop.f32.mrf.mxu0  ;;  %15148 = vmatprep.subr.bf16.mxu0 %v20393_v23  ;;  %v20454_v24 = vld [vmem:[%s21189_s8 + $0x2b68] ss:$16 sps:$4 sm:$0xff]   ;;  %v20459_v51 = vld [vmem:[%s21189_s8 + $0x294c] ss:$16 sps:$4 sm:$0xff]  }
 0x6d8   : > { %v14896_v40 = vpop.f32.mrf.mxu1  ;;  %15189 = vmatprep.subr.bf16.mxu1 %v20396_v29  ;;  %v20462_v30 = vld [vmem:[%s21189_s8 + $0x2b4c] ss:$16 sps:$4 sm:$0xff]   ;;  %v20457_v47 = vld [vmem:[%s21189_s8 + $0x2948] ss:$16 sps:$4 sm:$0xff]  }
 0x6d9   : > { %v20460_v17 = vld [vmem:[%s21189_s8 + $0x2b48] ss:$16 sps:$4 sm:$0xff]   ;;  %v20465_v23 = vld [vmem:[%s21189_s8 + $0x292c] ss:$16 sps:$4 sm:$0xff]  }
 0x6da   : > { %15149 = vmatpush1.bf16.msra.mxu0 %v20391_v4  ;;  %v20468_v29 = vld [vmem:[%s21189_s8 + $0x2b2c] ss:$16 sps:$4 sm:$0xff]   ;;  %v20463_v7 = vld [vmem:[%s21189_s8 + $0x2928] ss:$16 sps:$4 sm:$0xff]  }
 0x6db   : > { %15190 = vmatpush1.bf16.msra.mxu1 %v20394_v34  ;;  %15150 = vmatprep.subr.bf16.mxu0 %v20399_v48  ;;  %v20466_v14 = vld [vmem:[%s21189_s8 + $0x2b28] ss:$16 sps:$4 sm:$0xff]   ;;  %v20471_v18 = vld [vmem:[%s21189_s8 + $0x290c] ss:$16 sps:$4 sm:$0xff]  }
 0x6dc   : > { %15191 = vmatprep.subr.bf16.mxu1 %v20402_v58  ;;  %v20474_v41 = vld [vmem:[%s21189_s8 + $0x2b0c] ss:$16 sps:$4 sm:$0xff]   ;;  %v20469_v10 = vld [vmem:[%s21189_s8 + $0x2908] ss:$16 sps:$4 sm:$0xff]  }
 0x6dd   : > { %v20472_v4 = vld [vmem:[%s21189_s8 + $0x2b08] ss:$16 sps:$4 sm:$0xff]   ;;  %v20477_v34 = vld [vmem:[%s21189_s8 + $0x2cec] ss:$16 sps:$4 sm:$0xff]  }
 0x6de   : > { %15151 = vmatpush1.bf16.msra.mxu0 %v20397_v28  ;;  %v20480_v44 = vld [vmem:[%s21189_s8 + $0x2eec] ss:$16 sps:$4 sm:$0xff]   ;;  %v20475_v40 = vld [vmem:[%s21189_s8 + $0x2ce8] ss:$16 sps:$4 sm:$0xff]  }
 0x6df   : > { %15192 = vmatpush1.bf16.msra.mxu1 %v20400_v37  ;;  %15152 = vmatprep.subr.bf16.mxu0 %v20405_v16  ;;  %v20478_v48 = vld [vmem:[%s21189_s8 + $0x2ee8] ss:$16 sps:$4 sm:$0xff]   ;;  %v20483_v58 = vld [vmem:[%s21189_s8 + $0x2ccc] ss:$16 sps:$4 sm:$0xff]  }
 0x6e0   : > { %15193 = vmatprep.subr.bf16.mxu1 %v20408_v6  ;;  %v20486_v28 = vld [vmem:[%s21189_s8 + $0x2ecc] ss:$16 sps:$4 sm:$0xff]   ;;  %v24004_v6 = vld [vmem:[#allocation13_spill] sm:$0xff] }
 0x6e2   : > { %15153 = vmatpush1.bf16.msra.mxu0 %v20403_v60  ;;  %v24005_v60 = vld [vmem:[#allocation15_spill] sm:$0xff] }
 0x6e3   : > { %15194 = vmatpush1.bf16.msra.mxu1 %v20406_v25  ;;  %15154 = vmatprep.subr.bf16.mxu0 %v20411_v33  ;;  %v20481_v33 = vld [vmem:[%s21189_s8 + $0x2cc8] ss:$16 sps:$4 sm:$0xff]  }
 0x6e4   : > { %15195 = vmatprep.subr.bf16.mxu1 %v20414_v39  ;;  %v20484_v39 = vld [vmem:[%s21189_s8 + $0x2ec8] ss:$16 sps:$4 sm:$0xff]  }
 0x6e6   : > { %15155 = vmatpush1.bf16.msra.mxu0 %v20409_v52 }
 0x6e7   : > { %15196 = vmatpush1.bf16.msra.mxu1 %v20412_v8  ;;  %15156 = vmatprep.subr.bf16.mxu0 %v20417_v43  ;;  %v20489_v43 = vld [vmem:[%s21189_s8 + $0x2cac] ss:$16 sps:$4 sm:$0xff]  }
 0x6e8   : > { %15197 = vmatprep.subr.bf16.mxu1 %v20420_v0  ;;  %v20492_v0 = vld [vmem:[%s21189_s8 + $0x2eac] ss:$16 sps:$4 sm:$0xff]  }
 0x6ea   : > { %15157 = vmatpush1.bf16.msra.mxu0 %v20415_v32 }
 0x6eb   : > { %15198 = vmatpush1.bf16.msra.mxu1 %v20418_v2  ;;  %15158 = vmatprep.subr.bf16.mxu0 %v20423_v45  ;;  %v24006_v45 = vld [vmem:[#allocation14_spill] sm:$0xff] }
 0x6ec   : > { %15199 = vmatprep.subr.bf16.mxu1 %v20426_v46 }
 0x6ee   : > { %15159 = vmatpush1.bf16.msra.mxu0 %v20421_v3 }
 0x6ef   : > { %15200 = vmatpush1.bf16.msra.mxu1 %v20424_v57  ;;  %15160 = vmatprep.subr.bf16.mxu0 %v20429_v50  ;;  %v20487_v50 = vld [vmem:[%s21189_s8 + $0x2ca8] ss:$16 sps:$4 sm:$0xff]  }
 0x6f0   : > { %15201 = vmatprep.subr.bf16.mxu1 %v20432_v55  ;;  %v20490_v55 = vld [vmem:[%s21189_s8 + $0x2ea8] ss:$16 sps:$4 sm:$0xff]  }
 0x6f2   : > { %15161 = vmatpush2.bf16.msra.mxu0 %v20427_v62 }
 0x6f3   : > { %15202 = vmatpush2.bf16.msra.mxu1 %v20430_v49  ;;  %15162 = vmatprep.subr.bf16.mxu0 %v20435_v13  ;;  %v20498_v13 = vld [vmem:[%s21189_s8 + $0x2e8c] ss:$16 sps:$4 sm:$0xff]  }
 0x6f4   : > { %15203 = vmatprep.subr.bf16.mxu1 %v20438_v63  ;;  %v20493_v63 = vld [vmem:[%s21189_s8 + $0x2c88] ss:$16 sps:$4 sm:$0xff]  }
 0x6f6   : > { %15163 = vmatpush2.bf16.msra.mxu0 %v20433_v11  ;;  %v20496_v11 = vld [vmem:[%s21189_s8 + $0x2e88] ss:$16 sps:$4 sm:$0xff]  }
 0x6f7   : > { %15204 = vmatpush2.bf16.msra.mxu1 %v20436_v38  ;;  %15164 = vmatprep.subr.bf16.mxu0 %v20441_v9  ;;  %v20501_v38 = vld [vmem:[%s21189_s8 + $0x2c6c] ss:$16 sps:$4 sm:$0xff]  }
 0x6f8   : > { %15205 = vmatprep.subr.bf16.mxu1 %v20444_v15  ;;  %v20504_v9 = vld [vmem:[%s21189_s8 + $0x2e6c] ss:$16 sps:$4 sm:$0xff]   ;;  %v20499_v15 = vld [vmem:[%s21189_s8 + $0x2c68] ss:$16 sps:$4 sm:$0xff]  }
 0x6fa   : > { %15165 = vmatpush2.bf16.msra.mxu0 %v20439_v19  ;;  %v20502_v19 = vld [vmem:[%s21189_s8 + $0x2e68] ss:$16 sps:$4 sm:$0xff]  }
 0x6fb   : > { %15206 = vmatpush2.bf16.msra.mxu1 %v20442_v54  ;;  %15166 = vmatprep.subr.bf16.mxu0 %v20447_v35  ;;  %v20507_v54 = vld [vmem:[%s21189_s8 + $0x2c4c] ss:$16 sps:$4 sm:$0xff]  }
 0x6fc   : > { %15207 = vmatprep.subr.bf16.mxu1 %v20450_v1  ;;  %v20510_v35 = vld [vmem:[%s21189_s8 + $0x2e4c] ss:$16 sps:$4 sm:$0xff]   ;;  %v20505_v1 = vld [vmem:[%s21189_s8 + $0x2c48] ss:$16 sps:$4 sm:$0xff]  }
 0x6fe   : > { %15167 = vmatpush2.bf16.msra.mxu0 %v20445_v22  ;;  %v20508_v22 = vld [vmem:[%s21189_s8 + $0x2e48] ss:$16 sps:$4 sm:$0xff]  }
 0x6ff   : > { %15208 = vmatpush2.bf16.msra.mxu1 %v20448_v59  ;;  %15168 = vmatprep.subr.bf16.mxu0 %v20453_v42  ;;  %v20513_v59 = vld [vmem:[%s21189_s8 + $0x2c2c] ss:$16 sps:$4 sm:$0xff]  }
 0x700   : > { %15209 = vmatprep.subr.bf16.mxu1 %v20456_v61  ;;  %v20516_v42 = vld [vmem:[%s21189_s8 + $0x2e2c] ss:$16 sps:$4 sm:$0xff]   ;;  %v20511_v61 = vld [vmem:[%s21189_s8 + $0x2c28] ss:$16 sps:$4 sm:$0xff]  }
 0x702   : > { %15169 = vmatpush2.bf16.msra.mxu0 %v20451_v53  ;;  %v20514_v53 = vld [vmem:[%s21189_s8 + $0x2e28] ss:$16 sps:$4 sm:$0xff]  }
 0x703   : > { %15210 = vmatpush2.bf16.msra.mxu1 %v20454_v24  ;;  %15170 = vmatprep.subr.bf16.mxu0 %v20459_v51  ;;  %v20519_v24 = vld [vmem:[%s21189_s8 + $0x2c0c] ss:$16 sps:$4 sm:$0xff]  }
 0x704   : > { %15211 = vmatprep.subr.bf16.mxu1 %v20462_v30  ;;  %v20522_v51 = vld [vmem:[%s21189_s8 + $0x2e0c] ss:$16 sps:$4 sm:$0xff]   ;;  %v20517_v30 = vld [vmem:[%s21189_s8 + $0x2c08] ss:$16 sps:$4 sm:$0xff]  }
 0x706   : > { %15171 = vmatpush2.bf16.msra.mxu0 %v20457_v47  ;;  %v20520_v47 = vld [vmem:[%s21189_s8 + $0x2e08] ss:$16 sps:$4 sm:$0xff]  }
 0x707   : > { %15212 = vmatpush2.bf16.msra.mxu1 %v20460_v17  ;;  %15172 = vmatprep.subr.bf16.mxu0 %v20465_v23  ;;  %v20525_v17 = vld [vmem:[%s21189_s8 + $0x2dec] ss:$16 sps:$4 sm:$0xff]  }
 0x708   : > { %15213 = vmatprep.subr.bf16.mxu1 %v20468_v29  ;;  %v20528_v23 = vld [vmem:[%s21189_s8 + $0x2fec] ss:$16 sps:$4 sm:$0xff]   ;;  %v20523_v29 = vld [vmem:[%s21189_s8 + $0x2de8] ss:$16 sps:$4 sm:$0xff]  }
 0x70a   : > { %15173 = vmatpush2.bf16.msra.mxu0 %v20463_v7  ;;  %v20526_v7 = vld [vmem:[%s21189_s8 + $0x2fe8] ss:$16 sps:$4 sm:$0xff]  }
 0x70b   : > { %15214 = vmatpush2.bf16.msra.mxu1 %v20466_v14  ;;  %15174 = vmatprep.subr.bf16.mxu0 %v20471_v18  ;;  %v20531_v14 = vld [vmem:[%s21189_s8 + $0x2dcc] ss:$16 sps:$4 sm:$0xff]  }
 0x70c   : > { %15215 = vmatprep.subr.bf16.mxu1 %v20474_v41  ;;  %v20534_v18 = vld [vmem:[%s21189_s8 + $0x2fcc] ss:$16 sps:$4 sm:$0xff]   ;;  %v20529_v41 = vld [vmem:[%s21189_s8 + $0x2dc8] ss:$16 sps:$4 sm:$0xff]  }
 0x70e   : > { %15175 = vmatpush2.bf16.msra.mxu0 %v20469_v10  ;;  %v20532_v10 = vld [vmem:[%s21189_s8 + $0x2fc8] ss:$16 sps:$4 sm:$0xff]  }
 0x70f   : > { %15216 = vmatpush2.bf16.msra.mxu1 %v20472_v4  ;;  %15226 = vmatprep.subr.bf16.mxu0 %v20477_v34  ;;  %v20537_v4 = vld [vmem:[%s21189_s8 + $0x2dac] ss:$16 sps:$4 sm:$0xff]  }
 0x710   : > { %15267 = vmatprep.subr.bf16.mxu1 %v20480_v44  ;;  %v20540_v34 = vld [vmem:[%s21189_s8 + $0x2fac] ss:$16 sps:$4 sm:$0xff]   ;;  %v20535_v44 = vld [vmem:[%s21189_s8 + $0x2da8] ss:$16 sps:$4 sm:$0xff]  }
 0x711   : > { %v14932_v37 = vpop.f32.mrf.mxu0  ;;  %15177 = vmatmul.mubr.bf16.vlgmr.msra.gmra.mxu0 %v24004_v6  ;;  %v20552_v6 = vld [vmem:[%s21189_s8 + $0x2f6c] ss:$16 sps:$4 sm:$0xff]  }
 0x712   : > { %v14973_v16 = vpop.f32.mrf.mxu1  ;;  %15218 = vmatmul.mubr.bf16.vlgmr.msra.gmra.mxu1 %v24005_v60  ;;  %v14933_v25 = vadd.f32 %v14932_v37, %v23491_v20  ;;  %15227 = vmatpush1.bf16.msra.mxu0 %v20475_v40  ;;  %v24007_v20 = vld [vmem:[#allocation16_spill] sm:$0xff] }
 0x713   : > { %15268 = vmatpush1.bf16.msra.mxu1 %v20478_v48  ;;  %v14934_v52 = vpop.f32.mrf.mxu0  ;;  %15228 = vmatprep.subr.bf16.mxu0 %v20483_v58  ;;  %v20538_v40 = vld [vmem:[%s21189_s8 + $0x2fa8] ss:$16 sps:$4 sm:$0xff]   ;;  %v20543_v48 = vld [vmem:[%s21189_s8 + $0x2d8c] ss:$16 sps:$4 sm:$0xff]  }
 0x714   : > { %v14975_v8 = vpop.f32.mrf.mxu1  ;;  %15269 = vmatprep.subr.bf16.mxu1 %v20486_v28  ;;  %v23565_v32 = vadd.f32 %v14973_v16, %v14933_v25  ;;  %v14935_v2 = vadd.f32 %v14934_v52, %v23496_v12  ;;  %15258 = vmatprep.mubr.bf16.mxu0 %v24006_v45  ;;  %v20495_v12 = vld [vmem:[%s21189_s8 + $0x2c8c] ss:$16 sps:$4 sm:$0xff]   ;;  %v20541_v28 = vld [vmem:[%s21189_s8 + $0x2d88] ss:$16 sps:$4 sm:$0xff]  }
 0x715   : > { %15299 = vmatprep.mubr.bf16.mxu1 %v24007_v20  ;;  %v14936_v46 = vpop.f32.mrf.mxu0  ;;  %v20546_v58 = vld [vmem:[%s21189_s8 + $0x2f8c] ss:$16 sps:$4 sm:$0xff]   ;;  %v20544_v37 = vld [vmem:[%s21189_s8 + $0x2f88] ss:$16 sps:$4 sm:$0xff]  }
 0x716   : > { %v14977_v3 = vpop.f32.mrf.mxu1  ;;  %v23570_v57 = vadd.f32 %v14975_v8, %v14935_v2  ;;  %15229 = vmatpush1.bf16.msra.mxu0 %v20481_v33  ;;  %v20549_v16 = vld [vmem:[%s21189_s8 + $0x2d6c] ss:$16 sps:$4 sm:$0xff]   ;;  %v20547_v60 = vld [vmem:[%s21189_s8 + $0x2d68] ss:$16 sps:$4 sm:$0xff]  }
 0x717   : > { %15270 = vmatpush1.bf16.msra.mxu1 %v20484_v39  ;;  %v14937_v62 = vpop.f32.mrf.mxu0  ;;  %15230 = vmatprep.subr.bf16.mxu0 %v20489_v43  ;;  %v20550_v25 = vld [vmem:[%s21189_s8 + $0x2f68] ss:$16 sps:$4 sm:$0xff]   ;;  %v20555_v33 = vld [vmem:[%s21189_s8 + $0x2d4c] ss:$16 sps:$4 sm:$0xff]  }
 0x718   : > { %v14978_v49 = vpop.f32.mrf.mxu1  ;;  %15271 = vmatprep.subr.bf16.mxu1 %v20492_v0  ;;  %v20558_v39 = vld [vmem:[%s21189_s8 + $0x2f4c] ss:$16 sps:$4 sm:$0xff]   ;;  %v20553_v52 = vld [vmem:[%s21189_s8 + $0x2d48] ss:$16 sps:$4 sm:$0xff]  }
 0x719   : > { %v20556_v8 = vld [vmem:[%s21189_s8 + $0x2f48] ss:$16 sps:$4 sm:$0xff]   ;;  %v20561_v43 = vld [vmem:[%s21189_s8 + $0x2d2c] ss:$16 sps:$4 sm:$0xff]  }
 0x71a   : > { %15231 = vmatpush1.bf16.msra.mxu0 %v20487_v50  ;;  %v20564_v0 = vld [vmem:[%s21189_s8 + $0x2f2c] ss:$16 sps:$4 sm:$0xff]   ;;  %v20559_v2 = vld [vmem:[%s21189_s8 + $0x2d28] ss:$16 sps:$4 sm:$0xff]  }
 0x71b   : > { %15272 = vmatpush1.bf16.msra.mxu1 %v20490_v55  ;;  %15232 = vmatprep.subr.bf16.mxu0 %v20495_v12  ;;  %v20562_v45 = vld [vmem:[%s21189_s8 + $0x2f28] ss:$16 sps:$4 sm:$0xff]   ;;  %v20567_v20 = vld [vmem:[%s21189_s8 + $0x2d0c] ss:$16 sps:$4 sm:$0xff]  }
 0x71c   : > { %15273 = vmatprep.subr.bf16.mxu1 %v20498_v13  ;;  %v20570_v46 = vld [vmem:[%s21189_s8 + $0x2f0c] ss:$16 sps:$4 sm:$0xff]   ;;  %v20565_v3 = vld [vmem:[%s21189_s8 + $0x2d08] ss:$16 sps:$4 sm:$0xff]  }
 0x71d   : > { %v20568_v50 = vld [vmem:[%s21189_s8 + $0x2f08] ss:$16 sps:$4 sm:$0xff]   ;;  %v20573_v55 = vld [vmem:[%s21189_s8 + $0x30ec] ss:$16 sps:$4 sm:$0xff]  }
 0x71e   : > { %15233 = vmatpush1.bf16.msra.mxu0 %v20493_v63  ;;  %v20576_v62 = vld [vmem:[%s21189_s8 + $0x32ec] ss:$16 sps:$4 sm:$0xff]   ;;  %v20571_v49 = vld [vmem:[%s21189_s8 + $0x30e8] ss:$16 sps:$4 sm:$0xff]  }
 0x71f   : > { %15274 = vmatpush1.bf16.msra.mxu1 %v20496_v11  ;;  %15234 = vmatprep.subr.bf16.mxu0 %v20501_v38  ;;  %v20574_v12 = vld [vmem:[%s21189_s8 + $0x32e8] ss:$16 sps:$4 sm:$0xff]   ;;  %v20579_v13 = vld [vmem:[%s21189_s8 + $0x30cc] ss:$16 sps:$4 sm:$0xff]  }
 0x720   : > { %15275 = vmatprep.subr.bf16.mxu1 %v20504_v9  ;;  %v20582_v63 = vld [vmem:[%s21189_s8 + $0x32cc] ss:$16 sps:$4 sm:$0xff]   ;;  %v24008_v9 = vld [vmem:[#allocation17_spill] sm:$0xff] }
 0x722   : > { %15235 = vmatpush1.bf16.msra.mxu0 %v20499_v15  ;;  %v24009_v15 = vld [vmem:[#allocation19_spill] sm:$0xff] }
 0x723   : > { %15276 = vmatpush1.bf16.msra.mxu1 %v20502_v19  ;;  %15236 = vmatprep.subr.bf16.mxu0 %v20507_v54  ;;  %v20577_v54 = vld [vmem:[%s21189_s8 + $0x30c8] ss:$16 sps:$4 sm:$0xff]  }
 0x724   : > { %15277 = vmatprep.subr.bf16.mxu1 %v20510_v35  ;;  %v20580_v35 = vld [vmem:[%s21189_s8 + $0x32c8] ss:$16 sps:$4 sm:$0xff]  }
 0x726   : > { %15237 = vmatpush1.bf16.msra.mxu0 %v20505_v1 }
 0x727   : > { %15278 = vmatpush1.bf16.msra.mxu1 %v20508_v22  ;;  %15238 = vmatprep.subr.bf16.mxu0 %v20513_v59  ;;  %v20585_v59 = vld [vmem:[%s21189_s8 + $0x30ac] ss:$16 sps:$4 sm:$0xff]  }
 0x728   : > { %15279 = vmatprep.subr.bf16.mxu1 %v20516_v42  ;;  %v20588_v42 = vld [vmem:[%s21189_s8 + $0x32ac] ss:$16 sps:$4 sm:$0xff]  }
 0x72a   : > { %15239 = vmatpush1.bf16.msra.mxu0 %v20511_v61 }
 0x72b   : > { %15280 = vmatpush1.bf16.msra.mxu1 %v20514_v53  ;;  %15240 = vmatprep.subr.bf16.mxu0 %v20519_v24  ;;  %v24010_v24 = vld [vmem:[#allocation18_spill] sm:$0xff] }
 0x72c   : > { %15281 = vmatprep.subr.bf16.mxu1 %v20522_v51 }
 0x72e   : > { %15241 = vmatpush1.bf16.msra.mxu0 %v20517_v30 }
 0x72f   : > { %15282 = vmatpush1.bf16.msra.mxu1 %v20520_v47  ;;  %15242 = vmatprep.subr.bf16.mxu0 %v20525_v17  ;;  %v20583_v17 = vld [vmem:[%s21189_s8 + $0x30a8] ss:$16 sps:$4 sm:$0xff]  }
 0x730   : > { %15283 = vmatprep.subr.bf16.mxu1 %v20528_v23  ;;  %v20586_v23 = vld [vmem:[%s21189_s8 + $0x32a8] ss:$16 sps:$4 sm:$0xff]  }
 0x732   : > { %15243 = vmatpush2.bf16.msra.mxu0 %v20523_v29 }
 0x733   : > { %15284 = vmatpush2.bf16.msra.mxu1 %v20526_v7  ;;  %15244 = vmatprep.subr.bf16.mxu0 %v20531_v14  ;;  %v20594_v14 = vld [vmem:[%s21189_s8 + $0x328c] ss:$16 sps:$4 sm:$0xff]  }
 0x734   : > { %15285 = vmatprep.subr.bf16.mxu1 %v20534_v18  ;;  %v20589_v18 = vld [vmem:[%s21189_s8 + $0x3088] ss:$16 sps:$4 sm:$0xff]  }
 0x736   : > { %15245 = vmatpush2.bf16.msra.mxu0 %v20529_v41  ;;  %v20592_v41 = vld [vmem:[%s21189_s8 + $0x3288] ss:$16 sps:$4 sm:$0xff]  }
 0x737   : > { %15286 = vmatpush2.bf16.msra.mxu1 %v20532_v10  ;;  %15246 = vmatprep.subr.bf16.mxu0 %v20537_v4  ;;  %v20597_v10 = vld [vmem:[%s21189_s8 + $0x306c] ss:$16 sps:$4 sm:$0xff]  }
 0x738   : > { %15287 = vmatprep.subr.bf16.mxu1 %v20540_v34  ;;  %v20600_v4 = vld [vmem:[%s21189_s8 + $0x326c] ss:$16 sps:$4 sm:$0xff]   ;;  %v20595_v34 = vld [vmem:[%s21189_s8 + $0x3068] ss:$16 sps:$4 sm:$0xff]  }
 0x73a   : > { %15247 = vmatpush2.bf16.msra.mxu0 %v20535_v44  ;;  %v20598_v44 = vld [vmem:[%s21189_s8 + $0x3268] ss:$16 sps:$4 sm:$0xff]  }
 0x73b   : > { %15288 = vmatpush2.bf16.msra.mxu1 %v20538_v40  ;;  %15248 = vmatprep.subr.bf16.mxu0 %v20543_v48  ;;  %v20603_v40 = vld [vmem:[%s21189_s8 + $0x304c] ss:$16 sps:$4 sm:$0xff]  }
 0x73c   : > { %15289 = vmatprep.subr.bf16.mxu1 %v20546_v58  ;;  %v20606_v48 = vld [vmem:[%s21189_s8 + $0x324c] ss:$16 sps:$4 sm:$0xff]   ;;  %v20601_v58 = vld [vmem:[%s21189_s8 + $0x3048] ss:$16 sps:$4 sm:$0xff]  }
 0x73e   : > { %15249 = vmatpush2.bf16.msra.mxu0 %v20541_v28  ;;  %v20604_v28 = vld [vmem:[%s21189_s8 + $0x3248] ss:$16 sps:$4 sm:$0xff]  }
 0x73f   : > { %15290 = vmatpush2.bf16.msra.mxu1 %v20544_v37  ;;  %15250 = vmatprep.subr.bf16.mxu0 %v20549_v16  ;;  %v20609_v37 = vld [vmem:[%s21189_s8 + $0x302c] ss:$16 sps:$4 sm:$0xff]  }
 0x740   : > { %15291 = vmatprep.subr.bf16.mxu1 %v20552_v6  ;;  %v20612_v16 = vld [vmem:[%s21189_s8 + $0x322c] ss:$16 sps:$4 sm:$0xff]   ;;  %v20607_v6 = vld [vmem:[%s21189_s8 + $0x3028] ss:$16 sps:$4 sm:$0xff]  }
 0x742   : > { %15251 = vmatpush2.bf16.msra.mxu0 %v20547_v60  ;;  %v20610_v60 = vld [vmem:[%s21189_s8 + $0x3228] ss:$16 sps:$4 sm:$0xff]  }
 0x743   : > { %15292 = vmatpush2.bf16.msra.mxu1 %v20550_v25  ;;  %15252 = vmatprep.subr.bf16.mxu0 %v20555_v33  ;;  %v20615_v25 = vld [vmem:[%s21189_s8 + $0x300c] ss:$16 sps:$4 sm:$0xff]  }
 0x744   : > { %15293 = vmatprep.subr.bf16.mxu1 %v20558_v39  ;;  %v20618_v33 = vld [vmem:[%s21189_s8 + $0x320c] ss:$16 sps:$4 sm:$0xff]   ;;  %v20613_v39 = vld [vmem:[%s21189_s8 + $0x3008] ss:$16 sps:$4 sm:$0xff]  }
 0x746   : > { %15253 = vmatpush2.bf16.msra.mxu0 %v20553_v52  ;;  %v20616_v52 = vld [vmem:[%s21189_s8 + $0x3208] ss:$16 sps:$4 sm:$0xff]  }
 0x747   : > { %15294 = vmatpush2.bf16.msra.mxu1 %v20556_v8  ;;  %15254 = vmatprep.subr.bf16.mxu0 %v20561_v43  ;;  %v20621_v8 = vld [vmem:[%s21189_s8 + $0x31ec] ss:$16 sps:$4 sm:$0xff]  }
 0x748   : > { %15295 = vmatprep.subr.bf16.mxu1 %v20564_v0  ;;  %v20624_v43 = vld [vmem:[%s21189_s8 + $0x33ec] ss:$16 sps:$4 sm:$0xff]   ;;  %v20619_v0 = vld [vmem:[%s21189_s8 + $0x31e8] ss:$16 sps:$4 sm:$0xff]  }
 0x74a   : > { %15255 = vmatpush2.bf16.msra.mxu0 %v20559_v2  ;;  %v20622_v2 = vld [vmem:[%s21189_s8 + $0x33e8] ss:$16 sps:$4 sm:$0xff]  }
 0x74b   : > { %15296 = vmatpush2.bf16.msra.mxu1 %v20562_v45  ;;  %15256 = vmatprep.subr.bf16.mxu0 %v20567_v20  ;;  %v20627_v45 = vld [vmem:[%s21189_s8 + $0x31cc] ss:$16 sps:$4 sm:$0xff]  }
 0x74c   : > { %15297 = vmatprep.subr.bf16.mxu1 %v20570_v46  ;;  %v20630_v20 = vld [vmem:[%s21189_s8 + $0x33cc] ss:$16 sps:$4 sm:$0xff]   ;;  %v20625_v46 = vld [vmem:[%s21189_s8 + $0x31c8] ss:$16 sps:$4 sm:$0xff]  }
 0x74e   : > { %15257 = vmatpush2.bf16.msra.mxu0 %v20565_v3  ;;  %v20628_v3 = vld [vmem:[%s21189_s8 + $0x33c8] ss:$16 sps:$4 sm:$0xff]  }
 0x74f   : > { %15298 = vmatpush2.bf16.msra.mxu1 %v20568_v50  ;;  %15308 = vmatprep.subr.bf16.mxu0 %v20573_v55  ;;  %v20633_v50 = vld [vmem:[%s21189_s8 + $0x31ac] ss:$16 sps:$4 sm:$0xff]  }
 0x750   : > { %15349 = vmatprep.subr.bf16.mxu1 %v20576_v62  ;;  %v20636_v55 = vld [vmem:[%s21189_s8 + $0x33ac] ss:$16 sps:$4 sm:$0xff]   ;;  %v20631_v62 = vld [vmem:[%s21189_s8 + $0x31a8] ss:$16 sps:$4 sm:$0xff]  }
 0x751   : > { %v15014_v11 = vpop.f32.mrf.mxu0  ;;  %15259 = vmatmul.mubr.bf16.vlgmr.msra.gmra.mxu0 %v24008_v9  ;;  %v20648_v9 = vld [vmem:[%s21189_s8 + $0x336c] ss:$16 sps:$4 sm:$0xff]  }
 0x752   : > { %v15055_v38 = vpop.f32.mrf.mxu1  ;;  %15300 = vmatmul.mubr.bf16.vlgmr.msra.gmra.mxu1 %v24009_v15  ;;  %v15015_v19 = vadd.f32 %v15014_v11, %v23565_v32  ;;  %15309 = vmatpush1.bf16.msra.mxu0 %v20571_v49  ;;  %v24011_v32 = vld [vmem:[#allocation20_spill] sm:$0xff] }
 0x753   : > { %15350 = vmatpush1.bf16.msra.mxu1 %v20574_v12  ;;  %v15016_v1 = vpop.f32.mrf.mxu0  ;;  %15310 = vmatprep.subr.bf16.mxu0 %v20579_v13  ;;  %v20634_v49 = vld [vmem:[%s21189_s8 + $0x33a8] ss:$16 sps:$4 sm:$0xff]   ;;  %v20639_v12 = vld [vmem:[%s21189_s8 + $0x318c] ss:$16 sps:$4 sm:$0xff]  }
 0x754   : > { %v15057_v22 = vpop.f32.mrf.mxu1  ;;  %15351 = vmatprep.subr.bf16.mxu1 %v20582_v63  ;;  %v23639_v61 = vadd.f32 %v15055_v38, %v15015_v19  ;;  %v15017_v53 = vadd.f32 %v15016_v1, %v23570_v57  ;;  %15340 = vmatprep.mubr.bf16.mxu0 %v24010_v24  ;;  %v20591_v57 = vld [vmem:[%s21189_s8 + $0x308c] ss:$16 sps:$4 sm:$0xff]   ;;  %v20637_v63 = vld [vmem:[%s21189_s8 + $0x3188] ss:$16 sps:$4 sm:$0xff]  }
 0x755   : > { %15381 = vmatprep.mubr.bf16.mxu1 %v24011_v32  ;;  %v15018_v51 = vpop.f32.mrf.mxu0  ;;  %v20642_v13 = vld [vmem:[%s21189_s8 + $0x338c] ss:$16 sps:$4 sm:$0xff]   ;;  %v20640_v11 = vld [vmem:[%s21189_s8 + $0x3388] ss:$16 sps:$4 sm:$0xff]  }
 0x756   : > { %v15059_v30 = vpop.f32.mrf.mxu1  ;;  %v23644_v47 = vadd.f32 %v15057_v22, %v15017_v53  ;;  %15311 = vmatpush1.bf16.msra.mxu0 %v20577_v54  ;;  %v20645_v38 = vld [vmem:[%s21189_s8 + $0x316c] ss:$16 sps:$4 sm:$0xff]   ;;  %v20643_v15 = vld [vmem:[%s21189_s8 + $0x3168] ss:$16 sps:$4 sm:$0xff]  }
 0x757   : > { %15352 = vmatpush1.bf16.msra.mxu1 %v20580_v35  ;;  %v15019_v29 = vpop.f32.mrf.mxu0  ;;  %15312 = vmatprep.subr.bf16.mxu0 %v20585_v59  ;;  %v20646_v19 = vld [vmem:[%s21189_s8 + $0x3368] ss:$16 sps:$4 sm:$0xff]   ;;  %v20651_v54 = vld [vmem:[%s21189_s8 + $0x314c] ss:$16 sps:$4 sm:$0xff]  }
 0x758   : > { %v15060_v7 = vpop.f32.mrf.mxu1  ;;  %15353 = vmatprep.subr.bf16.mxu1 %v20588_v42  ;;  %v20654_v35 = vld [vmem:[%s21189_s8 + $0x334c] ss:$16 sps:$4 sm:$0xff]   ;;  %v20649_v1 = vld [vmem:[%s21189_s8 + $0x3148] ss:$16 sps:$4 sm:$0xff]  }
 0x759   : > { %v20652_v22 = vld [vmem:[%s21189_s8 + $0x3348] ss:$16 sps:$4 sm:$0xff]   ;;  %v20657_v59 = vld [vmem:[%s21189_s8 + $0x312c] ss:$16 sps:$4 sm:$0xff]  }
 0x75a   : > { %15313 = vmatpush1.bf16.msra.mxu0 %v20583_v17  ;;  %v20660_v42 = vld [vmem:[%s21189_s8 + $0x332c] ss:$16 sps:$4 sm:$0xff]   ;;  %v20655_v53 = vld [vmem:[%s21189_s8 + $0x3128] ss:$16 sps:$4 sm:$0xff]  }
 0x75b   : > { %15354 = vmatpush1.bf16.msra.mxu1 %v20586_v23  ;;  %15314 = vmatprep.subr.bf16.mxu0 %v20591_v57  ;;  %v20658_v24 = vld [vmem:[%s21189_s8 + $0x3328] ss:$16 sps:$4 sm:$0xff]   ;;  %v20663_v32 = vld [vmem:[%s21189_s8 + $0x310c] ss:$16 sps:$4 sm:$0xff]  }
 0x75c   : > { %15355 = vmatprep.subr.bf16.mxu1 %v20594_v14  ;;  %v20666_v51 = vld [vmem:[%s21189_s8 + $0x330c] ss:$16 sps:$4 sm:$0xff]   ;;  %v20661_v30 = vld [vmem:[%s21189_s8 + $0x3108] ss:$16 sps:$4 sm:$0xff]  }
 0x75d   : > { %v20664_v17 = vld [vmem:[%s21189_s8 + $0x3308] ss:$16 sps:$4 sm:$0xff]   ;;  %v20669_v23 = vld [vmem:[%s21189_s8 + $0x34ec] ss:$16 sps:$4 sm:$0xff]  }
 0x75e   : > { %15315 = vmatpush1.bf16.msra.mxu0 %v20589_v18  ;;  %v20672_v29 = vld [vmem:[%s21189_s8 + $0x36ec] ss:$16 sps:$4 sm:$0xff]   ;;  %v20667_v7 = vld [vmem:[%s21189_s8 + $0x34e8] ss:$16 sps:$4 sm:$0xff]  }
 0x75f   : > { %15356 = vmatpush1.bf16.msra.mxu1 %v20592_v41  ;;  %15316 = vmatprep.subr.bf16.mxu0 %v20597_v10  ;;  %v20670_v57 = vld [vmem:[%s21189_s8 + $0x36e8] ss:$16 sps:$4 sm:$0xff]   ;;  %v20675_v14 = vld [vmem:[%s21189_s8 + $0x34cc] ss:$16 sps:$4 sm:$0xff]  }
 0x760   : > { %15357 = vmatprep.subr.bf16.mxu1 %v20600_v4  ;;  %v20678_v18 = vld [vmem:[%s21189_s8 + $0x36cc] ss:$16 sps:$4 sm:$0xff]   ;;  %v24012_v4 = vld [vmem:[#allocation21_spill] sm:$0xff] }
 0x762   : > { %15317 = vmatpush1.bf16.msra.mxu0 %v20595_v34  ;;  %v24013_v34 = vld [vmem:[#allocation23_spill] sm:$0xff] }
 0x763   : > { %15358 = vmatpush1.bf16.msra.mxu1 %v20598_v44  ;;  %15318 = vmatprep.subr.bf16.mxu0 %v20603_v40  ;;  %v20673_v40 = vld [vmem:[%s21189_s8 + $0x34c8] ss:$16 sps:$4 sm:$0xff]  }
 0x764   : > { %15359 = vmatprep.subr.bf16.mxu1 %v20606_v48  ;;  %v20676_v48 = vld [vmem:[%s21189_s8 + $0x36c8] ss:$16 sps:$4 sm:$0xff]  }
 0x766   : > { %15319 = vmatpush1.bf16.msra.mxu0 %v20601_v58 }
 0x767   : > { %15360 = vmatpush1.bf16.msra.mxu1 %v20604_v28  ;;  %15320 = vmatprep.subr.bf16.mxu0 %v20609_v37  ;;  %v20681_v37 = vld [vmem:[%s21189_s8 + $0x34ac] ss:$16 sps:$4 sm:$0xff]  }
 0x768   : > { %15361 = vmatprep.subr.bf16.mxu1 %v20612_v16  ;;  %v20684_v16 = vld [vmem:[%s21189_s8 + $0x36ac] ss:$16 sps:$4 sm:$0xff]  }
 0x76a   : > { %15321 = vmatpush1.bf16.msra.mxu0 %v20607_v6 }
 0x76b   : > { %15362 = vmatpush1.bf16.msra.mxu1 %v20610_v60  ;;  %15322 = vmatprep.subr.bf16.mxu0 %v20615_v25  ;;  %v24014_v25 = vld [vmem:[#allocation22_spill] sm:$0xff] }
 0x76c   : > { %15363 = vmatprep.subr.bf16.mxu1 %v20618_v33 }
 0x76e   : > { %15323 = vmatpush1.bf16.msra.mxu0 %v20613_v39 }
 0x76f   : > { %15364 = vmatpush1.bf16.msra.mxu1 %v20616_v52  ;;  %15324 = vmatprep.subr.bf16.mxu0 %v20621_v8  ;;  %v20679_v8 = vld [vmem:[%s21189_s8 + $0x34a8] ss:$16 sps:$4 sm:$0xff]  }
 0x770   : > { %15365 = vmatprep.subr.bf16.mxu1 %v20624_v43  ;;  %v20682_v43 = vld [vmem:[%s21189_s8 + $0x36a8] ss:$16 sps:$4 sm:$0xff]  }
 0x772   : > { %15325 = vmatpush2.bf16.msra.mxu0 %v20619_v0 }
 0x773   : > { %15366 = vmatpush2.bf16.msra.mxu1 %v20622_v2  ;;  %15326 = vmatprep.subr.bf16.mxu0 %v20627_v45  ;;  %v20690_v45 = vld [vmem:[%s21189_s8 + $0x368c] ss:$16 sps:$4 sm:$0xff]  }
 0x774   : > { %15367 = vmatprep.subr.bf16.mxu1 %v20630_v20  ;;  %v20685_v20 = vld [vmem:[%s21189_s8 + $0x3488] ss:$16 sps:$4 sm:$0xff]  }
 0x776   : > { %15327 = vmatpush2.bf16.msra.mxu0 %v20625_v46  ;;  %v20688_v46 = vld [vmem:[%s21189_s8 + $0x3688] ss:$16 sps:$4 sm:$0xff]  }
 0x777   : > { %15368 = vmatpush2.bf16.msra.mxu1 %v20628_v3  ;;  %15328 = vmatprep.subr.bf16.mxu0 %v20633_v50  ;;  %v20693_v3 = vld [vmem:[%s21189_s8 + $0x346c] ss:$16 sps:$4 sm:$0xff]  }
 0x778   : > { %15369 = vmatprep.subr.bf16.mxu1 %v20636_v55  ;;  %v20696_v50 = vld [vmem:[%s21189_s8 + $0x366c] ss:$16 sps:$4 sm:$0xff]   ;;  %v20691_v55 = vld [vmem:[%s21189_s8 + $0x3468] ss:$16 sps:$4 sm:$0xff]  }
 0x77a   : > { %15329 = vmatpush2.bf16.msra.mxu0 %v20631_v62  ;;  %v20694_v62 = vld [vmem:[%s21189_s8 + $0x3668] ss:$16 sps:$4 sm:$0xff]  }
 0x77b   : > { %15370 = vmatpush2.bf16.msra.mxu1 %v20634_v49  ;;  %15330 = vmatprep.subr.bf16.mxu0 %v20639_v12  ;;  %v20699_v49 = vld [vmem:[%s21189_s8 + $0x344c] ss:$16 sps:$4 sm:$0xff]  }
 0x77c   : > { %15371 = vmatprep.subr.bf16.mxu1 %v20642_v13  ;;  %v20702_v12 = vld [vmem:[%s21189_s8 + $0x364c] ss:$16 sps:$4 sm:$0xff]   ;;  %v20697_v13 = vld [vmem:[%s21189_s8 + $0x3448] ss:$16 sps:$4 sm:$0xff]  }
 0x77e   : > { %15331 = vmatpush2.bf16.msra.mxu0 %v20637_v63  ;;  %v20700_v63 = vld [vmem:[%s21189_s8 + $0x3648] ss:$16 sps:$4 sm:$0xff]  }
 0x77f   : > { %15372 = vmatpush2.bf16.msra.mxu1 %v20640_v11  ;;  %15332 = vmatprep.subr.bf16.mxu0 %v20645_v38  ;;  %v20705_v11 = vld [vmem:[%s21189_s8 + $0x342c] ss:$16 sps:$4 sm:$0xff]  }
 0x780   : > { %15373 = vmatprep.subr.bf16.mxu1 %v20648_v9  ;;  %v20708_v38 = vld [vmem:[%s21189_s8 + $0x362c] ss:$16 sps:$4 sm:$0xff]   ;;  %v20703_v9 = vld [vmem:[%s21189_s8 + $0x3428] ss:$16 sps:$4 sm:$0xff]  }
 0x782   : > { %15333 = vmatpush2.bf16.msra.mxu0 %v20643_v15  ;;  %v20706_v15 = vld [vmem:[%s21189_s8 + $0x3628] ss:$16 sps:$4 sm:$0xff]  }
 0x783   : > { %15374 = vmatpush2.bf16.msra.mxu1 %v20646_v19  ;;  %15334 = vmatprep.subr.bf16.mxu0 %v20651_v54  ;;  %v20711_v19 = vld [vmem:[%s21189_s8 + $0x340c] ss:$16 sps:$4 sm:$0xff]  }
 0x784   : > { %15375 = vmatprep.subr.bf16.mxu1 %v20654_v35  ;;  %v20714_v54 = vld [vmem:[%s21189_s8 + $0x360c] ss:$16 sps:$4 sm:$0xff]   ;;  %v20709_v35 = vld [vmem:[%s21189_s8 + $0x3408] ss:$16 sps:$4 sm:$0xff]  }
 0x786   : > { %15335 = vmatpush2.bf16.msra.mxu0 %v20649_v1  ;;  %v20712_v1 = vld [vmem:[%s21189_s8 + $0x3608] ss:$16 sps:$4 sm:$0xff]  }
 0x787   : > { %15376 = vmatpush2.bf16.msra.mxu1 %v20652_v22  ;;  %15336 = vmatprep.subr.bf16.mxu0 %v20657_v59  ;;  %v20717_v22 = vld [vmem:[%s21189_s8 + $0x35ec] ss:$16 sps:$4 sm:$0xff]  }
 0x788   : > { %15377 = vmatprep.subr.bf16.mxu1 %v20660_v42  ;;  %v20720_v59 = vld [vmem:[%s21189_s8 + $0x37ec] ss:$16 sps:$4 sm:$0xff]   ;;  %v20715_v42 = vld [vmem:[%s21189_s8 + $0x35e8] ss:$16 sps:$4 sm:$0xff]  }
 0x78a   : > { %15337 = vmatpush2.bf16.msra.mxu0 %v20655_v53  ;;  %v20718_v53 = vld [vmem:[%s21189_s8 + $0x37e8] ss:$16 sps:$4 sm:$0xff]  }
 0x78b   : > { %15378 = vmatpush2.bf16.msra.mxu1 %v20658_v24  ;;  %15338 = vmatprep.subr.bf16.mxu0 %v20663_v32  ;;  %v20723_v24 = vld [vmem:[%s21189_s8 + $0x35cc] ss:$16 sps:$4 sm:$0xff]  }
 0x78c   : > { %15379 = vmatprep.subr.bf16.mxu1 %v20666_v51  ;;  %v20726_v32 = vld [vmem:[%s21189_s8 + $0x37cc] ss:$16 sps:$4 sm:$0xff]   ;;  %v20721_v51 = vld [vmem:[%s21189_s8 + $0x35c8] ss:$16 sps:$4 sm:$0xff]  }
 0x78e   : > { %15339 = vmatpush2.bf16.msra.mxu0 %v20661_v30  ;;  %v20724_v30 = vld [vmem:[%s21189_s8 + $0x37c8] ss:$16 sps:$4 sm:$0xff]  }
 0x78f   : > { %15380 = vmatpush2.bf16.msra.mxu1 %v20664_v17  ;;  %15390 = vmatprep.subr.bf16.mxu0 %v20669_v23  ;;  %v20729_v17 = vld [vmem:[%s21189_s8 + $0x35ac] ss:$16 sps:$4 sm:$0xff]  }
 0x790   : > { %15431 = vmatprep.subr.bf16.mxu1 %v20672_v29  ;;  %v20732_v23 = vld [vmem:[%s21189_s8 + $0x37ac] ss:$16 sps:$4 sm:$0xff]   ;;  %v20727_v29 = vld [vmem:[%s21189_s8 + $0x35a8] ss:$16 sps:$4 sm:$0xff]  }
 0x791   : > { %v15096_v41 = vpop.f32.mrf.mxu0  ;;  %15341 = vmatmul.mubr.bf16.vlgmr.msra.gmra.mxu0 %v24012_v4  ;;  %v20744_v4 = vld [vmem:[%s21189_s8 + $0x376c] ss:$16 sps:$4 sm:$0xff]  }
 0x792   : > { %v15137_v10 = vpop.f32.mrf.mxu1  ;;  %15382 = vmatmul.mubr.bf16.vlgmr.msra.gmra.mxu1 %v24013_v34  ;;  %v15097_v44 = vadd.f32 %v15096_v41, %v23639_v61  ;;  %15391 = vmatpush1.bf16.msra.mxu0 %v20667_v7  ;;  %v24015_v61 = vld [vmem:[#allocation24_spill] sm:$0xff] }
 0x793   : > { %15432 = vmatpush1.bf16.msra.mxu1 %v20670_v57  ;;  %v15098_v58 = vpop.f32.mrf.mxu0  ;;  %15392 = vmatprep.subr.bf16.mxu0 %v20675_v14  ;;  %v20730_v7 = vld [vmem:[%s21189_s8 + $0x37a8] ss:$16 sps:$4 sm:$0xff]   ;;  %v20735_v57 = vld [vmem:[%s21189_s8 + $0x358c] ss:$16 sps:$4 sm:$0xff]  }
 0x794   : > { %v15139_v28 = vpop.f32.mrf.mxu1  ;;  %15433 = vmatprep.subr.bf16.mxu1 %v20678_v18  ;;  %v23713_v6 = vadd.f32 %v15137_v10, %v15097_v44  ;;  %v15099_v60 = vadd.f32 %v15098_v58, %v23644_v47  ;;  %15422 = vmatprep.mubr.bf16.mxu0 %v24014_v25  ;;  %v20687_v47 = vld [vmem:[%s21189_s8 + $0x348c] ss:$16 sps:$4 sm:$0xff]   ;;  %v20733_v18 = vld [vmem:[%s21189_s8 + $0x3588] ss:$16 sps:$4 sm:$0xff]  }
 0x795   : > { %15463 = vmatprep.mubr.bf16.mxu1 %v24015_v61  ;;  %v15100_v33 = vpop.f32.mrf.mxu0  ;;  %v20738_v14 = vld [vmem:[%s21189_s8 + $0x378c] ss:$16 sps:$4 sm:$0xff]   ;;  %v20736_v41 = vld [vmem:[%s21189_s8 + $0x3788] ss:$16 sps:$4 sm:$0xff]  }
 0x796   : > { %v15141_v39 = vpop.f32.mrf.mxu1  ;;  %v23718_v52 = vadd.f32 %v15139_v28, %v15099_v60  ;;  %15393 = vmatpush1.bf16.msra.mxu0 %v20673_v40  ;;  %v20741_v10 = vld [vmem:[%s21189_s8 + $0x356c] ss:$16 sps:$4 sm:$0xff]   ;;  %v20739_v34 = vld [vmem:[%s21189_s8 + $0x3568] ss:$16 sps:$4 sm:$0xff]  }
 0x797   : > { %15434 = vmatpush1.bf16.msra.mxu1 %v20676_v48  ;;  %v15101_v0 = vpop.f32.mrf.mxu0  ;;  %15394 = vmatprep.subr.bf16.mxu0 %v20681_v37  ;;  %v20742_v44 = vld [vmem:[%s21189_s8 + $0x3768] ss:$16 sps:$4 sm:$0xff]   ;;  %v20747_v40 = vld [vmem:[%s21189_s8 + $0x354c] ss:$16 sps:$4 sm:$0xff]  }
 0x798   : > { %v15142_v2 = vpop.f32.mrf.mxu1  ;;  %15435 = vmatprep.subr.bf16.mxu1 %v20684_v16  ;;  %v20750_v48 = vld [vmem:[%s21189_s8 + $0x374c] ss:$16 sps:$4 sm:$0xff]   ;;  %v20745_v58 = vld [vmem:[%s21189_s8 + $0x3548] ss:$16 sps:$4 sm:$0xff]  }
 0x799   : > { %v20748_v28 = vld [vmem:[%s21189_s8 + $0x3748] ss:$16 sps:$4 sm:$0xff]   ;;  %v20753_v37 = vld [vmem:[%s21189_s8 + $0x352c] ss:$16 sps:$4 sm:$0xff]  }
 0x79a   : > { %15395 = vmatpush1.bf16.msra.mxu0 %v20679_v8  ;;  %v20756_v16 = vld [vmem:[%s21189_s8 + $0x372c] ss:$16 sps:$4 sm:$0xff]   ;;  %v20751_v60 = vld [vmem:[%s21189_s8 + $0x3528] ss:$16 sps:$4 sm:$0xff]  }
 0x79b   : > { %15436 = vmatpush1.bf16.msra.mxu1 %v20682_v43  ;;  %15396 = vmatprep.subr.bf16.mxu0 %v20687_v47  ;;  %v20754_v25 = vld [vmem:[%s21189_s8 + $0x3728] ss:$16 sps:$4 sm:$0xff]   ;;  %v20759_v61 = vld [vmem:[%s21189_s8 + $0x350c] ss:$16 sps:$4 sm:$0xff]  }
 0x79c   : > { %15437 = vmatprep.subr.bf16.mxu1 %v20690_v45  ;;  %v20762_v33 = vld [vmem:[%s21189_s8 + $0x370c] ss:$16 sps:$4 sm:$0xff]   ;;  %v20757_v39 = vld [vmem:[%s21189_s8 + $0x3508] ss:$16 sps:$4 sm:$0xff]  }
 0x79d   : > { %v20760_v8 = vld [vmem:[%s21189_s8 + $0x3708] ss:$16 sps:$4 sm:$0xff]   ;;  %v20765_v43 = vld [vmem:[%s21189_s8 + $0x38ec] ss:$16 sps:$4 sm:$0xff]  }
 0x79e   : > { %15397 = vmatpush1.bf16.msra.mxu0 %v20685_v20  ;;  %v20768_v0 = vld [vmem:[%s21189_s8 + $0x3aec] ss:$16 sps:$4 sm:$0xff]   ;;  %v20763_v2 = vld [vmem:[%s21189_s8 + $0x38e8] ss:$16 sps:$4 sm:$0xff]  }
 0x79f   : > { %15438 = vmatpush1.bf16.msra.mxu1 %v20688_v46  ;;  %15398 = vmatprep.subr.bf16.mxu0 %v20693_v3  ;;  %v20766_v47 = vld [vmem:[%s21189_s8 + $0x3ae8] ss:$16 sps:$4 sm:$0xff]   ;;  %v20771_v45 = vld [vmem:[%s21189_s8 + $0x38cc] ss:$16 sps:$4 sm:$0xff]  }
 0x7a0   : > { %15439 = vmatprep.subr.bf16.mxu1 %v20696_v50  ;;  %v20774_v20 = vld [vmem:[%s21189_s8 + $0x3acc] ss:$16 sps:$4 sm:$0xff]   ;;  %v24016_v50 = vld [vmem:[#allocation25_spill] sm:$0xff] }
 0x7a2   : > { %15399 = vmatpush1.bf16.msra.mxu0 %v20691_v55 }
 0x7a3   : > { %15440 = vmatpush1.bf16.msra.mxu1 %v20694_v62  ;;  %15400 = vmatprep.subr.bf16.mxu0 %v20699_v49  ;;  %v20769_v62 = vld [vmem:[%s21189_s8 + $0x38c8] ss:$16 sps:$4 sm:$0xff]  }
 0x7a4   : > { %15441 = vmatprep.subr.bf16.mxu1 %v20702_v12  ;;  %v20772_v49 = vld [vmem:[%s21189_s8 + $0x3ac8] ss:$16 sps:$4 sm:$0xff]  }
 0x7a6   : > { %15401 = vmatpush1.bf16.msra.mxu0 %v20697_v13 }
 0x7a7   : > { %15442 = vmatpush1.bf16.msra.mxu1 %v20700_v63  ;;  %15402 = vmatprep.subr.bf16.mxu0 %v20705_v11  ;;  %v20777_v63 = vld [vmem:[%s21189_s8 + $0x38ac] ss:$16 sps:$4 sm:$0xff]  }
 0x7a8   : > { %15443 = vmatprep.subr.bf16.mxu1 %v20708_v38  ;;  %v20780_v11 = vld [vmem:[%s21189_s8 + $0x3aac] ss:$16 sps:$4 sm:$0xff]  }
 0x7aa   : > { %15403 = vmatpush1.bf16.msra.mxu0 %v20703_v9  ;;  %v24017_v9 = vld [vmem:[#allocation26_spill] sm:$0xff] }
 0x7ab   : > { %15444 = vmatpush1.bf16.msra.mxu1 %v20706_v15  ;;  %15404 = vmatprep.subr.bf16.mxu0 %v20711_v19 }
 0x7ac   : > { %15445 = vmatprep.subr.bf16.mxu1 %v20714_v54 }
 0x7ae   : > { %15405 = vmatpush1.bf16.msra.mxu0 %v20709_v35  ;;  %v20775_v35 = vld [vmem:[%s21189_s8 + $0x38a8] ss:$16 sps:$4 sm:$0xff]  }
 0x7af   : > { %15446 = vmatpush1.bf16.msra.mxu1 %v20712_v1  ;;  %15406 = vmatprep.subr.bf16.mxu0 %v20717_v22  ;;  %v20778_v1 = vld [vmem:[%s21189_s8 + $0x3aa8] ss:$16 sps:$4 sm:$0xff]  }
 0x7b0   : > { %15447 = vmatprep.subr.bf16.mxu1 %v20720_v59 }
 0x7b2   : > { %15407 = vmatpush2.bf16.msra.mxu0 %v20715_v42  ;;  %v20786_v42 = vld [vmem:[%s21189_s8 + $0x3a8c] ss:$16 sps:$4 sm:$0xff]  }
 0x7b3   : > { %15448 = vmatpush2.bf16.msra.mxu1 %v20718_v53  ;;  %15408 = vmatprep.subr.bf16.mxu0 %v20723_v24  ;;  %v20781_v53 = vld [vmem:[%s21189_s8 + $0x3888] ss:$16 sps:$4 sm:$0xff]  }
 0x7b4   : > { %15449 = vmatprep.subr.bf16.mxu1 %v20726_v32  ;;  %v20784_v24 = vld [vmem:[%s21189_s8 + $0x3a88] ss:$16 sps:$4 sm:$0xff]   ;;  %v20789_v32 = vld [vmem:[%s21189_s8 + $0x386c] ss:$16 sps:$4 sm:$0xff]  }
 0x7b6   : > { %15409 = vmatpush2.bf16.msra.mxu0 %v20721_v51  ;;  %v20792_v51 = vld [vmem:[%s21189_s8 + $0x3a6c] ss:$16 sps:$4 sm:$0xff]  }
 0x7b7   : > { %15450 = vmatpush2.bf16.msra.mxu1 %v20724_v30  ;;  %15410 = vmatprep.subr.bf16.mxu0 %v20729_v17  ;;  %v20787_v30 = vld [vmem:[%s21189_s8 + $0x3868] ss:$16 sps:$4 sm:$0xff]  }
 0x7b8   : > { %15451 = vmatprep.subr.bf16.mxu1 %v20732_v23  ;;  %v20790_v17 = vld [vmem:[%s21189_s8 + $0x3a68] ss:$16 sps:$4 sm:$0xff]   ;;  %v20795_v23 = vld [vmem:[%s21189_s8 + $0x384c] ss:$16 sps:$4 sm:$0xff]  }
 0x7ba   : > { %15411 = vmatpush2.bf16.msra.mxu0 %v20727_v29  ;;  %v20798_v29 = vld [vmem:[%s21189_s8 + $0x3a4c] ss:$16 sps:$4 sm:$0xff]  }
 0x7bb   : > { %15452 = vmatpush2.bf16.msra.mxu1 %v20730_v7  ;;  %15412 = vmatprep.subr.bf16.mxu0 %v20735_v57  ;;  %v20793_v7 = vld [vmem:[%s21189_s8 + $0x3848] ss:$16 sps:$4 sm:$0xff]  }
 0x7bc   : > { %15453 = vmatprep.subr.bf16.mxu1 %v20738_v14  ;;  %v20796_v57 = vld [vmem:[%s21189_s8 + $0x3a48] ss:$16 sps:$4 sm:$0xff]   ;;  %v20801_v14 = vld [vmem:[%s21189_s8 + $0x382c] ss:$16 sps:$4 sm:$0xff]  }
 0x7be   : > { %15413 = vmatpush2.bf16.msra.mxu0 %v20733_v18  ;;  %v20804_v18 = vld [vmem:[%s21189_s8 + $0x3a2c] ss:$16 sps:$4 sm:$0xff]  }
 0x7bf   : > { %15454 = vmatpush2.bf16.msra.mxu1 %v20736_v41  ;;  %15414 = vmatprep.subr.bf16.mxu0 %v20741_v10  ;;  %v20799_v41 = vld [vmem:[%s21189_s8 + $0x3828] ss:$16 sps:$4 sm:$0xff]  }
 0x7c0   : > { %15455 = vmatprep.subr.bf16.mxu1 %v20744_v4  ;;  %v20802_v10 = vld [vmem:[%s21189_s8 + $0x3a28] ss:$16 sps:$4 sm:$0xff]   ;;  %v20807_v4 = vld [vmem:[%s21189_s8 + $0x380c] ss:$16 sps:$4 sm:$0xff]  }
 0x7c2   : > { %15415 = vmatpush2.bf16.msra.mxu0 %v20739_v34  ;;  %v20810_v34 = vld [vmem:[%s21189_s8 + $0x3a0c] ss:$16 sps:$4 sm:$0xff]  }
 0x7c3   : > { %15456 = vmatpush2.bf16.msra.mxu1 %v20742_v44  ;;  %15416 = vmatprep.subr.bf16.mxu0 %v20747_v40  ;;  %v20805_v44 = vld [vmem:[%s21189_s8 + $0x3808] ss:$16 sps:$4 sm:$0xff]  }
 0x7c4   : > { %15457 = vmatprep.subr.bf16.mxu1 %v20750_v48  ;;  %v20808_v40 = vld [vmem:[%s21189_s8 + $0x3a08] ss:$16 sps:$4 sm:$0xff]   ;;  %v20813_v48 = vld [vmem:[%s21189_s8 + $0x39ec] ss:$16 sps:$4 sm:$0xff]  }
 0x7c6   : > { %15417 = vmatpush2.bf16.msra.mxu0 %v20745_v58  ;;  %v20816_v58 = vld [vmem:[%s21189_s8 + $0x3bec] ss:$16 sps:$4 sm:$0xff]  }
 0x7c7   : > { %15458 = vmatpush2.bf16.msra.mxu1 %v20748_v28  ;;  %15418 = vmatprep.subr.bf16.mxu0 %v20753_v37  ;;  %v20811_v28 = vld [vmem:[%s21189_s8 + $0x39e8] ss:$16 sps:$4 sm:$0xff]  }
 0x7c8   : > { %15459 = vmatprep.subr.bf16.mxu1 %v20756_v16  ;;  %v20814_v37 = vld [vmem:[%s21189_s8 + $0x3be8] ss:$16 sps:$4 sm:$0xff]   ;;  %v20819_v16 = vld [vmem:[%s21189_s8 + $0x39cc] ss:$16 sps:$4 sm:$0xff]  }
 0x7ca   : > { %15419 = vmatpush2.bf16.msra.mxu0 %v20751_v60  ;;  %v20822_v60 = vld [vmem:[%s21189_s8 + $0x3bcc] ss:$16 sps:$4 sm:$0xff]  }
 0x7cb   : > { %15460 = vmatpush2.bf16.msra.mxu1 %v20754_v25  ;;  %15420 = vmatprep.subr.bf16.mxu0 %v20759_v61  ;;  %v20817_v25 = vld [vmem:[%s21189_s8 + $0x39c8] ss:$16 sps:$4 sm:$0xff]  }
 0x7cc   : > { %15461 = vmatprep.subr.bf16.mxu1 %v20762_v33  ;;  %v20820_v61 = vld [vmem:[%s21189_s8 + $0x3bc8] ss:$16 sps:$4 sm:$0xff]   ;;  %v20825_v33 = vld [vmem:[%s21189_s8 + $0x39ac] ss:$16 sps:$4 sm:$0xff]  }
 0x7ce   : > { %15421 = vmatpush2.bf16.msra.mxu0 %v20757_v39  ;;  %v20828_v39 = vld [vmem:[%s21189_s8 + $0x3bac] ss:$16 sps:$4 sm:$0xff]  }
 0x7cf   : > { %15462 = vmatpush2.bf16.msra.mxu1 %v20760_v8  ;;  %15472 = vmatprep.subr.bf16.mxu0 %v20765_v43  ;;  %v20823_v8 = vld [vmem:[%s21189_s8 + $0x39a8] ss:$16 sps:$4 sm:$0xff]  }
 0x7d0   : > { %15513 = vmatprep.subr.bf16.mxu1 %v20768_v0  ;;  %v20826_v43 = vld [vmem:[%s21189_s8 + $0x3ba8] ss:$16 sps:$4 sm:$0xff]   ;;  %v20831_v0 = vld [vmem:[%s21189_s8 + $0x398c] ss:$16 sps:$4 sm:$0xff]  }
 0x7d1   : > { %v15178_v46 = vpop.f32.mrf.mxu0  ;;  %15423 = vmatmul.mubr.bf16.vlgmr.msra.gmra.mxu0 %v24016_v50  ;;  %v20838_v50 = vld [vmem:[%s21189_s8 + $0x3b68] ss:$16 sps:$4 sm:$0xff]  }
 0x7d2   : > { %v15219_v3 = vpop.f32.mrf.mxu1  ;;  %15464 = vmatmul.mubr.bf16.vlgmr.msra.gmra.mxu1 %v22559_v56  ;;  %v15179_v55 = vadd.f32 %v15178_v46, %v23713_v6  ;;  %15473 = vmatpush1.bf16.msra.mxu0 %v20763_v2  ;;  %v24018_v6 = vld [vmem:[#allocation27_spill] sm:$0xff]  ;;  %v20834_v2 = vld [vmem:[%s21189_s8 + $0x3b8c] ss:$16 sps:$4 sm:$0xff]  }
 0x7d3   : > { %15514 = vmatpush1.bf16.msra.mxu1 %v20766_v47  ;;  %v15180_v12 = vpop.f32.mrf.mxu0  ;;  %15474 = vmatprep.subr.bf16.mxu0 %v20771_v45  ;;  %v20829_v47 = vld [vmem:[%s21189_s8 + $0x3988] ss:$16 sps:$4 sm:$0xff]   ;;  %v20840_v46 = vld [vmem:[%s21189_s8 + $0x3b6c] ss:$16 sps:$4 sm:$0xff]  }
 0x7d4   : > { %v15221_v13 = vpop.f32.mrf.mxu1  ;;  %15515 = vmatprep.subr.bf16.mxu1 %v20774_v20  ;;  %v23787_v38 = vadd.f32 %v15219_v3, %v15179_v55  ;;  %v15181_v56 = vadd.f32 %v15180_v12, %v23718_v52  ;;  %15504 = vmatprep.mubr.bf16.mxu0 %v24017_v9  ;;  %v20783_v52 = vld [vmem:[%s21189_s8 + $0x388c] ss:$16 sps:$4 sm:$0xff]   ;;  %v20832_v45 = vld [vmem:[%s21189_s8 + $0x3b88] ss:$16 sps:$4 sm:$0xff]  }
 0x7d5   : > { %15545 = vmatprep.mubr.bf16.mxu1 %v24018_v6  ;;  %v15182_v15 = vpop.f32.mrf.mxu0  ;;  %v20837_v20 = vld [vmem:[%s21189_s8 + $0x396c] ss:$16 sps:$4 sm:$0xff]   ;;  %v20835_v3 = vld [vmem:[%s21189_s8 + $0x3968] ss:$16 sps:$4 sm:$0xff]  }
 0x7d6   : > { %v15223_v19 = vpop.f32.mrf.mxu1  ;;  %v23792_v54 = vadd.f32 %v15221_v13, %v15181_v56  ;;  %15475 = vmatpush1.bf16.msra.mxu0 %v20769_v62  ;;  %v20843_v55 = vld [vmem:[%s21189_s8 + $0x394c] ss:$16 sps:$4 sm:$0xff]   ;;  %v20844_v12 = vld [vmem:[%s21189_s8 + $0x3b48] ss:$16 sps:$4 sm:$0xff]  }
 0x7d7   : > { %15516 = vmatpush1.bf16.msra.mxu1 %v20772_v49  ;;  %v15183_v22 = vpop.f32.mrf.mxu0  ;;  %15476 = vmatprep.subr.bf16.mxu0 %v20777_v63  ;;  %v20846_v62 = vld [vmem:[%s21189_s8 + $0x3b4c] ss:$16 sps:$4 sm:$0xff]   ;;  %v20841_v49 = vld [vmem:[%s21189_s8 + $0x3948] ss:$16 sps:$4 sm:$0xff]  }
 0x7d8   : > { %v15224_v59 = vpop.f32.mrf.mxu1  ;;  %15517 = vmatprep.subr.bf16.mxu1 %v20780_v11  ;;  %v20849_v13 = vld [vmem:[%s21189_s8 + $0x392c] ss:$16 sps:$4 sm:$0xff]   ;;  %v20847_v11 = vld [vmem:[%s21189_s8 + $0x3928] ss:$16 sps:$4 sm:$0xff]  }
 0x7d9   : > { %v20852_v63 = vld [vmem:[%s21189_s8 + $0x3b2c] ss:$16 sps:$4 sm:$0xff]   ;;  %v20850_v56 = vld [vmem:[%s21189_s8 + $0x3b28] ss:$16 sps:$4 sm:$0xff]  }
 0x7da   : > { %15477 = vmatpush1.bf16.msra.mxu0 %v20775_v35  ;;  %v20855_v9 = vld [vmem:[%s21189_s8 + $0x390c] ss:$16 sps:$4 sm:$0xff]   ;;  %v20853_v15 = vld [vmem:[%s21189_s8 + $0x3908] ss:$16 sps:$4 sm:$0xff]  }
 0x7db   : > { %15518 = vmatpush1.bf16.msra.mxu1 %v20778_v1  ;;  %15478 = vmatprep.subr.bf16.mxu0 %v20783_v52  ;;  %v20858_v6 = vld [vmem:[%s21189_s8 + $0x3b0c] ss:$16 sps:$4 sm:$0xff]   ;;  %v20856_v19 = vld [vmem:[%s21189_s8 + $0x3b08] ss:$16 sps:$4 sm:$0xff]  }
 0x7dc   : > { %15519 = vmatprep.subr.bf16.mxu1 %v20786_v42  ;;  %v20861_v35 = vld [vmem:[%s21189_s8 + $0x3cec] ss:$16 sps:$4 sm:$0xff]   ;;  %v20859_v22 = vld [vmem:[%s21189_s8 + $0x3ce8] ss:$16 sps:$4 sm:$0xff]  }
 0x7dd   : > { %v20864_v1 = vld [vmem:[%s21189_s8 + $0x3eec] ss:$16 sps:$4 sm:$0xff]   ;;  %v20862_v59 = vld [vmem:[%s21189_s8 + $0x3ee8] ss:$16 sps:$4 sm:$0xff]  }
 0x7de   : > { %15479 = vmatpush1.bf16.msra.mxu0 %v20781_v53  ;;  %v20867_v52 = vld [vmem:[%s21189_s8 + $0x3ccc] ss:$16 sps:$4 sm:$0xff]  }
 0x7df   : > { %15520 = vmatpush1.bf16.msra.mxu1 %v20784_v24  ;;  %15480 = vmatprep.subr.bf16.mxu0 %v20789_v32  ;;  %v20870_v42 = vld [vmem:[%s21189_s8 + $0x3ecc] ss:$16 sps:$4 sm:$0xff]  }
 0x7e0   : > { %15521 = vmatprep.subr.bf16.mxu1 %v20792_v51  ;;  %v24019_v32 = vld [vmem:[#allocation28_spill] sm:$0xff] }
 0x7e2   : > { %15481 = vmatpush1.bf16.msra.mxu0 %v20787_v30  ;;  %v20865_v30 = vld [vmem:[%s21189_s8 + $0x3cc8] ss:$16 sps:$4 sm:$0xff]  }
 0x7e3   : > { %15522 = vmatpush1.bf16.msra.mxu1 %v20790_v17  ;;  %15482 = vmatprep.subr.bf16.mxu0 %v20795_v23  ;;  %v20868_v17 = vld [vmem:[%s21189_s8 + $0x3ec8] ss:$16 sps:$4 sm:$0xff]  }
 0x7e4   : > { %15523 = vmatprep.subr.bf16.mxu1 %v20798_v29 }
 0x7e6   : > { %15483 = vmatpush1.bf16.msra.mxu0 %v20793_v7  ;;  %v20873_v7 = vld [vmem:[%s21189_s8 + $0x3cac] ss:$16 sps:$4 sm:$0xff]  }
 0x7e7   : > { %15524 = vmatpush1.bf16.msra.mxu1 %v20796_v57  ;;  %15484 = vmatprep.subr.bf16.mxu0 %v20801_v14  ;;  %v20876_v57 = vld [vmem:[%s21189_s8 + $0x3eac] ss:$16 sps:$4 sm:$0xff]  }
 0x7e8   : > { %15525 = vmatprep.subr.bf16.mxu1 %v20804_v18 }
 0x7ea   : > { %15485 = vmatpush1.bf16.msra.mxu0 %v20799_v41 }
 0x7eb   : > { %15526 = vmatpush1.bf16.msra.mxu1 %v20802_v10  ;;  %15486 = vmatprep.subr.bf16.mxu0 %v20807_v4  ;;  %v20871_v10 = vld [vmem:[%s21189_s8 + $0x3ca8] ss:$16 sps:$4 sm:$0xff]  }
 0x7ec   : > { %15527 = vmatprep.subr.bf16.mxu1 %v20810_v34  ;;  %v20874_v4 = vld [vmem:[%s21189_s8 + $0x3ea8] ss:$16 sps:$4 sm:$0xff]  }
 0x7ee   : > { %15487 = vmatpush1.bf16.msra.mxu0 %v20805_v44 }
 0x7ef   : > { %15528 = vmatpush1.bf16.msra.mxu1 %v20808_v40  ;;  %15488 = vmatprep.subr.bf16.mxu0 %v20813_v48  ;;  %v20880_v40 = vld [vmem:[%s21189_s8 + $0x3e88] ss:$16 sps:$4 sm:$0xff]   ;;  %v20885_v48 = vld [vmem:[%s21189_s8 + $0x3c6c] ss:$16 sps:$4 sm:$0xff]  }
 0x7f0   : > { %15529 = vmatprep.subr.bf16.mxu1 %v20816_v58  ;;  %v20888_v58 = vld [vmem:[%s21189_s8 + $0x3e6c] ss:$16 sps:$4 sm:$0xff]  }
 0x7f2   : > { %15489 = vmatpush2.bf16.msra.mxu0 %v20811_v28  ;;  %v20883_v28 = vld [vmem:[%s21189_s8 + $0x3c68] ss:$16 sps:$4 sm:$0xff]  }
 0x7f3   : > { %15530 = vmatpush2.bf16.msra.mxu1 %v20814_v37  ;;  %15490 = vmatprep.subr.bf16.mxu0 %v20819_v16  ;;  %v20886_v37 = vld [vmem:[%s21189_s8 + $0x3e68] ss:$16 sps:$4 sm:$0xff]   ;;  %v20891_v16 = vld [vmem:[%s21189_s8 + $0x3c4c] ss:$16 sps:$4 sm:$0xff]  }
 0x7f4   : > { %15531 = vmatprep.subr.bf16.mxu1 %v20822_v60  ;;  %v20894_v60 = vld [vmem:[%s21189_s8 + $0x3e4c] ss:$16 sps:$4 sm:$0xff]  }
 0x7f6   : > { %15491 = vmatpush2.bf16.msra.mxu0 %v20817_v25  ;;  %v20889_v25 = vld [vmem:[%s21189_s8 + $0x3c48] ss:$16 sps:$4 sm:$0xff]  }
 0x7f7   : > { %15532 = vmatpush2.bf16.msra.mxu1 %v20820_v61  ;;  %15492 = vmatprep.subr.bf16.mxu0 %v20825_v33  ;;  %v20892_v61 = vld [vmem:[%s21189_s8 + $0x3e48] ss:$16 sps:$4 sm:$0xff]   ;;  %v20897_v33 = vld [vmem:[%s21189_s8 + $0x3c2c] ss:$16 sps:$4 sm:$0xff]  }
 0x7f8   : > { %15533 = vmatprep.subr.bf16.mxu1 %v20828_v39  ;;  %v20900_v39 = vld [vmem:[%s21189_s8 + $0x3e2c] ss:$16 sps:$4 sm:$0xff]  }
 0x7fa   : > { %15493 = vmatpush2.bf16.msra.mxu0 %v20823_v8  ;;  %v20895_v8 = vld [vmem:[%s21189_s8 + $0x3c28] ss:$16 sps:$4 sm:$0xff]  }
 0x7fb   : > { %15534 = vmatpush2.bf16.msra.mxu1 %v20826_v43  ;;  %15494 = vmatprep.subr.bf16.mxu0 %v20831_v0  ;;  %v20898_v43 = vld [vmem:[%s21189_s8 + $0x3e28] ss:$16 sps:$4 sm:$0xff]   ;;  %v20903_v0 = vld [vmem:[%s21189_s8 + $0x3c0c] ss:$16 sps:$4 sm:$0xff]  }
 0x7fc   : > { %15535 = vmatprep.subr.bf16.mxu1 %v20834_v2  ;;  %v20906_v2 = vld [vmem:[%s21189_s8 + $0x3e0c] ss:$16 sps:$4 sm:$0xff]  }
 0x7fe   : > { %15495 = vmatpush2.bf16.msra.mxu0 %v20829_v47  ;;  %v20901_v47 = vld [vmem:[%s21189_s8 + $0x3c08] ss:$16 sps:$4 sm:$0xff]  }
 0x7ff   : > { %15536 = vmatpush2.bf16.msra.mxu1 %v20832_v45  ;;  %15496 = vmatprep.subr.bf16.mxu0 %v20837_v20  ;;  %v20904_v45 = vld [vmem:[%s21189_s8 + $0x3e08] ss:$16 sps:$4 sm:$0xff]   ;;  %v20909_v20 = vld [vmem:[%s21189_s8 + $0x3dec] ss:$16 sps:$4 sm:$0xff]  }
 0x800   : > { %15537 = vmatprep.subr.bf16.mxu1 %v20840_v46  ;;  %v20912_v46 = vld [vmem:[%s21189_s8 + $0x3fec] ss:$16 sps:$4 sm:$0xff]  }
 0x802   : > { %15497 = vmatpush2.bf16.msra.mxu0 %v20835_v3  ;;  %v20907_v3 = vld [vmem:[%s21189_s8 + $0x3de8] ss:$16 sps:$4 sm:$0xff]  }
 0x803   : > { %15538 = vmatpush2.bf16.msra.mxu1 %v20838_v50  ;;  %15498 = vmatprep.subr.bf16.mxu0 %v20843_v55  ;;  %v20910_v50 = vld [vmem:[%s21189_s8 + $0x3fe8] ss:$16 sps:$4 sm:$0xff]   ;;  %v20915_v55 = vld [vmem:[%s21189_s8 + $0x3dcc] ss:$16 sps:$4 sm:$0xff]  }
 0x804   : > { %15539 = vmatprep.subr.bf16.mxu1 %v20846_v62  ;;  %v20918_v62 = vld [vmem:[%s21189_s8 + $0x3fcc] ss:$16 sps:$4 sm:$0xff]  }
 0x806   : > { %15499 = vmatpush2.bf16.msra.mxu0 %v20841_v49  ;;  %v20913_v49 = vld [vmem:[%s21189_s8 + $0x3dc8] ss:$16 sps:$4 sm:$0xff]  }
 0x807   : > { %15540 = vmatpush2.bf16.msra.mxu1 %v20844_v12  ;;  %15500 = vmatprep.subr.bf16.mxu0 %v20849_v13  ;;  %v20916_v12 = vld [vmem:[%s21189_s8 + $0x3fc8] ss:$16 sps:$4 sm:$0xff]   ;;  %v20921_v13 = vld [vmem:[%s21189_s8 + $0x3dac] ss:$16 sps:$4 sm:$0xff]  }
 0x808   : > { %15541 = vmatprep.subr.bf16.mxu1 %v20852_v63  ;;  %v20924_v63 = vld [vmem:[%s21189_s8 + $0x3fac] ss:$16 sps:$4 sm:$0xff]  }
 0x80a   : > { %15501 = vmatpush2.bf16.msra.mxu0 %v20847_v11  ;;  %v20919_v11 = vld [vmem:[%s21189_s8 + $0x3da8] ss:$16 sps:$4 sm:$0xff]  }
 0x80b   : > { %15542 = vmatpush2.bf16.msra.mxu1 %v20850_v56  ;;  %15502 = vmatprep.subr.bf16.mxu0 %v20855_v9  ;;  %v20922_v56 = vld [vmem:[%s21189_s8 + $0x3fa8] ss:$16 sps:$4 sm:$0xff]   ;;  %v20927_v9 = vld [vmem:[%s21189_s8 + $0x3d8c] ss:$16 sps:$4 sm:$0xff]  }
 0x80c   : > { %15543 = vmatprep.subr.bf16.mxu1 %v20858_v6  ;;  %v20930_v6 = vld [vmem:[%s21189_s8 + $0x3f8c] ss:$16 sps:$4 sm:$0xff]  }
 0x80e   : > { %15503 = vmatpush2.bf16.msra.mxu0 %v20853_v15  ;;  %v20925_v15 = vld [vmem:[%s21189_s8 + $0x3d88] ss:$16 sps:$4 sm:$0xff]  }
 0x80f   : > { %15544 = vmatpush2.bf16.msra.mxu1 %v20856_v19  ;;  %15554 = vmatprep.subr.bf16.mxu0 %v20861_v35  ;;  %v20928_v19 = vld [vmem:[%s21189_s8 + $0x3f88] ss:$16 sps:$4 sm:$0xff]   ;;  %v20933_v35 = vld [vmem:[%s21189_s8 + $0x3d6c] ss:$16 sps:$4 sm:$0xff]  }
 0x810   : > { %15595 = vmatprep.subr.bf16.mxu1 %v20864_v1  ;;  %v20936_v1 = vld [vmem:[%s21189_s8 + $0x3f6c] ss:$16 sps:$4 sm:$0xff]  }
 0x811   : > { %v15260_v53 = vpop.f32.mrf.mxu0  ;;  %15505 = vmatmul.mubr.bf16.vlgmr.msra.gmra.mxu0 %v24019_v32  ;;  %v20945_v32 = vld [vmem:[%s21189_s8 + $0x3d2c] ss:$16 sps:$4 sm:$0xff]  }
 0x812   : > { %v15301_v24 = vpop.f32.mrf.mxu1  ;;  %15546 = vmatmul.mubr.bf16.vlgmr.msra.gmra.mxu1 %v22655_v21  ;;  %v15261_v51 = vadd.f32 %v15260_v53, %v23787_v38  ;;  %15555 = vmatpush1.bf16.msra.mxu0 %v20859_v22  ;;  %v20931_v22 = vld [vmem:[%s21189_s8 + $0x3d68] ss:$16 sps:$4 sm:$0xff]  }
 0x813   : > { %15596 = vmatpush1.bf16.msra.mxu1 %v20862_v59  ;;  %v15262_v23 = vpop.f32.mrf.mxu0  ;;  %15556 = vmatprep.subr.bf16.mxu0 %v20867_v52  ;;  %v20934_v59 = vld [vmem:[%s21189_s8 + $0x3f68] ss:$16 sps:$4 sm:$0xff]   ;;  %v20939_v52 = vld [vmem:[%s21189_s8 + $0x3d4c] ss:$16 sps:$4 sm:$0xff]  }
 0x814   : > { %v15303_v29 = vpop.f32.mrf.mxu1  ;;  %15597 = vmatprep.subr.bf16.mxu1 %v20870_v42  ;;  %v23861_v14 = vadd.f32 %v15301_v24, %v15261_v51  ;;  %v15263_v21 = vadd.f32 %v15262_v23, %v23792_v54  ;;  %15586 = vmatprep.mubr.bf16.mxu0 %v22651_v31  ;;  %v20879_v31 = vld [vmem:[%s21189_s8 + $0x3c8c] ss:$16 sps:$4 sm:$0xff]   ;;  %v20877_v54 = vld [vmem:[%s21189_s8 + $0x3c88] ss:$16 sps:$4 sm:$0xff]  }
 0x815   : > { %15627 = vmatprep.mubr.bf16.mxu1 %v22663_v5  ;;  %v15264_v38 = vpop.f32.mrf.mxu0  ;;  %v20882_v5 = vld [vmem:[%s21189_s8 + $0x3e8c] ss:$16 sps:$4 sm:$0xff]   ;;  %v20937_v53 = vld [vmem:[%s21189_s8 + $0x3d48] ss:$16 sps:$4 sm:$0xff]  }
 0x816   : > { %v15305_v18 = vpop.f32.mrf.mxu1  ;;  %v23866_v41 = vadd.f32 %v15303_v29, %v15263_v21  ;;  %15557 = vmatpush1.bf16.msra.mxu0 %v20865_v30  ;;  %v20942_v42 = vld [vmem:[%s21189_s8 + $0x3f4c] ss:$16 sps:$4 sm:$0xff]   ;;  %v20940_v24 = vld [vmem:[%s21189_s8 + $0x3f48] ss:$16 sps:$4 sm:$0xff]  }
 0x817   : > { %15598 = vmatpush1.bf16.msra.mxu1 %v20868_v17  ;;  %v15265_v34 = vpop.f32.mrf.mxu0  ;;  %15558 = vmatprep.subr.bf16.mxu0 %v20873_v7  ;;  %v20948_v51 = vld [vmem:[%s21189_s8 + $0x3f2c] ss:$16 sps:$4 sm:$0xff]   ;;  %v20943_v30 = vld [vmem:[%s21189_s8 + $0x3d28] ss:$16 sps:$4 sm:$0xff]  }
 0x818   : > { %v15306_v44 = vpop.f32.mrf.mxu1  ;;  %15599 = vmatprep.subr.bf16.mxu1 %v20876_v57  ;;  %v20946_v17 = vld [vmem:[%s21189_s8 + $0x3f28] ss:$16 sps:$4 sm:$0xff]   ;;  %v20951_v23 = vld [vmem:[%s21189_s8 + $0x3d0c] ss:$16 sps:$4 sm:$0xff]  }
 0x819   : > { %v20954_v29 = vld [vmem:[%s21189_s8 + $0x3f0c] ss:$16 sps:$4 sm:$0xff]   ;;  %v20949_v7 = vld [vmem:[%s21189_s8 + $0x3d08] ss:$16 sps:$4 sm:$0xff]  }
 0x81a   : > { %15559 = vmatpush1.bf16.msra.mxu0 %v20871_v10  ;;  %v20952_v57 = vld [vmem:[%s21189_s8 + $0x3f08] ss:$16 sps:$4 sm:$0xff]   ;;  %s228_s8 = scalar_lea.vmem %s23950_s3, %s24026_s6 }
 0x81b   : > { %15600 = vmatpush1.bf16.msra.mxu1 %v20874_v4  ;;  %15560 = vmatprep.subr.bf16.mxu0 %v20879_v31 }
 0x81c   : > { %15601 = vmatprep.subr.bf16.mxu1 %v20882_v5 }
 0x81e   : > { %15561 = vmatpush1.bf16.msra.mxu0 %v20877_v54 }
 0x81f   : > { %15602 = vmatpush1.bf16.msra.mxu1 %v20880_v40  ;;  %15562 = vmatprep.subr.bf16.mxu0 %v20885_v48 }
 0x820   : > { %15603 = vmatprep.subr.bf16.mxu1 %v20888_v58 }
 0x822   : > { %15563 = vmatpush1.bf16.msra.mxu0 %v20883_v28 }
 0x823   : > { %15604 = vmatpush1.bf16.msra.mxu1 %v20886_v37  ;;  %15564 = vmatprep.subr.bf16.mxu0 %v20891_v16 }
 0x824   : > { %15605 = vmatprep.subr.bf16.mxu1 %v20894_v60 }
 0x826   : > { %15565 = vmatpush1.bf16.msra.mxu0 %v20889_v25 }
 0x827   : > { %15606 = vmatpush1.bf16.msra.mxu1 %v20892_v61  ;;  %15566 = vmatprep.subr.bf16.mxu0 %v20897_v33 }
 0x828   : > { %15607 = vmatprep.subr.bf16.mxu1 %v20900_v39 }
 0x82a   : > { %15567 = vmatpush1.bf16.msra.mxu0 %v20895_v8 }
 0x82b   : > { %15608 = vmatpush1.bf16.msra.mxu1 %v20898_v43  ;;  %15568 = vmatprep.subr.bf16.mxu0 %v20903_v0 }
 0x82c   : > { %15609 = vmatprep.subr.bf16.mxu1 %v20906_v2 }
 0x82e   : > { %15569 = vmatpush1.bf16.msra.mxu0 %v20901_v47 }
 0x82f   : > { %15610 = vmatpush1.bf16.msra.mxu1 %v20904_v45  ;;  %15570 = vmatprep.subr.bf16.mxu0 %v20909_v20 }
 0x830   : > { %15611 = vmatprep.subr.bf16.mxu1 %v20912_v46 }
 0x832   : > { %15571 = vmatpush2.bf16.msra.mxu0 %v20907_v3 }
 0x833   : > { %15612 = vmatpush2.bf16.msra.mxu1 %v20910_v50  ;;  %15572 = vmatprep.subr.bf16.mxu0 %v20915_v55 }
 0x834   : > { %15613 = vmatprep.subr.bf16.mxu1 %v20918_v62 }
 0x836   : > { %15573 = vmatpush2.bf16.msra.mxu0 %v20913_v49 }
 0x837   : > { %15614 = vmatpush2.bf16.msra.mxu1 %v20916_v12  ;;  %15574 = vmatprep.subr.bf16.mxu0 %v20921_v13 }
 0x838   : > { %15615 = vmatprep.subr.bf16.mxu1 %v20924_v63 }
 0x83a   : > { %15575 = vmatpush2.bf16.msra.mxu0 %v20919_v11 }
 0x83b   : > { %15616 = vmatpush2.bf16.msra.mxu1 %v20922_v56  ;;  %15576 = vmatprep.subr.bf16.mxu0 %v20927_v9 }
 0x83c   : > { %15617 = vmatprep.subr.bf16.mxu1 %v20930_v6 }
 0x83e   : > { %15577 = vmatpush2.bf16.msra.mxu0 %v20925_v15 }
 0x83f   : > { %15618 = vmatpush2.bf16.msra.mxu1 %v20928_v19  ;;  %15578 = vmatprep.subr.bf16.mxu0 %v20933_v35 }
 0x840   : > { %15619 = vmatprep.subr.bf16.mxu1 %v20936_v1 }
 0x842   : > { %15579 = vmatpush2.bf16.msra.mxu0 %v20931_v22 }
 0x843   : > { %15620 = vmatpush2.bf16.msra.mxu1 %v20934_v59  ;;  %15580 = vmatprep.subr.bf16.mxu0 %v20939_v52  ;;  %v24020_v52 = vld [vmem:[#allocation8_spill] sm:$0xff] }
 0x844   : > { %15621 = vmatprep.subr.bf16.mxu1 %v20942_v42  ;;  %v15656_v42 = vrot.slane %v22981_v26, %v24020_v52 }
 0x846   : > { %15581 = vmatpush2.bf16.msra.mxu0 %v20937_v53 }
 0x847   : > { %15622 = vmatpush2.bf16.msra.mxu1 %v20940_v24  ;;  %15582 = vmatprep.subr.bf16.mxu0 %v20945_v32 }
 0x848   : > { %15623 = vmatprep.subr.bf16.mxu1 %v20948_v51 }
 0x84a   : > { %15583 = vmatpush2.bf16.msra.mxu0 %v20943_v30 }
 0x84b   : > { %15624 = vmatpush2.bf16.msra.mxu1 %v20946_v17  ;;  %15584 = vmatprep.subr.bf16.mxu0 %v20951_v23 }
 0x84c   : > { %15625 = vmatprep.subr.bf16.mxu1 %v20954_v29 }
 0x84e   : > { %15585 = vmatpush2.bf16.msra.mxu0 %v20949_v7 }
 0x84f   : > { %15626 = vmatpush2.bf16.msra.mxu1 %v20952_v57 }
 0x851   : > { %v15342_v21 = vpop.f32.mrf.mxu0  ;;  %15587 = vmatmul.mubr.bf16.vlgmr.msra.gmra.mxu0 %v22731_v27 }
 0x852   : > { %v15383_v38 = vpop.f32.mrf.mxu1  ;;  %15628 = vmatmul.mubr.bf16.vlgmr.msra.gmra.mxu1 %v22741_v36  ;;  %v15343_v18 = vadd.f32 %v15342_v21, %v23861_v14 }
 0x853   : > { %v15344_v10 = vpop.f32.mrf.mxu0 }
 0x854   : > { %v15385_v4 = vpop.f32.mrf.mxu1  ;;  %v15384_v34 = vadd.f32 %v15383_v38, %v15343_v18  ;;  %v15345_v44 = vadd.f32 %v15344_v10, %v23866_v41 }
 0x855   : > { %v15346_v31 = vpop.f32.mrf.mxu0 }
 0x856   : > { %v15387_v5 = vpop.f32.mrf.mxu1  ;;  %v15386_v54 = vadd.f32 %v15385_v4, %v15345_v44 }
 0x857   : > { %v15347_v40 = vpop.f32.mrf.mxu0 }
 0x858   : > { %v15388_v48 = vpop.f32.mrf.mxu1 }
 0x891   : > { %v15424_v58 = vpop.f32.mrf.mxu0 }
 0x892   : > { %v15465_v28 = vpop.f32.mrf.mxu1  ;;  %v15425_v37 = vadd.f32 %v15424_v58, %v15384_v34 }
 0x893   : > { %v15426_v16 = vpop.f32.mrf.mxu0 }
 0x894   : > { %v15467_v60 = vpop.f32.mrf.mxu1  ;;  %v15466_v27 = vadd.f32 %v15465_v28, %v15425_v37  ;;  %v15427_v25 = vadd.f32 %v15426_v16, %v15386_v54 }
 0x895   : > { %v15428_v36 = vpop.f32.mrf.mxu0 }
 0x896   : > { %v15469_v61 = vpop.f32.mrf.mxu1  ;;  %v15468_v14 = vadd.f32 %v15467_v60, %v15427_v25 }
 0x897   : > { %v15429_v33 = vpop.f32.mrf.mxu0 }
 0x898   : > { %v15470_v39 = vpop.f32.mrf.mxu1 }
 0x8d1   : > { %v15506_v8 = vpop.f32.mrf.mxu0 }
 0x8d2   : > { %v15547_v41 = vpop.f32.mrf.mxu1  ;;  %v15507_v43 = vadd.f32 %v15506_v8, %v15466_v27 }
 0x8d3   : > { %v15508_v0 = vpop.f32.mrf.mxu0 }
 0x8d4   : > { %v15549_v2 = vpop.f32.mrf.mxu1  ;;  %v15548_v47 = vadd.f32 %v15547_v41, %v15507_v43  ;;  %v15509_v50 = vadd.f32 %v15508_v0, %v15468_v14 }
 0x8d5   : > { %v15510_v45 = vpop.f32.mrf.mxu0 }
 0x8d6   : > { %v15551_v20 = vpop.f32.mrf.mxu1  ;;  %v15550_v49 = vadd.f32 %v15549_v2, %v15509_v50 }
 0x8d7   : > { %v15511_v46 = vpop.f32.mrf.mxu0 }
 0x8d8   : > { %v15552_v3 = vpop.f32.mrf.mxu1 }
 0x911   : > { %v15588_v55 = vpop.f32.mrf.mxu0 }
 0x912   : > { %v15629_v62 = vpop.f32.mrf.mxu1  ;;  %v15589_v12 = vadd.f32 %v15588_v55, %v15548_v47 }
 0x913   : > { %v15590_v13 = vpop.f32.mrf.mxu0 }
 0x914   : > { %v15631_v63 = vpop.f32.mrf.mxu1  ;;  %v15630_v11 = vadd.f32 %v15629_v62, %v15589_v12  ;;  %v15591_v56 = vadd.f32 %v15590_v13, %v15550_v49 }
 0x915   : > { %v15592_v9 = vpop.f32.mrf.mxu0 }
 0x916   : > { %v15633_v6 = vpop.f32.mrf.mxu1  ;;  %v15632_v15 = vadd.f32 %v15631_v63, %v15591_v56  ;;  %v15638_v1 = vmax.f32 %v15630_v11, 0.0 }
 0x917   : > { %v15593_v19 = vpop.f32.mrf.mxu0 }
 0x918   : > { %v15634_v35 = vpop.f32.mrf.mxu1  ;;  %v15639_v22 = vmax.f32 %v15632_v15, 0.0 }
 0x91a   : > { %v17821_v59 = vpack.c.bf16 %v15639_v22, %v15638_v1 }
 0x91c   : > { %v15663_v53 = vrot.slane %v17821_v59, %v24020_v52 }
 0x91e   : > { %v15664_v24 = vcombine.low %v15656_v42, %v15663_v53 }
 0x920   : > { %17822 = vst.sshfl [vmem:[%s228_s8] sm:$0x55 pattern:$0x73625140] %v15664_v24 }
 0x921 PF: > { %p16_p8 = scmp.ge.s32.totalorder %s21098_s17, 4   ;;  %s24021_s12 = smov %s21042_s13 }
 0x922   : > { %s24022_s13 = smov %s21046_s14  ;;  %s24023_s14 = smov %s21108_s20 }
 0x923   : > { %s24024_s15 = smov %s21098_s17  ;;  %18 = sbr.rel (!%p16_p8) target bundleno = 5 (0x5), region = 85 }
 0x928   :  { %15694 = vsyncpa [#allocation3], 1 }
 0x929   :  { %15696 = vsyncpa [#allocation3 + $0x1], 1 }
 0x92a   :  { %15697 = vsyncpa [#allocation5], 1 }
 0x92b   :  { %15699 = vsyncpa [#allocation5 + $0x1], 1 }

</bundles_post_ra>
